<compile_context>
chip_gen: v6e
topology: v6e:2x2x1
jax: 0.10.0
libtpu: 0.0.40
codegen_flags: <defaults>
</compile_context>

<pallas_src>
import functools

import jax
import jax.numpy as jnp
import numpy as np
from jax.experimental import pallas as pl
from jax.experimental.pallas import tpu as pltpu


# -----------------------------------------------------------------------------
# Static operator builders (numpy, trace-time constants).
# -----------------------------------------------------------------------------
def _round_up(v, m):
    return (v + m - 1) // m * m


def _shift_matrix(n, d):
    """S[o, i] = 1 iff i == o + d; zero rows where o + d is out of range."""
    s = np.zeros((n, n), np.float32)
    o = np.arange(n)
    i = o + d
    ok = (i >= 0) & (i < n)
    s[o[ok], i[ok]] = 1.0
    return s


def _nearest_idx(n_out, n_in):
    # torch nn.Upsample(mode='nearest'): src = floor(dst * in/out)
    idx = np.floor(np.arange(n_out) * (n_in / n_out)).astype(np.int64)
    return np.clip(idx, 0, n_in - 1)


def _nearest_matrix(n_out, n_in):
    m = np.zeros((n_out, n_in), np.float32)
    m[np.arange(n_out), _nearest_idx(n_out, n_in)] = 1.0
    return m


def _bilinear_matrix(n_out, n_in):
    """torch nn.Upsample(mode='bilinear', align_corners=False) as a matrix."""
    m = np.zeros((n_out, n_in), np.float64)
    scale = n_in / n_out
    for o in range(n_out):
        s = max((o + 0.5) * scale - 0.5, 0.0)
        i0 = min(int(np.floor(s)), n_in - 1)
        i1 = min(i0 + 1, n_in - 1)
        f = s - i0
        m[o, i0] += 1.0 - f
        m[o, i1] += f
    return m.astype(np.float32)


def _blur_matrix(n):
    """[1,2,1]/4 filter with reflect padding (kornia filter2d, normalized)."""
    g = np.zeros((n, n), np.float64)
    for o in range(n):
        for d, wgt in ((-1, 0.25), (0, 0.5), (1, 0.25)):
            i = o + d
            if i < 0:
                i = -i                       # reflect: x[-1] -> x[1]
            elif i >= n:
                i = 2 * (n - 1) - i          # reflect: x[n] -> x[n-2]
            g[o, i] += wgt
    return g.astype(np.float32)


def _conv_lane_ops(w, w_in, w_up, col_resize, k_pad, n_pad):
    """Qcat: (k_pad, 3*n_pad) bf16.

    For each dy tap, folds the dx taps, the W zero-padding, the preceding
    column resize and the channel mixing into one lanes-operator, zero-pads it
    to a 128-aligned block, and concatenates the 3 taps along lanes.
    """
    c_in, c_out = w.shape[2], w.shape[3]
    qs = []
    for dy in range(3):
        acc = None
        for dx in range(3):
            t = (_shift_matrix(w_up, dx - 1) @ col_resize).T      # (w_in, w_up)
            term = jnp.kron(jnp.asarray(t), w[dy, dx])            # (w_in*Ci, w_up*Co)
            acc = term if acc is None else acc + term
        acc = jnp.pad(acc, ((0, k_pad - w_in * c_in), (0, n_pad - w_up * c_out)))
        qs.append(acc)
    return jnp.concatenate(qs, axis=1).astype(jnp.bfloat16)


# -----------------------------------------------------------------------------
# Fused-decoder plan: flat list of kernel inputs + static op list.
# -----------------------------------------------------------------------------
def _build_plan(x_slab, params, *, n_blocks, h_dim, w_dim, h0, w0,
                batch_block):
    B = batch_block
    feat_w, feat_b = params["feat_w"], params["feat_b"]
    rgb_w, rgb_b = params["rgb_w"], params["rgb_b"]
    out_dim = rgb_w[0].shape[-1]

    inputs = [x_slab]
    cache = {}                               # dedup shared row operators
    ops = []

    def push(arr):
        inputs.append(arr)
        return len(inputs) - 1

    def push_op(key, build):
        # block-diagonal (per-image) row operator, bf16, cached by key
        if key not in cache:
            arr = np.kron(np.eye(B, dtype=np.float32), build())
            cache[key] = push(jnp.asarray(arr).astype(jnp.bfloat16))
        return cache[key]

    def conv(src, dst, wt, bias, hi, wi, k_src_pad, hu, wu, col_resize,
             row_up, act, skip):
        co = wt.shape[-1]
        n_real = wu * co
        n_pad = _round_up(n_real, 128)
        q = _conv_lane_ops(wt, wi, wu, col_resize, k_src_pad, n_pad)
        b_row = jnp.concatenate(
            [jnp.tile(bias, (wu,)),
             jnp.zeros((n_pad - n_real,), jnp.float32)])[None, :]
        rr = (push_op(("nnrow", hu, hi), lambda: _nearest_matrix(hu, hi))
              if row_up else None)
        ops.append(dict(
            op="conv", src=src, dst=dst, act=act, skip=skip, rr=rr,
            q=push(q), b=push(b_row), npad=n_pad,
            shd=push_op(("sh", hu, -1), lambda: _shift_matrix(hu, -1)),
            shu=push_op(("sh", hu, 1), lambda: _shift_matrix(hu, 1))))
        return n_pad

    def resize_blur(hi, wi, ho, wo, c, in_pad, out_pad):
        # rgb -> Blur(bilinear_resize(rgb))  as  L @ rgb2d @ R  (separable)
        l2 = (_blur_matrix(ho) @ _bilinear_matrix(ho, hi)).astype(np.float32)
        l2 = np.kron(np.eye(B, dtype=np.float32), l2)
        r_col = (_blur_matrix(wo) @ _bilinear_matrix(wo, wi)).astype(np.float32)
        r = np.kron(r_col.T, np.eye(c, dtype=np.float32))        # (wi*c, wo*c)
        r = np.pad(r, ((0, in_pad - wi * c), (0, out_pad - wo * c)))
        ops.append(dict(op="lin", src="rgb", dst="rgb",
                        L=push(jnp.asarray(l2).astype(jnp.bfloat16)),
                        R=push(jnp.asarray(r).astype(jnp.bfloat16))))

    k0_pad = x_slab.shape[-1]

    # rgb = Blur(bilinear_2x(conv_rgb[0](x)))
    rgb_pad = conv("x", "rgb", rgb_w[0], rgb_b[0], h0, w0, k0_pad, h0, w0,
                   np.eye(w0, dtype=np.float32), False, "none", None)
    new_pad = _round_up(2 * w0 * out_dim, 128)
    resize_blur(h0, w0, 2 * h0, 2 * w0, out_dim, rgb_pad, new_pad)
    rgb_pad = new_pad

    hf, wf, src, src_pad = h0, w0, "x", k0_pad                 # conv_in == id
    for idx in range(n_blocks):
        ho, wo = (2 * hf, 2 * wf) if idx < n_blocks - 1 else (h_dim, w_dim)
        # net = LeakyReLU(conv_layers[idx](nearest_upsample(net)))   (fused)
        net_pad = conv(src, "net", feat_w[idx], feat_b[idx], hf, wf, src_pad,
                       ho, wo, _nearest_matrix(wo, wf), True, "leaky", None)
        hf, wf, src, src_pad = ho, wo, "net", net_pad
        # rgb = rgb + conv_rgb[idx+1](net)   (+ sigmoid on the last block)
        rgb_pad = conv("net", "rgb", rgb_w[idx + 1], rgb_b[idx + 1], hf, wf,
                       src_pad, hf, wf, np.eye(wf, dtype=np.float32), False,
                       "sigmoid" if idx == n_blocks - 1 else "none", "rgb")
        if idx < n_blocks - 2:
            new_pad = _round_up(2 * wf * out_dim, 128)
            resize_blur(hf, wf, 2 * hf, 2 * wf, out_dim, rgb_pad, new_pad)
            rgb_pad = new_pad
        elif idx == n_blocks - 2:
            new_pad = _round_up(w_dim * out_dim, 128)
            resize_blur(hf, wf, h_dim, w_dim, out_dim, rgb_pad, new_pad)
            rgb_pad = new_pad

    return inputs, ops, out_dim, rgb_pad


# -----------------------------------------------------------------------------
# The single fused Pallas kernel: bf16 MXU matmuls + f32 VPU/EUP elementwise.
# -----------------------------------------------------------------------------
def _make_kernel(ops, n_in):
    def kernel(*refs):
        in_refs, out_ref = refs[:n_in], refs[n_in]
        f32, bf16 = jnp.float32, jnp.bfloat16

        def mm(lhs, rhs):
            return jnp.dot(lhs.astype(bf16), rhs.astype(bf16),
                           preferred_element_type=f32)

        env = {"x": in_refs[0][0]}           # (B*h0, w0*c0) slab for this block
        for op in ops:
            a = env[op["src"]]
            if op["op"] == "conv":
                if op["rr"] is not None:     # hoisted nearest row-upsample
                    a = mm(in_refs[op["rr"]][...], a)
                bcat = mm(a, in_refs[op["q"]][...])      # all 3 dy taps at once
                npad = op["npad"]
                b0 = bcat[:, :npad]
                b1 = bcat[:, npad:2 * npad]
                b2 = bcat[:, 2 * npad:]
                acc = (mm(in_refs[op["shd"]][...], b0)   # dy=0: rows shift down
                       + b1                              # dy=1: identity
                       + mm(in_refs[op["shu"]][...], b2)  # dy=2: rows shift up
                       + in_refs[op["b"]][...])
                if op["skip"] is not None:
                    acc = acc + env[op["skip"]]
                if op["act"] == "leaky":
                    acc = jnp.where(acc >= 0.0, acc, 0.2 * acc)
                elif op["act"] == "sigmoid":
                    acc = pl.reciprocal(1.0 + jnp.exp(-acc), approx=True)
                env[op["dst"]] = acc
            else:                            # resize+blur:  L @ rgb @ R
                env[op["dst"]] = mm(in_refs[op["L"]][...],
                                    mm(a, in_refs[op["R"]][...]))
        out_ref[0] = env["rgb"].astype(out_ref.dtype)
    return kernel


def decoder_forward(x, params, *, n_blocks, h_dim, w_dim, batch_block=None):
    n, h0, w0, c0 = x.shape
    if batch_block is None:
        # default: 2 grid steps (one per v7x core; cheap on single-core chips)
        batch_block = n // 2 if (n % 2 == 0 and n >= 2) else n
    B = batch_block
    assert n % B == 0, "batch_block must divide the batch size"

    k0 = w0 * c0
    k0_pad = _round_up(k0, 128)
    x_slab = x.reshape(n, h0, k0)
    if k0_pad != k0:
        x_slab = jnp.pad(x_slab, ((0, 0), (0, 0), (0, k0_pad - k0)))
    x_slab = x_slab.reshape(n // B, B * h0, k0_pad)   # rows = batch*H, lanes=W*C

    inputs, ops, out_dim, out_pad = _build_plan(
        x_slab, params, n_blocks=n_blocks, h_dim=h_dim, w_dim=w_dim,
        h0=h0, w0=w0, batch_block=B)
    n_in = len(inputs)

    in_specs = [pl.BlockSpec((1, B * h0, k0_pad), lambda i: (i, 0, 0))]
    in_specs += [pl.BlockSpec(a.shape, lambda i: (0, 0)) for a in inputs[1:]]

    out2d = pl.pallas_call(
        _make_kernel(ops, n_in),
        out_shape=jax.ShapeDtypeStruct((n // B, B * h_dim, out_pad),
                                       jnp.float32),
        grid=(n // B,),
        in_specs=in_specs,
        out_specs=pl.BlockSpec((1, B * h_dim, out_pad), lambda i: (i, 0, 0)),
        compiler_params=pltpu.CompilerParams(
            dimension_semantics=("parallel",),
            vmem_limit_bytes=32 * 1024 * 1024),
    )(*inputs)

    out = out2d.reshape(n, h_dim, out_pad)[:, :, :w_dim * out_dim]
    return out.reshape(n, h_dim, w_dim, out_dim)


# -----------------------------------------------------------------------------
# Pure-JAX reference (independent NHWC conv / upsample / blur implementation).
# -----------------------------------------------------------------------------
def _conv3x3_ref(x, w, b, pad_mode="constant"):
    n, h, wd, cin = x.shape
    cout = w.shape[-1]
    xp = jnp.pad(x, ((0, 0), (1, 1), (1, 1), (0, 0)), mode=pad_mode)
    cols = [xp[:, dy:dy + h, dx:dx + wd, :] for dy in range(3) for dx in range(3)]
    xcol = jnp.concatenate(cols, axis=-1).reshape(n * h * wd, 9 * cin)
    out = jnp.dot(xcol, w.reshape(9 * cin, cout),
                  precision=jax.lax.Precision.HIGHEST) + b
    return out.reshape(n, h, wd, cout)


def _blur_ref(x):
    c = x.shape[-1]
    f = jnp.array([1.0, 2.0, 1.0], jnp.float32)
    f2 = f[:, None] * f[None, :]
    f2 = f2 / jnp.sum(f2)                                   # normalized=True
    w = f2[:, :, None, None] * jnp.eye(c, dtype=jnp.float32)[None, None]
    return _conv3x3_ref(x, w, jnp.zeros((c,), jnp.float32), pad_mode="reflect")


def _up_nearest_ref(x, oh, ow):
    return x[:, _nearest_idx(oh, x.shape[1])][:, :, _nearest_idx(ow, x.shape[2])]


def _up_bilinear_ref(x, oh, ow):
    bh = jnp.asarray(_bilinear_matrix(oh, x.shape[1]))
    bw = jnp.asarray(_bilinear_matrix(ow, x.shape[2]))
    x = jnp.einsum("oh,nhwc->nowc", bh, x, precision=jax.lax.Precision.HIGHEST)
    return jnp.einsum("pw,nowc->nopc", bw, x, precision=jax.lax.Precision.HIGHEST)


def decoder_forward_ref(x, params, *, n_blocks, h_dim, w_dim):
    _, h, w, _ = x.shape
    net = x                                                  # conv_in = identity
    rgb = _conv3x3_ref(x, params["rgb_w"][0], params["rgb_b"][0])
    rgb = _blur_ref(_up_bilinear_ref(rgb, 2 * h, 2 * w))
    for idx in range(n_blocks):
        if idx < n_blocks - 1:
            up = _up_nearest_ref(net, 2 * net.shape[1], 2 * net.shape[2])
        else:
            up = _up_nearest_ref(net, h_dim, w_dim)
        hid = _conv3x3_ref(up, params["feat_w"][idx], params["feat_b"][idx])
        net = jnp.where(hid >= 0.0, hid, 0.2 * hid)
        rgb = rgb + _conv3x3_ref(net, params["rgb_w"][idx + 1],
                                 params["rgb_b"][idx + 1])
        if idx < n_blocks - 2:
            rgb = _blur_ref(_up_bilinear_ref(rgb, 2 * rgb.shape[1], 2 * rgb.shape[2]))
        elif idx == n_blocks - 2:
            rgb = _blur_ref(_up_bilinear_ref(rgb, h_dim, w_dim))
    return jax.nn.sigmoid(rgb)                               # final_actvn=True


# -----------------------------------------------------------------------------
# Deterministic synthetic parameter init (shapes follow Decoder.__init__).
# -----------------------------------------------------------------------------
def init_params(key, *, input_dim, n_feat, min_feat, out_dim, n_blocks):
    feat = [n_feat] + [max(n_feat // 2 ** (i + 1), min_feat) for i in range(n_blocks)]

    def conv_init(k, cin, cout):
        k1, k2 = jax.random.split(k)
        s = 1.0 / jnp.sqrt(9.0 * cin)
        w = jax.random.uniform(k1, (3, 3, cin, cout), jnp.float32, -s, s)
        b = jax.random.uniform(k2, (cout,), jnp.float32, -s, s)
        return w, b

    keys = jax.random.split(key, 2 * n_blocks + 1)
    feat_w, feat_b, rgb_w, rgb_b = [], [], [], []
    for i in range(n_blocks):                                  # conv_layers
        w, b = conv_init(keys[i], feat[i], feat[i + 1])
        feat_w.append(w), feat_b.append(b)
    w, b = conv_init(keys[n_blocks], input_dim, out_dim)       # conv_rgb[0]
    rgb_w.append(w), rgb_b.append(b)
    for i in range(n_blocks):                                  # conv_rgb[1:]
        w, b = conv_init(keys[n_blocks + 1 + i], feat[i + 1], out_dim)
        rgb_w.append(w), rgb_b.append(b)
    return {"feat_w": feat_w, "feat_b": feat_b, "rgb_w": rgb_w, "rgb_b": rgb_b}


if __name__ == "__main__":
    N, H, W = 4, 4, 4
    input_dim = n_feat = 32
    min_feat, out_dim, n_blocks = 8, 3, 4
    h_dim, w_dim = 36, 40

    key = jax.random.PRNGKey(0)
    kx, kp = jax.random.split(key)
    x = jax.random.normal(kx, (N, H, W, input_dim), jnp.float32)
    params = init_params(kp, input_dim=input_dim, n_feat=n_feat,
                         min_feat=min_feat, out_dim=out_dim, n_blocks=n_blocks)

    fwd = jax.jit(functools.partial(decoder_forward, n_blocks=n_blocks,
                                    h_dim=h_dim, w_dim=w_dim))
    rgb = jax.block_until_ready(fwd(x, params))

    # Sanity: shape / finiteness / agreement with an independent JAX reference.
    assert rgb.shape == (N, h_dim, w_dim, out_dim), rgb.shape
    assert bool(jnp.all(jnp.isfinite(rgb)))
    ref = decoder_forward_ref(x, params, n_blocks=n_blocks,
                              h_dim=h_dim, w_dim=w_dim)
    # Kernel uses bf16 MXU operands (f32 accumulate); reference is f32 HIGHEST.
    max_err = float(jnp.max(jnp.abs(rgb - ref)))
    assert max_err < 4e-2, max_err
    print("KERNEL_OK")
</pallas_src>

<mosaic_0001>
module attributes {stable_mosaic.version = 11 : i64} {
  func.func @kernel(%arg0: i32, %arg1: memref<1x8x128xf32, #tpu.memory_space<vmem>>, %arg2: memref<128x384xbf16, #tpu.memory_space<vmem>>, %arg3: memref<1x128xf32, #tpu.memory_space<vmem>>, %arg4: memref<8x8xbf16, #tpu.memory_space<vmem>>, %arg5: memref<8x8xbf16, #tpu.memory_space<vmem>>, %arg6: memref<16x8xbf16, #tpu.memory_space<vmem>>, %arg7: memref<128x128xbf16, #tpu.memory_space<vmem>>, %arg8: memref<16x8xbf16, #tpu.memory_space<vmem>>, %arg9: memref<128x384xbf16, #tpu.memory_space<vmem>>, %arg10: memref<1x128xf32, #tpu.memory_space<vmem>>, %arg11: memref<16x16xbf16, #tpu.memory_space<vmem>>, %arg12: memref<16x16xbf16, #tpu.memory_space<vmem>>, %arg13: memref<128x384xbf16, #tpu.memory_space<vmem>>, %arg14: memref<1x128xf32, #tpu.memory_space<vmem>>, %arg15: memref<32x16xbf16, #tpu.memory_space<vmem>>, %arg16: memref<128x128xbf16, #tpu.memory_space<vmem>>, %arg17: memref<32x16xbf16, #tpu.memory_space<vmem>>, %arg18: memref<128x384xbf16, #tpu.memory_space<vmem>>, %arg19: memref<1x128xf32, #tpu.memory_space<vmem>>, %arg20: memref<32x32xbf16, #tpu.memory_space<vmem>>, %arg21: memref<32x32xbf16, #tpu.memory_space<vmem>>, %arg22: memref<128x384xbf16, #tpu.memory_space<vmem>>, %arg23: memref<1x128xf32, #tpu.memory_space<vmem>>, %arg24: memref<64x32xbf16, #tpu.memory_space<vmem>>, %arg25: memref<128x128xbf16, #tpu.memory_space<vmem>>, %arg26: memref<64x32xbf16, #tpu.memory_space<vmem>>, %arg27: memref<128x768xbf16, #tpu.memory_space<vmem>>, %arg28: memref<1x256xf32, #tpu.memory_space<vmem>>, %arg29: memref<64x64xbf16, #tpu.memory_space<vmem>>, %arg30: memref<64x64xbf16, #tpu.memory_space<vmem>>, %arg31: memref<256x384xbf16, #tpu.memory_space<vmem>>, %arg32: memref<1x128xf32, #tpu.memory_space<vmem>>, %arg33: memref<72x64xbf16, #tpu.memory_space<vmem>>, %arg34: memref<128x128xbf16, #tpu.memory_space<vmem>>, %arg35: memref<72x64xbf16, #tpu.memory_space<vmem>>, %arg36: memref<256x1152xbf16, #tpu.memory_space<vmem>>, %arg37: memref<1x384xf32, #tpu.memory_space<vmem>>, %arg38: memref<72x72xbf16, #tpu.memory_space<vmem>>, %arg39: memref<72x72xbf16, #tpu.memory_space<vmem>>, %arg40: memref<384x384xbf16, #tpu.memory_space<vmem>>, %arg41: memref<1x128xf32, #tpu.memory_space<vmem>>, %arg42: memref<1x72x128xf32, #tpu.memory_space<vmem>>) attributes {dimension_semantics = [#tpu.dimension_semantics<parallel>], iteration_bounds = array<i64: 2>, scalar_prefetch = 0 : i64, scratch_operands = 0 : i64, tpu.core_type = #tpu.core_type<tc>, window_params = [{transform_indices = @transform_0, window_bounds = array<i64: 1, 8, 128>}, {pipeline_mode = #tpu.pipeline_mode<synchronous>, transform_indices = @transform_1, window_bounds = array<i64: 128, 384>}, {pipeline_mode = #tpu.pipeline_mode<synchronous>, transform_indices = @transform_2, window_bounds = array<i64: 1, 128>}, {pipeline_mode = #tpu.pipeline_mode<synchronous>, transform_indices = @transform_3, window_bounds = array<i64: 8, 8>}, {pipeline_mode = #tpu.pipeline_mode<synchronous>, transform_indices = @transform_4, window_bounds = array<i64: 8, 8>}, {pipeline_mode = #tpu.pipeline_mode<synchronous>, transform_indices = @transform_5, window_bounds = array<i64: 16, 8>}, {pipeline_mode = #tpu.pipeline_mode<synchronous>, transform_indices = @transform_6, window_bounds = array<i64: 128, 128>}, {pipeline_mode = #tpu.pipeline_mode<synchronous>, transform_indices = @transform_7, window_bounds = array<i64: 16, 8>}, {pipeline_mode = #tpu.pipeline_mode<synchronous>, transform_indices = @transform_8, window_bounds = array<i64: 128, 384>}, {pipeline_mode = #tpu.pipeline_mode<synchronous>, transform_indices = @transform_9, window_bounds = array<i64: 1, 128>}, {pipeline_mode = #tpu.pipeline_mode<synchronous>, transform_indices = @transform_10, window_bounds = array<i64: 16, 16>}, {pipeline_mode = #tpu.pipeline_mode<synchronous>, transform_indices = @transform_11, window_bounds = array<i64: 16, 16>}, {pipeline_mode = #tpu.pipeline_mode<synchronous>, transform_indices = @transform_12, window_bounds = array<i64: 128, 384>}, {pipeline_mode = #tpu.pipeline_mode<synchronous>, transform_indices = @transform_13, window_bounds = array<i64: 1, 128>}, {pipeline_mode = #tpu.pipeline_mode<synchronous>, transform_indices = @transform_14, window_bounds = array<i64: 32, 16>}, {pipeline_mode = #tpu.pipeline_mode<synchronous>, transform_indices = @transform_15, window_bounds = array<i64: 128, 128>}, {pipeline_mode = #tpu.pipeline_mode<synchronous>, transform_indices = @transform_16, window_bounds = array<i64: 32, 16>}, {pipeline_mode = #tpu.pipeline_mode<synchronous>, transform_indices = @transform_17, window_bounds = array<i64: 128, 384>}, {pipeline_mode = #tpu.pipeline_mode<synchronous>, transform_indices = @transform_18, window_bounds = array<i64: 1, 128>}, {pipeline_mode = #tpu.pipeline_mode<synchronous>, transform_indices = @transform_19, window_bounds = array<i64: 32, 32>}, {pipeline_mode = #tpu.pipeline_mode<synchronous>, transform_indices = @transform_20, window_bounds = array<i64: 32, 32>}, {pipeline_mode = #tpu.pipeline_mode<synchronous>, transform_indices = @transform_21, window_bounds = array<i64: 128, 384>}, {pipeline_mode = #tpu.pipeline_mode<synchronous>, transform_indices = @transform_22, window_bounds = array<i64: 1, 128>}, {pipeline_mode = #tpu.pipeline_mode<synchronous>, transform_indices = @transform_23, window_bounds = array<i64: 64, 32>}, {pipeline_mode = #tpu.pipeline_mode<synchronous>, transform_indices = @transform_24, window_bounds = array<i64: 128, 128>}, {pipeline_mode = #tpu.pipeline_mode<synchronous>, transform_indices = @transform_25, window_bounds = array<i64: 64, 32>}, {pipeline_mode = #tpu.pipeline_mode<synchronous>, transform_indices = @transform_26, window_bounds = array<i64: 128, 768>}, {pipeline_mode = #tpu.pipeline_mode<synchronous>, transform_indices = @transform_27, window_bounds = array<i64: 1, 256>}, {pipeline_mode = #tpu.pipeline_mode<synchronous>, transform_indices = @transform_28, window_bounds = array<i64: 64, 64>}, {pipeline_mode = #tpu.pipeline_mode<synchronous>, transform_indices = @transform_29, window_bounds = array<i64: 64, 64>}, {pipeline_mode = #tpu.pipeline_mode<synchronous>, transform_indices = @transform_30, window_bounds = array<i64: 256, 384>}, {pipeline_mode = #tpu.pipeline_mode<synchronous>, transform_indices = @transform_31, window_bounds = array<i64: 1, 128>}, {pipeline_mode = #tpu.pipeline_mode<synchronous>, transform_indices = @transform_32, window_bounds = array<i64: 72, 64>}, {pipeline_mode = #tpu.pipeline_mode<synchronous>, transform_indices = @transform_33, window_bounds = array<i64: 128, 128>}, {pipeline_mode = #tpu.pipeline_mode<synchronous>, transform_indices = @transform_34, window_bounds = array<i64: 72, 64>}, {pipeline_mode = #tpu.pipeline_mode<synchronous>, transform_indices = @transform_35, window_bounds = array<i64: 256, 1152>}, {pipeline_mode = #tpu.pipeline_mode<synchronous>, transform_indices = @transform_36, window_bounds = array<i64: 1, 384>}, {pipeline_mode = #tpu.pipeline_mode<synchronous>, transform_indices = @transform_37, window_bounds = array<i64: 72, 72>}, {pipeline_mode = #tpu.pipeline_mode<synchronous>, transform_indices = @transform_38, window_bounds = array<i64: 72, 72>}, {pipeline_mode = #tpu.pipeline_mode<synchronous>, transform_indices = @transform_39, window_bounds = array<i64: 384, 384>}, {pipeline_mode = #tpu.pipeline_mode<synchronous>, transform_indices = @transform_40, window_bounds = array<i64: 1, 128>}, {transform_indices = @transform_41, window_bounds = array<i64: 1, 72, 128>}]} {
    %c0 = arith.constant 0 : index
    %c0_0 = arith.constant 0 : index
    %c0_1 = arith.constant 0 : index
    %0 = vector.load %arg1[%c0, %c0_0, %c0_1] : memref<1x8x128xf32, #tpu.memory_space<vmem>>, vector<1x8x128xf32>
    %1 = vector.shape_cast %0 : vector<1x8x128xf32> to vector<8x128xf32>
    %c0_2 = arith.constant 0 : index
    %c0_3 = arith.constant 0 : index
    %2 = vector.load %arg2[%c0_2, %c0_3] : memref<128x384xbf16, #tpu.memory_space<vmem>>, vector<128x384xbf16>
    %3 = arith.truncf %1 : vector<8x128xf32> to vector<8x128xbf16>
    %cst = arith.constant dense<0.000000e+00> : vector<8x384xf32>
    %4 = tpu.matmul %3, %2, %cst {dimension_numbers = #tpu.dot_dimension_numbers<[1], [0], [0], [1], [0, 0, 1, 1], [], []>} : vector<8x128xbf16>, vector<128x384xbf16>, vector<8x384xf32> -> vector<8x384xf32>
    %5 = vector.extract_strided_slice %4 {offsets = [0, 0], sizes = [8, 128], strides = [1, 1]} : vector<8x384xf32> to vector<8x128xf32>
    %6 = vector.extract_strided_slice %4 {offsets = [0, 128], sizes = [8, 128], strides = [1, 1]} : vector<8x384xf32> to vector<8x128xf32>
    %7 = vector.extract_strided_slice %4 {offsets = [0, 256], sizes = [8, 128], strides = [1, 1]} : vector<8x384xf32> to vector<8x128xf32>
    %c0_4 = arith.constant 0 : index
    %c0_5 = arith.constant 0 : index
    %8 = vector.load %arg4[%c0_4, %c0_5] : memref<8x8xbf16, #tpu.memory_space<vmem>>, vector<8x8xbf16>
    %9 = arith.truncf %5 : vector<8x128xf32> to vector<8x128xbf16>
    %cst_6 = arith.constant dense<0.000000e+00> : vector<8x128xf32>
    %10 = tpu.matmul %8, %9, %cst_6 {dimension_numbers = #tpu.dot_dimension_numbers<[1], [0], [0], [1], [0, 0, 1, 1], [], []>} : vector<8x8xbf16>, vector<8x128xbf16>, vector<8x128xf32> -> vector<8x128xf32>
    %11 = arith.addf %10, %6 : vector<8x128xf32>
    %c0_7 = arith.constant 0 : index
    %c0_8 = arith.constant 0 : index
    %12 = vector.load %arg5[%c0_7, %c0_8] : memref<8x8xbf16, #tpu.memory_space<vmem>>, vector<8x8xbf16>
    %13 = arith.truncf %7 : vector<8x128xf32> to vector<8x128xbf16>
    %cst_9 = arith.constant dense<0.000000e+00> : vector<8x128xf32>
    %14 = tpu.matmul %12, %13, %cst_9 {dimension_numbers = #tpu.dot_dimension_numbers<[1], [0], [0], [1], [0, 0, 1, 1], [], []>} : vector<8x8xbf16>, vector<8x128xbf16>, vector<8x128xf32> -> vector<8x128xf32>
    %15 = arith.addf %11, %14 : vector<8x128xf32>
    %c0_10 = arith.constant 0 : index
    %c0_11 = arith.constant 0 : index
    %16 = vector.load %arg3[%c0_10, %c0_11] : memref<1x128xf32, #tpu.memory_space<vmem>>, vector<1x128xf32>
    %17 = vector.broadcast %16 : vector<1x128xf32> to vector<8x128xf32>
    %18 = arith.addf %15, %17 : vector<8x128xf32>
    %c0_12 = arith.constant 0 : index
    %c0_13 = arith.constant 0 : index
    %19 = vector.load %arg6[%c0_12, %c0_13] : memref<16x8xbf16, #tpu.memory_space<vmem>>, vector<16x8xbf16>
    %c0_14 = arith.constant 0 : index
    %c0_15 = arith.constant 0 : index
    %20 = vector.load %arg7[%c0_14, %c0_15] : memref<128x128xbf16, #tpu.memory_space<vmem>>, vector<128x128xbf16>
    %21 = arith.truncf %18 : vector<8x128xf32> to vector<8x128xbf16>
    %cst_16 = arith.constant dense<0.000000e+00> : vector<8x128xf32>
    %22 = tpu.matmul %21, %20, %cst_16 {dimension_numbers = #tpu.dot_dimension_numbers<[1], [0], [0], [1], [0, 0, 1, 1], [], []>} : vector<8x128xbf16>, vector<128x128xbf16>, vector<8x128xf32> -> vector<8x128xf32>
    %23 = arith.truncf %22 : vector<8x128xf32> to vector<8x128xbf16>
    %cst_17 = arith.constant dense<0.000000e+00> : vector<16x128xf32>
    %24 = tpu.matmul %19, %23, %cst_17 {dimension_numbers = #tpu.dot_dimension_numbers<[1], [0], [0], [1], [0, 0, 1, 1], [], []>} : vector<16x8xbf16>, vector<8x128xbf16>, vector<16x128xf32> -> vector<16x128xf32>
    %c0_18 = arith.constant 0 : index
    %c0_19 = arith.constant 0 : index
    %25 = vector.load %arg8[%c0_18, %c0_19] : memref<16x8xbf16, #tpu.memory_space<vmem>>, vector<16x8xbf16>
    %26 = arith.truncf %1 : vector<8x128xf32> to vector<8x128xbf16>
    %cst_20 = arith.constant dense<0.000000e+00> : vector<16x128xf32>
    %27 = tpu.matmul %25, %26, %cst_20 {dimension_numbers = #tpu.dot_dimension_numbers<[1], [0], [0], [1], [0, 0, 1, 1], [], []>} : vector<16x8xbf16>, vector<8x128xbf16>, vector<16x128xf32> -> vector<16x128xf32>
    %c0_21 = arith.constant 0 : index
    %c0_22 = arith.constant 0 : index
    %28 = vector.load %arg9[%c0_21, %c0_22] : memref<128x384xbf16, #tpu.memory_space<vmem>>, vector<128x384xbf16>
    %29 = arith.truncf %27 : vector<16x128xf32> to vector<16x128xbf16>
    %cst_23 = arith.constant dense<0.000000e+00> : vector<16x384xf32>
    %30 = tpu.matmul %29, %28, %cst_23 {dimension_numbers = #tpu.dot_dimension_numbers<[1], [0], [0], [1], [0, 0, 1, 1], [], []>} : vector<16x128xbf16>, vector<128x384xbf16>, vector<16x384xf32> -> vector<16x384xf32>
    %31 = vector.extract_strided_slice %30 {offsets = [0, 0], sizes = [16, 128], strides = [1, 1]} : vector<16x384xf32> to vector<16x128xf32>
    %32 = vector.extract_strided_slice %30 {offsets = [0, 128], sizes = [16, 128], strides = [1, 1]} : vector<16x384xf32> to vector<16x128xf32>
    %33 = vector.extract_strided_slice %30 {offsets = [0, 256], sizes = [16, 128], strides = [1, 1]} : vector<16x384xf32> to vector<16x128xf32>
    %c0_24 = arith.constant 0 : index
    %c0_25 = arith.constant 0 : index
    %34 = vector.load %arg11[%c0_24, %c0_25] : memref<16x16xbf16, #tpu.memory_space<vmem>>, vector<16x16xbf16>
    %35 = arith.truncf %31 : vector<16x128xf32> to vector<16x128xbf16>
    %cst_26 = arith.constant dense<0.000000e+00> : vector<16x128xf32>
    %36 = tpu.matmul %34, %35, %cst_26 {dimension_numbers = #tpu.dot_dimension_numbers<[1], [0], [0], [1], [0, 0, 1, 1], [], []>} : vector<16x16xbf16>, vector<16x128xbf16>, vector<16x128xf32> -> vector<16x128xf32>
    %37 = arith.addf %36, %32 : vector<16x128xf32>
    %c0_27 = arith.constant 0 : index
    %c0_28 = arith.constant 0 : index
    %38 = vector.load %arg12[%c0_27, %c0_28] : memref<16x16xbf16, #tpu.memory_space<vmem>>, vector<16x16xbf16>
    %39 = arith.truncf %33 : vector<16x128xf32> to vector<16x128xbf16>
    %cst_29 = arith.constant dense<0.000000e+00> : vector<16x128xf32>
    %40 = tpu.matmul %38, %39, %cst_29 {dimension_numbers = #tpu.dot_dimension_numbers<[1], [0], [0], [1], [0, 0, 1, 1], [], []>} : vector<16x16xbf16>, vector<16x128xbf16>, vector<16x128xf32> -> vector<16x128xf32>
    %41 = arith.addf %37, %40 : vector<16x128xf32>
    %c0_30 = arith.constant 0 : index
    %c0_31 = arith.constant 0 : index
    %42 = vector.load %arg10[%c0_30, %c0_31] : memref<1x128xf32, #tpu.memory_space<vmem>>, vector<1x128xf32>
    %43 = vector.broadcast %42 : vector<1x128xf32> to vector<16x128xf32>
    %44 = arith.addf %41, %43 : vector<16x128xf32>
    %cst_32 = arith.constant 0.000000e+00 : f32
    %45 = vector.broadcast %cst_32 : f32 to vector<16x128xf32>
    %46 = arith.cmpf oge, %44, %45 : vector<16x128xf32>
    %cst_33 = arith.constant 2.000000e-01 : f32
    %47 = vector.broadcast %cst_33 : f32 to vector<16x128xf32>
    %48 = arith.mulf %47, %44 : vector<16x128xf32>
    %49 = arith.select %46, %44, %48 : vector<16x128xi1>, vector<16x128xf32>
    %c0_34 = arith.constant 0 : index
    %c0_35 = arith.constant 0 : index
    %50 = vector.load %arg13[%c0_34, %c0_35] : memref<128x384xbf16, #tpu.memory_space<vmem>>, vector<128x384xbf16>
    %51 = arith.truncf %49 : vector<16x128xf32> to vector<16x128xbf16>
    %cst_36 = arith.constant dense<0.000000e+00> : vector<16x384xf32>
    %52 = tpu.matmul %51, %50, %cst_36 {dimension_numbers = #tpu.dot_dimension_numbers<[1], [0], [0], [1], [0, 0, 1, 1], [], []>} : vector<16x128xbf16>, vector<128x384xbf16>, vector<16x384xf32> -> vector<16x384xf32>
    %53 = vector.extract_strided_slice %52 {offsets = [0, 0], sizes = [16, 128], strides = [1, 1]} : vector<16x384xf32> to vector<16x128xf32>
    %54 = vector.extract_strided_slice %52 {offsets = [0, 128], sizes = [16, 128], strides = [1, 1]} : vector<16x384xf32> to vector<16x128xf32>
    %55 = vector.extract_strided_slice %52 {offsets = [0, 256], sizes = [16, 128], strides = [1, 1]} : vector<16x384xf32> to vector<16x128xf32>
    %c0_37 = arith.constant 0 : index
    %c0_38 = arith.constant 0 : index
    %56 = vector.load %arg11[%c0_37, %c0_38] : memref<16x16xbf16, #tpu.memory_space<vmem>>, vector<16x16xbf16>
    %57 = arith.truncf %53 : vector<16x128xf32> to vector<16x128xbf16>
    %cst_39 = arith.constant dense<0.000000e+00> : vector<16x128xf32>
    %58 = tpu.matmul %56, %57, %cst_39 {dimension_numbers = #tpu.dot_dimension_numbers<[1], [0], [0], [1], [0, 0, 1, 1], [], []>} : vector<16x16xbf16>, vector<16x128xbf16>, vector<16x128xf32> -> vector<16x128xf32>
    %59 = arith.addf %58, %54 : vector<16x128xf32>
    %c0_40 = arith.constant 0 : index
    %c0_41 = arith.constant 0 : index
    %60 = vector.load %arg12[%c0_40, %c0_41] : memref<16x16xbf16, #tpu.memory_space<vmem>>, vector<16x16xbf16>
    %61 = arith.truncf %55 : vector<16x128xf32> to vector<16x128xbf16>
    %cst_42 = arith.constant dense<0.000000e+00> : vector<16x128xf32>
    %62 = tpu.matmul %60, %61, %cst_42 {dimension_numbers = #tpu.dot_dimension_numbers<[1], [0], [0], [1], [0, 0, 1, 1], [], []>} : vector<16x16xbf16>, vector<16x128xbf16>, vector<16x128xf32> -> vector<16x128xf32>
    %63 = arith.addf %59, %62 : vector<16x128xf32>
    %c0_43 = arith.constant 0 : index
    %c0_44 = arith.constant 0 : index
    %64 = vector.load %arg14[%c0_43, %c0_44] : memref<1x128xf32, #tpu.memory_space<vmem>>, vector<1x128xf32>
    %65 = vector.broadcast %64 : vector<1x128xf32> to vector<16x128xf32>
    %66 = arith.addf %63, %65 : vector<16x128xf32>
    %67 = arith.addf %66, %24 : vector<16x128xf32>
    %c0_45 = arith.constant 0 : index
    %c0_46 = arith.constant 0 : index
    %68 = vector.load %arg15[%c0_45, %c0_46] : memref<32x16xbf16, #tpu.memory_space<vmem>>, vector<32x16xbf16>
    %c0_47 = arith.constant 0 : index
    %c0_48 = arith.constant 0 : index
    %69 = vector.load %arg16[%c0_47, %c0_48] : memref<128x128xbf16, #tpu.memory_space<vmem>>, vector<128x128xbf16>
    %70 = arith.truncf %67 : vector<16x128xf32> to vector<16x128xbf16>
    %cst_49 = arith.constant dense<0.000000e+00> : vector<16x128xf32>
    %71 = tpu.matmul %70, %69, %cst_49 {dimension_numbers = #tpu.dot_dimension_numbers<[1], [0], [0], [1], [0, 0, 1, 1], [], []>} : vector<16x128xbf16>, vector<128x128xbf16>, vector<16x128xf32> -> vector<16x128xf32>
    %72 = arith.truncf %71 : vector<16x128xf32> to vector<16x128xbf16>
    %cst_50 = arith.constant dense<0.000000e+00> : vector<32x128xf32>
    %73 = tpu.matmul %68, %72, %cst_50 {dimension_numbers = #tpu.dot_dimension_numbers<[1], [0], [0], [1], [0, 0, 1, 1], [], []>} : vector<32x16xbf16>, vector<16x128xbf16>, vector<32x128xf32> -> vector<32x128xf32>
    %c0_51 = arith.constant 0 : index
    %c0_52 = arith.constant 0 : index
    %74 = vector.load %arg17[%c0_51, %c0_52] : memref<32x16xbf16, #tpu.memory_space<vmem>>, vector<32x16xbf16>
    %75 = arith.truncf %49 : vector<16x128xf32> to vector<16x128xbf16>
    %cst_53 = arith.constant dense<0.000000e+00> : vector<32x128xf32>
    %76 = tpu.matmul %74, %75, %cst_53 {dimension_numbers = #tpu.dot_dimension_numbers<[1], [0], [0], [1], [0, 0, 1, 1], [], []>} : vector<32x16xbf16>, vector<16x128xbf16>, vector<32x128xf32> -> vector<32x128xf32>
    %c0_54 = arith.constant 0 : index
    %c0_55 = arith.constant 0 : index
    %77 = vector.load %arg18[%c0_54, %c0_55] : memref<128x384xbf16, #tpu.memory_space<vmem>>, vector<128x384xbf16>
    %78 = arith.truncf %76 : vector<32x128xf32> to vector<32x128xbf16>
    %cst_56 = arith.constant dense<0.000000e+00> : vector<32x384xf32>
    %79 = tpu.matmul %78, %77, %cst_56 {dimension_numbers = #tpu.dot_dimension_numbers<[1], [0], [0], [1], [0, 0, 1, 1], [], []>} : vector<32x128xbf16>, vector<128x384xbf16>, vector<32x384xf32> -> vector<32x384xf32>
    %80 = vector.extract_strided_slice %79 {offsets = [0, 0], sizes = [32, 128], strides = [1, 1]} : vector<32x384xf32> to vector<32x128xf32>
    %81 = vector.extract_strided_slice %79 {offsets = [0, 128], sizes = [32, 128], strides = [1, 1]} : vector<32x384xf32> to vector<32x128xf32>
    %82 = vector.extract_strided_slice %79 {offsets = [0, 256], sizes = [32, 128], strides = [1, 1]} : vector<32x384xf32> to vector<32x128xf32>
    %c0_57 = arith.constant 0 : index
    %c0_58 = arith.constant 0 : index
    %83 = vector.load %arg20[%c0_57, %c0_58] : memref<32x32xbf16, #tpu.memory_space<vmem>>, vector<32x32xbf16>
    %84 = arith.truncf %80 : vector<32x128xf32> to vector<32x128xbf16>
    %cst_59 = arith.constant dense<0.000000e+00> : vector<32x128xf32>
    %85 = tpu.matmul %83, %84, %cst_59 {dimension_numbers = #tpu.dot_dimension_numbers<[1], [0], [0], [1], [0, 0, 1, 1], [], []>} : vector<32x32xbf16>, vector<32x128xbf16>, vector<32x128xf32> -> vector<32x128xf32>
    %86 = arith.addf %85, %81 : vector<32x128xf32>
    %c0_60 = arith.constant 0 : index
    %c0_61 = arith.constant 0 : index
    %87 = vector.load %arg21[%c0_60, %c0_61] : memref<32x32xbf16, #tpu.memory_space<vmem>>, vector<32x32xbf16>
    %88 = arith.truncf %82 : vector<32x128xf32> to vector<32x128xbf16>
    %cst_62 = arith.constant dense<0.000000e+00> : vector<32x128xf32>
    %89 = tpu.matmul %87, %88, %cst_62 {dimension_numbers = #tpu.dot_dimension_numbers<[1], [0], [0], [1], [0, 0, 1, 1], [], []>} : vector<32x32xbf16>, vector<32x128xbf16>, vector<32x128xf32> -> vector<32x128xf32>
    %90 = arith.addf %86, %89 : vector<32x128xf32>
    %c0_63 = arith.constant 0 : index
    %c0_64 = arith.constant 0 : index
    %91 = vector.load %arg19[%c0_63, %c0_64] : memref<1x128xf32, #tpu.memory_space<vmem>>, vector<1x128xf32>
    %92 = vector.broadcast %91 : vector<1x128xf32> to vector<32x128xf32>
    %93 = arith.addf %90, %92 : vector<32x128xf32>
    %cst_65 = arith.constant 0.000000e+00 : f32
    %94 = vector.broadcast %cst_65 : f32 to vector<32x128xf32>
    %95 = arith.cmpf oge, %93, %94 : vector<32x128xf32>
    %cst_66 = arith.constant 2.000000e-01 : f32
    %96 = vector.broadcast %cst_66 : f32 to vector<32x128xf32>
    %97 = arith.mulf %96, %93 : vector<32x128xf32>
    %98 = arith.select %95, %93, %97 : vector<32x128xi1>, vector<32x128xf32>
    %c0_67 = arith.constant 0 : index
    %c0_68 = arith.constant 0 : index
    %99 = vector.load %arg22[%c0_67, %c0_68] : memref<128x384xbf16, #tpu.memory_space<vmem>>, vector<128x384xbf16>
    %100 = arith.truncf %98 : vector<32x128xf32> to vector<32x128xbf16>
    %cst_69 = arith.constant dense<0.000000e+00> : vector<32x384xf32>
    %101 = tpu.matmul %100, %99, %cst_69 {dimension_numbers = #tpu.dot_dimension_numbers<[1], [0], [0], [1], [0, 0, 1, 1], [], []>} : vector<32x128xbf16>, vector<128x384xbf16>, vector<32x384xf32> -> vector<32x384xf32>
    %102 = vector.extract_strided_slice %101 {offsets = [0, 0], sizes = [32, 128], strides = [1, 1]} : vector<32x384xf32> to vector<32x128xf32>
    %103 = vector.extract_strided_slice %101 {offsets = [0, 128], sizes = [32, 128], strides = [1, 1]} : vector<32x384xf32> to vector<32x128xf32>
    %104 = vector.extract_strided_slice %101 {offsets = [0, 256], sizes = [32, 128], strides = [1, 1]} : vector<32x384xf32> to vector<32x128xf32>
    %c0_70 = arith.constant 0 : index
    %c0_71 = arith.constant 0 : index
    %105 = vector.load %arg20[%c0_70, %c0_71] : memref<32x32xbf16, #tpu.memory_space<vmem>>, vector<32x32xbf16>
    %106 = arith.truncf %102 : vector<32x128xf32> to vector<32x128xbf16>
    %cst_72 = arith.constant dense<0.000000e+00> : vector<32x128xf32>
    %107 = tpu.matmul %105, %106, %cst_72 {dimension_numbers = #tpu.dot_dimension_numbers<[1], [0], [0], [1], [0, 0, 1, 1], [], []>} : vector<32x32xbf16>, vector<32x128xbf16>, vector<32x128xf32> -> vector<32x128xf32>
    %108 = arith.addf %107, %103 : vector<32x128xf32>
    %c0_73 = arith.constant 0 : index
    %c0_74 = arith.constant 0 : index
    %109 = vector.load %arg21[%c0_73, %c0_74] : memref<32x32xbf16, #tpu.memory_space<vmem>>, vector<32x32xbf16>
    %110 = arith.truncf %104 : vector<32x128xf32> to vector<32x128xbf16>
    %cst_75 = arith.constant dense<0.000000e+00> : vector<32x128xf32>
    %111 = tpu.matmul %109, %110, %cst_75 {dimension_numbers = #tpu.dot_dimension_numbers<[1], [0], [0], [1], [0, 0, 1, 1], [], []>} : vector<32x32xbf16>, vector<32x128xbf16>, vector<32x128xf32> -> vector<32x128xf32>
    %112 = arith.addf %108, %111 : vector<32x128xf32>
    %c0_76 = arith.constant 0 : index
    %c0_77 = arith.constant 0 : index
    %113 = vector.load %arg23[%c0_76, %c0_77] : memref<1x128xf32, #tpu.memory_space<vmem>>, vector<1x128xf32>
    %114 = vector.broadcast %113 : vector<1x128xf32> to vector<32x128xf32>
    %115 = arith.addf %112, %114 : vector<32x128xf32>
    %116 = arith.addf %115, %73 : vector<32x128xf32>
    %c0_78 = arith.constant 0 : index
    %c0_79 = arith.constant 0 : index
    %117 = vector.load %arg24[%c0_78, %c0_79] : memref<64x32xbf16, #tpu.memory_space<vmem>>, vector<64x32xbf16>
    %c0_80 = arith.constant 0 : index
    %c0_81 = arith.constant 0 : index
    %118 = vector.load %arg25[%c0_80, %c0_81] : memref<128x128xbf16, #tpu.memory_space<vmem>>, vector<128x128xbf16>
    %119 = arith.truncf %116 : vector<32x128xf32> to vector<32x128xbf16>
    %cst_82 = arith.constant dense<0.000000e+00> : vector<32x128xf32>
    %120 = tpu.matmul %119, %118, %cst_82 {dimension_numbers = #tpu.dot_dimension_numbers<[1], [0], [0], [1], [0, 0, 1, 1], [], []>} : vector<32x128xbf16>, vector<128x128xbf16>, vector<32x128xf32> -> vector<32x128xf32>
    %121 = arith.truncf %120 : vector<32x128xf32> to vector<32x128xbf16>
    %cst_83 = arith.constant dense<0.000000e+00> : vector<64x128xf32>
    %122 = tpu.matmul %117, %121, %cst_83 {dimension_numbers = #tpu.dot_dimension_numbers<[1], [0], [0], [1], [0, 0, 1, 1], [], []>} : vector<64x32xbf16>, vector<32x128xbf16>, vector<64x128xf32> -> vector<64x128xf32>
    %c0_84 = arith.constant 0 : index
    %c0_85 = arith.constant 0 : index
    %123 = vector.load %arg26[%c0_84, %c0_85] : memref<64x32xbf16, #tpu.memory_space<vmem>>, vector<64x32xbf16>
    %124 = arith.truncf %98 : vector<32x128xf32> to vector<32x128xbf16>
    %cst_86 = arith.constant dense<0.000000e+00> : vector<64x128xf32>
    %125 = tpu.matmul %123, %124, %cst_86 {dimension_numbers = #tpu.dot_dimension_numbers<[1], [0], [0], [1], [0, 0, 1, 1], [], []>} : vector<64x32xbf16>, vector<32x128xbf16>, vector<64x128xf32> -> vector<64x128xf32>
    %c0_87 = arith.constant 0 : index
    %c0_88 = arith.constant 0 : index
    %126 = vector.load %arg27[%c0_87, %c0_88] : memref<128x768xbf16, #tpu.memory_space<vmem>>, vector<128x768xbf16>
    %127 = arith.truncf %125 : vector<64x128xf32> to vector<64x128xbf16>
    %cst_89 = arith.constant dense<0.000000e+00> : vector<64x768xf32>
    %128 = tpu.matmul %127, %126, %cst_89 {dimension_numbers = #tpu.dot_dimension_numbers<[1], [0], [0], [1], [0, 0, 1, 1], [], []>} : vector<64x128xbf16>, vector<128x768xbf16>, vector<64x768xf32> -> vector<64x768xf32>
    %129 = vector.extract_strided_slice %128 {offsets = [0, 0], sizes = [64, 256], strides = [1, 1]} : vector<64x768xf32> to vector<64x256xf32>
    %130 = vector.extract_strided_slice %128 {offsets = [0, 256], sizes = [64, 256], strides = [1, 1]} : vector<64x768xf32> to vector<64x256xf32>
    %131 = vector.extract_strided_slice %128 {offsets = [0, 512], sizes = [64, 256], strides = [1, 1]} : vector<64x768xf32> to vector<64x256xf32>
    %c0_90 = arith.constant 0 : index
    %c0_91 = arith.constant 0 : index
    %132 = vector.load %arg29[%c0_90, %c0_91] : memref<64x64xbf16, #tpu.memory_space<vmem>>, vector<64x64xbf16>
    %133 = arith.truncf %129 : vector<64x256xf32> to vector<64x256xbf16>
    %cst_92 = arith.constant dense<0.000000e+00> : vector<64x256xf32>
    %134 = tpu.matmul %132, %133, %cst_92 {dimension_numbers = #tpu.dot_dimension_numbers<[1], [0], [0], [1], [0, 0, 1, 1], [], []>} : vector<64x64xbf16>, vector<64x256xbf16>, vector<64x256xf32> -> vector<64x256xf32>
    %135 = arith.addf %134, %130 : vector<64x256xf32>
    %c0_93 = arith.constant 0 : index
    %c0_94 = arith.constant 0 : index
    %136 = vector.load %arg30[%c0_93, %c0_94] : memref<64x64xbf16, #tpu.memory_space<vmem>>, vector<64x64xbf16>
    %137 = arith.truncf %131 : vector<64x256xf32> to vector<64x256xbf16>
    %cst_95 = arith.constant dense<0.000000e+00> : vector<64x256xf32>
    %138 = tpu.matmul %136, %137, %cst_95 {dimension_numbers = #tpu.dot_dimension_numbers<[1], [0], [0], [1], [0, 0, 1, 1], [], []>} : vector<64x64xbf16>, vector<64x256xbf16>, vector<64x256xf32> -> vector<64x256xf32>
    %139 = arith.addf %135, %138 : vector<64x256xf32>
    %c0_96 = arith.constant 0 : index
    %c0_97 = arith.constant 0 : index
    %140 = vector.load %arg28[%c0_96, %c0_97] : memref<1x256xf32, #tpu.memory_space<vmem>>, vector<1x256xf32>
    %141 = vector.broadcast %140 : vector<1x256xf32> to vector<64x256xf32>
    %142 = arith.addf %139, %141 : vector<64x256xf32>
    %cst_98 = arith.constant 0.000000e+00 : f32
    %143 = vector.broadcast %cst_98 : f32 to vector<64x256xf32>
    %144 = arith.cmpf oge, %142, %143 : vector<64x256xf32>
    %cst_99 = arith.constant 2.000000e-01 : f32
    %145 = vector.broadcast %cst_99 : f32 to vector<64x256xf32>
    %146 = arith.mulf %145, %142 : vector<64x256xf32>
    %147 = arith.select %144, %142, %146 : vector<64x256xi1>, vector<64x256xf32>
    %c0_100 = arith.constant 0 : index
    %c0_101 = arith.constant 0 : index
    %148 = vector.load %arg31[%c0_100, %c0_101] : memref<256x384xbf16, #tpu.memory_space<vmem>>, vector<256x384xbf16>
    %149 = arith.truncf %147 : vector<64x256xf32> to vector<64x256xbf16>
    %cst_102 = arith.constant dense<0.000000e+00> : vector<64x384xf32>
    %150 = tpu.matmul %149, %148, %cst_102 {dimension_numbers = #tpu.dot_dimension_numbers<[1], [0], [0], [1], [0, 0, 1, 1], [], []>} : vector<64x256xbf16>, vector<256x384xbf16>, vector<64x384xf32> -> vector<64x384xf32>
    %151 = vector.extract_strided_slice %150 {offsets = [0, 0], sizes = [64, 128], strides = [1, 1]} : vector<64x384xf32> to vector<64x128xf32>
    %152 = vector.extract_strided_slice %150 {offsets = [0, 128], sizes = [64, 128], strides = [1, 1]} : vector<64x384xf32> to vector<64x128xf32>
    %153 = vector.extract_strided_slice %150 {offsets = [0, 256], sizes = [64, 128], strides = [1, 1]} : vector<64x384xf32> to vector<64x128xf32>
    %c0_103 = arith.constant 0 : index
    %c0_104 = arith.constant 0 : index
    %154 = vector.load %arg29[%c0_103, %c0_104] : memref<64x64xbf16, #tpu.memory_space<vmem>>, vector<64x64xbf16>
    %155 = arith.truncf %151 : vector<64x128xf32> to vector<64x128xbf16>
    %cst_105 = arith.constant dense<0.000000e+00> : vector<64x128xf32>
    %156 = tpu.matmul %154, %155, %cst_105 {dimension_numbers = #tpu.dot_dimension_numbers<[1], [0], [0], [1], [0, 0, 1, 1], [], []>} : vector<64x64xbf16>, vector<64x128xbf16>, vector<64x128xf32> -> vector<64x128xf32>
    %157 = arith.addf %156, %152 : vector<64x128xf32>
    %c0_106 = arith.constant 0 : index
    %c0_107 = arith.constant 0 : index
    %158 = vector.load %arg30[%c0_106, %c0_107] : memref<64x64xbf16, #tpu.memory_space<vmem>>, vector<64x64xbf16>
    %159 = arith.truncf %153 : vector<64x128xf32> to vector<64x128xbf16>
    %cst_108 = arith.constant dense<0.000000e+00> : vector<64x128xf32>
    %160 = tpu.matmul %158, %159, %cst_108 {dimension_numbers = #tpu.dot_dimension_numbers<[1], [0], [0], [1], [0, 0, 1, 1], [], []>} : vector<64x64xbf16>, vector<64x128xbf16>, vector<64x128xf32> -> vector<64x128xf32>
    %161 = arith.addf %157, %160 : vector<64x128xf32>
    %c0_109 = arith.constant 0 : index
    %c0_110 = arith.constant 0 : index
    %162 = vector.load %arg32[%c0_109, %c0_110] : memref<1x128xf32, #tpu.memory_space<vmem>>, vector<1x128xf32>
    %163 = vector.broadcast %162 : vector<1x128xf32> to vector<64x128xf32>
    %164 = arith.addf %161, %163 : vector<64x128xf32>
    %165 = arith.addf %164, %122 : vector<64x128xf32>
    %c0_111 = arith.constant 0 : index
    %c0_112 = arith.constant 0 : index
    %166 = vector.load %arg33[%c0_111, %c0_112] : memref<72x64xbf16, #tpu.memory_space<vmem>>, vector<72x64xbf16>
    %c0_113 = arith.constant 0 : index
    %c0_114 = arith.constant 0 : index
    %167 = vector.load %arg34[%c0_113, %c0_114] : memref<128x128xbf16, #tpu.memory_space<vmem>>, vector<128x128xbf16>
    %168 = arith.truncf %165 : vector<64x128xf32> to vector<64x128xbf16>
    %cst_115 = arith.constant dense<0.000000e+00> : vector<64x128xf32>
    %169 = tpu.matmul %168, %167, %cst_115 {dimension_numbers = #tpu.dot_dimension_numbers<[1], [0], [0], [1], [0, 0, 1, 1], [], []>} : vector<64x128xbf16>, vector<128x128xbf16>, vector<64x128xf32> -> vector<64x128xf32>
    %170 = arith.truncf %169 : vector<64x128xf32> to vector<64x128xbf16>
    %cst_116 = arith.constant dense<0.000000e+00> : vector<72x128xf32>
    %171 = tpu.matmul %166, %170, %cst_116 {dimension_numbers = #tpu.dot_dimension_numbers<[1], [0], [0], [1], [0, 0, 1, 1], [], []>} : vector<72x64xbf16>, vector<64x128xbf16>, vector<72x128xf32> -> vector<72x128xf32>
    %c0_117 = arith.constant 0 : index
    %c0_118 = arith.constant 0 : index
    %172 = vector.load %arg35[%c0_117, %c0_118] : memref<72x64xbf16, #tpu.memory_space<vmem>>, vector<72x64xbf16>
    %173 = arith.truncf %147 : vector<64x256xf32> to vector<64x256xbf16>
    %cst_119 = arith.constant dense<0.000000e+00> : vector<72x256xf32>
    %174 = tpu.matmul %172, %173, %cst_119 {dimension_numbers = #tpu.dot_dimension_numbers<[1], [0], [0], [1], [0, 0, 1, 1], [], []>} : vector<72x64xbf16>, vector<64x256xbf16>, vector<72x256xf32> -> vector<72x256xf32>
    %c0_120 = arith.constant 0 : index
    %c0_121 = arith.constant 0 : index
    %175 = vector.load %arg36[%c0_120, %c0_121] : memref<256x1152xbf16, #tpu.memory_space<vmem>>, vector<256x1152xbf16>
    %176 = arith.truncf %174 : vector<72x256xf32> to vector<72x256xbf16>
    %cst_122 = arith.constant dense<0.000000e+00> : vector<72x1152xf32>
    %177 = tpu.matmul %176, %175, %cst_122 {dimension_numbers = #tpu.dot_dimension_numbers<[1], [0], [0], [1], [0, 0, 1, 1], [], []>} : vector<72x256xbf16>, vector<256x1152xbf16>, vector<72x1152xf32> -> vector<72x1152xf32>
    %178 = vector.extract_strided_slice %177 {offsets = [0, 0], sizes = [72, 384], strides = [1, 1]} : vector<72x1152xf32> to vector<72x384xf32>
    %179 = vector.extract_strided_slice %177 {offsets = [0, 384], sizes = [72, 384], strides = [1, 1]} : vector<72x1152xf32> to vector<72x384xf32>
    %180 = vector.extract_strided_slice %177 {offsets = [0, 768], sizes = [72, 384], strides = [1, 1]} : vector<72x1152xf32> to vector<72x384xf32>
    %c0_123 = arith.constant 0 : index
    %c0_124 = arith.constant 0 : index
    %181 = vector.load %arg38[%c0_123, %c0_124] : memref<72x72xbf16, #tpu.memory_space<vmem>>, vector<72x72xbf16>
    %182 = arith.truncf %178 : vector<72x384xf32> to vector<72x384xbf16>
    %cst_125 = arith.constant dense<0.000000e+00> : vector<72x384xf32>
    %183 = tpu.matmul %181, %182, %cst_125 {dimension_numbers = #tpu.dot_dimension_numbers<[1], [0], [0], [1], [0, 0, 1, 1], [], []>} : vector<72x72xbf16>, vector<72x384xbf16>, vector<72x384xf32> -> vector<72x384xf32>
    %184 = arith.addf %183, %179 : vector<72x384xf32>
    %c0_126 = arith.constant 0 : index
    %c0_127 = arith.constant 0 : index
    %185 = vector.load %arg39[%c0_126, %c0_127] : memref<72x72xbf16, #tpu.memory_space<vmem>>, vector<72x72xbf16>
    %186 = arith.truncf %180 : vector<72x384xf32> to vector<72x384xbf16>
    %cst_128 = arith.constant dense<0.000000e+00> : vector<72x384xf32>
    %187 = tpu.matmul %185, %186, %cst_128 {dimension_numbers = #tpu.dot_dimension_numbers<[1], [0], [0], [1], [0, 0, 1, 1], [], []>} : vector<72x72xbf16>, vector<72x384xbf16>, vector<72x384xf32> -> vector<72x384xf32>
    %188 = arith.addf %184, %187 : vector<72x384xf32>
    %c0_129 = arith.constant 0 : index
    %c0_130 = arith.constant 0 : index
    %189 = vector.load %arg37[%c0_129, %c0_130] : memref<1x384xf32, #tpu.memory_space<vmem>>, vector<1x384xf32>
    %190 = vector.broadcast %189 : vector<1x384xf32> to vector<72x384xf32>
    %191 = arith.addf %188, %190 : vector<72x384xf32>
    %cst_131 = arith.constant 0.000000e+00 : f32
    %192 = vector.broadcast %cst_131 : f32 to vector<72x384xf32>
    %193 = arith.cmpf oge, %191, %192 : vector<72x384xf32>
    %cst_132 = arith.constant 2.000000e-01 : f32
    %194 = vector.broadcast %cst_132 : f32 to vector<72x384xf32>
    %195 = arith.mulf %194, %191 : vector<72x384xf32>
    %196 = arith.select %193, %191, %195 : vector<72x384xi1>, vector<72x384xf32>
    %c0_133 = arith.constant 0 : index
    %c0_134 = arith.constant 0 : index
    %197 = vector.load %arg40[%c0_133, %c0_134] : memref<384x384xbf16, #tpu.memory_space<vmem>>, vector<384x384xbf16>
    %198 = arith.truncf %196 : vector<72x384xf32> to vector<72x384xbf16>
    %cst_135 = arith.constant dense<0.000000e+00> : vector<72x384xf32>
    %199 = tpu.matmul %198, %197, %cst_135 {dimension_numbers = #tpu.dot_dimension_numbers<[1], [0], [0], [1], [0, 0, 1, 1], [], []>} : vector<72x384xbf16>, vector<384x384xbf16>, vector<72x384xf32> -> vector<72x384xf32>
    %200 = vector.extract_strided_slice %199 {offsets = [0, 0], sizes = [72, 128], strides = [1, 1]} : vector<72x384xf32> to vector<72x128xf32>
    %201 = vector.extract_strided_slice %199 {offsets = [0, 128], sizes = [72, 128], strides = [1, 1]} : vector<72x384xf32> to vector<72x128xf32>
    %202 = vector.extract_strided_slice %199 {offsets = [0, 256], sizes = [72, 128], strides = [1, 1]} : vector<72x384xf32> to vector<72x128xf32>
    %c0_136 = arith.constant 0 : index
    %c0_137 = arith.constant 0 : index
    %203 = vector.load %arg38[%c0_136, %c0_137] : memref<72x72xbf16, #tpu.memory_space<vmem>>, vector<72x72xbf16>
    %204 = arith.truncf %200 : vector<72x128xf32> to vector<72x128xbf16>
    %cst_138 = arith.constant dense<0.000000e+00> : vector<72x128xf32>
    %205 = tpu.matmul %203, %204, %cst_138 {dimension_numbers = #tpu.dot_dimension_numbers<[1], [0], [0], [1], [0, 0, 1, 1], [], []>} : vector<72x72xbf16>, vector<72x128xbf16>, vector<72x128xf32> -> vector<72x128xf32>
    %206 = arith.addf %205, %201 : vector<72x128xf32>
    %c0_139 = arith.constant 0 : index
    %c0_140 = arith.constant 0 : index
    %207 = vector.load %arg39[%c0_139, %c0_140] : memref<72x72xbf16, #tpu.memory_space<vmem>>, vector<72x72xbf16>
    %208 = arith.truncf %202 : vector<72x128xf32> to vector<72x128xbf16>
    %cst_141 = arith.constant dense<0.000000e+00> : vector<72x128xf32>
    %209 = tpu.matmul %207, %208, %cst_141 {dimension_numbers = #tpu.dot_dimension_numbers<[1], [0], [0], [1], [0, 0, 1, 1], [], []>} : vector<72x72xbf16>, vector<72x128xbf16>, vector<72x128xf32> -> vector<72x128xf32>
    %210 = arith.addf %206, %209 : vector<72x128xf32>
    %c0_142 = arith.constant 0 : index
    %c0_143 = arith.constant 0 : index
    %211 = vector.load %arg41[%c0_142, %c0_143] : memref<1x128xf32, #tpu.memory_space<vmem>>, vector<1x128xf32>
    %212 = vector.broadcast %211 : vector<1x128xf32> to vector<72x128xf32>
    %213 = arith.addf %210, %212 : vector<72x128xf32>
    %214 = arith.addf %213, %171 : vector<72x128xf32>
    %cst_144 = arith.constant 0.000000e+00 : f32
    %215 = vector.broadcast %cst_144 : f32 to vector<72x128xf32>
    %216 = arith.subf %215, %214 : vector<72x128xf32>
    %217 = math.exp %216 : vector<72x128xf32>
    %cst_145 = arith.constant 1.000000e+00 : f32
    %218 = vector.broadcast %cst_145 : f32 to vector<72x128xf32>
    %219 = arith.addf %218, %217 : vector<72x128xf32>
    %220 = tpu.reciprocal %219 {approx = true} : vector<72x128xf32> -> vector<72x128xf32>
    %c0_146 = arith.constant 0 : index
    %c0_147 = arith.constant 0 : index
    %c0_148 = arith.constant 0 : index
    %221 = vector.load %arg42[%c0_146, %c0_147, %c0_148] : memref<1x72x128xf32, #tpu.memory_space<vmem>>, vector<1x72x128xf32>
    %222 = vector.shape_cast %221 : vector<1x72x128xf32> to vector<72x128xf32>
    %223 = vector.shape_cast %220 : vector<72x128xf32> to vector<1x72x128xf32>
    tpu.vector_store %arg42[%c0_146, %c0_147, %c0_148], %223 {strides = array<i32>} : memref<1x72x128xf32, #tpu.memory_space<vmem>>, vector<1x72x128xf32>,
    return
  }
  func.func @transform_0(%arg0: i32) -> (i32, i32, i32) {
    %c0_i32 = arith.constant 0 : i32
    %c0_i32_0 = arith.constant 0 : i32
    %c0_i32_1 = arith.constant 0 : i32
    return %arg0, %c0_i32, %c0_i32_0 : i32, i32, i32
  }
  func.func @transform_1(%arg0: i32) -> (i32, i32) {
    %c0_i32 = arith.constant 0 : i32
    %c0_i32_0 = arith.constant 0 : i32
    %c0_i32_1 = arith.constant 0 : i32
    return %c0_i32, %c0_i32_0 : i32, i32
  }
  func.func @transform_2(%arg0: i32) -> (i32, i32) {
    %c0_i32 = arith.constant 0 : i32
    %c0_i32_0 = arith.constant 0 : i32
    %c0_i32_1 = arith.constant 0 : i32
    return %c0_i32, %c0_i32_0 : i32, i32
  }
  func.func @transform_3(%arg0: i32) -> (i32, i32) {
    %c0_i32 = arith.constant 0 : i32
    %c0_i32_0 = arith.constant 0 : i32
    %c0_i32_1 = arith.constant 0 : i32
    return %c0_i32, %c0_i32_0 : i32, i32
  }
  func.func @transform_4(%arg0: i32) -> (i32, i32) {
    %c0_i32 = arith.constant 0 : i32
    %c0_i32_0 = arith.constant 0 : i32
    %c0_i32_1 = arith.constant 0 : i32
    return %c0_i32, %c0_i32_0 : i32, i32
  }
  func.func @transform_5(%arg0: i32) -> (i32, i32) {
    %c0_i32 = arith.constant 0 : i32
    %c0_i32_0 = arith.constant 0 : i32
    %c0_i32_1 = arith.constant 0 : i32
    return %c0_i32, %c0_i32_0 : i32, i32
  }
  func.func @transform_6(%arg0: i32) -> (i32, i32) {
    %c0_i32 = arith.constant 0 : i32
    %c0_i32_0 = arith.constant 0 : i32
    %c0_i32_1 = arith.constant 0 : i32
    return %c0_i32, %c0_i32_0 : i32, i32
  }
  func.func @transform_7(%arg0: i32) -> (i32, i32) {
    %c0_i32 = arith.constant 0 : i32
    %c0_i32_0 = arith.constant 0 : i32
    %c0_i32_1 = arith.constant 0 : i32
    return %c0_i32, %c0_i32_0 : i32, i32
  }
  func.func @transform_8(%arg0: i32) -> (i32, i32) {
    %c0_i32 = arith.constant 0 : i32
    %c0_i32_0 = arith.constant 0 : i32
    %c0_i32_1 = arith.constant 0 : i32
    return %c0_i32, %c0_i32_0 : i32, i32
  }
  func.func @transform_9(%arg0: i32) -> (i32, i32) {
    %c0_i32 = arith.constant 0 : i32
    %c0_i32_0 = arith.constant 0 : i32
    %c0_i32_1 = arith.constant 0 : i32
    return %c0_i32, %c0_i32_0 : i32, i32
  }
  func.func @transform_10(%arg0: i32) -> (i32, i32) {
    %c0_i32 = arith.constant 0 : i32
    %c0_i32_0 = arith.constant 0 : i32
    %c0_i32_1 = arith.constant 0 : i32
    return %c0_i32, %c0_i32_0 : i32, i32
  }
  func.func @transform_11(%arg0: i32) -> (i32, i32) {
    %c0_i32 = arith.constant 0 : i32
    %c0_i32_0 = arith.constant 0 : i32
    %c0_i32_1 = arith.constant 0 : i32
    return %c0_i32, %c0_i32_0 : i32, i32
  }
  func.func @transform_12(%arg0: i32) -> (i32, i32) {
    %c0_i32 = arith.constant 0 : i32
    %c0_i32_0 = arith.constant 0 : i32
    %c0_i32_1 = arith.constant 0 : i32
    return %c0_i32, %c0_i32_0 : i32, i32
  }
  func.func @transform_13(%arg0: i32) -> (i32, i32) {
    %c0_i32 = arith.constant 0 : i32
    %c0_i32_0 = arith.constant 0 : i32
    %c0_i32_1 = arith.constant 0 : i32
    return %c0_i32, %c0_i32_0 : i32, i32
  }
  func.func @transform_14(%arg0: i32) -> (i32, i32) {
    %c0_i32 = arith.constant 0 : i32
    %c0_i32_0 = arith.constant 0 : i32
    %c0_i32_1 = arith.constant 0 : i32
    return %c0_i32, %c0_i32_0 : i32, i32
  }
  func.func @transform_15(%arg0: i32) -> (i32, i32) {
    %c0_i32 = arith.constant 0 : i32
    %c0_i32_0 = arith.constant 0 : i32
    %c0_i32_1 = arith.constant 0 : i32
    return %c0_i32, %c0_i32_0 : i32, i32
  }
  func.func @transform_16(%arg0: i32) -> (i32, i32) {
    %c0_i32 = arith.constant 0 : i32
    %c0_i32_0 = arith.constant 0 : i32
    %c0_i32_1 = arith.constant 0 : i32
    return %c0_i32, %c0_i32_0 : i32, i32
  }
  func.func @transform_17(%arg0: i32) -> (i32, i32) {
    %c0_i32 = arith.constant 0 : i32
    %c0_i32_0 = arith.constant 0 : i32
    %c0_i32_1 = arith.constant 0 : i32
    return %c0_i32, %c0_i32_0 : i32, i32
  }
  func.func @transform_18(%arg0: i32) -> (i32, i32) {
    %c0_i32 = arith.constant 0 : i32
    %c0_i32_0 = arith.constant 0 : i32
    %c0_i32_1 = arith.constant 0 : i32
    return %c0_i32, %c0_i32_0 : i32, i32
  }
  func.func @transform_19(%arg0: i32) -> (i32, i32) {
    %c0_i32 = arith.constant 0 : i32
    %c0_i32_0 = arith.constant 0 : i32
    %c0_i32_1 = arith.constant 0 : i32
    return %c0_i32, %c0_i32_0 : i32, i32
  }
  func.func @transform_20(%arg0: i32) -> (i32, i32) {
    %c0_i32 = arith.constant 0 : i32
    %c0_i32_0 = arith.constant 0 : i32
    %c0_i32_1 = arith.constant 0 : i32
    return %c0_i32, %c0_i32_0 : i32, i32
  }
  func.func @transform_21(%arg0: i32) -> (i32, i32) {
    %c0_i32 = arith.constant 0 : i32
    %c0_i32_0 = arith.constant 0 : i32
    %c0_i32_1 = arith.constant 0 : i32
    return %c0_i32, %c0_i32_0 : i32, i32
  }
  func.func @transform_22(%arg0: i32) -> (i32, i32) {
    %c0_i32 = arith.constant 0 : i32
    %c0_i32_0 = arith.constant 0 : i32
    %c0_i32_1 = arith.constant 0 : i32
    return %c0_i32, %c0_i32_0 : i32, i32
  }
  func.func @transform_23(%arg0: i32) -> (i32, i32) {
    %c0_i32 = arith.constant 0 : i32
    %c0_i32_0 = arith.constant 0 : i32
    %c0_i32_1 = arith.constant 0 : i32
    return %c0_i32, %c0_i32_0 : i32, i32
  }
  func.func @transform_24(%arg0: i32) -> (i32, i32) {
    %c0_i32 = arith.constant 0 : i32
    %c0_i32_0 = arith.constant 0 : i32
    %c0_i32_1 = arith.constant 0 : i32
    return %c0_i32, %c0_i32_0 : i32, i32
  }
  func.func @transform_25(%arg0: i32) -> (i32, i32) {
    %c0_i32 = arith.constant 0 : i32
    %c0_i32_0 = arith.constant 0 : i32
    %c0_i32_1 = arith.constant 0 : i32
    return %c0_i32, %c0_i32_0 : i32, i32
  }
  func.func @transform_26(%arg0: i32) -> (i32, i32) {
    %c0_i32 = arith.constant 0 : i32
    %c0_i32_0 = arith.constant 0 : i32
    %c0_i32_1 = arith.constant 0 : i32
    return %c0_i32, %c0_i32_0 : i32, i32
  }
  func.func @transform_27(%arg0: i32) -> (i32, i32) {
    %c0_i32 = arith.constant 0 : i32
    %c0_i32_0 = arith.constant 0 : i32
    %c0_i32_1 = arith.constant 0 : i32
    return %c0_i32, %c0_i32_0 : i32, i32
  }
  func.func @transform_28(%arg0: i32) -> (i32, i32) {
    %c0_i32 = arith.constant 0 : i32
    %c0_i32_0 = arith.constant 0 : i32
    %c0_i32_1 = arith.constant 0 : i32
    return %c0_i32, %c0_i32_0 : i32, i32
  }
  func.func @transform_29(%arg0: i32) -> (i32, i32) {
    %c0_i32 = arith.constant 0 : i32
    %c0_i32_0 = arith.constant 0 : i32
    %c0_i32_1 = arith.constant 0 : i32
    return %c0_i32, %c0_i32_0 : i32, i32
  }
  func.func @transform_30(%arg0: i32) -> (i32, i32) {
    %c0_i32 = arith.constant 0 : i32
    %c0_i32_0 = arith.constant 0 : i32
    %c0_i32_1 = arith.constant 0 : i32
    return %c0_i32, %c0_i32_0 : i32, i32
  }
  func.func @transform_31(%arg0: i32) -> (i32, i32) {
    %c0_i32 = arith.constant 0 : i32
    %c0_i32_0 = arith.constant 0 : i32
    %c0_i32_1 = arith.constant 0 : i32
    return %c0_i32, %c0_i32_0 : i32, i32
  }
  func.func @transform_32(%arg0: i32) -> (i32, i32) {
    %c0_i32 = arith.constant 0 : i32
    %c0_i32_0 = arith.constant 0 : i32
    %c0_i32_1 = arith.constant 0 : i32
    return %c0_i32, %c0_i32_0 : i32, i32
  }
  func.func @transform_33(%arg0: i32) -> (i32, i32) {
    %c0_i32 = arith.constant 0 : i32
    %c0_i32_0 = arith.constant 0 : i32
    %c0_i32_1 = arith.constant 0 : i32
    return %c0_i32, %c0_i32_0 : i32, i32
  }
  func.func @transform_34(%arg0: i32) -> (i32, i32) {
    %c0_i32 = arith.constant 0 : i32
    %c0_i32_0 = arith.constant 0 : i32
    %c0_i32_1 = arith.constant 0 : i32
    return %c0_i32, %c0_i32_0 : i32, i32
  }
  func.func @transform_35(%arg0: i32) -> (i32, i32) {
    %c0_i32 = arith.constant 0 : i32
    %c0_i32_0 = arith.constant 0 : i32
    %c0_i32_1 = arith.constant 0 : i32
    return %c0_i32, %c0_i32_0 : i32, i32
  }
  func.func @transform_36(%arg0: i32) -> (i32, i32) {
    %c0_i32 = arith.constant 0 : i32
    %c0_i32_0 = arith.constant 0 : i32
    %c0_i32_1 = arith.constant 0 : i32
    return %c0_i32, %c0_i32_0 : i32, i32
  }
  func.func @transform_37(%arg0: i32) -> (i32, i32) {
    %c0_i32 = arith.constant 0 : i32
    %c0_i32_0 = arith.constant 0 : i32
    %c0_i32_1 = arith.constant 0 : i32
    return %c0_i32, %c0_i32_0 : i32, i32
  }
  func.func @transform_38(%arg0: i32) -> (i32, i32) {
    %c0_i32 = arith.constant 0 : i32
    %c0_i32_0 = arith.constant 0 : i32
    %c0_i32_1 = arith.constant 0 : i32
    return %c0_i32, %c0_i32_0 : i32, i32
  }
  func.func @transform_39(%arg0: i32) -> (i32, i32) {
    %c0_i32 = arith.constant 0 : i32
    %c0_i32_0 = arith.constant 0 : i32
    %c0_i32_1 = arith.constant 0 : i32
    return %c0_i32, %c0_i32_0 : i32, i32
  }
  func.func @transform_40(%arg0: i32) -> (i32, i32) {
    %c0_i32 = arith.constant 0 : i32
    %c0_i32_0 = arith.constant 0 : i32
    %c0_i32_1 = arith.constant 0 : i32
    return %c0_i32, %c0_i32_0 : i32, i32
  }
  func.func @transform_41(%arg0: i32) -> (i32, i32, i32) {
    %c0_i32 = arith.constant 0 : i32
    %c0_i32_0 = arith.constant 0 : i32
    %c0_i32_1 = arith.constant 0 : i32
    return %arg0, %c0_i32, %c0_i32_0 : i32, i32, i32
  }
}

</mosaic_0001>

<bundles_post_ra>
// kernel: tile.88
= control target key start
LH: loop header
LB: loop body
LE: loop exit
PB: predicated region body
PF: predicated region fallthrough
CT: control target
= control target key end

     0   :  { %s46_s0 = inlined_call_operand.vmem [shape: f32[3], index: 0, kind: input, shape index: {}]   ;;  %s47_s1 = inlined_call_operand.vmem [shape: f32[40,3], index: 1, kind: output, shape index: {}]  }
   0x1   :  { %v4_v0 = vld [vmem:[%s46_s0] ss:$0 sm:$0xff] }
   0x2   :  { %5 = vst [vmem:[%s47_s1] sm:$0xff] %v4_v0  ;;  %14 = vst [vmem:[%s47_s1 + $0x8] sm:$0xff] %v4_v0 }
   0x3   :  { %15 = vst [vmem:[%s47_s1 + $0x10] sm:$0xff] %v4_v0  ;;  %16 = vst [vmem:[%s47_s1 + $0x18] sm:$0xff] %v4_v0 }
   0x4   :  { %17 = vst [vmem:[%s47_s1 + $0x20] sm:$0xff] %v4_v0 }

// kernel: tile.89
= control target key start
LH: loop header
LB: loop body
LE: loop exit
PB: predicated region body
PF: predicated region fallthrough
CT: control target
= control target key end

     0   :  { %s325_s10 = smov 117   ;;  %s326_s11 = smov 111   ;;  %vm3_vm0 = vcmask 23552   ;;  %vm9_vm1 = vcmask 982952   ;;  %vm15_vm2 = vcmask 958352   ;;  %vm21_vm3 = vcmask 933752   ;;  %s497_s0 = inlined_call_operand.vmem [shape: f32[40,3], index: 0, kind: input, shape index: {}]   ;;  %s498_s1 = inlined_call_operand.vmem [shape: f32[120], index: 1, kind: output, shape index: {}]  }
   0x1   :  { %v247_v0 = vld [vmem:[%s497_s0 + $0x27] sm:$0x1]   ;;  %v249_v1 = vld [vmem:[%s497_s0 + $0x25] sm:$0x1]   ;;  %v248_v2 = vld [vmem:[%s497_s0 + $0x26] sm:$0x1]  }
   0x2   :  { %7 = vrot.lane.b32.xlu0 %v247_v0, %s325_s10  ;;  %19 = vrot.lane.b32.xlu1 %v249_v1, %s326_s11  ;;  %v250_v3 = vld [vmem:[%s497_s0 + $0x24] sm:$0x1]   ;;  %s327_s16 = smov 114   ;;  %s328_s17 = smov 108   ;;  %v251_v4 = vld [vmem:[%s497_s0 + $0x23] sm:$0x1]  }
   0x3   :  { %v252_v5 = vld [vmem:[%s497_s0 + $0x22] sm:$0x1]   ;;  %s329_s22 = smov 105   ;;  %s330_s23 = smov 102   ;;  %v253_v6 = vld [vmem:[%s497_s0 + $0x21] sm:$0x1]  }
   0x4   :  { %v254_v7 = vld [vmem:[%s497_s0 + $0x20] sm:$0x1]   ;;  %s331_s28 = smov 99   ;;  %s332_s29 = smov 96   ;;  %v255_v8 = vld [vmem:[%s497_s0 + $0x1f] sm:$0x1]  }
   0x5   :  { %v256_v9 = vld [vmem:[%s497_s0 + $0x1e] sm:$0x1]   ;;  %s333_s5 = smov 93   ;;  %s334_s6 = smov 90   ;;  %v257_v10 = vld [vmem:[%s497_s0 + $0x1d] sm:$0x1]  }
   0x6   :  { %13 = vrot.lane.b32.xlu0 %v248_v2, %s327_s16  ;;  %25 = vrot.lane.b32.xlu1 %v250_v3, %s328_s17  ;;  %v258_v11 = vld [vmem:[%s497_s0 + $0x1c] sm:$0x1]   ;;  %v2_v12 = vld [vmem:[%s497_s0] sm:$0x1]   ;;  %s335_s13 = smov 87   ;;  %s336_s14 = smov 84  }
   0x7   :  { %4 = vst.msk [vmem:[#allocation0] sm:$0x1] %vm3_vm0, %v2_v12   ;;  %v259_v13 = vld [vmem:[%s497_s0 + $0x1b] sm:$0x1]   ;;  %v260_v14 = vld [vmem:[%s497_s0 + $0x1a] sm:$0x1]  }
   0x8   :  { %s337_s19 = smov 81   ;;  %s338_s20 = smov 78   ;;  %v261_v15 = vld [vmem:[%s497_s0 + $0x19] sm:$0x1]   ;;  %v262_v16 = vld [vmem:[%s497_s0 + $0x18] sm:$0x1]  }
   0x9   :  { %s339_s25 = smov 75   ;;  %s340_s26 = smov 72   ;;  %v263_v17 = vld [vmem:[%s497_s0 + $0x17] sm:$0x1]   ;;  %v264_v18 = vld [vmem:[%s497_s0 + $0x16] sm:$0x1]  }
   0xa   :  { %31 = vrot.lane.b32.xlu0 %v251_v4, %s329_s22  ;;  %37 = vrot.lane.b32.xlu1 %v252_v5, %s330_s23  ;;  %s341_s2 = smov 69   ;;  %s342_s3 = smov 66   ;;  %v265_v19 = vld [vmem:[%s497_s0 + $0x15] sm:$0x1]   ;;  %v266_v20 = vld [vmem:[%s497_s0 + $0x14] sm:$0x1]  }
   0xb   :  { %s343_s8 = smov 63   ;;  %s344_s9 = smov 60   ;;  %v267_v21 = vld [vmem:[%s497_s0 + $0x13] sm:$0x1]   ;;  %v268_v22 = vld [vmem:[%s497_s0 + $0x12] sm:$0x1]  }
   0xc   :  { %s346_s15 = smov 54   ;;  %v269_v23 = vld [vmem:[%s497_s0 + $0x11] sm:$0x1]   ;;  %v270_v24 = vld [vmem:[%s497_s0 + $0x10] sm:$0x1]   ;;  %s348_s21 = smov 48  }
   0xd   :  { %v271_v25 = vld [vmem:[%s497_s0 + $0xf] sm:$0x1]   ;;  %v272_v26 = vld [vmem:[%s497_s0 + $0xe] sm:$0x1]   ;;  %s350_s27 = smov 42   ;;  %s352_s4 = smov 36  }
   0xe   :  { %43 = vrot.lane.b32.xlu0 %v253_v6, %s331_s28  ;;  %49 = vrot.lane.b32.xlu1 %v254_v7, %s332_s29  ;;  %v273_v27 = vld [vmem:[%s497_s0 + $0xd] sm:$0x1]   ;;  %v274_v28 = vld [vmem:[%s497_s0 + $0xc] sm:$0x1]   ;;  %s354_s10 = smov 30   ;;  %s356_s16 = smov 24  }
   0xf   :  { %v275_v29 = vld [vmem:[%s497_s0 + $0xb] sm:$0x1]   ;;  %v276_v30 = vld [vmem:[%s497_s0 + $0xa] sm:$0x1]   ;;  %v277_v31 = vld [vmem:[%s497_s0 + $0x9] sm:$0x1]  }
  0x10   :  { %v278_v32 = vld [vmem:[%s497_s0 + $0x8] sm:$0x1]   ;;  %v279_v33 = vld [vmem:[%s497_s0 + $0x7] sm:$0x1]   ;;  %v280_v34 = vld [vmem:[%s497_s0 + $0x6] sm:$0x1]  }
  0x11   :  { %s358_s22 = smov 18   ;;  %v281_v35 = vld [vmem:[%s497_s0 + $0x5] sm:$0x1]   ;;  %v282_v36 = vld [vmem:[%s497_s0 + $0x4] sm:$0x1]   ;;  %s360_s28 = smov 12  }
  0x12   :  { %55 = vrot.lane.b32.xlu0 %v255_v8, %s333_s5  ;;  %61 = vrot.lane.b32.xlu1 %v256_v9, %s334_s6  ;;  %v283_v37 = vld [vmem:[%s497_s0 + $0x3] sm:$0x1]   ;;  %v284_v38 = vld [vmem:[%s497_s0 + $0x2] sm:$0x1]   ;;  %s362_s5 = smov 6   ;;  %vm27_vm4 = vcmask 909152  }
  0x13   :  { %v285_v39 = vld [vmem:[%s497_s0 + $0x1] sm:$0x1]   ;;  %s363_s0 = smov 3   ;;  %vm33_vm5 = vcmask 884552   ;;  %vm39_vm6 = vcmask 859952   ;;  %vm45_vm7 = vcmask 835352  }
  0x14   :  { %vm51_vm8 = vcmask 810752   ;;  %vm57_vm9 = vcmask 786152   ;;  %vm63_vm10 = vcmask 761552   ;;  %vm69_vm11 = vcmask 736952  }
  0x15   :  { %vm75_vm12 = vcmask 712352   ;;  %vm81_vm13 = vcmask 687752   ;;  %vm87_vm14 = vcmask 663152   ;;  %vm93_vm15 = vcmask 638552  }
  0x16   :  { %67 = vrot.lane.b32.xlu0 %v257_v10, %s335_s13  ;;  %73 = vrot.lane.b32.xlu1 %v258_v11, %s336_s14  ;;  %s345_s14 = smov 57   ;;  %vm99_vm0 = vcmask 613952  }
  0x1a   :  { %79 = vrot.lane.b32.xlu0 %v259_v13, %s337_s19  ;;  %85 = vrot.lane.b32.xlu1 %v260_v14, %s338_s20  ;;  %s347_s20 = smov 51  }
  0x1e   :  { %91 = vrot.lane.b32.xlu0 %v261_v15, %s339_s25  ;;  %97 = vrot.lane.b32.xlu1 %v262_v16, %s340_s26  ;;  %s349_s26 = smov 45  }
  0x22   :  { %103 = vrot.lane.b32.xlu0 %v263_v17, %s341_s2  ;;  %109 = vrot.lane.b32.xlu1 %v264_v18, %s342_s3  ;;  %s351_s3 = smov 39  }
  0x26   :  { %115 = vrot.lane.b32.xlu0 %v265_v19, %s343_s8  ;;  %121 = vrot.lane.b32.xlu1 %v266_v20, %s344_s9  ;;  %s353_s9 = smov 33  }
  0x2a   :  { %127 = vrot.lane.b32.xlu0 %v267_v21, %s345_s14  ;;  %133 = vrot.lane.b32.xlu1 %v268_v22, %s346_s15  ;;  %s355_s15 = smov 27  }
  0x2e   :  { %139 = vrot.lane.b32.xlu0 %v269_v23, %s347_s20  ;;  %145 = vrot.lane.b32.xlu1 %v270_v24, %s348_s21  ;;  %s357_s21 = smov 21  }
  0x32   :  { %151 = vrot.lane.b32.xlu0 %v271_v25, %s349_s26  ;;  %157 = vrot.lane.b32.xlu1 %v272_v26, %s350_s27  ;;  %s359_s27 = smov 15  }
  0x36   :  { %163 = vrot.lane.b32.xlu0 %v273_v27, %s351_s3  ;;  %169 = vrot.lane.b32.xlu1 %v274_v28, %s352_s4  ;;  %s361_s4 = smov 9  }
  0x3a   :  { %175 = vrot.lane.b32.xlu0 %v275_v29, %s353_s9  ;;  %181 = vrot.lane.b32.xlu1 %v276_v30, %s354_s10 }
  0x3e   :  { %187 = vrot.lane.b32.xlu0 %v277_v31, %s355_s15  ;;  %193 = vrot.lane.b32.xlu1 %v278_v32, %s356_s16 }
  0x42   :  { %199 = vrot.lane.b32.xlu0 %v279_v33, %s357_s21  ;;  %205 = vrot.lane.b32.xlu1 %v280_v34, %s358_s22 }
  0x46   :  { %211 = vrot.lane.b32.xlu0 %v281_v35, %s359_s27  ;;  %217 = vrot.lane.b32.xlu1 %v282_v36, %s360_s28 }
  0x4a   :  { %223 = vrot.lane.b32.xlu0 %v283_v37, %s361_s4  ;;  %229 = vrot.lane.b32.xlu1 %v284_v38, %s362_s5 }
  0x4e   :  { %235 = vrot.lane.b32.xlu0 %v285_v39, %s363_s0 }
  0x74   :  { %v8_v40 = vpop.permute.xlu0 %7   ;;  %v20_v41 = vpop.permute.xlu1 %19  }
  0x75   :  { %10 = vst.msk [vmem:[#allocation0] sm:$0x1] %vm9_vm1, %v8_v40   ;;  %vm105_vm1 = vcmask 589352  }
  0x78   :  { %v14_v42 = vpop.permute.xlu0 %13   ;;  %v26_v43 = vpop.permute.xlu1 %25  }
  0x79   :  { %16 = vst.msk [vmem:[#allocation0] sm:$0x1] %vm15_vm2, %v14_v42   ;;  %vm111_vm2 = vcmask 564752  }
  0x7a   :  { %22 = vst.msk [vmem:[#allocation0] sm:$0x1] %vm21_vm3, %v20_v41   ;;  %vm117_vm3 = vcmask 540152  }
  0x7b   :  { %28 = vst.msk [vmem:[#allocation0] sm:$0x1] %vm27_vm4, %v26_v43   ;;  %vm123_vm4 = vcmask 515552  }
  0x7c   :  { %v32_v44 = vpop.permute.xlu0 %31   ;;  %v38_v45 = vpop.permute.xlu1 %37  }
  0x7d   :  { %34 = vst.msk [vmem:[#allocation0] sm:$0x1] %vm33_vm5, %v32_v44   ;;  %vm129_vm5 = vcmask 490952  }
  0x7e   :  { %40 = vst.msk [vmem:[#allocation0] sm:$0x1] %vm39_vm6, %v38_v45   ;;  %vm135_vm6 = vcmask 466352  }
  0x80   :  { %v44_v46 = vpop.permute.xlu0 %43   ;;  %v50_v47 = vpop.permute.xlu1 %49  }
  0x81   :  { %46 = vst.msk [vmem:[#allocation0] sm:$0x1] %vm45_vm7, %v44_v46   ;;  %vm141_vm7 = vcmask 441752  }
  0x82   :  { %52 = vst.msk [vmem:[#allocation0] sm:$0x1] %vm51_vm8, %v50_v47   ;;  %vm147_vm8 = vcmask 417152  }
  0x84   :  { %v56_v48 = vpop.permute.xlu0 %55   ;;  %v62_v49 = vpop.permute.xlu1 %61  }
  0x85   :  { %58 = vst.msk [vmem:[#allocation0] sm:$0x1] %vm57_vm9, %v56_v48   ;;  %vm153_vm9 = vcmask 392552  }
  0x86   :  { %64 = vst.msk [vmem:[#allocation0] sm:$0x1] %vm63_vm10, %v62_v49   ;;  %vm159_vm10 = vcmask 367952  }
  0x88   :  { %v68_v50 = vpop.permute.xlu0 %67   ;;  %v74_v51 = vpop.permute.xlu1 %73  }
  0x89   :  { %70 = vst.msk [vmem:[#allocation0] sm:$0x1] %vm69_vm11, %v68_v50   ;;  %vm165_vm11 = vcmask 343352  }
  0x8a   :  { %76 = vst.msk [vmem:[#allocation0] sm:$0x1] %vm75_vm12, %v74_v51   ;;  %vm171_vm12 = vcmask 318752  }
  0x8c   :  { %v80_v52 = vpop.permute.xlu0 %79   ;;  %v86_v53 = vpop.permute.xlu1 %85  }
  0x8d   :  { %82 = vst.msk [vmem:[#allocation0] sm:$0x1] %vm81_vm13, %v80_v52   ;;  %vm177_vm13 = vcmask 294152  }
  0x8e   :  { %88 = vst.msk [vmem:[#allocation0] sm:$0x1] %vm87_vm14, %v86_v53   ;;  %vm183_vm14 = vcmask 269552  }
  0x90   :  { %v92_v54 = vpop.permute.xlu0 %91   ;;  %v98_v55 = vpop.permute.xlu1 %97  }
  0x91   :  { %94 = vst.msk [vmem:[#allocation0] sm:$0x1] %vm93_vm15, %v92_v54   ;;  %vm189_vm15 = vcmask 244952  }
  0x92   :  { %100 = vst.msk [vmem:[#allocation0] sm:$0x1] %vm99_vm0, %v98_v55   ;;  %vm195_vm0 = vcmask 220352  }
  0x94   :  { %v104_v56 = vpop.permute.xlu0 %103   ;;  %v110_v57 = vpop.permute.xlu1 %109  }
  0x95   :  { %106 = vst.msk [vmem:[#allocation0] sm:$0x1] %vm105_vm1, %v104_v56   ;;  %vm201_vm1 = vcmask 195752  }
  0x96   :  { %112 = vst.msk [vmem:[#allocation0] sm:$0x1] %vm111_vm2, %v110_v57   ;;  %vm207_vm2 = vcmask 171152  }
  0x98   :  { %v116_v58 = vpop.permute.xlu0 %115   ;;  %v122_v59 = vpop.permute.xlu1 %121  }
  0x99   :  { %118 = vst.msk [vmem:[#allocation0] sm:$0x1] %vm117_vm3, %v116_v58   ;;  %vm213_vm3 = vcmask 146552  }
  0x9a   :  { %124 = vst.msk [vmem:[#allocation0] sm:$0x1] %vm123_vm4, %v122_v59   ;;  %vm219_vm4 = vcmask 121952  }
  0x9c   :  { %v128_v60 = vpop.permute.xlu0 %127   ;;  %v134_v61 = vpop.permute.xlu1 %133  }
  0x9d   :  { %130 = vst.msk [vmem:[#allocation0] sm:$0x1] %vm129_vm5, %v128_v60   ;;  %vm225_vm5 = vcmask 97352  }
  0x9e   :  { %136 = vst.msk [vmem:[#allocation0] sm:$0x1] %vm135_vm6, %v134_v61   ;;  %vm231_vm6 = vcmask 72752  }
  0xa0   :  { %v140_v62 = vpop.permute.xlu0 %139   ;;  %v146_v63 = vpop.permute.xlu1 %145  }
  0xa1   :  { %142 = vst.msk [vmem:[#allocation0] sm:$0x1] %vm141_vm7, %v140_v62   ;;  %vm237_vm7 = vcmask 48152  }
  0xa2   :  { %148 = vst.msk [vmem:[#allocation0] sm:$0x1] %vm147_vm8, %v146_v63  }
  0xa4   :  { %v152_v0 = vpop.permute.xlu0 %151   ;;  %v158_v1 = vpop.permute.xlu1 %157  }
  0xa5   :  { %154 = vst.msk [vmem:[#allocation0] sm:$0x1] %vm153_vm9, %v152_v0  }
  0xa6   :  { %160 = vst.msk [vmem:[#allocation0] sm:$0x1] %vm159_vm10, %v158_v1  }
  0xa8   :  { %v164_v2 = vpop.permute.xlu0 %163   ;;  %v170_v3 = vpop.permute.xlu1 %169  }
  0xa9   :  { %166 = vst.msk [vmem:[#allocation0] sm:$0x1] %vm165_vm11, %v164_v2  }
  0xaa   :  { %172 = vst.msk [vmem:[#allocation0] sm:$0x1] %vm171_vm12, %v170_v3  }
  0xac   :  { %v176_v4 = vpop.permute.xlu0 %175   ;;  %v182_v5 = vpop.permute.xlu1 %181  }
  0xad   :  { %178 = vst.msk [vmem:[#allocation0] sm:$0x1] %vm177_vm13, %v176_v4  }
  0xae   :  { %184 = vst.msk [vmem:[#allocation0] sm:$0x1] %vm183_vm14, %v182_v5  }
  0xb0   :  { %v188_v6 = vpop.permute.xlu0 %187   ;;  %v194_v7 = vpop.permute.xlu1 %193  }
  0xb1   :  { %190 = vst.msk [vmem:[#allocation0] sm:$0x1] %vm189_vm15, %v188_v6  }
  0xb2   :  { %196 = vst.msk [vmem:[#allocation0] sm:$0x1] %vm195_vm0, %v194_v7  }
  0xb4   :  { %v200_v8 = vpop.permute.xlu0 %199   ;;  %v206_v9 = vpop.permute.xlu1 %205  }
  0xb5   :  { %202 = vst.msk [vmem:[#allocation0] sm:$0x1] %vm201_vm1, %v200_v8  }
  0xb6   :  { %208 = vst.msk [vmem:[#allocation0] sm:$0x1] %vm207_vm2, %v206_v9  }
  0xb8   :  { %v212_v10 = vpop.permute.xlu0 %211   ;;  %v218_v11 = vpop.permute.xlu1 %217  }
  0xb9   :  { %214 = vst.msk [vmem:[#allocation0] sm:$0x1] %vm213_vm3, %v212_v10  }
  0xba   :  { %220 = vst.msk [vmem:[#allocation0] sm:$0x1] %vm219_vm4, %v218_v11  }
  0xbc   :  { %v224_v12 = vpop.permute.xlu0 %223   ;;  %v230_v13 = vpop.permute.xlu1 %229  }
  0xbd   :  { %226 = vst.msk [vmem:[#allocation0] sm:$0x1] %vm225_vm5, %v224_v12  }
  0xbe   :  { %232 = vst.msk [vmem:[#allocation0] sm:$0x1] %vm231_vm6, %v230_v13  }
  0xc0   :  { %v236_v14 = vpop.permute.xlu0 %235  }
  0xc1   :  { %238 = vst.msk [vmem:[#allocation0] sm:$0x1] %vm237_vm7, %v236_v14  }
  0xc8   :  { %v243_v15 = vld [vmem:[#allocation0] sm:$0x1] }
  0xc9   :  { %246 = vst [vmem:[%s498_s1] sm:$0x1] %v243_v15 }

// kernel: tile.78
= control target key start
LH: loop header
LB: loop body
LE: loop exit
PB: predicated region body
PF: predicated region fallthrough
CT: control target
= control target key end

     0   :  { %s40_s0 = inlined_call_operand.vmem [shape: f32[3], index: 0, kind: input, shape index: {}]   ;;  %s41_s1 = inlined_call_operand.vmem [shape: f32[32,3], index: 1, kind: output, shape index: {}]  }
   0x1   :  { %v4_v0 = vld [vmem:[%s40_s0] ss:$0 sm:$0xff] }
   0x2   :  { %5 = vst [vmem:[%s41_s1] sm:$0xff] %v4_v0  ;;  %12 = vst [vmem:[%s41_s1 + $0x8] sm:$0xff] %v4_v0 }
   0x3   :  { %13 = vst [vmem:[%s41_s1 + $0x10] sm:$0xff] %v4_v0  ;;  %14 = vst [vmem:[%s41_s1 + $0x18] sm:$0xff] %v4_v0 }

// kernel: tile.79
= control target key start
LH: loop header
LB: loop body
LE: loop exit
PB: predicated region body
PF: predicated region fallthrough
CT: control target
= control target key end

     0   :  { %s261_s10 = smov 93   ;;  %s262_s11 = smov 87   ;;  %vm3_vm0 = vcmask 23552   ;;  %vm9_vm1 = vcmask 786152   ;;  %vm15_vm2 = vcmask 761552   ;;  %vm21_vm3 = vcmask 736952   ;;  %s401_s0 = inlined_call_operand.vmem [shape: f32[32,3], index: 0, kind: input, shape index: {}]   ;;  %s402_s1 = inlined_call_operand.vmem [shape: f32[96], index: 1, kind: output, shape index: {}]  }
   0x1   :  { %v199_v0 = vld [vmem:[%s401_s0 + $0x1f] sm:$0x1]   ;;  %v201_v1 = vld [vmem:[%s401_s0 + $0x1d] sm:$0x1]   ;;  %v200_v2 = vld [vmem:[%s401_s0 + $0x1e] sm:$0x1]  }
   0x2   :  { %7 = vrot.lane.b32.xlu0 %v199_v0, %s261_s10  ;;  %19 = vrot.lane.b32.xlu1 %v201_v1, %s262_s11  ;;  %v202_v3 = vld [vmem:[%s401_s0 + $0x1c] sm:$0x1]   ;;  %s263_s16 = smov 90   ;;  %s264_s17 = smov 84   ;;  %v203_v4 = vld [vmem:[%s401_s0 + $0x1b] sm:$0x1]  }
   0x3   :  { %v204_v5 = vld [vmem:[%s401_s0 + $0x1a] sm:$0x1]   ;;  %s265_s22 = smov 81   ;;  %s266_s23 = smov 78   ;;  %v205_v6 = vld [vmem:[%s401_s0 + $0x19] sm:$0x1]  }
   0x4   :  { %v206_v7 = vld [vmem:[%s401_s0 + $0x18] sm:$0x1]   ;;  %s267_s28 = smov 75   ;;  %s268_s29 = smov 72   ;;  %v207_v8 = vld [vmem:[%s401_s0 + $0x17] sm:$0x1]  }
   0x5   :  { %v208_v9 = vld [vmem:[%s401_s0 + $0x16] sm:$0x1]   ;;  %v2_v10 = vld [vmem:[%s401_s0] sm:$0x1]   ;;  %s269_s7 = smov 69   ;;  %s270_s8 = smov 66  }
   0x6   :  { %13 = vrot.lane.b32.xlu0 %v200_v2, %s263_s16  ;;  %25 = vrot.lane.b32.xlu1 %v202_v3, %s264_s17  ;;  %4 = vst.msk [vmem:[#allocation0] sm:$0x1] %vm3_vm0, %v2_v10   ;;  %v209_v11 = vld [vmem:[%s401_s0 + $0x15] sm:$0x1]   ;;  %v210_v12 = vld [vmem:[%s401_s0 + $0x14] sm:$0x1]  }
   0x7   :  { %s271_s13 = smov 63   ;;  %s272_s14 = smov 60   ;;  %v211_v13 = vld [vmem:[%s401_s0 + $0x13] sm:$0x1]   ;;  %v212_v14 = vld [vmem:[%s401_s0 + $0x12] sm:$0x1]  }
   0x8   :  { %s273_s19 = smov 57   ;;  %s274_s20 = smov 54   ;;  %v213_v15 = vld [vmem:[%s401_s0 + $0x11] sm:$0x1]   ;;  %v214_v16 = vld [vmem:[%s401_s0 + $0x10] sm:$0x1]  }
   0x9   :  { %s275_s25 = smov 51   ;;  %s276_s26 = smov 48   ;;  %v215_v17 = vld [vmem:[%s401_s0 + $0xf] sm:$0x1]   ;;  %v216_v18 = vld [vmem:[%s401_s0 + $0xe] sm:$0x1]  }
   0xa   :  { %31 = vrot.lane.b32.xlu0 %v203_v4, %s265_s22  ;;  %37 = vrot.lane.b32.xlu1 %v204_v5, %s266_s23  ;;  %s277_s2 = smov 45   ;;  %s278_s3 = smov 42   ;;  %v217_v19 = vld [vmem:[%s401_s0 + $0xd] sm:$0x1]   ;;  %v218_v20 = vld [vmem:[%s401_s0 + $0xc] sm:$0x1]  }
   0xb   :  { %s280_s9 = smov 36   ;;  %v219_v21 = vld [vmem:[%s401_s0 + $0xb] sm:$0x1]   ;;  %v220_v22 = vld [vmem:[%s401_s0 + $0xa] sm:$0x1]   ;;  %s282_s15 = smov 30  }
   0xc   :  { %v221_v23 = vld [vmem:[%s401_s0 + $0x9] sm:$0x1]   ;;  %v222_v24 = vld [vmem:[%s401_s0 + $0x8] sm:$0x1]   ;;  %s284_s21 = smov 24   ;;  %s286_s27 = smov 18  }
   0xd   :  { %v223_v25 = vld [vmem:[%s401_s0 + $0x7] sm:$0x1]   ;;  %v224_v26 = vld [vmem:[%s401_s0 + $0x6] sm:$0x1]   ;;  %v225_v27 = vld [vmem:[%s401_s0 + $0x5] sm:$0x1]  }
   0xe   :  { %43 = vrot.lane.b32.xlu0 %v205_v6, %s267_s28  ;;  %49 = vrot.lane.b32.xlu1 %v206_v7, %s268_s29  ;;  %v226_v28 = vld [vmem:[%s401_s0 + $0x4] sm:$0x1]   ;;  %s288_s4 = smov 12   ;;  %v227_v29 = vld [vmem:[%s401_s0 + $0x3] sm:$0x1]   ;;  %s290_s10 = smov 6  }
   0xf   :  { %v228_v30 = vld [vmem:[%s401_s0 + $0x2] sm:$0x1]   ;;  %v229_v31 = vld [vmem:[%s401_s0 + $0x1] sm:$0x1]   ;;  %s291_s0 = smov 3   ;;  %vm27_vm4 = vcmask 712352  }
  0x10   :  { %vm33_vm5 = vcmask 687752   ;;  %vm39_vm6 = vcmask 663152   ;;  %vm45_vm7 = vcmask 638552   ;;  %vm51_vm8 = vcmask 613952  }
  0x11   :  { %vm57_vm9 = vcmask 589352   ;;  %vm63_vm10 = vcmask 564752   ;;  %vm69_vm11 = vcmask 540152   ;;  %vm75_vm12 = vcmask 515552  }
  0x12   :  { %55 = vrot.lane.b32.xlu0 %v207_v8, %s269_s7  ;;  %61 = vrot.lane.b32.xlu1 %v208_v9, %s270_s8  ;;  %s279_s8 = smov 39   ;;  %vm81_vm13 = vcmask 490952   ;;  %vm87_vm14 = vcmask 466352   ;;  %vm93_vm15 = vcmask 441752   ;;  %vm99_vm0 = vcmask 417152  }
  0x16   :  { %67 = vrot.lane.b32.xlu0 %v209_v11, %s271_s13  ;;  %73 = vrot.lane.b32.xlu1 %v210_v12, %s272_s14  ;;  %s281_s14 = smov 33  }
  0x1a   :  { %79 = vrot.lane.b32.xlu0 %v211_v13, %s273_s19  ;;  %85 = vrot.lane.b32.xlu1 %v212_v14, %s274_s20  ;;  %s283_s20 = smov 27  }
  0x1e   :  { %91 = vrot.lane.b32.xlu0 %v213_v15, %s275_s25  ;;  %97 = vrot.lane.b32.xlu1 %v214_v16, %s276_s26  ;;  %s285_s26 = smov 21  }
  0x22   :  { %103 = vrot.lane.b32.xlu0 %v215_v17, %s277_s2  ;;  %109 = vrot.lane.b32.xlu1 %v216_v18, %s278_s3  ;;  %s287_s3 = smov 15  }
  0x26   :  { %115 = vrot.lane.b32.xlu0 %v217_v19, %s279_s8  ;;  %121 = vrot.lane.b32.xlu1 %v218_v20, %s280_s9  ;;  %s289_s9 = smov 9  }
  0x2a   :  { %127 = vrot.lane.b32.xlu0 %v219_v21, %s281_s14  ;;  %133 = vrot.lane.b32.xlu1 %v220_v22, %s282_s15 }
  0x2e   :  { %139 = vrot.lane.b32.xlu0 %v221_v23, %s283_s20  ;;  %145 = vrot.lane.b32.xlu1 %v222_v24, %s284_s21 }
  0x32   :  { %151 = vrot.lane.b32.xlu0 %v223_v25, %s285_s26  ;;  %157 = vrot.lane.b32.xlu1 %v224_v26, %s286_s27 }
  0x36   :  { %163 = vrot.lane.b32.xlu0 %v225_v27, %s287_s3  ;;  %169 = vrot.lane.b32.xlu1 %v226_v28, %s288_s4 }
  0x3a   :  { %175 = vrot.lane.b32.xlu0 %v227_v29, %s289_s9  ;;  %181 = vrot.lane.b32.xlu1 %v228_v30, %s290_s10 }
  0x3e   :  { %187 = vrot.lane.b32.xlu0 %v229_v31, %s291_s0 }
  0x74   :  { %v8_v32 = vpop.permute.xlu0 %7   ;;  %v20_v33 = vpop.permute.xlu1 %19  }
  0x75   :  { %10 = vst.msk [vmem:[#allocation0] sm:$0x1] %vm9_vm1, %v8_v32   ;;  %vm105_vm1 = vcmask 392552  }
  0x78   :  { %v14_v34 = vpop.permute.xlu0 %13   ;;  %v26_v35 = vpop.permute.xlu1 %25  }
  0x79   :  { %16 = vst.msk [vmem:[#allocation0] sm:$0x1] %vm15_vm2, %v14_v34   ;;  %vm111_vm2 = vcmask 367952  }
  0x7a   :  { %22 = vst.msk [vmem:[#allocation0] sm:$0x1] %vm21_vm3, %v20_v33   ;;  %vm117_vm3 = vcmask 343352  }
  0x7b   :  { %28 = vst.msk [vmem:[#allocation0] sm:$0x1] %vm27_vm4, %v26_v35   ;;  %vm123_vm4 = vcmask 318752  }
  0x7c   :  { %v32_v36 = vpop.permute.xlu0 %31   ;;  %v38_v37 = vpop.permute.xlu1 %37  }
  0x7d   :  { %34 = vst.msk [vmem:[#allocation0] sm:$0x1] %vm33_vm5, %v32_v36   ;;  %vm129_vm5 = vcmask 294152  }
  0x7e   :  { %40 = vst.msk [vmem:[#allocation0] sm:$0x1] %vm39_vm6, %v38_v37   ;;  %vm135_vm6 = vcmask 269552  }
  0x80   :  { %v44_v38 = vpop.permute.xlu0 %43   ;;  %v50_v39 = vpop.permute.xlu1 %49  }
  0x81   :  { %46 = vst.msk [vmem:[#allocation0] sm:$0x1] %vm45_vm7, %v44_v38   ;;  %vm141_vm7 = vcmask 244952  }
  0x82   :  { %52 = vst.msk [vmem:[#allocation0] sm:$0x1] %vm51_vm8, %v50_v39   ;;  %vm147_vm8 = vcmask 220352  }
  0x84   :  { %v56_v40 = vpop.permute.xlu0 %55   ;;  %v62_v41 = vpop.permute.xlu1 %61  }
  0x85   :  { %58 = vst.msk [vmem:[#allocation0] sm:$0x1] %vm57_vm9, %v56_v40   ;;  %vm153_vm9 = vcmask 195752  }
  0x86   :  { %64 = vst.msk [vmem:[#allocation0] sm:$0x1] %vm63_vm10, %v62_v41   ;;  %vm159_vm10 = vcmask 171152  }
  0x88   :  { %v68_v42 = vpop.permute.xlu0 %67   ;;  %v74_v43 = vpop.permute.xlu1 %73  }
  0x89   :  { %70 = vst.msk [vmem:[#allocation0] sm:$0x1] %vm69_vm11, %v68_v42   ;;  %vm165_vm11 = vcmask 146552  }
  0x8a   :  { %76 = vst.msk [vmem:[#allocation0] sm:$0x1] %vm75_vm12, %v74_v43   ;;  %vm171_vm12 = vcmask 121952  }
  0x8c   :  { %v80_v44 = vpop.permute.xlu0 %79   ;;  %v86_v45 = vpop.permute.xlu1 %85  }
  0x8d   :  { %82 = vst.msk [vmem:[#allocation0] sm:$0x1] %vm81_vm13, %v80_v44   ;;  %vm177_vm13 = vcmask 97352  }
  0x8e   :  { %88 = vst.msk [vmem:[#allocation0] sm:$0x1] %vm87_vm14, %v86_v45   ;;  %vm183_vm14 = vcmask 72752  }
  0x90   :  { %v92_v46 = vpop.permute.xlu0 %91   ;;  %v98_v47 = vpop.permute.xlu1 %97  }
  0x91   :  { %94 = vst.msk [vmem:[#allocation0] sm:$0x1] %vm93_vm15, %v92_v46   ;;  %vm189_vm15 = vcmask 48152  }
  0x92   :  { %100 = vst.msk [vmem:[#allocation0] sm:$0x1] %vm99_vm0, %v98_v47  }
  0x94   :  { %v104_v48 = vpop.permute.xlu0 %103   ;;  %v110_v49 = vpop.permute.xlu1 %109  }
  0x95   :  { %106 = vst.msk [vmem:[#allocation0] sm:$0x1] %vm105_vm1, %v104_v48  }
  0x96   :  { %112 = vst.msk [vmem:[#allocation0] sm:$0x1] %vm111_vm2, %v110_v49  }
  0x98   :  { %v116_v50 = vpop.permute.xlu0 %115   ;;  %v122_v51 = vpop.permute.xlu1 %121  }
  0x99   :  { %118 = vst.msk [vmem:[#allocation0] sm:$0x1] %vm117_vm3, %v116_v50  }
  0x9a   :  { %124 = vst.msk [vmem:[#allocation0] sm:$0x1] %vm123_vm4, %v122_v51  }
  0x9c   :  { %v128_v52 = vpop.permute.xlu0 %127   ;;  %v134_v53 = vpop.permute.xlu1 %133  }
  0x9d   :  { %130 = vst.msk [vmem:[#allocation0] sm:$0x1] %vm129_vm5, %v128_v52  }
  0x9e   :  { %136 = vst.msk [vmem:[#allocation0] sm:$0x1] %vm135_vm6, %v134_v53  }
  0xa0   :  { %v140_v54 = vpop.permute.xlu0 %139   ;;  %v146_v55 = vpop.permute.xlu1 %145  }
  0xa1   :  { %142 = vst.msk [vmem:[#allocation0] sm:$0x1] %vm141_vm7, %v140_v54  }
  0xa2   :  { %148 = vst.msk [vmem:[#allocation0] sm:$0x1] %vm147_vm8, %v146_v55  }
  0xa4   :  { %v152_v56 = vpop.permute.xlu0 %151   ;;  %v158_v57 = vpop.permute.xlu1 %157  }
  0xa5   :  { %154 = vst.msk [vmem:[#allocation0] sm:$0x1] %vm153_vm9, %v152_v56  }
  0xa6   :  { %160 = vst.msk [vmem:[#allocation0] sm:$0x1] %vm159_vm10, %v158_v57  }
  0xa8   :  { %v164_v58 = vpop.permute.xlu0 %163   ;;  %v170_v59 = vpop.permute.xlu1 %169  }
  0xa9   :  { %166 = vst.msk [vmem:[#allocation0] sm:$0x1] %vm165_vm11, %v164_v58  }
  0xaa   :  { %172 = vst.msk [vmem:[#allocation0] sm:$0x1] %vm171_vm12, %v170_v59  }
  0xac   :  { %v176_v60 = vpop.permute.xlu0 %175   ;;  %v182_v61 = vpop.permute.xlu1 %181  }
  0xad   :  { %178 = vst.msk [vmem:[#allocation0] sm:$0x1] %vm177_vm13, %v176_v60  }
  0xae   :  { %184 = vst.msk [vmem:[#allocation0] sm:$0x1] %vm183_vm14, %v182_v61  }
  0xb0   :  { %v188_v62 = vpop.permute.xlu0 %187  }
  0xb1   :  { %190 = vst.msk [vmem:[#allocation0] sm:$0x1] %vm189_vm15, %v188_v62  }
  0xb8   :  { %v195_v63 = vld [vmem:[#allocation0] sm:$0x1] }
  0xb9   :  { %198 = vst [vmem:[%s402_s1] sm:$0x1] %v195_v63 }

// kernel: tile.68
= control target key start
LH: loop header
LB: loop body
LE: loop exit
PB: predicated region body
PF: predicated region fallthrough
CT: control target
= control target key end

     0   :  { %s28_s0 = inlined_call_operand.vmem [shape: f32[3], index: 0, kind: input, shape index: {}]   ;;  %s29_s1 = inlined_call_operand.vmem [shape: f32[16,3], index: 1, kind: output, shape index: {}]  }
   0x1   :  { %v4_v0 = vld [vmem:[%s28_s0] ss:$0 sm:$0xff] }
   0x2   :  { %5 = vst [vmem:[%s29_s1] sm:$0xff] %v4_v0  ;;  %8 = vst [vmem:[%s29_s1 + $0x8] sm:$0xff] %v4_v0 }

// kernel: tile.69
= control target key start
LH: loop header
LB: loop body
LE: loop exit
PB: predicated region body
PF: predicated region fallthrough
CT: control target
= control target key end

     0   :  { %s133_s10 = smov 45   ;;  %s134_s11 = smov 39   ;;  %vm3_vm0 = vcmask 23552   ;;  %vm9_vm1 = vcmask 392552   ;;  %vm15_vm2 = vcmask 367952   ;;  %vm21_vm3 = vcmask 343352   ;;  %s209_s0 = inlined_call_operand.vmem [shape: f32[16,3], index: 0, kind: input, shape index: {}]   ;;  %s210_s1 = inlined_call_operand.vmem [shape: f32[48], index: 1, kind: output, shape index: {}]  }
   0x1   :  { %v103_v0 = vld [vmem:[%s209_s0 + $0xf] sm:$0x1]   ;;  %v105_v1 = vld [vmem:[%s209_s0 + $0xd] sm:$0x1]   ;;  %v104_v2 = vld [vmem:[%s209_s0 + $0xe] sm:$0x1]  }
   0x2   :  { %7 = vrot.lane.b32.xlu0 %v103_v0, %s133_s10  ;;  %19 = vrot.lane.b32.xlu1 %v105_v1, %s134_s11  ;;  %v106_v3 = vld [vmem:[%s209_s0 + $0xc] sm:$0x1]   ;;  %s135_s16 = smov 42   ;;  %s136_s17 = smov 36   ;;  %v107_v4 = vld [vmem:[%s209_s0 + $0xb] sm:$0x1]  }
   0x3   :  { %v108_v5 = vld [vmem:[%s209_s0 + $0xa] sm:$0x1]   ;;  %v2_v6 = vld [vmem:[%s209_s0] sm:$0x1]   ;;  %s137_s24 = smov 33   ;;  %s138_s25 = smov 30  }
   0x4   :  { %4 = vst.msk [vmem:[#allocation0] sm:$0x1] %vm3_vm0, %v2_v6   ;;  %v109_v7 = vld [vmem:[%s209_s0 + $0x9] sm:$0x1]   ;;  %v110_v8 = vld [vmem:[%s209_s0 + $0x8] sm:$0x1]  }
   0x5   :  { %s139_s30 = smov 27   ;;  %s140_s2 = smov 24   ;;  %v111_v9 = vld [vmem:[%s209_s0 + $0x7] sm:$0x1]   ;;  %v112_v10 = vld [vmem:[%s209_s0 + $0x6] sm:$0x1]  }
   0x6   :  { %13 = vrot.lane.b32.xlu0 %v104_v2, %s135_s16  ;;  %25 = vrot.lane.b32.xlu1 %v106_v3, %s136_s17  ;;  %s141_s7 = smov 21   ;;  %s142_s8 = smov 18   ;;  %v113_v11 = vld [vmem:[%s209_s0 + $0x5] sm:$0x1]   ;;  %v114_v12 = vld [vmem:[%s209_s0 + $0x4] sm:$0x1]  }
   0x7   :  { %s143_s13 = smov 15   ;;  %s144_s14 = smov 12   ;;  %v115_v13 = vld [vmem:[%s209_s0 + $0x3] sm:$0x1]   ;;  %v116_v14 = vld [vmem:[%s209_s0 + $0x2] sm:$0x1]  }
   0x8   :  { %s145_s19 = smov 9   ;;  %s146_s20 = smov 6   ;;  %v117_v15 = vld [vmem:[%s209_s0 + $0x1] sm:$0x1]   ;;  %vm27_vm4 = vcmask 318752   ;;  %vm33_vm5 = vcmask 294152  }
   0x9   :  { %s147_s0 = smov 3   ;;  %vm39_vm6 = vcmask 269552   ;;  %vm45_vm7 = vcmask 244952   ;;  %vm51_vm8 = vcmask 220352   ;;  %vm57_vm9 = vcmask 195752  }
   0xa   :  { %31 = vrot.lane.b32.xlu0 %v107_v4, %s137_s24  ;;  %37 = vrot.lane.b32.xlu1 %v108_v5, %s138_s25  ;;  %vm63_vm10 = vcmask 171152   ;;  %vm69_vm11 = vcmask 146552   ;;  %vm75_vm12 = vcmask 121952   ;;  %vm81_vm13 = vcmask 97352  }
   0xb   :  { %vm87_vm14 = vcmask 72752   ;;  %vm93_vm15 = vcmask 48152  }
   0xe   :  { %43 = vrot.lane.b32.xlu0 %v109_v7, %s139_s30  ;;  %49 = vrot.lane.b32.xlu1 %v110_v8, %s140_s2 }
  0x12   :  { %55 = vrot.lane.b32.xlu0 %v111_v9, %s141_s7  ;;  %61 = vrot.lane.b32.xlu1 %v112_v10, %s142_s8 }
  0x16   :  { %67 = vrot.lane.b32.xlu0 %v113_v11, %s143_s13  ;;  %73 = vrot.lane.b32.xlu1 %v114_v12, %s144_s14 }
  0x1a   :  { %79 = vrot.lane.b32.xlu0 %v115_v13, %s145_s19  ;;  %85 = vrot.lane.b32.xlu1 %v116_v14, %s146_s20 }
  0x1e   :  { %91 = vrot.lane.b32.xlu0 %v117_v15, %s147_s0 }
  0x74   :  { %v8_v16 = vpop.permute.xlu0 %7   ;;  %v20_v17 = vpop.permute.xlu1 %19  }
  0x75   :  { %10 = vst.msk [vmem:[#allocation0] sm:$0x1] %vm9_vm1, %v8_v16  }
  0x78   :  { %v14_v18 = vpop.permute.xlu0 %13   ;;  %v26_v19 = vpop.permute.xlu1 %25  }
  0x79   :  { %16 = vst.msk [vmem:[#allocation0] sm:$0x1] %vm15_vm2, %v14_v18  }
  0x7a   :  { %22 = vst.msk [vmem:[#allocation0] sm:$0x1] %vm21_vm3, %v20_v17  }
  0x7b   :  { %28 = vst.msk [vmem:[#allocation0] sm:$0x1] %vm27_vm4, %v26_v19  }
  0x7c   :  { %v32_v20 = vpop.permute.xlu0 %31   ;;  %v38_v21 = vpop.permute.xlu1 %37  }
  0x7d   :  { %34 = vst.msk [vmem:[#allocation0] sm:$0x1] %vm33_vm5, %v32_v20  }
  0x7e   :  { %40 = vst.msk [vmem:[#allocation0] sm:$0x1] %vm39_vm6, %v38_v21  }
  0x80   :  { %v44_v22 = vpop.permute.xlu0 %43   ;;  %v50_v23 = vpop.permute.xlu1 %49  }
  0x81   :  { %46 = vst.msk [vmem:[#allocation0] sm:$0x1] %vm45_vm7, %v44_v22  }
  0x82   :  { %52 = vst.msk [vmem:[#allocation0] sm:$0x1] %vm51_vm8, %v50_v23  }
  0x84   :  { %v56_v24 = vpop.permute.xlu0 %55   ;;  %v62_v25 = vpop.permute.xlu1 %61  }
  0x85   :  { %58 = vst.msk [vmem:[#allocation0] sm:$0x1] %vm57_vm9, %v56_v24  }
  0x86   :  { %64 = vst.msk [vmem:[#allocation0] sm:$0x1] %vm63_vm10, %v62_v25  }
  0x88   :  { %v68_v26 = vpop.permute.xlu0 %67   ;;  %v74_v27 = vpop.permute.xlu1 %73  }
  0x89   :  { %70 = vst.msk [vmem:[#allocation0] sm:$0x1] %vm69_vm11, %v68_v26  }
  0x8a   :  { %76 = vst.msk [vmem:[#allocation0] sm:$0x1] %vm75_vm12, %v74_v27  }
  0x8c   :  { %v80_v28 = vpop.permute.xlu0 %79   ;;  %v86_v29 = vpop.permute.xlu1 %85  }
  0x8d   :  { %82 = vst.msk [vmem:[#allocation0] sm:$0x1] %vm81_vm13, %v80_v28  }
  0x8e   :  { %88 = vst.msk [vmem:[#allocation0] sm:$0x1] %vm87_vm14, %v86_v29  }
  0x90   :  { %v92_v30 = vpop.permute.xlu0 %91  }
  0x91   :  { %94 = vst.msk [vmem:[#allocation0] sm:$0x1] %vm93_vm15, %v92_v30  }
  0x98   :  { %v99_v31 = vld [vmem:[#allocation0] sm:$0x1] }
  0x99   :  { %102 = vst [vmem:[%s210_s1] sm:$0x1] %v99_v31 }

// kernel: tile.58
= control target key start
LH: loop header
LB: loop body
LE: loop exit
PB: predicated region body
PF: predicated region fallthrough
CT: control target
= control target key end

     0   :  { %s22_s0 = inlined_call_operand.vmem [shape: f32[3], index: 0, kind: input, shape index: {}]   ;;  %s23_s1 = inlined_call_operand.vmem [shape: f32[8,3], index: 1, kind: output, shape index: {}]  }
   0x1   :  { %v4_v0 = vld [vmem:[%s22_s0] ss:$0 sm:$0xff] }
   0x2   :  { %5 = vst [vmem:[%s23_s1] sm:$0xff] %v4_v0 }

// kernel: tile.59
= control target key start
LH: loop header
LB: loop body
LE: loop exit
PB: predicated region body
PF: predicated region fallthrough
CT: control target
= control target key end

     0   :  { %s69_s10 = smov 21   ;;  %s70_s11 = smov 15   ;;  %vm3_vm0 = vcmask 23552   ;;  %vm9_vm1 = vcmask 195752   ;;  %vm15_vm2 = vcmask 171152   ;;  %vm21_vm3 = vcmask 146552   ;;  %s113_s0 = inlined_call_operand.vmem [shape: f32[8,3], index: 0, kind: input, shape index: {}]   ;;  %s114_s1 = inlined_call_operand.vmem [shape: f32[24], index: 1, kind: output, shape index: {}]  }
   0x1   :  { %v55_v0 = vld [vmem:[%s113_s0 + $0x7] sm:$0x1]   ;;  %v57_v1 = vld [vmem:[%s113_s0 + $0x5] sm:$0x1]   ;;  %v56_v2 = vld [vmem:[%s113_s0 + $0x6] sm:$0x1]  }
   0x2   :  { %7 = vrot.lane.b32.xlu0 %v55_v0, %s69_s10  ;;  %19 = vrot.lane.b32.xlu1 %v57_v1, %s70_s11  ;;  %v58_v3 = vld [vmem:[%s113_s0 + $0x4] sm:$0x1]   ;;  %v2_v4 = vld [vmem:[%s113_s0] sm:$0x1]   ;;  %s71_s18 = smov 18   ;;  %s72_s19 = smov 12  }
   0x3   :  { %4 = vst.msk [vmem:[#allocation0] sm:$0x1] %vm3_vm0, %v2_v4   ;;  %v59_v5 = vld [vmem:[%s113_s0 + $0x3] sm:$0x1]   ;;  %v60_v6 = vld [vmem:[%s113_s0 + $0x2] sm:$0x1]  }
   0x4   :  { %s73_s24 = smov 9   ;;  %s74_s25 = smov 6   ;;  %v61_v7 = vld [vmem:[%s113_s0 + $0x1] sm:$0x1]   ;;  %vm27_vm4 = vcmask 121952   ;;  %vm33_vm5 = vcmask 97352  }
   0x5   :  { %s75_s0 = smov 3   ;;  %vm39_vm6 = vcmask 72752   ;;  %vm45_vm7 = vcmask 48152  }
   0x6   :  { %13 = vrot.lane.b32.xlu0 %v56_v2, %s71_s18  ;;  %25 = vrot.lane.b32.xlu1 %v58_v3, %s72_s19 }
   0xa   :  { %31 = vrot.lane.b32.xlu0 %v59_v5, %s73_s24  ;;  %37 = vrot.lane.b32.xlu1 %v60_v6, %s74_s25 }
   0xe   :  { %43 = vrot.lane.b32.xlu0 %v61_v7, %s75_s0 }
  0x74   :  { %v8_v8 = vpop.permute.xlu0 %7   ;;  %v20_v9 = vpop.permute.xlu1 %19  }
  0x75   :  { %10 = vst.msk [vmem:[#allocation0] sm:$0x1] %vm9_vm1, %v8_v8  }
  0x78   :  { %v14_v10 = vpop.permute.xlu0 %13   ;;  %v26_v11 = vpop.permute.xlu1 %25  }
  0x79   :  { %16 = vst.msk [vmem:[#allocation0] sm:$0x1] %vm15_vm2, %v14_v10  }
  0x7a   :  { %22 = vst.msk [vmem:[#allocation0] sm:$0x1] %vm21_vm3, %v20_v9  }
  0x7b   :  { %28 = vst.msk [vmem:[#allocation0] sm:$0x1] %vm27_vm4, %v26_v11  }
  0x7c   :  { %v32_v12 = vpop.permute.xlu0 %31   ;;  %v38_v13 = vpop.permute.xlu1 %37  }
  0x7d   :  { %34 = vst.msk [vmem:[#allocation0] sm:$0x1] %vm33_vm5, %v32_v12  }
  0x7e   :  { %40 = vst.msk [vmem:[#allocation0] sm:$0x1] %vm39_vm6, %v38_v13  }
  0x80   :  { %v44_v14 = vpop.permute.xlu0 %43  }
  0x81   :  { %46 = vst.msk [vmem:[#allocation0] sm:$0x1] %vm45_vm7, %v44_v14  }
  0x88   :  { %v51_v15 = vld [vmem:[#allocation0] sm:$0x1] }
  0x89   :  { %54 = vst [vmem:[%s114_s1] sm:$0x1] %v51_v15 }

// kernel: tile.83
= control target key start
LH: loop header
LB: loop body
LE: loop exit
PB: predicated region body
PF: predicated region fallthrough
CT: control target
= control target key end

     0   :  { %s46_s0 = inlined_call_operand.vmem [shape: f32[8], index: 0, kind: input, shape index: {}]   ;;  %s47_s1 = inlined_call_operand.vmem [shape: f32[40,8], index: 1, kind: output, shape index: {}]  }
   0x1   :  { %v4_v0 = vld [vmem:[%s46_s0] ss:$0 sm:$0xff] }
   0x2   :  { %5 = vst [vmem:[%s47_s1] sm:$0xff] %v4_v0  ;;  %14 = vst [vmem:[%s47_s1 + $0x8] sm:$0xff] %v4_v0 }
   0x3   :  { %15 = vst [vmem:[%s47_s1 + $0x10] sm:$0xff] %v4_v0  ;;  %16 = vst [vmem:[%s47_s1 + $0x18] sm:$0xff] %v4_v0 }
   0x4   :  { %17 = vst [vmem:[%s47_s1 + $0x20] sm:$0xff] %v4_v0 }

// kernel: tile.84
= control target key start
LH: loop header
LB: loop body
LE: loop exit
PB: predicated region body
PF: predicated region fallthrough
CT: control target
= control target key end

     0   :  { %s11_s6 = smov 3  ;;  %s25_s9 = smov 3  ;;  %vm6_vm0 = vcmask 1042434   ;;  %vm8_vm1 = vcmask 64512   ;;  %vm15_vm2 = vcmask 1048512   ;;  %vm22_vm3 = vcmask 982912   ;;  %s297_s0 = inlined_call_operand.vmem [shape: f32[40,8], index: 0, kind: input, shape index: {}]   ;;  %s298_s1 = inlined_call_operand.vmem [shape: f32[320], index: 1, kind: output, shape index: {}]  }
   0x1   :  { %v152_v0 = vld [vmem:[%s297_s0 + $0xf] ss:$16 sm:%s11_s6]   ;;  %s189_s10 = smov 120   ;;  %v154_v1 = vld [vmem:[%s297_s0 + $0xd] ss:$16 sm:%s25_s9]   ;;  %s18_s13 = smov 3 }
   0x2   :  { %13 = vrot.lane.b32.xlu0 %v152_v0, %s189_s10  ;;  %s190_s14 = smov 104   ;;  %v153_v2 = vld [vmem:[%s297_s0 + $0xe] ss:$16 sm:%s18_s13]   ;;  %s32_s17 = smov 3  ;;  %v161_v7 = vld [vmem:[%s297_s0 + $0x25] sm:$0x4]  }
   0x3   :  { %27 = vrot.lane.b32.xlu1 %v154_v1, %s190_s14  ;;  %v155_v3 = vld [vmem:[%s297_s0 + $0xc] ss:$16 sm:%s32_s17]   ;;  %s39_s20 = smov 3  ;;  %s46_s21 = smov 3  ;;  %v163_v11 = vld [vmem:[%s297_s0 + $0x24] sm:$0x4]  }
   0x4   :  { %s191_s22 = smov 112   ;;  %s192_s23 = smov 96   ;;  %v156_v4 = vld [vmem:[%s297_s0 + $0xb] ss:$16 sm:%s39_s20]   ;;  %v157_v5 = vld [vmem:[%s297_s0 + $0xa] ss:$16 sm:%s46_s21]  }
   0x5   :  { %s53_s28 = smov 3  ;;  %s60_s29 = smov 3  ;;  %v151_v12 = vld [vmem:[%s297_s0 + $0x1e] sm:$0x4]   ;;  %v165_v14 = vld [vmem:[%s297_s0 + $0x23] sm:$0x4]  }
   0x6   :  { %20 = vrot.lane.b32.xlu0 %v153_v2, %s191_s22  ;;  %s67_s30 = smov 3  ;;  %s193_s2 = smov 88   ;;  %v158_v6 = vld [vmem:[%s297_s0 + $0x9] ss:$16 sm:%s53_s28]   ;;  %v167_v19 = vld [vmem:[%s297_s0 + $0x22] sm:$0x4]  }
   0x7   :  { %34 = vrot.lane.b32.xlu1 %v155_v3, %s192_s23  ;;  %s78_s3 = smov 3  ;;  %s194_s4 = smov 80   ;;  %v159_v8 = vld [vmem:[%s297_s0 + $0x8] ss:$16 sm:%s60_s29]   ;;  %v169_v24 = vld [vmem:[%s297_s0 + $0x21] sm:$0x4]  }
   0x8   :  { %v160_v9 = vld [vmem:[%s297_s0 + $0x7] ss:$16 sm:%s67_s30]   ;;  %v162_v10 = vld [vmem:[%s297_s0 + $0x6] ss:$16 sm:%s78_s3]   ;;  %s89_s17 = smov 3  ;;  %s195_s18 = smov 72  }
   0x9   :  { %s100_s19 = smov 3  ;;  %s196_s22 = smov 64   ;;  %v72_v13 = vsel %vm6_vm0, %v161_v7, %v160_v9  ;;  %v83_v15 = vsel %vm6_vm0, %v163_v11, %v162_v10  ;;  %v164_v16 = vld [vmem:[%s297_s0 + $0x5] ss:$16 sm:%s89_s17]   ;;  %v171_v26 = vld [vmem:[%s297_s0 + $0x20] sm:$0x4]  }
   0xa   :  { %41 = vrot.lane.b32.xlu0 %v156_v4, %s193_s2  ;;  %s2_s25 = smov 3  ;;  %v166_v18 = vld [vmem:[%s297_s0 + $0x4] ss:$16 sm:%s100_s19]   ;;  %s111_s5 = smov 3  ;;  %v94_v21 = vsel %vm6_vm0, %v165_v14, %v164_v16  ;;  %v173_v30 = vld [vmem:[%s297_s0 + $0x1f] sm:$0x4]  }
   0xb   :  { %48 = vrot.lane.b32.xlu1 %v157_v5, %s194_s4  ;;  %v3_v17 = vld [vmem:[%s297_s0] ss:$16 sm:%s2_s25]   ;;  %s197_s6 = smov 56   ;;  %s122_s7 = smov 3  ;;  %v105_v22 = vsel %vm6_vm0, %v167_v19, %v166_v18  ;;  %vm29_vm4 = vcmask 917312   ;;  %vm36_vm5 = vcmask 851712  }
   0xc   :  { %v7_v20 = vsel %vm6_vm0, %v151_v12, %v3_v17  ;;  %s198_s8 = smov 48   ;;  %v168_v23 = vld [vmem:[%s297_s0 + $0x3] ss:$16 sm:%s111_s5]   ;;  %v170_v25 = vld [vmem:[%s297_s0 + $0x2] ss:$16 sm:%s122_s7]   ;;  %s133_s17 = smov 3 }
   0xd   :  { %9 = vst.msk [vmem:[#allocation0] sm:$0x7] %vm8_vm1, %v7_v20   ;;  %s200_s19 = smov 32   ;;  %v116_v27 = vsel %vm6_vm0, %v169_v24, %v168_v23  ;;  %v127_v28 = vsel %vm6_vm0, %v171_v26, %v170_v25  ;;  %v172_v29 = vld [vmem:[%s297_s0 + $0x1] ss:$16 sm:%s133_s17]   ;;  %s201_s0 = smov 24  }
   0xe   :  { %55 = vrot.lane.b32.xlu0 %v158_v6, %s195_s18  ;;  %s199_s18 = smov 40   ;;  %s202_s24 = smov 16   ;;  %v138_v31 = vsel %vm6_vm0, %v173_v30, %v172_v29  ;;  %vm43_vm6 = vcmask 786112   ;;  %vm50_vm7 = vcmask 720512   ;;  %vm57_vm8 = vcmask 654912  }
   0xf   :  { %62 = vrot.lane.b32.xlu1 %v159_v8, %s196_s22  ;;  %s203_s25 = smov 8   ;;  %vm64_vm9 = vcmask 589312   ;;  %vm75_vm10 = vcmask 523712   ;;  %vm86_vm11 = vcmask 458112   ;;  %vm97_vm12 = vcmask 392512  }
  0x10   :  { %vm108_vm13 = vcmask 326912   ;;  %vm119_vm14 = vcmask 261312   ;;  %vm130_vm15 = vcmask 195712   ;;  %vm141_vm0 = vcmask 130112  }
  0x12   :  { %73 = vrot.lane.b32.xlu0 %v72_v13, %s197_s6 }
  0x13   :  { %84 = vrot.lane.b32.xlu1 %v83_v15, %s198_s8 }
  0x16   :  { %95 = vrot.lane.b32.xlu0 %v94_v21, %s199_s18 }
  0x17   :  { %106 = vrot.lane.b32.xlu1 %v105_v22, %s200_s19 }
  0x1a   :  { %117 = vrot.lane.b32.xlu0 %v116_v27, %s201_s0 }
  0x1b   :  { %128 = vrot.lane.b32.xlu1 %v127_v28, %s202_s24 }
  0x1e   :  { %139 = vrot.lane.b32.xlu0 %v138_v31, %s203_s25 }
  0x74   :  { %v14_v32 = vpop.permute.xlu0 %13  }
  0x75   :  { %16 = vst.msk [vmem:[#allocation0] sm:$0x3] %vm15_vm2, %v14_v32   ;;  %v28_v33 = vpop.permute.xlu1 %27  }
  0x78   :  { %v21_v34 = vpop.permute.xlu0 %20  }
  0x79   :  { %23 = vst.msk [vmem:[#allocation0] sm:$0x3] %vm22_vm3, %v21_v34   ;;  %v35_v35 = vpop.permute.xlu1 %34  }
  0x7a   :  { %30 = vst.msk [vmem:[#allocation0] sm:$0x3] %vm29_vm4, %v28_v33  }
  0x7b   :  { %37 = vst.msk [vmem:[#allocation0] sm:$0x3] %vm36_vm5, %v35_v35  }
  0x7c   :  { %v42_v36 = vpop.permute.xlu0 %41  }
  0x7d   :  { %44 = vst.msk [vmem:[#allocation0] sm:$0x3] %vm43_vm6, %v42_v36   ;;  %v49_v37 = vpop.permute.xlu1 %48  }
  0x7e   :  { %51 = vst.msk [vmem:[#allocation0] sm:$0x3] %vm50_vm7, %v49_v37  }
  0x80   :  { %v56_v38 = vpop.permute.xlu0 %55  }
  0x81   :  { %58 = vst.msk [vmem:[#allocation0] sm:$0x3] %vm57_vm8, %v56_v38   ;;  %v63_v39 = vpop.permute.xlu1 %62  }
  0x82   :  { %65 = vst.msk [vmem:[#allocation0] sm:$0x3] %vm64_vm9, %v63_v39  }
  0x84   :  { %v74_v40 = vpop.permute.xlu0 %73  }
  0x85   :  { %76 = vst.msk [vmem:[#allocation0] sm:$0x7] %vm75_vm10, %v74_v40   ;;  %v85_v41 = vpop.permute.xlu1 %84  }
  0x86   :  { %87 = vst.msk [vmem:[#allocation0] sm:$0x7] %vm86_vm11, %v85_v41  }
  0x88   :  { %v96_v42 = vpop.permute.xlu0 %95  }
  0x89   :  { %98 = vst.msk [vmem:[#allocation0] sm:$0x7] %vm97_vm12, %v96_v42   ;;  %v107_v43 = vpop.permute.xlu1 %106  }
  0x8a   :  { %109 = vst.msk [vmem:[#allocation0] sm:$0x7] %vm108_vm13, %v107_v43  }
  0x8c   :  { %v118_v44 = vpop.permute.xlu0 %117  }
  0x8d   :  { %120 = vst.msk [vmem:[#allocation0] sm:$0x7] %vm119_vm14, %v118_v44   ;;  %v129_v45 = vpop.permute.xlu1 %128  }
  0x8e   :  { %131 = vst.msk [vmem:[#allocation0] sm:$0x7] %vm130_vm15, %v129_v45  }
  0x90   :  { %v140_v46 = vpop.permute.xlu0 %139  }
  0x91   :  { %142 = vst.msk [vmem:[#allocation0] sm:$0x7] %vm141_vm0, %v140_v46  }
  0x98   :  { %v147_v47 = vld [vmem:[#allocation0] sm:$0xf] }
  0x99   :  { %150 = vst [vmem:[%s298_s1] sm:$0xf] %v147_v47 }

// kernel: tile.73
= control target key start
LH: loop header
LB: loop body
LE: loop exit
PB: predicated region body
PF: predicated region fallthrough
CT: control target
= control target key end

     0   :  { %s40_s0 = inlined_call_operand.vmem [shape: f32[8], index: 0, kind: input, shape index: {}]   ;;  %s41_s1 = inlined_call_operand.vmem [shape: f32[32,8], index: 1, kind: output, shape index: {}]  }
   0x1   :  { %v4_v0 = vld [vmem:[%s40_s0] ss:$0 sm:$0xff] }
   0x2   :  { %5 = vst [vmem:[%s41_s1] sm:$0xff] %v4_v0  ;;  %12 = vst [vmem:[%s41_s1 + $0x8] sm:$0xff] %v4_v0 }
   0x3   :  { %13 = vst [vmem:[%s41_s1 + $0x10] sm:$0xff] %v4_v0  ;;  %14 = vst [vmem:[%s41_s1 + $0x18] sm:$0xff] %v4_v0 }

// kernel: tile.74
= control target key start
LH: loop header
LB: loop body
LE: loop exit
PB: predicated region body
PF: predicated region fallthrough
CT: control target
= control target key end

     0   :  { %s7_s6 = smov 3  ;;  %s21_s9 = smov 3  ;;  %vm4_vm0 = vcmask 64512   ;;  %vm11_vm1 = vcmask 1048512   ;;  %vm18_vm2 = vcmask 982912   ;;  %vm25_vm3 = vcmask 917312   ;;  %s235_s0 = inlined_call_operand.vmem [shape: f32[32,8], index: 0, kind: input, shape index: {}]   ;;  %s236_s1 = inlined_call_operand.vmem [shape: f32[1,256], index: 1, kind: output, shape index: {}]  }
   0x1   :  { %v125_v0 = vld [vmem:[%s235_s0 + $0xf] ss:$16 sm:%s7_s6]   ;;  %s156_s10 = smov 120   ;;  %v127_v1 = vld [vmem:[%s235_s0 + $0xd] ss:$16 sm:%s21_s9]   ;;  %s14_s13 = smov 3 }
   0x2   :  { %9 = vrot.lane.b32.xlu0 %v125_v0, %s156_s10  ;;  %s157_s14 = smov 104   ;;  %v126_v2 = vld [vmem:[%s235_s0 + $0xe] ss:$16 sm:%s14_s13]   ;;  %s28_s17 = smov 3  ;;  %vm32_vm4 = vcmask 851712   ;;  %vm39_vm5 = vcmask 786112  }
   0x3   :  { %23 = vrot.lane.b32.xlu1 %v127_v1, %s157_s14  ;;  %v128_v3 = vld [vmem:[%s235_s0 + $0xc] ss:$16 sm:%s28_s17]   ;;  %s35_s20 = smov 3  ;;  %s42_s21 = smov 3  ;;  %vm46_vm6 = vcmask 720512   ;;  %vm53_vm7 = vcmask 654912  }
   0x4   :  { %s158_s22 = smov 112   ;;  %s159_s23 = smov 96   ;;  %v129_v4 = vld [vmem:[%s235_s0 + $0xb] ss:$16 sm:%s35_s20]   ;;  %v130_v5 = vld [vmem:[%s235_s0 + $0xa] ss:$16 sm:%s42_s21]  }
   0x5   :  { %s49_s28 = smov 3  ;;  %s56_s29 = smov 3  ;;  %vm60_vm8 = vcmask 589312   ;;  %vm67_vm9 = vcmask 523712   ;;  %vm74_vm10 = vcmask 458112   ;;  %vm81_vm11 = vcmask 392512  }
   0x6   :  { %16 = vrot.lane.b32.xlu0 %v126_v2, %s158_s22  ;;  %s160_s30 = smov 88   ;;  %s161_s2 = smov 80   ;;  %v131_v6 = vld [vmem:[%s235_s0 + $0x9] ss:$16 sm:%s49_s28]   ;;  %vm88_vm12 = vcmask 326912   ;;  %vm95_vm13 = vcmask 261312  }
   0x7   :  { %30 = vrot.lane.b32.xlu1 %v128_v3, %s159_s23  ;;  %v132_v7 = vld [vmem:[%s235_s0 + $0x8] ss:$16 sm:%s56_s29]   ;;  %s63_s7 = smov 3  ;;  %s70_s8 = smov 3  ;;  %vm102_vm14 = vcmask 195712   ;;  %vm109_vm15 = vcmask 130112  }
   0x8   :  { %s162_s9 = smov 72   ;;  %s163_s10 = smov 64   ;;  %v133_v8 = vld [vmem:[%s235_s0 + $0x7] ss:$16 sm:%s63_s7]   ;;  %v134_v9 = vld [vmem:[%s235_s0 + $0x6] ss:$16 sm:%s70_s8]  }
   0x9   :  { %s2_s13 = smov 3  ;;  %s77_s16 = smov 3 }
   0xa   :  { %37 = vrot.lane.b32.xlu0 %v129_v4, %s160_s30  ;;  %v3_v10 = vld [vmem:[%s235_s0] ss:$16 sm:%s2_s13]   ;;  %s84_s19 = smov 3  ;;  %s164_s20 = smov 56  }
   0xb   :  { %44 = vrot.lane.b32.xlu1 %v130_v5, %s161_s2  ;;  %5 = vst.msk [vmem:[#allocation0] ss:$8 sm:$0x3] %vm4_vm0, %v3_v10   ;;  %s165_s21 = smov 48   ;;  %v135_v11 = vld [vmem:[%s235_s0 + $0x5] ss:$16 sm:%s77_s16]  }
   0xc   :  { %v136_v12 = vld [vmem:[%s235_s0 + $0x4] ss:$16 sm:%s84_s19]   ;;  %s91_s26 = smov 3  ;;  %s98_s27 = smov 3 }
   0xd   :  { %s166_s28 = smov 40   ;;  %s167_s29 = smov 32   ;;  %v137_v13 = vld [vmem:[%s235_s0 + $0x3] ss:$16 sm:%s91_s26]   ;;  %v138_v14 = vld [vmem:[%s235_s0 + $0x2] ss:$16 sm:%s98_s27]  }
   0xe   :  { %51 = vrot.lane.b32.xlu0 %v131_v6, %s162_s9  ;;  %s105_s5 = smov 3  ;;  %s168_s6 = smov 24  }
   0xf   :  { %58 = vrot.lane.b32.xlu1 %v132_v7, %s163_s10  ;;  %s169_s7 = smov 16   ;;  %v139_v15 = vld [vmem:[%s235_s0 + $0x1] ss:$16 sm:%s105_s5]   ;;  %s170_s0 = smov 8  }
  0x12   :  { %65 = vrot.lane.b32.xlu0 %v133_v8, %s164_s20 }
  0x13   :  { %72 = vrot.lane.b32.xlu1 %v134_v9, %s165_s21 }
  0x16   :  { %79 = vrot.lane.b32.xlu0 %v135_v11, %s166_s28 }
  0x17   :  { %86 = vrot.lane.b32.xlu1 %v136_v12, %s167_s29 }
  0x1a   :  { %93 = vrot.lane.b32.xlu0 %v137_v13, %s168_s6 }
  0x1b   :  { %100 = vrot.lane.b32.xlu1 %v138_v14, %s169_s7 }
  0x1e   :  { %107 = vrot.lane.b32.xlu0 %v139_v15, %s170_s0 }
  0x74   :  { %v10_v16 = vpop.permute.xlu0 %9  }
  0x75   :  { %12 = vst.msk [vmem:[#allocation0] ss:$8 sm:$0x3] %vm11_vm1, %v10_v16   ;;  %v24_v17 = vpop.permute.xlu1 %23  }
  0x78   :  { %v17_v18 = vpop.permute.xlu0 %16  }
  0x79   :  { %19 = vst.msk [vmem:[#allocation0] ss:$8 sm:$0x3] %vm18_vm2, %v17_v18   ;;  %v31_v19 = vpop.permute.xlu1 %30  }
  0x7a   :  { %26 = vst.msk [vmem:[#allocation0] ss:$8 sm:$0x3] %vm25_vm3, %v24_v17  }
  0x7b   :  { %33 = vst.msk [vmem:[#allocation0] ss:$8 sm:$0x3] %vm32_vm4, %v31_v19  }
  0x7c   :  { %v38_v20 = vpop.permute.xlu0 %37  }
  0x7d   :  { %40 = vst.msk [vmem:[#allocation0] ss:$8 sm:$0x3] %vm39_vm5, %v38_v20   ;;  %v45_v21 = vpop.permute.xlu1 %44  }
  0x7e   :  { %47 = vst.msk [vmem:[#allocation0] ss:$8 sm:$0x3] %vm46_vm6, %v45_v21  }
  0x80   :  { %v52_v22 = vpop.permute.xlu0 %51  }
  0x81   :  { %54 = vst.msk [vmem:[#allocation0] ss:$8 sm:$0x3] %vm53_vm7, %v52_v22   ;;  %v59_v23 = vpop.permute.xlu1 %58  }
  0x82   :  { %61 = vst.msk [vmem:[#allocation0] ss:$8 sm:$0x3] %vm60_vm8, %v59_v23  }
  0x84   :  { %v66_v24 = vpop.permute.xlu0 %65  }
  0x85   :  { %68 = vst.msk [vmem:[#allocation0] ss:$8 sm:$0x3] %vm67_vm9, %v66_v24   ;;  %v73_v25 = vpop.permute.xlu1 %72  }
  0x86   :  { %75 = vst.msk [vmem:[#allocation0] ss:$8 sm:$0x3] %vm74_vm10, %v73_v25  }
  0x88   :  { %v80_v26 = vpop.permute.xlu0 %79  }
  0x89   :  { %82 = vst.msk [vmem:[#allocation0] ss:$8 sm:$0x3] %vm81_vm11, %v80_v26   ;;  %v87_v27 = vpop.permute.xlu1 %86  }
  0x8a   :  { %89 = vst.msk [vmem:[#allocation0] ss:$8 sm:$0x3] %vm88_vm12, %v87_v27  }
  0x8c   :  { %v94_v28 = vpop.permute.xlu0 %93  }
  0x8d   :  { %96 = vst.msk [vmem:[#allocation0] ss:$8 sm:$0x3] %vm95_vm13, %v94_v28   ;;  %v101_v29 = vpop.permute.xlu1 %100  }
  0x8e   :  { %103 = vst.msk [vmem:[#allocation0] ss:$8 sm:$0x3] %vm102_vm14, %v101_v29  }
  0x90   :  { %v108_v30 = vpop.permute.xlu0 %107  }
  0x91   :  { %110 = vst.msk [vmem:[#allocation0] ss:$8 sm:$0x3] %vm109_vm15, %v108_v30  }
  0x98   :  { %v115_v31 = vld [vmem:[#allocation0] sm:$0x1]  ;;  %v120_v32 = vld [vmem:[#allocation0 + $0x8] sm:$0x1] }
  0x99   :  { %118 = vst [vmem:[%s236_s1] sm:$0x1] %v115_v31  ;;  %140 = vst [vmem:[%s236_s1 + $0x1] sm:$0x1] %v120_v32 }

// kernel: tile.63
= control target key start
LH: loop header
LB: loop body
LE: loop exit
PB: predicated region body
PF: predicated region fallthrough
CT: control target
= control target key end

     0   :  { %s28_s0 = inlined_call_operand.vmem [shape: f32[8], index: 0, kind: input, shape index: {}]   ;;  %s29_s1 = inlined_call_operand.vmem [shape: f32[16,8], index: 1, kind: output, shape index: {}]  }
   0x1   :  { %v4_v0 = vld [vmem:[%s28_s0] ss:$0 sm:$0xff] }
   0x2   :  { %5 = vst [vmem:[%s29_s1] sm:$0xff] %v4_v0  ;;  %8 = vst [vmem:[%s29_s1 + $0x8] sm:$0xff] %v4_v0 }

// kernel: tile.64
= control target key start
LH: loop header
LB: loop body
LE: loop exit
PB: predicated region body
PF: predicated region fallthrough
CT: control target
= control target key end

     0   :  { %s133_s10 = smov 120   ;;  %s134_s11 = smov 104   ;;  %vm3_vm0 = vcmask 64512   ;;  %vm9_vm1 = vcmask 1048512   ;;  %vm15_vm2 = vcmask 982912   ;;  %vm21_vm3 = vcmask 917312   ;;  %s209_s0 = inlined_call_operand.vmem [shape: f32[16,8], index: 0, kind: input, shape index: {}]   ;;  %s210_s1 = inlined_call_operand.vmem [shape: f32[1,128], index: 1, kind: output, shape index: {}]  }
   0x1   :  { %v103_v0 = vld [vmem:[%s209_s0 + $0xf] sm:$0x1]   ;;  %v105_v1 = vld [vmem:[%s209_s0 + $0xd] sm:$0x1]   ;;  %v104_v2 = vld [vmem:[%s209_s0 + $0xe] sm:$0x1]  }
   0x2   :  { %7 = vrot.lane.b32.xlu0 %v103_v0, %s133_s10  ;;  %19 = vrot.lane.b32.xlu1 %v105_v1, %s134_s11  ;;  %v106_v3 = vld [vmem:[%s209_s0 + $0xc] sm:$0x1]   ;;  %s135_s16 = smov 112   ;;  %s136_s17 = smov 96   ;;  %v107_v4 = vld [vmem:[%s209_s0 + $0xb] sm:$0x1]  }
   0x3   :  { %v108_v5 = vld [vmem:[%s209_s0 + $0xa] sm:$0x1]   ;;  %v2_v6 = vld [vmem:[%s209_s0] sm:$0x1]   ;;  %s137_s24 = smov 88   ;;  %s138_s25 = smov 80  }
   0x4   :  { %4 = vst.msk [vmem:[#allocation0] sm:$0x1] %vm3_vm0, %v2_v6   ;;  %v109_v7 = vld [vmem:[%s209_s0 + $0x9] sm:$0x1]   ;;  %v110_v8 = vld [vmem:[%s209_s0 + $0x8] sm:$0x1]  }
   0x5   :  { %s139_s30 = smov 72   ;;  %s140_s2 = smov 64   ;;  %v111_v9 = vld [vmem:[%s209_s0 + $0x7] sm:$0x1]   ;;  %v112_v10 = vld [vmem:[%s209_s0 + $0x6] sm:$0x1]  }
   0x6   :  { %13 = vrot.lane.b32.xlu0 %v104_v2, %s135_s16  ;;  %25 = vrot.lane.b32.xlu1 %v106_v3, %s136_s17  ;;  %s141_s7 = smov 56   ;;  %s142_s8 = smov 48   ;;  %v113_v11 = vld [vmem:[%s209_s0 + $0x5] sm:$0x1]   ;;  %v114_v12 = vld [vmem:[%s209_s0 + $0x4] sm:$0x1]  }
   0x7   :  { %s143_s13 = smov 40   ;;  %s144_s14 = smov 32   ;;  %v115_v13 = vld [vmem:[%s209_s0 + $0x3] sm:$0x1]   ;;  %v116_v14 = vld [vmem:[%s209_s0 + $0x2] sm:$0x1]  }
   0x8   :  { %s145_s19 = smov 24   ;;  %s146_s20 = smov 16   ;;  %v117_v15 = vld [vmem:[%s209_s0 + $0x1] sm:$0x1]   ;;  %vm27_vm4 = vcmask 851712   ;;  %vm33_vm5 = vcmask 786112  }
   0x9   :  { %s147_s0 = smov 8   ;;  %vm39_vm6 = vcmask 720512   ;;  %vm45_vm7 = vcmask 654912   ;;  %vm51_vm8 = vcmask 589312   ;;  %vm57_vm9 = vcmask 523712  }
   0xa   :  { %31 = vrot.lane.b32.xlu0 %v107_v4, %s137_s24  ;;  %37 = vrot.lane.b32.xlu1 %v108_v5, %s138_s25  ;;  %vm63_vm10 = vcmask 458112   ;;  %vm69_vm11 = vcmask 392512   ;;  %vm75_vm12 = vcmask 326912   ;;  %vm81_vm13 = vcmask 261312  }
   0xb   :  { %vm87_vm14 = vcmask 195712   ;;  %vm93_vm15 = vcmask 130112  }
   0xe   :  { %43 = vrot.lane.b32.xlu0 %v109_v7, %s139_s30  ;;  %49 = vrot.lane.b32.xlu1 %v110_v8, %s140_s2 }
  0x12   :  { %55 = vrot.lane.b32.xlu0 %v111_v9, %s141_s7  ;;  %61 = vrot.lane.b32.xlu1 %v112_v10, %s142_s8 }
  0x16   :  { %67 = vrot.lane.b32.xlu0 %v113_v11, %s143_s13  ;;  %73 = vrot.lane.b32.xlu1 %v114_v12, %s144_s14 }
  0x1a   :  { %79 = vrot.lane.b32.xlu0 %v115_v13, %s145_s19  ;;  %85 = vrot.lane.b32.xlu1 %v116_v14, %s146_s20 }
  0x1e   :  { %91 = vrot.lane.b32.xlu0 %v117_v15, %s147_s0 }
  0x74   :  { %v8_v16 = vpop.permute.xlu0 %7   ;;  %v20_v17 = vpop.permute.xlu1 %19  }
  0x75   :  { %10 = vst.msk [vmem:[#allocation0] sm:$0x1] %vm9_vm1, %v8_v16  }
  0x78   :  { %v14_v18 = vpop.permute.xlu0 %13   ;;  %v26_v19 = vpop.permute.xlu1 %25  }
  0x79   :  { %16 = vst.msk [vmem:[#allocation0] sm:$0x1] %vm15_vm2, %v14_v18  }
  0x7a   :  { %22 = vst.msk [vmem:[#allocation0] sm:$0x1] %vm21_vm3, %v20_v17  }
  0x7b   :  { %28 = vst.msk [vmem:[#allocation0] sm:$0x1] %vm27_vm4, %v26_v19  }
  0x7c   :  { %v32_v20 = vpop.permute.xlu0 %31   ;;  %v38_v21 = vpop.permute.xlu1 %37  }
  0x7d   :  { %34 = vst.msk [vmem:[#allocation0] sm:$0x1] %vm33_vm5, %v32_v20  }
  0x7e   :  { %40 = vst.msk [vmem:[#allocation0] sm:$0x1] %vm39_vm6, %v38_v21  }
  0x80   :  { %v44_v22 = vpop.permute.xlu0 %43   ;;  %v50_v23 = vpop.permute.xlu1 %49  }
  0x81   :  { %46 = vst.msk [vmem:[#allocation0] sm:$0x1] %vm45_vm7, %v44_v22  }
  0x82   :  { %52 = vst.msk [vmem:[#allocation0] sm:$0x1] %vm51_vm8, %v50_v23  }
  0x84   :  { %v56_v24 = vpop.permute.xlu0 %55   ;;  %v62_v25 = vpop.permute.xlu1 %61  }
  0x85   :  { %58 = vst.msk [vmem:[#allocation0] sm:$0x1] %vm57_vm9, %v56_v24  }
  0x86   :  { %64 = vst.msk [vmem:[#allocation0] sm:$0x1] %vm63_vm10, %v62_v25  }
  0x88   :  { %v68_v26 = vpop.permute.xlu0 %67   ;;  %v74_v27 = vpop.permute.xlu1 %73  }
  0x89   :  { %70 = vst.msk [vmem:[#allocation0] sm:$0x1] %vm69_vm11, %v68_v26  }
  0x8a   :  { %76 = vst.msk [vmem:[#allocation0] sm:$0x1] %vm75_vm12, %v74_v27  }
  0x8c   :  { %v80_v28 = vpop.permute.xlu0 %79   ;;  %v86_v29 = vpop.permute.xlu1 %85  }
  0x8d   :  { %82 = vst.msk [vmem:[#allocation0] sm:$0x1] %vm81_vm13, %v80_v28  }
  0x8e   :  { %88 = vst.msk [vmem:[#allocation0] sm:$0x1] %vm87_vm14, %v86_v29  }
  0x90   :  { %v92_v30 = vpop.permute.xlu0 %91  }
  0x91   :  { %94 = vst.msk [vmem:[#allocation0] sm:$0x1] %vm93_vm15, %v92_v30  }
  0x98   :  { %v99_v31 = vld [vmem:[#allocation0] sm:$0x1] }
  0x99   :  { %102 = vst [vmem:[%s210_s1] sm:$0x1] %v99_v31 }

// kernel: tile.53
= control target key start
LH: loop header
LB: loop body
LE: loop exit
PB: predicated region body
PF: predicated region fallthrough
CT: control target
= control target key end

     0   :  { %s22_s0 = inlined_call_operand.vmem [shape: f32[16], index: 0, kind: input, shape index: {}]   ;;  %s23_s1 = inlined_call_operand.vmem [shape: f32[8,16], index: 1, kind: output, shape index: {}]  }
   0x1   :  { %v4_v0 = vld [vmem:[%s22_s0] ss:$0 sm:$0xff] }
   0x2   :  { %5 = vst [vmem:[%s23_s1] sm:$0xff] %v4_v0 }

// kernel: tile.54
= control target key start
LH: loop header
LB: loop body
LE: loop exit
PB: predicated region body
PF: predicated region fallthrough
CT: control target
= control target key end

     0   :  { %s69_s10 = smov 112   ;;  %s70_s11 = smov 80   ;;  %vm3_vm0 = vcmask 130048   ;;  %vm9_vm1 = vcmask 1048448   ;;  %vm15_vm2 = vcmask 917248   ;;  %vm21_vm3 = vcmask 786048   ;;  %s113_s0 = inlined_call_operand.vmem [shape: f32[8,16], index: 0, kind: input, shape index: {}]   ;;  %s114_s1 = inlined_call_operand.vmem [shape: f32[1,128], index: 1, kind: output, shape index: {}]  }
   0x1   :  { %v55_v0 = vld [vmem:[%s113_s0 + $0x7] sm:$0x1]   ;;  %v57_v1 = vld [vmem:[%s113_s0 + $0x5] sm:$0x1]   ;;  %v56_v2 = vld [vmem:[%s113_s0 + $0x6] sm:$0x1]  }
   0x2   :  { %7 = vrot.lane.b32.xlu0 %v55_v0, %s69_s10  ;;  %19 = vrot.lane.b32.xlu1 %v57_v1, %s70_s11  ;;  %v58_v3 = vld [vmem:[%s113_s0 + $0x4] sm:$0x1]   ;;  %v2_v4 = vld [vmem:[%s113_s0] sm:$0x1]   ;;  %s71_s18 = smov 96   ;;  %s72_s19 = smov 64  }
   0x3   :  { %4 = vst.msk [vmem:[#allocation0] sm:$0x1] %vm3_vm0, %v2_v4   ;;  %v59_v5 = vld [vmem:[%s113_s0 + $0x3] sm:$0x1]   ;;  %v60_v6 = vld [vmem:[%s113_s0 + $0x2] sm:$0x1]  }
   0x4   :  { %s73_s24 = smov 48   ;;  %s74_s25 = smov 32   ;;  %v61_v7 = vld [vmem:[%s113_s0 + $0x1] sm:$0x1]   ;;  %vm27_vm4 = vcmask 654848   ;;  %vm33_vm5 = vcmask 523648  }
   0x5   :  { %s75_s0 = smov 16   ;;  %vm39_vm6 = vcmask 392448   ;;  %vm45_vm7 = vcmask 261248  }
   0x6   :  { %13 = vrot.lane.b32.xlu0 %v56_v2, %s71_s18  ;;  %25 = vrot.lane.b32.xlu1 %v58_v3, %s72_s19 }
   0xa   :  { %31 = vrot.lane.b32.xlu0 %v59_v5, %s73_s24  ;;  %37 = vrot.lane.b32.xlu1 %v60_v6, %s74_s25 }
   0xe   :  { %43 = vrot.lane.b32.xlu0 %v61_v7, %s75_s0 }
  0x74   :  { %v8_v8 = vpop.permute.xlu0 %7   ;;  %v20_v9 = vpop.permute.xlu1 %19  }
  0x75   :  { %10 = vst.msk [vmem:[#allocation0] sm:$0x1] %vm9_vm1, %v8_v8  }
  0x78   :  { %v14_v10 = vpop.permute.xlu0 %13   ;;  %v26_v11 = vpop.permute.xlu1 %25  }
  0x79   :  { %16 = vst.msk [vmem:[#allocation0] sm:$0x1] %vm15_vm2, %v14_v10  }
  0x7a   :  { %22 = vst.msk [vmem:[#allocation0] sm:$0x1] %vm21_vm3, %v20_v9  }
  0x7b   :  { %28 = vst.msk [vmem:[#allocation0] sm:$0x1] %vm27_vm4, %v26_v11  }
  0x7c   :  { %v32_v12 = vpop.permute.xlu0 %31   ;;  %v38_v13 = vpop.permute.xlu1 %37  }
  0x7d   :  { %34 = vst.msk [vmem:[#allocation0] sm:$0x1] %vm33_vm5, %v32_v12  }
  0x7e   :  { %40 = vst.msk [vmem:[#allocation0] sm:$0x1] %vm39_vm6, %v38_v13  }
  0x80   :  { %v44_v14 = vpop.permute.xlu0 %43  }
  0x81   :  { %46 = vst.msk [vmem:[#allocation0] sm:$0x1] %vm45_vm7, %v44_v14  }
  0x88   :  { %v51_v15 = vld [vmem:[#allocation0] sm:$0x1] }
  0x89   :  { %54 = vst [vmem:[%s114_s1] sm:$0x1] %v51_v15 }

// kernel: tile.48
= control target key start
LH: loop header
LB: loop body
LE: loop exit
PB: predicated region body
PF: predicated region fallthrough
CT: control target
= control target key end

     0   :  { %s22_s0 = inlined_call_operand.vmem [shape: f32[3], index: 0, kind: input, shape index: {}]   ;;  %s23_s1 = inlined_call_operand.vmem [shape: f32[4,3], index: 1, kind: output, shape index: {}]  }
   0x1   :  { %v4_v0 = vld [vmem:[%s22_s0] ss:$0 sm:$0xff] }
   0x2   :  { %5 = vst [vmem:[%s23_s1] sm:$0xf] %v4_v0 }

// kernel: tile.49
= control target key start
LH: loop header
LB: loop body
LE: loop exit
PB: predicated region body
PF: predicated region fallthrough
CT: control target
= control target key end

     0   :  { %vm8_vm0 = vcmask 23552   ;;  %s40_s8 = smov 3   ;;  %s41_s9 = smov 6   ;;  %vm14_vm1 = vcmask 97352   ;;  %vm20_vm2 = vcmask 72752   ;;  %vm26_vm3 = vcmask 48152   ;;  %s58_s0 = inlined_call_operand.vmem [shape: f32[4,3], index: 0, kind: input, shape index: {}]   ;;  %s59_s1 = inlined_call_operand.vmem [shape: f32[12], index: 1, kind: output, shape index: {}]  }
   0x1   :  { %v5_v0 = vld [vmem:[%s58_s0] sm:$0xf]  ;;  %s39_s0 = smov 9  }
   0x2   :  { %6 = vst [vmem:[#allocation1] sm:$0xf] %v5_v0 }
   0x9   :  { %v11_v1 = vld [vmem:[#allocation1 + $0x3] sm:$0x1]   ;;  %v23_v2 = vld [vmem:[#allocation1 + $0x1] sm:$0x1]   ;;  %v7_v3 = vld [vmem:[#allocation1] sm:$0x1]  }
   0xa   :  { %12 = vrot.lane.b32.xlu0 %v11_v1, %s39_s0  ;;  %24 = vrot.lane.b32.xlu1 %v23_v2, %s40_s8  ;;  %v17_v4 = vld [vmem:[#allocation1 + $0x2] sm:$0x1]   ;;  %9 = vst.msk [vmem:[#allocation0] sm:$0x1] %vm8_vm0, %v7_v3  }
   0xe   :  { %18 = vrot.lane.b32.xlu0 %v17_v4, %s41_s9 }
  0x7c   :  { %v13_v5 = vpop.permute.xlu0 %12   ;;  %v25_v6 = vpop.permute.xlu1 %24  }
  0x7d   :  { %15 = vst.msk [vmem:[#allocation0] sm:$0x1] %vm14_vm1, %v13_v5  }
  0x80   :  { %v19_v7 = vpop.permute.xlu0 %18  }
  0x81   :  { %21 = vst.msk [vmem:[#allocation0] sm:$0x1] %vm20_vm2, %v19_v7  }
  0x82   :  { %27 = vst.msk [vmem:[#allocation0] sm:$0x1] %vm26_vm3, %v25_v6  }
  0x89   :  { %v32_v8 = vld [vmem:[#allocation0] sm:$0x1] }
  0x8a   :  { %35 = vst [vmem:[%s59_s1] sm:$0x1] %v32_v8 }

// kernel: decoder_forward.1
= control target key start
LH: loop header
LB: loop body
LE: loop exit
PB: predicated region body
PF: predicated region fallthrough
CT: control target
= control target key end

     0   :  { %s11078_s6 = smov 1   ;;  %s11079_s10 = smov 2   ;;  %s12955_s0 = inlined_call_operand.smem [shape: u32[42], index: -1, kind: input, shape index: {}] }
   0x1   :  { %s11130_s5 = sld [smem:[%s12955_s0]]   ;;  %s11080_s14 = smov 3  }
   0x2   :  { %s11135_s9 = sld [smem:[%s12955_s0 + %s11078_s6]]   ;;  %s11081_s18 = smov 4  }
   0x3   :  { %s11140_s13 = sld [smem:[%s12955_s0 + %s11079_s10]]   ;;  %s11082_s22 = smov 5  }
   0x4   :  { %s11145_s17 = sld [smem:[%s12955_s0 + %s11080_s14]]   ;;  %s11083_s26 = smov 6  }
   0x5   :  { %s11150_s21 = sld [smem:[%s12955_s0 + %s11081_s18]]   ;;  %s11084_s30 = smov 7  }
   0x6   :  { %s11155_s25 = sld [smem:[%s12955_s0 + %s11082_s22]]   ;;  %s11085_s4 = smov 8  }
   0x7   :  { %s11160_s29 = sld [smem:[%s12955_s0 + %s11083_s26]]   ;;  %s11086_s10 = smov 9  }
   0x8   :  { %s11165_s3 = sld [smem:[%s12955_s0 + %s11084_s30]]   ;;  %s11087_s15 = smov 10  }
   0x9   :  { %s11170_s8 = sld [smem:[%s12955_s0 + %s11085_s4]]   ;;  %s11088_s20 = smov 11  }
   0xa   :  { %s11175_s14 = sld [smem:[%s12955_s0 + %s11086_s10]]   ;;  %s11089_s26 = smov 12  }
   0xb   :  { %s11180_s19 = sld [smem:[%s12955_s0 + %s11087_s15]]   ;;  %s11090_s1 = smov 13  }
   0xc   :  { %s11185_s24 = sld [smem:[%s12955_s0 + %s11088_s20]]   ;;  %s11091_s7 = smov 14  }
   0xd   :  { %s11190_s30 = sld [smem:[%s12955_s0 + %s11089_s26]]   ;;  %s11092_s15 = smov 15  }
   0xe   :  { %s11195_s6 = sld [smem:[%s12955_s0 + %s11090_s1]]   ;;  %s11093_s22 = smov 16  }
   0xf   :  { %s11200_s12 = sld [smem:[%s12955_s0 + %s11091_s7]]   ;;  %s11094_s28 = smov 17  }
  0x10   :  { %s11205_s20 = sld [smem:[%s12955_s0 + %s11092_s15]]   ;;  %s11095_s7 = smov 18  }
  0x11   :  { %s11210_s27 = sld [smem:[%s12955_s0 + %s11093_s22]]   ;;  %s11096_s15 = smov 19  }
  0x12   :  { %s11215_s4 = sld [smem:[%s12955_s0 + %s11094_s28]]   ;;  %s11097_s22 = smov 20  }
  0x13   :  { %s11098_s28 = smov 21  }
  0x14   :  { %12992 = sst [smem:[#allocation2_spill]] %s11195_s6 }
  0x15   :  { %12993 = sst [smem:[#allocation3_spill]] %s11200_s12 }
  0x16   :  { %s11220_s12 = sld [smem:[%s12955_s0 + %s11095_s7]]   ;;  %s11099_s7 = smov 22  }
  0x17   :  { %12994 = sst [smem:[#allocation4_spill]] %s11210_s27 }
  0x18   :  { %12995 = sst [smem:[#allocation5_spill]] %s11215_s4 }
  0x19   :  { %s11225_s6 = sld [smem:[%s12955_s0 + %s11096_s15]]   ;;  %s11100_s15 = smov 23  }
  0x1a   :  { %s11230_s27 = sld [smem:[%s12955_s0 + %s11097_s22]]   ;;  %s11101_s22 = smov 24  }
  0x1b   :  { %s11235_s4 = sld [smem:[%s12955_s0 + %s11098_s28]]   ;;  %s11102_s28 = smov 25  }
  0x1c   :  { %12996 = sst [smem:[#allocation6_spill]] %s11220_s12 }
  0x1d   :  { %s11240_s12 = sld [smem:[%s12955_s0 + %s11099_s7]]   ;;  %s11103_s7 = smov 26  }
  0x1f   :  { %12997 = sst [smem:[#allocation7_spill]] %s11225_s6 }
  0x20   :  { %12998 = sst [smem:[#allocation8_spill]] %s11230_s27 }
  0x21   :  { %12999 = sst [smem:[#allocation9_spill]] %s11235_s4 }
  0x22   :  { %s11245_s6 = sld [smem:[%s12955_s0 + %s11100_s15]]   ;;  %s11104_s15 = smov 27  }
  0x23   :  { %13000 = sst [smem:[#allocation10_spill]] %s11240_s12 }
  0x24   :  { %s11250_s27 = sld [smem:[%s12955_s0 + %s11101_s22]]   ;;  %s11105_s22 = smov 28  }
  0x25   :  { %s11255_s4 = sld [smem:[%s12955_s0 + %s11102_s28]]   ;;  %s11106_s28 = smov 29  }
  0x26   :  { %s11260_s12 = sld [smem:[%s12955_s0 + %s11103_s7]]   ;;  %s11107_s7 = smov 30  }
  0x28   :  { %13001 = sst [smem:[#allocation11_spill]] %s11245_s6 }
  0x29   :  { %s11265_s6 = sld [smem:[%s12955_s0 + %s11104_s15]]   ;;  %s11108_s15 = smov 31  }
  0x2a   :  { %13002 = sst [smem:[#allocation12_spill]] %s11250_s27 }
  0x2b   :  { %13003 = sst [smem:[#allocation13_spill]] %s11255_s4 }
  0x2c   :  { %13004 = sst [smem:[#allocation14_spill]] %s11260_s12 }
  0x2d   :  { %s11270_s27 = sld [smem:[%s12955_s0 + %s11105_s22]]   ;;  %s11109_s22 = smov 32  }
  0x2e   :  { %s11275_s4 = sld [smem:[%s12955_s0 + %s11106_s28]]   ;;  %s11110_s28 = smov 33  }
  0x2f   :  { %13005 = sst [smem:[#allocation15_spill]] %s11265_s6 }
  0x30   :  { %s11280_s12 = sld [smem:[%s12955_s0 + %s11107_s7]]   ;;  %s11111_s7 = smov 34  }
  0x31   :  { %s11285_s6 = sld [smem:[%s12955_s0 + %s11108_s15]]   ;;  %s11112_s15 = smov 35  }
  0x33   :  { %13006 = sst [smem:[#allocation16_spill]] %s11270_s27 }
  0x34   :  { %13007 = sst [smem:[#allocation17_spill]] %s11275_s4 }
  0x35   :  { %s11290_s27 = sld [smem:[%s12955_s0 + %s11109_s22]]   ;;  %s11113_s22 = smov 36  }
  0x36   :  { %13008 = sst [smem:[#allocation18_spill]] %s11280_s12 }
  0x37   :  { %13009 = sst [smem:[#allocation19_spill]] %s11285_s6 }
  0x38   :  { %s11295_s4 = sld [smem:[%s12955_s0 + %s11110_s28]]   ;;  %s11114_s28 = smov 37  }
  0x39   :  { %s11300_s12 = sld [smem:[%s12955_s0 + %s11111_s7]]   ;;  %s11115_s7 = smov 38  }
  0x3a   :  { %s11305_s6 = sld [smem:[%s12955_s0 + %s11112_s15]]   ;;  %s11116_s15 = smov 39  }
  0x3b   :  { %13010 = sst [smem:[#allocation20_spill]] %s11290_s27 }
  0x3c   :  { %s11310_s27 = sld [smem:[%s12955_s0 + %s11113_s22]]   ;;  %s11117_s22 = smov 40  }
  0x3e   :  { %13011 = sst [smem:[#allocation21_spill]] %s11295_s4 }
  0x3f   :  { %13012 = sst [smem:[#allocation22_spill]] %s11300_s12 }
  0x40   :  { %13013 = sst [smem:[#allocation23_spill]] %s11305_s6 }
  0x41   :  { %s11315_s4 = sld [smem:[%s12955_s0 + %s11114_s28]]   ;;  %s11118_s28 = smov 41  }
  0x42   :  { %13014 = sst [smem:[#allocation24_spill]] %s11310_s27 }
  0x43   :  { %s11320_s12 = sld [smem:[%s12955_s0 + %s11115_s7]]   ;;  %s11337_s7 = smov 0  }
  0x44   :  { %s11325_s6 = sld [smem:[%s12955_s0 + %s11116_s15]]  }
  0x45   :  { %s11330_s27 = sld [smem:[%s12955_s0 + %s11117_s22]]  }
  0x47   :  { %13015 = sst [smem:[#allocation25_spill]] %s11315_s4 }
  0x48   :  { %s11335_s4 = sld [smem:[%s12955_s0 + %s11118_s28]]  }
  0x49 LB: > { %s8814_s10 = sadd.s32 4294967295, %s11076_s7   ;;  %p8818_p0 = scmp.ge.s32.totalorder %s11076_s7, 1  ;;  %s11076_s7 = sphi %s11337_s7, %s93_s7  }
  0x4a   : > { %p1128_p1 = scmp.lt.s32.totalorder %s11076_s7, 3 }
  0x4c   : > { %p1129_p2 = pnand %p8818_p0, %p1128_p1 }
  0x4e   : > { %1132 = sbr.rel (%p1129_p2) target bundleno = 5773 (0x168d), region = 184 }
  0x53   : > { %v10344_v0 = vld [vmem:[%s11135_s9 + $0xac] ss:$12 sps:$4 sm:$0xff]   ;;  %v12981_v1 = vmov 0.0   ;;  %v10346_v2 = vld [vmem:[%s11135_s9 + $0xb0] ss:$12 sps:$4 sm:$0xff]   ;;  %vm11120_vm0 = vmmov 0  }
  0x54   : > { %9775 = vmatprep.subr.bf16.mxu1 %v12981_v1  ;;  %9791 = vmatprep.mubr.msk.bf16.mxu1 %vm11120_vm0, %v12981_v1  ;;  %v10347_v3 = vld [vmem:[%s11135_s9 + $0xa8] ss:$12 sps:$4 sm:$0xff]   ;;  %v12979_v5 = vmov 0   ;;  %v10350_v6 = vld [vmem:[%s11135_s9 + $0x98] ss:$12 sps:$4 sm:$0xff]   ;;  %p1227_p3 = scmp.lt.s32.totalorder %s8814_s10, 1 }
  0x55   : > { %1399 = vmatprep.subr.bf16.mxu0 %v10344_v0  ;;  %9776 = vmatpush3.bf16.msra.mxu1 %v10346_v2  ;;  %v10348_v4 = vld [vmem:[%s11135_s9 + $0x94] ss:$12 sps:$4 sm:$0xff]   ;;  %v10351_v7 = vld [vmem:[%s11135_s9 + $0x90] ss:$12 sps:$4 sm:$0xff]   ;;  %v10355_v10 = vld [vmem:[%s11135_s9 + $0x78] ss:$12 sps:$4 sm:$0xff]  }
  0x56   : > { %1431 = vmatprep.mubr.bf16.mxu0 %v12979_v5  ;;  %1400 = vmatpush1.bf16.msra.mxu0 %v10347_v3  ;;  %v10352_v8 = vld [vmem:[%s11135_s9 + $0x7c] ss:$12 sps:$4 sm:$0xff]   ;;  %v10354_v9 = vld [vmem:[%s11135_s9 + $0x80] ss:$12 sps:$4 sm:$0xff]   ;;  %v10356_v11 = vld [vmem:[%s11135_s9 + $0x64] ss:$12 sps:$4 sm:$0xff]  }
  0x57   : > { %9777 = vmatprep.subr.bf16.mxu1 %v12981_v1  ;;  %1401 = vmatprep.subr.bf16.mxu0 %v10348_v4  ;;  %v10358_v12 = vld [vmem:[%s11135_s9 + $0x68] ss:$12 sps:$4 sm:$0xff]   ;;  %v10359_v13 = vld [vmem:[%s11135_s9 + $0x60] ss:$12 sps:$4 sm:$0xff]   ;;  %s13085_s10 = smov (!%p1227_p3, %s8814_s10), 1  ;;  %vm1486_vm1 = vcmask 1043456  }
  0x58   : > { %v10360_v14 = vld [vmem:[%s11135_s9 + $0x4c] ss:$12 sps:$4 sm:$0xff]   ;;  %v10362_v15 = vld [vmem:[%s11135_s9 + $0x50] ss:$12 sps:$4 sm:$0xff]   ;;  %v10363_v16 = vld [vmem:[%s11135_s9 + $0x48] ss:$12 sps:$4 sm:$0xff]  }
  0x59   : > { %9778 = vmatpush3.bf16.msra.mxu1 %v10350_v6  ;;  %v10364_v17 = vld [vmem:[%s11135_s9 + $0x34] ss:$12 sps:$4 sm:$0xff]   ;;  %v10366_v18 = vld [vmem:[%s11135_s9 + $0x38] ss:$12 sps:$4 sm:$0xff]   ;;  %v10367_v19 = vld [vmem:[%s11135_s9 + $0x30] ss:$12 sps:$4 sm:$0xff]  }
  0x5a   : > { %1402 = vmatpush1.bf16.msra.mxu0 %v10351_v7  ;;  %9779 = vmatprep.subr.bf16.mxu1 %v12981_v1  ;;  %s8819_s0 = sshll.u32 %s13085_s10, 3  ;;  %v10368_v20 = vld [vmem:[%s11135_s9 + $0x1c] ss:$12 sps:$4 sm:$0xff]   ;;  %v10370_v21 = vld [vmem:[%s11135_s9 + $0x20] ss:$12 sps:$4 sm:$0xff]   ;;  %vm1482_vm2 = vcmask 64512  }
  0x5b   : > { %1403 = vmatprep.subr.bf16.mxu0 %v10352_v8  ;;  %v10371_v22 = vld [vmem:[%s11135_s9 + $0x18] ss:$12 sps:$4 sm:$0xff]   ;;  %s1230_s11 = scalar_lea.vmem %s11130_s5, %s8819_s0  ;;  %v10374_v24 = vld [vmem:[%s11135_s9 + $0x8] ss:$12 sps:$4 sm:$0xff]   ;;  %v10375_v26 = vld [vmem:[%s11135_s9] ss:$12 sps:$4 sm:$0xff]  }
  0x5c   : > { %v10372_v23 = vld [vmem:[%s11135_s9 + $0x4] ss:$12 sps:$4 sm:$0xff]   ;;  %v1530_v33 = vld [vmem:[%s11150_s21] sm:$0xf]  ;;  %v10376_v39 = vld [vmem:[%s11160_s29 + $0x38] sm:$0xff]   ;;  %vm2054_vm3 = vcmask 130048  }
  0x5d   : > { %9780 = vmatpush3.bf16.msra.mxu1 %v10354_v9  ;;  %v1237_v25 = vld [vmem:[%s1230_s11] sm:$0xff]  ;;  %v10377_v43 = vld [vmem:[%s11160_s29 + $0x30] sm:$0xff]   ;;  %v10378_v44 = vld [vmem:[%s11160_s29 + $0x28] sm:$0xff]   ;;  %s13016_s15 = sld [smem:[#allocation2_spill]]  ;;  %vm3035_vm6 = vcmask 261120   ;;  %vm4448_vm11 = vcmask 523264  }
  0x5e   : > { %1404 = vmatpush1.bf16.msra.mxu0 %v10355_v10  ;;  %9781 = vmatprep.subr.bf16.mxu1 %v12981_v1  ;;  %v11388_v27 = vpack.c.bf16 %v1237_v25, %v1237_v25  ;;  %v1480_v36 = vld [vmem:[%s11145_s17] sm:$0xf]  ;;  %v10380_v46 = vld [vmem:[%s11160_s29 + $0x18] sm:$0xff]   ;;  %v10381_v47 = vld [vmem:[%s11160_s29 + $0x10] sm:$0xff]   ;;  %s13017_s16 = sld [smem:[#allocation3_spill]] }
  0x5f   : > { %1405 = vmatprep.subr.bf16.mxu0 %v10356_v11  ;;  %v10379_v45 = vld [vmem:[%s11160_s29 + $0x20] sm:$0xff]   ;;  %v10382_v48 = vld [vmem:[%s11160_s29 + $0x8] sm:$0xff]   ;;  %v10389_v63 = vld [vmem:[%s11170_s8 + $0xb0] ss:$12 sps:$4 sm:$0xff]   ;;  %s13018_s18 = sld [smem:[#allocation5_spill]] }
  0x60   : > { %v10383_v49 = vld [vmem:[%s11160_s29] sm:$0xff]   ;;  %v10401_v3 = vld [vmem:[%s11170_s8 + $0x68] ss:$12 sps:$4 sm:$0xff]   ;;  %v1758_v11 = vsel %vm1486_vm1, %v11388_v27, 0  ;;  %s13019_s22 = sld [smem:[#allocation4_spill]] }
  0x61   : > { %9782 = vmatpush3.bf16.msra.mxu1 %v10358_v12  ;;  %v8847_v54 = vld [vmem:[%s11140_s13] ss:$0 sm:$0xff]  ;;  %v10393_v0 = vld [vmem:[%s11170_s8 + $0x98] ss:$12 sps:$4 sm:$0xff]   ;;  %s13020_s23 = sld [smem:[#allocation8_spill]] }
  0x62   : > { %1406 = vmatpush1.bf16.msra.mxu0 %v10359_v13  ;;  %9783 = vmatprep.subr.bf16.mxu1 %v12981_v1  ;;  %v10397_v2 = vld [vmem:[%s11170_s8 + $0x80] ss:$12 sps:$4 sm:$0xff]   ;;  %s13021_s26 = sld [smem:[#allocation7_spill]] }
  0x63   : > { %1407 = vmatprep.subr.bf16.mxu0 %v10360_v14  ;;  %v10384_v9 = vld [vmem:[%s11155_s25] sm:$0xff]   ;;  %v10388_v12 = vld [vmem:[%s11170_s8 + $0xac] ss:$12 sps:$4 sm:$0xff]   ;;  %s13022_s28 = sld [smem:[#allocation9_spill]] }
  0x64   : > { %v10385_v14 = vld [vmem:[%s11165_s3] sm:$0xff]   ;;  %s13023_s1 = sld [smem:[#allocation6_spill]] }
  0x65   : > { %9784 = vmatpush3.bf16.msra.mxu1 %v10362_v15  ;;  %v10386_v15 = vld [vmem:[%s11170_s8 + $0xa8] ss:$12 sps:$4 sm:$0xff]   ;;  %s13024_s2 = sld [smem:[#allocation12_spill]] }
  0x66   : > { %1408 = vmatpush1.bf16.msra.mxu0 %v10363_v16  ;;  %9785 = vmatprep.subr.bf16.mxu1 %v12981_v1  ;;  %v10392_v16 = vld [vmem:[%s11170_s8 + $0x94] ss:$12 sps:$4 sm:$0xff]   ;;  %s13025_s0 = sld [smem:[#allocation10_spill]] }
  0x67   : > { %1409 = vmatprep.subr.bf16.mxu0 %v10364_v17  ;;  %v10390_v17 = vld [vmem:[%s11170_s8 + $0x90] ss:$12 sps:$4 sm:$0xff]   ;;  %v10408_v25 = vld [vmem:[%s11170_s8 + $0x34] ss:$12 sps:$4 sm:$0xff]   ;;  %s13026_s11 = sld [smem:[#allocation11_spill]] }
  0x69   : > { %9786 = vmatpush3.bf16.msra.mxu1 %v10366_v18  ;;  %v10396_v18 = vld [vmem:[%s11170_s8 + $0x7c] ss:$12 sps:$4 sm:$0xff]  }
  0x6a   : > { %1410 = vmatpush1.bf16.msra.mxu0 %v10367_v19  ;;  %9787 = vmatprep.subr.bf16.mxu1 %v12981_v1  ;;  %v10394_v19 = vld [vmem:[%s11170_s8 + $0x78] ss:$12 sps:$4 sm:$0xff]  }
  0x6b   : > { %1411 = vmatprep.subr.bf16.mxu0 %v10368_v20  ;;  %v10400_v20 = vld [vmem:[%s11170_s8 + $0x64] ss:$12 sps:$4 sm:$0xff]  }
  0x6d   : > { %9788 = vmatpush3.bf16.msra.mxu1 %v10370_v21  ;;  %v10398_v21 = vld [vmem:[%s11170_s8 + $0x60] ss:$12 sps:$4 sm:$0xff]  }
  0x6e   : > { %1412 = vmatpush1.bf16.msra.mxu0 %v10371_v22  ;;  %9789 = vmatprep.subr.bf16.mxu1 %v12981_v1  ;;  %v10404_v22 = vld [vmem:[%s11170_s8 + $0x4c] ss:$12 sps:$4 sm:$0xff]  }
  0x6f   : > { %1413 = vmatprep.subr.bf16.mxu0 %v10372_v23  ;;  %v10402_v23 = vld [vmem:[%s11170_s8 + $0x48] ss:$12 sps:$4 sm:$0xff]  }
  0x71   : > { %9790 = vmatpush3.bf16.msra.mxu1 %v10374_v24  ;;  %v10405_v24 = vld [vmem:[%s11170_s8 + $0x50] ss:$12 sps:$4 sm:$0xff]  }
  0x72   : > { %1414 = vmatpush1.bf16.msra.mxu0 %v10375_v26  ;;  %9801 = vmatprep.subr.bf16.mxu1 %v12981_v1  ;;  %v10406_v26 = vld [vmem:[%s11170_s8 + $0x30] ss:$12 sps:$4 sm:$0xff]  }
  0x73   : > { %9795 = vmatprep.subr.bf16.mxu0 %v12981_v1 }
  0x74   : > { %9792 = vmatmul.mubr.bf16.vlgmr.msra.gmra.mxu1 %v11388_v27 }
  0x75   : > { %1432 = vmatmul.mubr.bf16.vlgmr.msra.gmra.mxu0 %v11388_v27  ;;  %9803 = vmatprep.mubr.msk.bf16.mxu1 %vm11120_vm0, %v12981_v1  ;;  %v10409_v27 = vld [vmem:[%s11170_s8 + $0x38] ss:$12 sps:$4 sm:$0xff]  }
  0x76   : > { %9797 = vmatprep.mubr.msk.bf16.mxu0 %vm11120_vm0, %v12981_v1 }
 0x134   : > { %v1474_v28 = vpop.f32.mrf.mxu1 }
 0x135   : > { %v1531_v29 = vpack.c.bf16 %v1474_v28, %v1474_v28  ;;  %v1433_v30 = vpop.f32.mrf.mxu0  ;;  %v10412_v28 = vld [vmem:[%s11170_s8 + $0x1c] ss:$12 sps:$4 sm:$0xff]  }
 0x136   : > { %v1481_v31 = vpack.c.bf16 %v1433_v30, %v1433_v30  ;;  %v9793_v32 = vpop.f32.mrf.mxu1  ;;  %v10413_v30 = vld [vmem:[%s11170_s8 + $0x20] ss:$12 sps:$4 sm:$0xff]  }
 0x137   : > { %v1536_v34 = vsel %vm1486_vm1, %v1531_v29, 0  ;;  %v1435_v35 = vpop.f32.mrf.mxu0  ;;  %v10410_v29 = vld [vmem:[%s11170_s8 + $0x18] ss:$12 sps:$4 sm:$0xff]   ;;  %v10414_v32 = vld [vmem:[%s11170_s8] ss:$12 sps:$4 sm:$0xff]  }
 0x138   : > { %v1488_v37 = vsel %vm1486_vm1, %v1481_v31, 0  ;;  %v1477_v38 = vpop.f32.mrf.mxu1  ;;  %9802 = vmatpush3.bf16.msra.mxu1 %v1536_v34  ;;  %v10416_v31 = vld [vmem:[%s11170_s8 + $0x4] ss:$12 sps:$4 sm:$0xff]  }
 0x139   : > { %v1437_v40 = vpop.f32.mrf.mxu0  ;;  %9796 = vmatpush3.bf16.msra.mxu0 %v1488_v37  ;;  %9827 = vmatprep.subr.bf16.mxu1 %v12981_v1 }
 0x13a   : > { %v9794_v41 = vpop.f32.mrf.mxu1  ;;  %9807 = vmatprep.subr.bf16.mxu0 %v12981_v1 }
 0x13b   : > { %v1438_v42 = vpop.f32.mrf.mxu0  ;;  %9804 = vmatmul.mubr.msk.bf16.vlgmr.msra.gmra.mxu1 %vm1482_vm2, %v1530_v33  ;;  %v10417_v33 = vld [vmem:[%s11170_s8 + $0x8] ss:$12 sps:$4 sm:$0xff]  }
 0x13c   : > { %9798 = vmatmul.mubr.msk.bf16.vlgmr.msra.gmra.mxu0 %vm1482_vm2, %v1480_v36  ;;  %9829 = vmatprep.mubr.msk.bf16.mxu1 %vm11120_vm0, %v12981_v1 }
 0x13d   : > { %9808 = vmatpush3.bf16.msra.mxu0 %v10376_v39  ;;  %9823 = vmatprep.mubr.msk.bf16.mxu0 %vm11120_vm0, %v12981_v1 }
 0x13e   : > { %9809 = vmatprep.subr.bf16.mxu0 %v12981_v1 }
 0x141   : > { %9810 = vmatpush3.bf16.msra.mxu0 %v10377_v43  ;;  %v10420_v43 = vld [vmem:[%s11190_s30 + $0xa8] ss:$12 sps:$4 sm:$0xff]  }
 0x142   : > { %9811 = vmatprep.subr.bf16.mxu0 %v12981_v1 }
 0x145   : > { %9812 = vmatpush3.bf16.msra.mxu0 %v10378_v44  ;;  %v10422_v44 = vld [vmem:[%s11190_s30 + $0xac] ss:$12 sps:$4 sm:$0xff]  }
 0x146   : > { %9813 = vmatprep.subr.bf16.mxu0 %v12981_v1 }
 0x149   : > { %9814 = vmatpush3.bf16.msra.mxu0 %v10379_v45  ;;  %v10426_v45 = vld [vmem:[%s11190_s30 + $0x94] ss:$12 sps:$4 sm:$0xff]  }
 0x14a   : > { %9815 = vmatprep.subr.bf16.mxu0 %v12981_v1 }
 0x14d   : > { %9816 = vmatpush3.bf16.msra.mxu0 %v10380_v46  ;;  %v10424_v46 = vld [vmem:[%s11190_s30 + $0x90] ss:$12 sps:$4 sm:$0xff]  }
 0x14e   : > { %9817 = vmatprep.subr.bf16.mxu0 %v12981_v1 }
 0x151   : > { %9818 = vmatpush3.bf16.msra.mxu0 %v10381_v47  ;;  %v10430_v47 = vld [vmem:[%s11190_s30 + $0x7c] ss:$12 sps:$4 sm:$0xff]  }
 0x152   : > { %9819 = vmatprep.subr.bf16.mxu0 %v12981_v1 }
 0x155   : > { %9820 = vmatpush3.bf16.msra.mxu0 %v10382_v48  ;;  %v10428_v48 = vld [vmem:[%s11190_s30 + $0x78] ss:$12 sps:$4 sm:$0xff]  }
 0x156   : > { %9821 = vmatprep.subr.bf16.mxu0 %v12981_v1 }
 0x159   : > { %9822 = vmatpush3.bf16.msra.mxu0 %v10383_v49 }
 0x15a   : > { %9839 = vmatprep.subr.bf16.mxu0 %v12981_v1 }
 0x1fb   : > { %v1572_v50 = vpop.f32.mrf.mxu1 }
 0x1fc   : > { %v1524_v51 = vpop.f32.mrf.mxu0 }
 0x1fd   : > { %v1525_v52 = vadd.f32 %v1524_v51, %v1435_v35  ;;  %v9805_v53 = vpop.f32.mrf.mxu1 }
 0x1fe   : > { %v9799_v55 = vpop.f32.mrf.mxu0 }
 0x1ff   : > { %v1578_v56 = vadd.f32 %v1572_v50, %v1525_v52  ;;  %v1575_v57 = vpop.f32.mrf.mxu1 }
 0x200   : > { %v1527_v58 = vpop.f32.mrf.mxu0  ;;  %v11488_v57 = vld [vmem:[%s11180_s19] sm:$0xff]  }
 0x201   : > { %v1586_v59 = vadd.f32 %v8847_v54, %v1578_v56  ;;  %v9806_v60 = vpop.f32.mrf.mxu1 }
 0x202   : > { %v9800_v61 = vpop.f32.mrf.mxu0  ;;  %v10423_v60 = vld [vmem:[%s11190_s30 + $0xb0] ss:$12 sps:$4 sm:$0xff]  }
 0x203   : > { %v1605_v62 = vpack.c.bf16 %v1586_v59, %v1586_v59  ;;  %v11497_v59 = vld [vmem:[%s11185_s24] sm:$0xff]  }
 0x204   : > { %v10427_v61 = vld [vmem:[%s11190_s30 + $0x98] ss:$12 sps:$4 sm:$0xff]  }
 0x205   : > { %9824 = vmatmul.mubr.bf16.vlgmr.msra.gmra.mxu0 %v1605_v62  ;;  %v10431_v62 = vld [vmem:[%s11190_s30 + $0x80] ss:$12 sps:$4 sm:$0xff]  }
 0x206   : > { %9855 = vmatprep.mubr.msk.bf16.mxu0 %vm11120_vm0, %v12981_v1  ;;  %9840 = vmatpush3.bf16.msra.mxu0 %v10389_v63  ;;  %v10434_v63 = vld [vmem:[%s11190_s30 + $0x64] ss:$12 sps:$4 sm:$0xff]  }
 0x207   : > { %9841 = vmatprep.subr.bf16.mxu0 %v12981_v1 }
 0x20a   : > { %9842 = vmatpush3.bf16.msra.mxu0 %v10393_v0  ;;  %v10432_v0 = vld [vmem:[%s11190_s30 + $0x60] ss:$12 sps:$4 sm:$0xff]  }
 0x20b   : > { %9843 = vmatprep.subr.bf16.mxu0 %v12981_v1 }
 0x20e   : > { %9844 = vmatpush3.bf16.msra.mxu0 %v10397_v2  ;;  %v10435_v2 = vld [vmem:[%s11190_s30 + $0x68] ss:$12 sps:$4 sm:$0xff]  }
 0x20f   : > { %9845 = vmatprep.subr.bf16.mxu0 %v12981_v1 }
 0x212   : > { %9846 = vmatpush3.bf16.msra.mxu0 %v10401_v3  ;;  %v10438_v3 = vld [vmem:[%s11190_s30 + $0x4c] ss:$12 sps:$4 sm:$0xff]  }
 0x213   : > { %9847 = vmatprep.subr.bf16.mxu0 %v12981_v1 }
 0x216   : > { %9848 = vmatpush3.bf16.msra.mxu0 %v10405_v24 }
 0x217   : > { %9849 = vmatprep.subr.bf16.mxu0 %v12981_v1 }
 0x21a   : > { %9850 = vmatpush3.bf16.msra.mxu0 %v10409_v27 }
 0x21b   : > { %9851 = vmatprep.subr.bf16.mxu0 %v12981_v1 }
 0x21e   : > { %9852 = vmatpush3.bf16.msra.mxu0 %v10413_v30 }
 0x21f   : > { %9853 = vmatprep.subr.bf16.mxu0 %v12981_v1 }
 0x222   : > { %9854 = vmatpush3.bf16.msra.mxu0 %v10417_v33 }
 0x223   : > { %2329 = vmatprep.subr.bf16.mxu0 %v10422_v44 }
 0x2c5   : > { %v1688_v4 = vpop.f32.mrf.mxu0 }
 0x2c6   : > { %v1694_v6 = vpack.c.bf16 %v1688_v4, %v1688_v4  ;;  %v10436_v4 = vld [vmem:[%s11190_s30 + $0x48] ss:$12 sps:$4 sm:$0xff]  }
 0x2c7   : > { %v9825_v7 = vpop.f32.mrf.mxu0 }
 0x2c8   : > { %v1704_v8 = vsel %vm1486_vm1, %v1694_v6, 0  ;;  %v10439_v6 = vld [vmem:[%s11190_s30 + $0x50] ss:$12 sps:$4 sm:$0xff]   ;;  %v10442_v7 = vld [vmem:[%s11190_s30 + $0x34] ss:$12 sps:$4 sm:$0xff]  }
 0x2c9   : > { %v1691_v10 = vpop.f32.mrf.mxu0  ;;  %9828 = vmatpush3.bf16.msra.mxu1 %v1704_v8  ;;  %v10440_v8 = vld [vmem:[%s11190_s30 + $0x30] ss:$12 sps:$4 sm:$0xff]  }
 0x2ca   : > { %9833 = vmatprep.subr.bf16.mxu1 %v12981_v1  ;;  %v10446_v10 = vld [vmem:[%s11190_s30 + $0x1c] ss:$12 sps:$4 sm:$0xff]  }
 0x2cb   : > { %v9826_v13 = vpop.f32.mrf.mxu0 }
 0x2cc   : > { %9830 = vmatmul.mubr.msk.bf16.vlgmr.msra.gmra.mxu1 %vm1482_vm2, %v10384_v9  ;;  %v10443_v9 = vld [vmem:[%s11190_s30 + $0x38] ss:$12 sps:$4 sm:$0xff]  }
 0x2cd   : > { %9834 = vmatpush3.bf16.msra.mxu1 %v1758_v11  ;;  %9835 = vmatprep.mubr.msk.bf16.mxu1 %vm11120_vm0, %v12981_v1  ;;  %v10444_v11 = vld [vmem:[%s11190_s30 + $0x18] ss:$12 sps:$4 sm:$0xff]  }
 0x2ce   : > { %1962 = vmatprep.subr.bf16.mxu1 %v10388_v12  ;;  %v10447_v12 = vld [vmem:[%s11190_s30 + $0x20] ss:$12 sps:$4 sm:$0xff]   ;;  %v10450_v13 = vld [vmem:[%s11190_s30 + $0x4] ss:$12 sps:$4 sm:$0xff]  }
 0x2d4   : > { %9836 = vmatmul.mubr.msk.bf16.vlgmr.msra.gmra.mxu1 %vm1482_vm2, %v10385_v14  ;;  %v10448_v14 = vld [vmem:[%s11190_s30] ss:$12 sps:$4 sm:$0xff]  }
 0x2d5   : > { %1963 = vmatpush1.bf16.msra.mxu1 %v10386_v15  ;;  %1994 = vmatprep.mubr.bf16.mxu1 %v12979_v5  ;;  %v10451_v15 = vld [vmem:[%s11190_s30 + $0x8] ss:$12 sps:$4 sm:$0xff]  }
 0x2d6   : > { %1964 = vmatprep.subr.bf16.mxu1 %v10392_v16 }
 0x2d9   : > { %1965 = vmatpush1.bf16.msra.mxu1 %v10390_v17 }
 0x2da   : > { %1966 = vmatprep.subr.bf16.mxu1 %v10396_v18 }
 0x2dd   : > { %1967 = vmatpush1.bf16.msra.mxu1 %v10394_v19 }
 0x2de   : > { %1968 = vmatprep.subr.bf16.mxu1 %v10400_v20 }
 0x2e1   : > { %1969 = vmatpush1.bf16.msra.mxu1 %v10398_v21 }
 0x2e2   : > { %1970 = vmatprep.subr.bf16.mxu1 %v10404_v22 }
 0x2e5   : > { %1971 = vmatpush1.bf16.msra.mxu1 %v10402_v23  ;;  %v8888_v23 = vld [vmem:[%s11175_s14] ss:$0 sm:$0xff] }
 0x2e6   : > { %1972 = vmatprep.subr.bf16.mxu1 %v10408_v25 }
 0x2e9   : > { %1973 = vmatpush1.bf16.msra.mxu1 %v10406_v26 }
 0x2ea   : > { %1974 = vmatprep.subr.bf16.mxu1 %v10412_v28 }
 0x2ed   : > { %1975 = vmatpush1.bf16.msra.mxu1 %v10410_v29 }
 0x2ee   : > { %1976 = vmatprep.subr.bf16.mxu1 %v10416_v31 }
 0x2f1   : > { %1977 = vmatpush1.bf16.msra.mxu1 %v10414_v32 }
 0x2f2   : > { %9859 = vmatprep.subr.bf16.mxu1 %v12981_v1 }
 0x38c   : > { %v11472_v34 = vpop.f32.mrf.mxu1 }
 0x38e   : > { %v9831_v35 = vpop.f32.mrf.mxu1 }
 0x390   : > { %v11474_v36 = vpop.f32.mrf.mxu1 }
 0x392   : > { %v9832_v37 = vpop.f32.mrf.mxu1 }
 0x394   : > { %v1794_v38 = vpop.f32.mrf.mxu1 }
 0x396   : > { %v9837_v39 = vpop.f32.mrf.mxu1 }
 0x398   : > { %v1797_v40 = vpop.f32.mrf.mxu1 }
 0x399   : > { %v1833_v41 = vpack.c.bf16 %v1797_v40, %v1794_v38 }
 0x39a   : > { %v9838_v42 = vpop.f32.mrf.mxu1 }
 0x39b   : > { %1995 = vmatmul.mubr.bf16.vlgmr.msra.gmra.mxu1 %v1833_v41  ;;  %9856 = vmatmul.mubr.bf16.vlgmr.msra.gmra.mxu0 %v1833_v41 }
 0x39c   : > { %9861 = vmatprep.mubr.msk.bf16.mxu1 %vm11120_vm0, %v12981_v1  ;;  %2361 = vmatprep.mubr.bf16.mxu0 %v12979_v5 }
 0x39d   : > { %2330 = vmatpush1.bf16.msra.mxu0 %v10420_v43 }
 0x39e   : > { %2331 = vmatprep.subr.bf16.mxu0 %v10426_v45 }
 0x3a1   : > { %2332 = vmatpush1.bf16.msra.mxu0 %v10424_v46 }
 0x3a2   : > { %2333 = vmatprep.subr.bf16.mxu0 %v10430_v47 }
 0x3a5   : > { %2334 = vmatpush1.bf16.msra.mxu0 %v10428_v48  ;;  %v10452_v48 = vld [vmem:[%s11205_s20 + $0x38] sm:$0xff]  }
 0x3a6   : > { %2335 = vmatprep.subr.bf16.mxu0 %v10434_v63  ;;  %v8915_v63 = vld [vmem:[%s13016_s15] ss:$0 sm:$0xff]  ;;  %s13027_s15 = sld [smem:[#allocation14_spill]] }
 0x3a9   : > { %2336 = vmatpush1.bf16.msra.mxu0 %v10432_v0 }
 0x3aa   : > { %2337 = vmatprep.subr.bf16.mxu0 %v10438_v3 }
 0x3ad   : > { %2338 = vmatpush1.bf16.msra.mxu0 %v10436_v4 }
 0x3ae   : > { %2339 = vmatprep.subr.bf16.mxu0 %v10442_v7 }
 0x3b1   : > { %2340 = vmatpush1.bf16.msra.mxu0 %v10440_v8 }
 0x3b2   : > { %2341 = vmatprep.subr.bf16.mxu0 %v10446_v10 }
 0x3b5   : > { %2342 = vmatpush1.bf16.msra.mxu0 %v10444_v11 }
 0x3b6   : > { %2343 = vmatprep.subr.bf16.mxu0 %v10450_v13  ;;  %v10460_v13 = vld [vmem:[%s13017_s16] sm:$0xff]  }
 0x3b9   : > { %2344 = vmatpush1.bf16.msra.mxu0 %v10448_v14  ;;  %v10467_v14 = vld [vmem:[%s13018_s18 + $0xb0] ss:$12 sps:$4 sm:$0xff]  }
 0x3ba   : > { %9891 = vmatprep.subr.bf16.mxu0 %v12981_v1 }
 0x45b   : > { %v1996_v49 = vpop.f32.mrf.mxu1  ;;  %v2039_v50 = vpop.f32.mrf.mxu0 }
 0x45d   : > { %v11485_v51 = vpop.f32.mrf.mxu1  ;;  %v9857_v52 = vpop.f32.mrf.mxu0 }
 0x45e   : > { %v10456_v52 = vld [vmem:[%s11205_s20 + $0x18] sm:$0xff]  }
 0x45f   : > { %v2000_v53 = vpop.f32.mrf.mxu1  ;;  %v2042_v54 = vpop.f32.mrf.mxu0 }
 0x460   : > { %v2048_v55 = vpack.c.bf16 %v2000_v53, %v1996_v49  ;;  %v2101_v58 = vpack.c.bf16 %v2042_v54, %v2039_v50  ;;  %v10453_v49 = vld [vmem:[%s11205_s20 + $0x30] sm:$0xff]   ;;  %v10454_v50 = vld [vmem:[%s11205_s20 + $0x28] sm:$0xff]  }
 0x461   : > { %v9858_v56 = vpop.f32.mrf.mxu0  ;;  %v2002_v16 = vpop.f32.mrf.mxu1  ;;  %v10457_v53 = vld [vmem:[%s11205_s20 + $0x10] sm:$0xff]   ;;  %v10458_v54 = vld [vmem:[%s11205_s20 + $0x8] sm:$0xff]  }
 0x462   : > { %9860 = vmatpush3.bf16.msra.mxu1 %v2048_v55  ;;  %v10459_v55 = vld [vmem:[%s11205_s20] sm:$0xff]  }
 0x463   : > { %9865 = vmatprep.subr.bf16.mxu1 %v12981_v1 }
 0x465   : > { %9862 = vmatmul.mubr.msk.bf16.vlgmr.msra.gmra.mxu1 %vm2054_vm3, %v11488_v57 }
 0x466   : > { %9866 = vmatpush3.bf16.msra.mxu1 %v2101_v58  ;;  %9867 = vmatprep.mubr.msk.bf16.mxu1 %vm11120_vm0, %v12981_v1 }
 0x467   : > { %9871 = vmatprep.subr.bf16.mxu1 %v12981_v1 }
 0x46d   : > { %9868 = vmatmul.mubr.msk.bf16.vlgmr.msra.gmra.mxu1 %vm2054_vm3, %v11497_v59 }
 0x46e   : > { %9872 = vmatpush3.bf16.msra.mxu1 %v10423_v60  ;;  %9887 = vmatprep.mubr.msk.bf16.mxu1 %vm11120_vm0, %v12981_v1 }
 0x46f   : > { %9873 = vmatprep.subr.bf16.mxu1 %v12981_v1 }
 0x472   : > { %9874 = vmatpush3.bf16.msra.mxu1 %v10427_v61 }
 0x473   : > { %9875 = vmatprep.subr.bf16.mxu1 %v12981_v1 }
 0x476   : > { %9876 = vmatpush3.bf16.msra.mxu1 %v10431_v62 }
 0x477   : > { %9877 = vmatprep.subr.bf16.mxu1 %v12981_v1 }
 0x47a   : > { %9878 = vmatpush3.bf16.msra.mxu1 %v10435_v2 }
 0x47b   : > { %9879 = vmatprep.subr.bf16.mxu1 %v12981_v1 }
 0x47e   : > { %9880 = vmatpush3.bf16.msra.mxu1 %v10439_v6 }
 0x47f   : > { %9881 = vmatprep.subr.bf16.mxu1 %v12981_v1 }
 0x482   : > { %9882 = vmatpush3.bf16.msra.mxu1 %v10443_v9 }
 0x483   : > { %9883 = vmatprep.subr.bf16.mxu1 %v12981_v1 }
 0x486   : > { %9884 = vmatpush3.bf16.msra.mxu1 %v10447_v12 }
 0x487   : > { %9885 = vmatprep.subr.bf16.mxu1 %v12981_v1 }
 0x48a   : > { %9886 = vmatpush3.bf16.msra.mxu1 %v10451_v15  ;;  %v10471_v15 = vld [vmem:[%s13018_s18 + $0x98] ss:$12 sps:$4 sm:$0xff]  }
 0x48b   : > { %9897 = vmatprep.subr.bf16.mxu1 %v12981_v1 }
 0x525   : > { %v2092_v17 = vpop.f32.mrf.mxu1 }
 0x526   : > { %v2093_v21 = vadd.f32 %v2092_v17, %v11485_v51  ;;  %v10455_v51 = vld [vmem:[%s11205_s20 + $0x20] sm:$0xff]  }
 0x527   : > { %v9863_v18 = vpop.f32.mrf.mxu1 }
 0x529   : > { %v2095_v19 = vpop.f32.mrf.mxu1 }
 0x52a   : > { %v2096_v26 = vadd.f32 %v2095_v19, %v2002_v16  ;;  %v10475_v16 = vld [vmem:[%s13018_s18 + $0x80] ss:$12 sps:$4 sm:$0xff]  }
 0x52b   : > { %v9864_v20 = vpop.f32.mrf.mxu1 }
 0x52d   : > { %v2144_v22 = vpop.f32.mrf.mxu1 }
 0x52e   : > { %v2151_v24 = vadd.f32 %v2144_v22, %v2093_v21  ;;  %v10461_v21 = vld [vmem:[%s13017_s16 + $0x8] sm:$0xff]   ;;  %v10462_v22 = vld [vmem:[%s13019_s22] sm:$0xff]  }
 0x52f   : > { %v9869_v25 = vpop.f32.mrf.mxu1 }
 0x530   : > { %v2160_v27 = vadd.f32 %v8888_v23, %v2151_v24  ;;  %v10463_v24 = vld [vmem:[%s13019_s22 + $0x8] sm:$0xff]  }
 0x531   : > { %v2147_v28 = vpop.f32.mrf.mxu1  ;;  %v10464_v25 = vld [vmem:[%s13018_s18 + $0xa8] ss:$12 sps:$4 sm:$0xff]  }
 0x532   : > { %v2152_v29 = vadd.f32 %v2147_v28, %v2096_v26  ;;  %v2164_v31 = vmul.f32 0.2, %v2160_v27  ;;  %vm2162_vm4 = vcmp.ge.f32.partialorder %v2160_v27, 0.0  ;;  %v10470_v26 = vld [vmem:[%s13018_s18 + $0x94] ss:$12 sps:$4 sm:$0xff]  }
 0x533   : > { %v9870_v30 = vpop.f32.mrf.mxu1  ;;  %v10474_v28 = vld [vmem:[%s13018_s18 + $0x7c] ss:$12 sps:$4 sm:$0xff]  }
 0x534   : > { %v2161_v32 = vadd.f32 %v8888_v23, %v2152_v29  ;;  %v2166_v35 = vsel %vm2162_vm4, %v2160_v27, %v2164_v31  ;;  %v10466_v23 = vld [vmem:[%s13018_s18 + $0xac] ss:$12 sps:$4 sm:$0xff]   ;;  %v10468_v27 = vld [vmem:[%s13018_s18 + $0x90] ss:$12 sps:$4 sm:$0xff]  }
 0x535   : > { %v10472_v29 = vld [vmem:[%s13018_s18 + $0x78] ss:$12 sps:$4 sm:$0xff]   ;;  %v10476_v31 = vld [vmem:[%s13018_s18 + $0x60] ss:$12 sps:$4 sm:$0xff]  }
 0x536   : > { %vm2163_vm5 = vcmp.ge.f32.partialorder %v2161_v32, 0.0  ;;  %v2165_v33 = vmul.f32 0.2, %v2161_v32  ;;  %v10478_v30 = vld [vmem:[%s13018_s18 + $0x64] ss:$12 sps:$4 sm:$0xff]  }
 0x538   : > { %v2167_v37 = vsel %vm2163_vm5, %v2161_v32, %v2165_v33  ;;  %v10482_v32 = vld [vmem:[%s13018_s18 + $0x4c] ss:$12 sps:$4 sm:$0xff]   ;;  %v10480_v33 = vld [vmem:[%s13018_s18 + $0x48] ss:$12 sps:$4 sm:$0xff]  }
 0x539   : > { %v11532_v38 = vpack.c.bf16 %v2167_v37, %v2166_v35  ;;  %v10483_v35 = vld [vmem:[%s13018_s18 + $0x50] ss:$12 sps:$4 sm:$0xff]   ;;  %v10486_v37 = vld [vmem:[%s13018_s18 + $0x34] ss:$12 sps:$4 sm:$0xff]  }
 0x53b   : > { %2362 = vmatmul.mubr.bf16.vlgmr.msra.gmra.mxu0 %v11532_v38  ;;  %9888 = vmatmul.mubr.bf16.vlgmr.msra.gmra.mxu1 %v11532_v38 }
 0x53c   : > { %9893 = vmatprep.mubr.msk.bf16.mxu0 %vm11120_vm0, %v12981_v1  ;;  %9899 = vmatprep.mubr.msk.bf16.mxu1 %vm11120_vm0, %v12981_v1 }
 0x5fb   : > { %v2363_v39 = vpop.f32.mrf.mxu0  ;;  %v2406_v40 = vpop.f32.mrf.mxu1 }
 0x5fd   : > { %v2365_v41 = vpop.f32.mrf.mxu0  ;;  %v9889_v42 = vpop.f32.mrf.mxu1 }
 0x5fe   : > { %v10491_v42 = vld [vmem:[%s13018_s18 + $0x20] ss:$12 sps:$4 sm:$0xff]  }
 0x5ff   : > { %v2367_v43 = vpop.f32.mrf.mxu0  ;;  %v2409_v44 = vpop.f32.mrf.mxu1 }
 0x600   : > { %v2413_v45 = vpack.c.bf16 %v2367_v43, %v2363_v39  ;;  %v2455_v46 = vpack.c.bf16 %v2409_v44, %v2406_v40  ;;  %v10487_v39 = vld [vmem:[%s13018_s18 + $0x38] ss:$12 sps:$4 sm:$0xff]   ;;  %v10490_v40 = vld [vmem:[%s13018_s18 + $0x1c] ss:$12 sps:$4 sm:$0xff]   ;;  %v10492_v44 = vld [vmem:[%s13018_s18] ss:$12 sps:$4 sm:$0xff]  }
 0x601   : > { %v9890_v47 = vpop.f32.mrf.mxu1  ;;  %v2369_v56 = vpop.f32.mrf.mxu0  ;;  %v10494_v43 = vld [vmem:[%s13018_s18 + $0x4] ss:$12 sps:$4 sm:$0xff]  }
 0x602   : > { %9892 = vmatpush3.bf16.msra.mxu0 %v2413_v45  ;;  %9898 = vmatpush3.bf16.msra.mxu1 %v2455_v46  ;;  %v10495_v45 = vld [vmem:[%s13018_s18 + $0x8] ss:$12 sps:$4 sm:$0xff]  }
 0x603   : > { %9903 = vmatprep.subr.bf16.mxu0 %v12981_v1 }
 0x605   : > { %9894 = vmatmul.mubr.msk.bf16.vlgmr.msra.gmra.mxu0 %vm2054_vm3, %v11488_v57  ;;  %9900 = vmatmul.mubr.msk.bf16.vlgmr.msra.gmra.mxu1 %vm2054_vm3, %v11497_v59 }
 0x606   : > { %9904 = vmatpush3.bf16.msra.mxu0 %v10452_v48  ;;  %9919 = vmatprep.mubr.msk.bf16.mxu0 %vm11120_vm0, %v12981_v1 }
 0x607   : > { %9905 = vmatprep.subr.bf16.mxu0 %v12981_v1  ;;  %9925 = vmatprep.mubr.msk.bf16.mxu1 %vm2054_vm3, %v10460_v13 }
 0x60a   : > { %9906 = vmatpush3.bf16.msra.mxu0 %v10453_v49 }
 0x60b   : > { %9907 = vmatprep.subr.bf16.mxu0 %v12981_v1 }
 0x60e   : > { %9908 = vmatpush3.bf16.msra.mxu0 %v10454_v50 }
 0x60f   : > { %9909 = vmatprep.subr.bf16.mxu0 %v12981_v1 }
 0x612   : > { %9910 = vmatpush3.bf16.msra.mxu0 %v10455_v51 }
 0x613   : > { %9911 = vmatprep.subr.bf16.mxu0 %v12981_v1 }
 0x616   : > { %9912 = vmatpush3.bf16.msra.mxu0 %v10456_v52 }
 0x617   : > { %9913 = vmatprep.subr.bf16.mxu0 %v12981_v1 }
 0x61a   : > { %9914 = vmatpush3.bf16.msra.mxu0 %v10457_v53 }
 0x61b   : > { %9915 = vmatprep.subr.bf16.mxu0 %v12981_v1 }
 0x61e   : > { %9916 = vmatpush3.bf16.msra.mxu0 %v10458_v54 }
 0x61f   : > { %9917 = vmatprep.subr.bf16.mxu0 %v12981_v1 }
 0x622   : > { %9918 = vmatpush3.bf16.msra.mxu0 %v10459_v55 }
 0x623   : > { %9935 = vmatprep.subr.bf16.mxu0 %v10467_v14 }
 0x6c5   : > { %v2448_v57 = vpop.f32.mrf.mxu0  ;;  %v2490_v58 = vpop.f32.mrf.mxu1 }
 0x6c6   : > { %v2449_v59 = vadd.f32 %v2448_v57, %v2365_v41  ;;  %v10488_v41 = vld [vmem:[%s13018_s18 + $0x18] ss:$12 sps:$4 sm:$0xff]  }
 0x6c7   : > { %v9895_v60 = vpop.f32.mrf.mxu0  ;;  %v9901_v61 = vpop.f32.mrf.mxu1  ;;  %v11615_v57 = vld [vmem:[%s13021_s26] sm:$0xff]  }
 0x6c8   : > { %v2497_v62 = vadd.f32 %v2490_v58, %v2449_v59 }
 0x6c9   : > { %v2451_v0 = vpop.f32.mrf.mxu0  ;;  %v2493_v2 = vpop.f32.mrf.mxu1 }
 0x6ca   : > { %v2452_v3 = vadd.f32 %v2451_v0, %v2369_v56  ;;  %v2506_v7 = vadd.f32 %v8915_v63, %v2497_v62  ;;  %v11610_v56 = vld [vmem:[%s13020_s23] sm:$0xff]  }
 0x6cb   : > { %v9896_v4 = vpop.f32.mrf.mxu0  ;;  %v9902_v6 = vpop.f32.mrf.mxu1 }
 0x6cc   : > { %v2498_v8 = vadd.f32 %v2493_v2, %v2452_v3  ;;  %v2508_v10 = vadd.f32 %v2506_v7, %v11472_v34  ;;  %v10479_v34 = vld [vmem:[%s13018_s18 + $0x68] ss:$12 sps:$4 sm:$0xff]  }
 0x6ce   : > { %v2507_v9 = vadd.f32 %v8915_v63, %v2498_v8  ;;  %v10503_v8 = vld [vmem:[%s13022_s28 + $0xb0] ss:$12 sps:$4 sm:$0xff]  }
 0x6d0   : > { %v2509_v11 = vadd.f32 %v2507_v9, %v11474_v36 }
 0x6d2   : > { %v2530_v12 = vpack.c.bf16 %v2509_v11, %v2508_v10  ;;  %v11627_v10 = vld [vmem:[%s13020_s23 + $0x8] sm:$0xff]  }
 0x6d4   : > { %9920 = vmatmul.mubr.bf16.vlgmr.msra.gmra.mxu0 %v2530_v12  ;;  %v10507_v12 = vld [vmem:[%s13022_s28 + $0x98] ss:$12 sps:$4 sm:$0xff]  }
 0x6d5   : > { %9936 = vmatpush3.bf16.msra.mxu0 %v10467_v14  ;;  %v10502_v14 = vld [vmem:[%s13022_s28 + $0xac] ss:$12 sps:$4 sm:$0xff]  }
 0x6d6   : > { %9937 = vmatprep.subr.bf16.mxu0 %v10471_v15 }
 0x6d9   : > { %9938 = vmatpush3.bf16.msra.mxu0 %v10471_v15  ;;  %v10511_v15 = vld [vmem:[%s13022_s28 + $0x80] ss:$12 sps:$4 sm:$0xff]  }
 0x6da   : > { %9939 = vmatprep.subr.bf16.mxu0 %v10475_v16 }
 0x6dd   : > { %9940 = vmatpush3.bf16.msra.mxu0 %v10475_v16  ;;  %v11635_v16 = vld [vmem:[%s13021_s26 + $0x8] sm:$0xff]  }
 0x6de   : > { %9941 = vmatprep.subr.bf16.mxu0 %v10479_v34 }
 0x6e1   : > { %9942 = vmatpush3.bf16.msra.mxu0 %v10479_v34  ;;  %v10500_v34 = vld [vmem:[%s13022_s28 + $0xa8] ss:$12 sps:$4 sm:$0xff]  }
 0x6e2   : > { %9943 = vmatprep.subr.bf16.mxu0 %v10483_v35 }
 0x6e5   : > { %9944 = vmatpush3.bf16.msra.mxu0 %v10483_v35  ;;  %v10531_v35 = vld [vmem:[%s13022_s28 + $0x8] ss:$12 sps:$4 sm:$0xff]  }
 0x6e6   : > { %9945 = vmatprep.subr.bf16.mxu0 %v10487_v39 }
 0x6e9   : > { %9946 = vmatpush3.bf16.msra.mxu0 %v10487_v39 }
 0x6ea   : > { %9947 = vmatprep.subr.bf16.mxu0 %v10491_v42 }
 0x6ed   : > { %9948 = vmatpush3.bf16.msra.mxu0 %v10491_v42 }
 0x6ee   : > { %9949 = vmatprep.subr.bf16.mxu0 %v10495_v45 }
 0x6f1   : > { %9950 = vmatpush3.bf16.msra.mxu0 %v10495_v45 }
 0x794   : > { %v2613_v36 = vpop.f32.mrf.mxu0 }
 0x796   : > { %v9921_v17 = vpop.f32.mrf.mxu0 }
 0x797   : > { %v10504_v17 = vld [vmem:[%s13022_s28 + $0x90] ss:$12 sps:$4 sm:$0xff]  }
 0x798   : > { %v2616_v18 = vpop.f32.mrf.mxu0 }
 0x799   : > { %v2620_v19 = vpack.c.bf16 %v2616_v18, %v2613_v36  ;;  %v10506_v36 = vld [vmem:[%s13022_s28 + $0x94] ss:$12 sps:$4 sm:$0xff]   ;;  %v10510_v18 = vld [vmem:[%s13022_s28 + $0x7c] ss:$12 sps:$4 sm:$0xff]  }
 0x79a   : > { %v9922_v20 = vpop.f32.mrf.mxu0 }
 0x79b   : > { %9923 = vmatprep.subr.bf16.mxu1 %v2620_v19  ;;  %v10512_v20 = vld [vmem:[%s13022_s28 + $0x60] ss:$12 sps:$4 sm:$0xff]  }
 0x79c   : > { %9924 = vmatpush3.bf16.msra.mxu1 %v2620_v19  ;;  %v10508_v19 = vld [vmem:[%s13022_s28 + $0x78] ss:$12 sps:$4 sm:$0xff]  }
 0x79d   : > { %9929 = vmatprep.subr.bf16.mxu1 %v11532_v38 }
 0x79f   : > { %9926 = vmatmul.mubr.msk.bf16.vlgmr.msra.gmra.mxu1 %vm2054_vm3, %v10461_v21  ;;  %v10514_v21 = vld [vmem:[%s13022_s28 + $0x64] ss:$12 sps:$4 sm:$0xff]  }
 0x7a0   : > { %9930 = vmatpush3.bf16.msra.mxu1 %v11532_v38  ;;  %9931 = vmatprep.mubr.msk.bf16.mxu1 %vm2054_vm3, %v10462_v22  ;;  %v10484_v38 = vld [vmem:[%s13018_s18 + $0x30] ss:$12 sps:$4 sm:$0xff]   ;;  %v10515_v22 = vld [vmem:[%s13022_s28 + $0x68] ss:$12 sps:$4 sm:$0xff]  }
 0x7a1   : > { %2917 = vmatprep.subr.bf16.mxu1 %v10466_v23  ;;  %v10518_v23 = vld [vmem:[%s13022_s28 + $0x4c] ss:$12 sps:$4 sm:$0xff]  }
 0x7a7   : > { %9932 = vmatmul.mubr.msk.bf16.vlgmr.msra.gmra.mxu1 %vm2054_vm3, %v10463_v24  ;;  %v10516_v24 = vld [vmem:[%s13022_s28 + $0x48] ss:$12 sps:$4 sm:$0xff]  }
 0x7a8   : > { %2918 = vmatpush1.bf16.msra.mxu1 %v10464_v25  ;;  %2949 = vmatprep.mubr.bf16.mxu1 %v12979_v5  ;;  %v10519_v25 = vld [vmem:[%s13022_s28 + $0x50] ss:$12 sps:$4 sm:$0xff]  }
 0x7a9   : > { %2919 = vmatprep.subr.bf16.mxu1 %v10470_v26  ;;  %v10522_v26 = vld [vmem:[%s13022_s28 + $0x34] ss:$12 sps:$4 sm:$0xff]  }
 0x7ac   : > { %2920 = vmatpush1.bf16.msra.mxu1 %v10468_v27  ;;  %v10520_v27 = vld [vmem:[%s13022_s28 + $0x30] ss:$12 sps:$4 sm:$0xff]  }
 0x7ad   : > { %2921 = vmatprep.subr.bf16.mxu1 %v10474_v28  ;;  %v10523_v28 = vld [vmem:[%s13022_s28 + $0x38] ss:$12 sps:$4 sm:$0xff]  }
 0x7b0   : > { %2922 = vmatpush1.bf16.msra.mxu1 %v10472_v29  ;;  %v10526_v29 = vld [vmem:[%s13022_s28 + $0x1c] ss:$12 sps:$4 sm:$0xff]  }
 0x7b1   : > { %2923 = vmatprep.subr.bf16.mxu1 %v10478_v30  ;;  %v10524_v30 = vld [vmem:[%s13022_s28 + $0x18] ss:$12 sps:$4 sm:$0xff]  }
 0x7b4   : > { %2924 = vmatpush1.bf16.msra.mxu1 %v10476_v31  ;;  %v10527_v31 = vld [vmem:[%s13022_s28 + $0x20] ss:$12 sps:$4 sm:$0xff]  }
 0x7b5   : > { %2925 = vmatprep.subr.bf16.mxu1 %v10482_v32  ;;  %v10530_v32 = vld [vmem:[%s13022_s28 + $0x4] ss:$12 sps:$4 sm:$0xff]  }
 0x7b8   : > { %2926 = vmatpush1.bf16.msra.mxu1 %v10480_v33  ;;  %v10528_v33 = vld [vmem:[%s13022_s28] ss:$12 sps:$4 sm:$0xff]  }
 0x7b9   : > { %2927 = vmatprep.subr.bf16.mxu1 %v10486_v37 }
 0x7bc   : > { %2928 = vmatpush1.bf16.msra.mxu1 %v10484_v38 }
 0x7bd   : > { %2929 = vmatprep.subr.bf16.mxu1 %v10490_v40 }
 0x7c0   : > { %2930 = vmatpush1.bf16.msra.mxu1 %v10488_v41 }
 0x7c1   : > { %2931 = vmatprep.subr.bf16.mxu1 %v10494_v43 }
 0x7c4   : > { %2932 = vmatpush1.bf16.msra.mxu1 %v10492_v44 }
 0x85f   : > { %v11600_v46 = vpop.f32.mrf.mxu1 }
 0x861   : > { %v11602_v47 = vpop.f32.mrf.mxu1 }
 0x863   : > { %v11604_v48 = vpop.f32.mrf.mxu1 }
 0x865   : > { %v11606_v49 = vpop.f32.mrf.mxu1 }
 0x867   : > { %v9933_v50 = vpop.f32.mrf.mxu1 }
 0x869   : > { %v2740_v51 = vpop.f32.mrf.mxu1 }
 0x86b   : > { %v9934_v52 = vpop.f32.mrf.mxu1 }
 0x86c   : > { %v2788_v55 = vpack.c.bf16 %v9934_v52, %v9933_v50 }
 0x86d   : > { %v2743_v53 = vpop.f32.mrf.mxu1 }
 0x86e   : > { %v2787_v54 = vpack.c.bf16 %v2743_v53, %v2740_v51  ;;  %v8964_v53 = vld [vmem:[%s13023_s1] ss:$0 sm:$0xff]  ;;  %s13028_s1 = sld [smem:[#allocation13_spill]] }
 0x870   : > { %2950 = vmatmul.mubr.bf16.vlgmr.msra.gmra.mxu1 %v2787_v54  ;;  %9951 = vmatprep.mubr.bf16.mxu0 %v2787_v54 }
 0x871   : > { %9952 = vmatmul.mubr.bf16.vlgmr.msra.gmra.mxu0 %v2788_v55  ;;  %2959 = vmatprep.mubr.bf16.mxu1 %v12979_v5 }
 0x872   : > { %9967 = vmatprep.mubr.msk.bf16.mxu0 %vm3035_vm6, %v11610_v56 }
 0x878   : > { %2960 = vmatmul.mubr.bf16.gmra.mxu1 %v2788_v55 }
 0x879   : > { %9959 = vmatprep.mubr.msk.bf16.mxu1 %vm3035_vm6, %v11615_v57 }
 0x930   : > { %v2951_v58 = vpop.f32.mrf.mxu1 }
 0x931   : > { %v9953_v59 = vpop.f32.mrf.mxu0 }
 0x932   : > { %v11619_v60 = vpop.f32.mrf.mxu1 }
 0x933   : > { %v3004_v61 = vpop.f32.mrf.mxu0 }
 0x934   : > { %v2955_v62 = vpop.f32.mrf.mxu1 }
 0x935   : > { %v9954_v63 = vpop.f32.mrf.mxu0  ;;  %v3023_v13 = vpack.c.bf16 %v2955_v62, %v2951_v58 }
 0x936   : > { %v3096_v0 = vpack.c.bf16 %v9954_v63, %v9953_v59  ;;  %v11621_v2 = vpop.f32.mrf.mxu1 }
 0x937   : > { %v3007_v3 = vpop.f32.mrf.mxu0 }
 0x938   : > { %v3095_v4 = vpack.c.bf16 %v3007_v3, %v3004_v61  ;;  %v2961_v6 = vpop.f32.mrf.mxu1  ;;  %9963 = vmatprep.subr.bf16.mxu0 %v3096_v0 }
 0x939   : > { %9964 = vmatpush3.bf16.msra.mxu0 %v3096_v0 }
 0x93a   : > { %v11623_v7 = vpop.f32.mrf.mxu1  ;;  %9965 = vmatprep.subr.bf16.mxu0 %v3095_v4 }
 0x93c   : > { %v2965_v9 = vpop.f32.mrf.mxu1 }
 0x93d   : > { %v3024_v11 = vpack.c.bf16 %v2965_v9, %v2961_v6  ;;  %9966 = vmatpush3.bf16.msra.mxu0 %v3095_v4 }
 0x93e   : > { %9971 = vmatprep.subr.bf16.mxu0 %v10503_v8  ;;  %v2967_v38 = vpop.f32.mrf.mxu1 }
 0x93f   : > { %9955 = vmatprep.subr.bf16.mxu1 %v3024_v11 }
 0x940   : > { %9956 = vmatpush3.bf16.msra.mxu1 %v3024_v11  ;;  %9968 = vmatmul.mubr.msk.bf16.vlgmr.msra.gmra.mxu0 %vm3035_vm6, %v11627_v10 }
 0x941   : > { %9957 = vmatprep.subr.bf16.mxu1 %v3023_v13  ;;  %9972 = vmatpush3.bf16.msra.mxu0 %v10503_v8 }
 0x942   : > { %9973 = vmatprep.subr.bf16.mxu0 %v10507_v12 }
 0x944   : > { %9958 = vmatpush3.bf16.msra.mxu1 %v3023_v13 }
 0x945   : > { %3351 = vmatprep.subr.bf16.mxu1 %v10502_v14  ;;  %9974 = vmatpush3.bf16.msra.mxu0 %v10507_v12 }
 0x946   : > { %9975 = vmatprep.subr.bf16.mxu0 %v10511_v15 }
 0x947   : > { %9960 = vmatmul.mubr.msk.bf16.vlgmr.msra.gmra.mxu1 %vm3035_vm6, %v11635_v16 }
 0x948   : > { %3352 = vmatpush1.bf16.msra.mxu1 %v10500_v34  ;;  %3383 = vmatprep.mubr.bf16.mxu1 %v12979_v5 }
 0x949   : > { %3353 = vmatprep.subr.bf16.mxu1 %v10506_v36  ;;  %9976 = vmatpush3.bf16.msra.mxu0 %v10511_v15 }
 0x94a   : > { %9977 = vmatprep.subr.bf16.mxu0 %v10515_v22 }
 0x94c   : > { %3354 = vmatpush1.bf16.msra.mxu1 %v10504_v17 }
 0x94d   : > { %3355 = vmatprep.subr.bf16.mxu1 %v10510_v18  ;;  %9978 = vmatpush3.bf16.msra.mxu0 %v10515_v22 }
 0x94e   : > { %9979 = vmatprep.subr.bf16.mxu0 %v10519_v25 }
 0x950   : > { %3356 = vmatpush1.bf16.msra.mxu1 %v10508_v19 }
 0x951   : > { %3357 = vmatprep.subr.bf16.mxu1 %v10514_v21  ;;  %9980 = vmatpush3.bf16.msra.mxu0 %v10519_v25 }
 0x952   : > { %9981 = vmatprep.subr.bf16.mxu0 %v10523_v28 }
 0x954   : > { %3358 = vmatpush1.bf16.msra.mxu1 %v10512_v20 }
 0x955   : > { %3359 = vmatprep.subr.bf16.mxu1 %v10518_v23  ;;  %9982 = vmatpush3.bf16.msra.mxu0 %v10523_v28  ;;  %v10534_v28 = vld [vmem:[%s13024_s2 + $0x28] sm:$0xff]  }
 0x956   : > { %9983 = vmatprep.subr.bf16.mxu0 %v10527_v31 }
 0x958   : > { %3360 = vmatpush1.bf16.msra.mxu1 %v10516_v24 }
 0x959   : > { %3361 = vmatprep.subr.bf16.mxu1 %v10522_v26  ;;  %9984 = vmatpush3.bf16.msra.mxu0 %v10527_v31  ;;  %v10532_v26 = vld [vmem:[%s13024_s2 + $0x38] sm:$0xff]   ;;  %v10538_v31 = vld [vmem:[%s13024_s2 + $0x8] sm:$0xff]  }
 0x95a   : > { %9985 = vmatprep.subr.bf16.mxu0 %v10531_v35 }
 0x95c   : > { %3362 = vmatpush1.bf16.msra.mxu1 %v10520_v27  ;;  %v10533_v27 = vld [vmem:[%s13024_s2 + $0x30] sm:$0xff]  }
 0x95d   : > { %3363 = vmatprep.subr.bf16.mxu1 %v10526_v29  ;;  %9986 = vmatpush3.bf16.msra.mxu0 %v10531_v35  ;;  %v10535_v29 = vld [vmem:[%s13024_s2 + $0x20] sm:$0xff]  }
 0x960   : > { %3364 = vmatpush1.bf16.msra.mxu1 %v10524_v30  ;;  %v10537_v30 = vld [vmem:[%s13024_s2 + $0x10] sm:$0xff]  }
 0x961   : > { %3365 = vmatprep.subr.bf16.mxu1 %v10530_v32 }
 0x964   : > { %3366 = vmatpush1.bf16.msra.mxu1 %v10528_v33 }
 0xa00   : > { %v9969_v37 = vpop.f32.mrf.mxu0 }
 0xa02   : > { %v3147_v40 = vpop.f32.mrf.mxu0 }
 0xa04   : > { %v9970_v50 = vpop.f32.mrf.mxu0 }
 0xa06   : > { %v3150_v62 = vpop.f32.mrf.mxu0 }
 0xa07   : > { %v9961_v39 = vpop.f32.mrf.mxu1 }
 0xa08   : > { %v3085_v41 = vadd.f32 %v9961_v39, %v11623_v7 }
 0xa09   : > { %v3076_v42 = vpop.f32.mrf.mxu1 }
 0xa0a   : > { %v3077_v43 = vadd.f32 %v3076_v42, %v11619_v60  ;;  %v3164_v45 = vadd.f32 %v9969_v37, %v3085_v41 }
 0xa0b   : > { %v9962_v44 = vpop.f32.mrf.mxu1 }
 0xa0c   : > { %v3162_v51 = vadd.f32 %v3147_v40, %v3077_v43  ;;  %v3088_v52 = vadd.f32 %v9962_v44, %v2967_v38  ;;  %v3175_v61 = vadd.f32 %v8964_v53, %v3164_v45 }
 0xa0d   : > { %v3079_v54 = vpop.f32.mrf.mxu1 }
 0xa0e   : > { %v3165_v55 = vadd.f32 %v9970_v50, %v3088_v52  ;;  %v3173_v58 = vadd.f32 %v8964_v53, %v3162_v51  ;;  %v3080_v59 = vadd.f32 %v3079_v54, %v11621_v2  ;;  %v3183_v60 = vmul.f32 0.2, %v3175_v61  ;;  %v8993_v51 = vld [vmem:[%s13025_s0] ss:$0 sm:$0xff]  ;;  %s13029_s0 = sld [smem:[#allocation18_spill]] }
 0xa0f   : > { %vm3179_vm9 = vcmp.ge.f32.partialorder %v3175_v61, 0.0 }
 0xa10   : > { %v3176_v63 = vadd.f32 %v8964_v53, %v3165_v55  ;;  %v3163_v0 = vadd.f32 %v3150_v62, %v3080_v59  ;;  %v3181_v4 = vmul.f32 0.2, %v3173_v58  ;;  %vm3177_vm8 = vcmp.ge.f32.partialorder %v3173_v58, 0.0 }
 0xa11   : > { %v3187_v13 = vsel %vm3179_vm9, %v3175_v61, %v3183_v60 }
 0xa12   : > { %v3184_v3 = vmul.f32 0.2, %v3176_v63  ;;  %vm3180_vm7 = vcmp.ge.f32.partialorder %v3176_v63, 0.0  ;;  %v3174_v6 = vadd.f32 %v8964_v53, %v3163_v0  ;;  %v3185_v9 = vsel %vm3177_vm8, %v3173_v58, %v3181_v4 }
 0xa14   : > { %vm3178_vm10 = vcmp.ge.f32.partialorder %v3174_v6, 0.0  ;;  %v3182_v7 = vmul.f32 0.2, %v3174_v6  ;;  %v3188_v8 = vsel %vm3180_vm7, %v3176_v63, %v3184_v3 }
 0xa15   : > { %v11666_v2 = vpack.c.bf16 %v3188_v8, %v3187_v13  ;;  %v10551_v8 = vld [vmem:[%s13027_s15 + $0x158] ss:$24 sps:$4 sm:$0xff]  }
 0xa16   : > { %v3186_v11 = vsel %vm3178_vm10, %v3174_v6, %v3182_v7  ;;  %v10540_v7 = vld [vmem:[%s13026_s11] sm:$0xff]  }
 0xa17   : > { %v11664_v12 = vpack.c.bf16 %v3186_v11, %v3185_v9  ;;  %v10553_v9 = vld [vmem:[%s13027_s15 + $0x15c] ss:$24 sps:$4 sm:$0xff]  }
 0xa19   : > { %3384 = vmatmul.mubr.bf16.vlgmr.msra.gmra.mxu1 %v11664_v12  ;;  %9987 = vmatprep.mubr.bf16.mxu0 %v11664_v12 }
 0xa1a   : > { %9988 = vmatmul.mubr.bf16.vlgmr.msra.gmra.mxu0 %v11666_v2  ;;  %3393 = vmatprep.mubr.bf16.mxu1 %v12979_v5 }
 0xa1b   : > { %9995 = vmatprep.mubr.msk.bf16.mxu0 %vm3035_vm6, %v11615_v57 }
 0xa21   : > { %3394 = vmatmul.mubr.bf16.gmra.mxu1 %v11666_v2 }
 0xa22   : > { %10003 = vmatprep.mubr.msk.bf16.mxu1 %vm3035_vm6, %v11610_v56 }
 0xad9   : > { %v3385_v14 = vpop.f32.mrf.mxu1 }
 0xada   : > { %v9989_v15 = vpop.f32.mrf.mxu0 }
 0xadb   : > { %v3387_v34 = vpop.f32.mrf.mxu1 }
 0xadc   : > { %v3438_v36 = vpop.f32.mrf.mxu0 }
 0xadd   : > { %v3389_v17 = vpop.f32.mrf.mxu1 }
 0xade   : > { %v9990_v18 = vpop.f32.mrf.mxu0  ;;  %v3453_v25 = vpack.c.bf16 %v3389_v17, %v3385_v14  ;;  %v10550_v17 = vld [vmem:[%s13027_s15 + $0x154] ss:$24 sps:$4 sm:$0xff]  }
 0xadf   : > { %v3505_v19 = vpack.c.bf16 %v9990_v18, %v9989_v15  ;;  %v3391_v20 = vpop.f32.mrf.mxu1  ;;  %v10543_v18 = vld [vmem:[%s13026_s11 + $0x18] sm:$0xff]  }
 0xae0   : > { %v3441_v21 = vpop.f32.mrf.mxu0 }
 0xae1   : > { %v3504_v22 = vpack.c.bf16 %v3441_v21, %v3438_v36  ;;  %v3395_v23 = vpop.f32.mrf.mxu1  ;;  %9999 = vmatprep.subr.bf16.mxu1 %v3505_v19  ;;  %v10542_v36 = vld [vmem:[%s13026_s11 + $0x10] sm:$0xff]  }
 0xae2   : > { %10000 = vmatpush3.bf16.msra.mxu1 %v3505_v19  ;;  %v10544_v19 = vld [vmem:[%s13028_s1] sm:$0xff]   ;;  %v10548_v21 = vld [vmem:[%s13027_s15 + $0x150] ss:$24 sps:$4 sm:$0xff]  }
 0xae3   : > { %v3397_v57 = vpop.f32.mrf.mxu1  ;;  %10001 = vmatprep.subr.bf16.mxu1 %v3504_v22 }
 0xae5   : > { %v3399_v24 = vpop.f32.mrf.mxu1 }
 0xae6   : > { %v3454_v56 = vpack.c.bf16 %v3399_v24, %v3395_v23  ;;  %10002 = vmatpush3.bf16.msra.mxu1 %v3504_v22  ;;  %v10556_v22 = vld [vmem:[%s13027_s15 + $0x124] ss:$24 sps:$4 sm:$0xff]  }
 0xae7   : > { %v3401_v32 = vpop.f32.mrf.mxu1  ;;  %v10547_v23 = vld [vmem:[%s13028_s1 + $0x18] sm:$0xff]  }
 0xae8   : > { %9991 = vmatprep.subr.bf16.mxu0 %v3454_v56  ;;  %v10565_v24 = vld [vmem:[%s13027_s15 + $0xfc] ss:$24 sps:$4 sm:$0xff]  }
 0xae9   : > { %9992 = vmatpush3.bf16.msra.mxu0 %v3454_v56  ;;  %10004 = vmatmul.mubr.msk.bf16.vlgmr.msra.gmra.mxu1 %vm3035_vm6, %v11627_v10  ;;  %v10536_v10 = vld [vmem:[%s13024_s2 + $0x18] sm:$0xff]   ;;  %v10560_v56 = vld [vmem:[%s13027_s15 + $0xf0] ss:$24 sps:$4 sm:$0xff]  }
 0xaea   : > { %9993 = vmatprep.subr.bf16.mxu0 %v3453_v25  ;;  %10031 = vmatprep.mubr.msk.bf16.mxu1 %vm3035_vm6, %v10540_v7 }
 0xaed   : > { %9994 = vmatpush3.bf16.msra.mxu0 %v3453_v25  ;;  %v10563_v25 = vld [vmem:[%s13027_s15 + $0xf8] ss:$24 sps:$4 sm:$0xff]  }
 0xaee   : > { %10007 = vmatprep.subr.bf16.mxu0 %v10532_v26 }
 0xaf0   : > { %9996 = vmatmul.mubr.msk.bf16.vlgmr.msra.gmra.mxu0 %vm3035_vm6, %v11635_v16  ;;  %v10539_v16 = vld [vmem:[%s13024_s2] sm:$0xff]   ;;  %s13031_s2 = sld [smem:[#allocation17_spill]] }
 0xaf1   : > { %10008 = vmatpush3.bf16.msra.mxu0 %v10532_v26  ;;  %v10568_v26 = vld [vmem:[%s13027_s15 + $0xc4] ss:$24 sps:$4 sm:$0xff]  }
 0xaf2   : > { %10009 = vmatprep.subr.bf16.mxu0 %v10533_v27 }
 0xaf5   : > { %10010 = vmatpush3.bf16.msra.mxu0 %v10533_v27  ;;  %v10571_v27 = vld [vmem:[%s13027_s15 + $0xcc] ss:$24 sps:$4 sm:$0xff]  }
 0xaf6   : > { %10011 = vmatprep.subr.bf16.mxu0 %v10534_v28 }
 0xaf9   : > { %10012 = vmatpush3.bf16.msra.mxu0 %v10534_v28  ;;  %v10566_v28 = vld [vmem:[%s13027_s15 + $0xc0] ss:$24 sps:$4 sm:$0xff]  }
 0xafa   : > { %10013 = vmatprep.subr.bf16.mxu0 %v10535_v29 }
 0xafd   : > { %10014 = vmatpush3.bf16.msra.mxu0 %v10535_v29  ;;  %v10569_v29 = vld [vmem:[%s13027_s15 + $0xc8] ss:$24 sps:$4 sm:$0xff]  }
 0xafe   : > { %10015 = vmatprep.subr.bf16.mxu0 %v10536_v10 }
 0xb01   : > { %10016 = vmatpush3.bf16.msra.mxu0 %v10536_v10  ;;  %v10574_v10 = vld [vmem:[%s13027_s15 + $0x94] ss:$24 sps:$4 sm:$0xff]  }
 0xb02   : > { %10017 = vmatprep.subr.bf16.mxu0 %v10537_v30 }
 0xb05   : > { %10018 = vmatpush3.bf16.msra.mxu0 %v10537_v30  ;;  %v10577_v30 = vld [vmem:[%s13027_s15 + $0x9c] ss:$24 sps:$4 sm:$0xff]  }
 0xb06   : > { %10019 = vmatprep.subr.bf16.mxu0 %v10538_v31 }
 0xb09   : > { %10020 = vmatpush3.bf16.msra.mxu0 %v10538_v31  ;;  %v10572_v31 = vld [vmem:[%s13027_s15 + $0x90] ss:$24 sps:$4 sm:$0xff]  }
 0xb0a   : > { %10021 = vmatprep.subr.bf16.mxu0 %v10539_v16 }
 0xb0d   : > { %10022 = vmatpush3.bf16.msra.mxu0 %v10539_v16  ;;  %v10575_v16 = vld [vmem:[%s13027_s15 + $0x98] ss:$24 sps:$4 sm:$0xff]  }
 0xb0e   : > { %4266 = vmatprep.subr.bf16.mxu0 %v10553_v9  ;;  %v10604_v9 = vld [vmem:[%s13027_s15 + $0x104] ss:$24 sps:$4 sm:$0xff]  }
 0xba9   : > { %v10005_v33 = vpop.f32.mrf.mxu1 }
 0xbab   : > { %v3540_v35 = vpop.f32.mrf.mxu1 }
 0xbad   : > { %v10006_v41 = vpop.f32.mrf.mxu1 }
 0xbaf   : > { %v3543_v54 = vpop.f32.mrf.mxu1 }
 0xbb0   : > { %v9997_v37 = vpop.f32.mrf.mxu0 }
 0xbb1   : > { %v3498_v38 = vadd.f32 %v9997_v37, %v3397_v57  ;;  %v10562_v57 = vld [vmem:[%s13027_s15 + $0xf4] ss:$24 sps:$4 sm:$0xff]   ;;  %v10581_v37 = vld [vmem:[%s13027_s15 + $0x68] ss:$24 sps:$4 sm:$0xff]  }
 0xbb2   : > { %v3489_v39 = vpop.f32.mrf.mxu0 }
 0xbb3   : > { %v3490_v40 = vadd.f32 %v3489_v39, %v3387_v34  ;;  %v3557_v45 = vadd.f32 %v10005_v33, %v3498_v38  ;;  %v10541_v34 = vld [vmem:[%s13026_s11 + $0x8] sm:$0xff]   ;;  %v10589_v39 = vld [vmem:[%s13027_s15 + $0x3c] ss:$24 sps:$4 sm:$0xff]  }
 0xbb4   : > { %v9998_v42 = vpop.f32.mrf.mxu0  ;;  %v10583_v33 = vld [vmem:[%s13027_s15 + $0x6c] ss:$24 sps:$4 sm:$0xff]  }
 0xbb5   : > { %v3555_v43 = vadd.f32 %v3540_v35, %v3490_v40  ;;  %v3501_v44 = vadd.f32 %v9998_v42, %v3401_v32  ;;  %v3568_v61 = vadd.f32 %v8993_v51, %v3557_v45  ;;  %v10580_v32 = vld [vmem:[%s13027_s15 + $0x64] ss:$24 sps:$4 sm:$0xff]   ;;  %v10578_v35 = vld [vmem:[%s13027_s15 + $0x60] ss:$24 sps:$4 sm:$0xff]   ;;  %v10586_v38 = vld [vmem:[%s13027_s15 + $0x34] ss:$24 sps:$4 sm:$0xff]  }
 0xbb6   : > { %v3492_v50 = vpop.f32.mrf.mxu0  ;;  %v10584_v40 = vld [vmem:[%s13027_s15 + $0x30] ss:$24 sps:$4 sm:$0xff]   ;;  %v10592_v42 = vld [vmem:[%s13027_s15 + $0x4] ss:$24 sps:$4 sm:$0xff]  }
 0xbb7   : > { %v3558_v52 = vadd.f32 %v10006_v41, %v3501_v44  ;;  %v3493_v53 = vadd.f32 %v3492_v50, %v3391_v20  ;;  %v3566_v55 = vadd.f32 %v8993_v51, %v3555_v43  ;;  %v3572_v4 = vadd.f32 %v11600_v46, %v3568_v61  ;;  %v10546_v20 = vld [vmem:[%s13028_s1 + $0x10] sm:$0xff]   ;;  %v10595_v43 = vld [vmem:[%s13027_s15 + $0xc] ss:$24 sps:$4 sm:$0xff]   ;;  %v10590_v44 = vld [vmem:[%s13027_s15] ss:$24 sps:$4 sm:$0xff]  }
 0xbb8   : > { %v10587_v41 = vld [vmem:[%s13027_s15 + $0x38] ss:$24 sps:$4 sm:$0xff]   ;;  %v10593_v45 = vld [vmem:[%s13027_s15 + $0x8] ss:$24 sps:$4 sm:$0xff]   ;;  %v10598_v50 = vld [vmem:[%s13027_s15 + $0x164] ss:$24 sps:$4 sm:$0xff]  }
 0xbb9   : > { %v3569_v58 = vadd.f32 %v8993_v51, %v3558_v52  ;;  %v3556_v59 = vadd.f32 %v3543_v54, %v3493_v53  ;;  %v3570_v0 = vadd.f32 %v3566_v55, %v11602_v47  ;;  %v10557_v47 = vld [vmem:[%s13027_s15 + $0x128] ss:$24 sps:$4 sm:$0xff]  }
 0xbbb   : > { %v3567_v62 = vadd.f32 %v8993_v51, %v3556_v59  ;;  %v3573_v63 = vadd.f32 %v11604_v48, %v3569_v58  ;;  %v10559_v48 = vld [vmem:[%s13027_s15 + $0x12c] ss:$24 sps:$4 sm:$0xff]  }
 0xbbd   : > { %v3571_v3 = vadd.f32 %v3567_v62, %v11606_v49  ;;  %v3599_v60 = vpack.c.bf16 %v3573_v63, %v3572_v4  ;;  %v10596_v4 = vld [vmem:[%s13027_s15 + $0x160] ss:$24 sps:$4 sm:$0xff]  }
 0xbbf   : > { %v3598_v6 = vpack.c.bf16 %v3571_v3, %v3570_v0 }
 0xbc1   : > { %10023 = vmatprep.mubr.bf16.mxu0 %v3598_v6 }
 0xbc2   : > { %10024 = vmatmul.mubr.bf16.vlgmr.msra.gmra.mxu0 %v3599_v60  ;;  %v10601_v60 = vld [vmem:[%s13027_s15 + $0x134] ss:$24 sps:$4 sm:$0xff]  }
 0xbc3   : > { %4298 = vmatprep.mubr.bf16.mxu0 %v12979_v5  ;;  %4267 = vmatpush1.bf16.msra.mxu0 %v10551_v8  ;;  %v10599_v8 = vld [vmem:[%s13027_s15 + $0x130] ss:$24 sps:$4 sm:$0xff]  }
 0xbc4   : > { %4268 = vmatprep.subr.bf16.mxu0 %v10559_v48 }
 0xbc7   : > { %4269 = vmatpush1.bf16.msra.mxu0 %v10557_v47  ;;  %v10602_v47 = vld [vmem:[%s13027_s15 + $0x100] ss:$24 sps:$4 sm:$0xff]  }
 0xbc8   : > { %4270 = vmatprep.subr.bf16.mxu0 %v10565_v24 }
 0xbcb   : > { %4271 = vmatpush1.bf16.msra.mxu0 %v10563_v25 }
 0xbcc   : > { %4272 = vmatprep.subr.bf16.mxu0 %v10571_v27 }
 0xbcf   : > { %4273 = vmatpush1.bf16.msra.mxu0 %v10569_v29 }
 0xbd0   : > { %4274 = vmatprep.subr.bf16.mxu0 %v10577_v30 }
 0xbd3   : > { %4275 = vmatpush1.bf16.msra.mxu0 %v10575_v16 }
 0xbd4   : > { %4276 = vmatprep.subr.bf16.mxu0 %v10583_v33 }
 0xbd7   : > { %4277 = vmatpush1.bf16.msra.mxu0 %v10581_v37 }
 0xbd8   : > { %4278 = vmatprep.subr.bf16.mxu0 %v10589_v39 }
 0xbdb   : > { %4279 = vmatpush1.bf16.msra.mxu0 %v10587_v41 }
 0xbdc   : > { %4280 = vmatprep.subr.bf16.mxu0 %v10595_v43 }
 0xbdf   : > { %4281 = vmatpush1.bf16.msra.mxu0 %v10593_v45 }
 0xc82   : > { %v10025_v46 = vpop.f32.mrf.mxu0 }
 0xc84   : > { %v3682_v49 = vpop.f32.mrf.mxu0 }
 0xc86   : > { %v10026_v11 = vpop.f32.mrf.mxu0 }
 0xc87   : > { %v3698_v13 = vpack.c.bf16 %v10026_v11, %v10025_v46 }
 0xc88   : > { %v3685_v14 = vpop.f32.mrf.mxu0 }
 0xc89   : > { %v3697_v15 = vpack.c.bf16 %v3685_v14, %v3682_v49  ;;  %10027 = vmatprep.subr.bf16.mxu1 %v3698_v13  ;;  %v10607_v49 = vld [vmem:[%s13027_s15 + $0xd4] ss:$24 sps:$4 sm:$0xff]   ;;  %v10610_v14 = vld [vmem:[%s13027_s15 + $0xa4] ss:$24 sps:$4 sm:$0xff]  }
 0xc8a   : > { %10028 = vmatpush3.bf16.msra.mxu1 %v3698_v13  ;;  %v10605_v13 = vld [vmem:[%s13027_s15 + $0xd0] ss:$24 sps:$4 sm:$0xff]  }
 0xc8b   : > { %10029 = vmatprep.subr.bf16.mxu1 %v3697_v15 }
 0xc8e   : > { %10030 = vmatpush3.bf16.msra.mxu1 %v3697_v15 }
 0xc8f   : > { %10039 = vmatprep.subr.bf16.mxu1 %v11666_v2 }
 0xc91   : > { %10032 = vmatmul.mubr.msk.bf16.vlgmr.msra.gmra.mxu1 %vm3035_vm6, %v10541_v34  ;;  %v10608_v34 = vld [vmem:[%s13027_s15 + $0xa0] ss:$24 sps:$4 sm:$0xff]  }
 0xc92   : > { %10040 = vmatpush3.bf16.msra.mxu1 %v11666_v2  ;;  %10035 = vmatprep.mubr.msk.bf16.mxu1 %vm3035_vm6, %v10542_v36  ;;  %v10545_v2 = vld [vmem:[%s13028_s1 + $0x8] sm:$0xff]   ;;  %s13030_s1 = sld [smem:[#allocation16_spill]] }
 0xc93   : > { %10041 = vmatprep.subr.bf16.mxu1 %v11664_v12 }
 0xc96   : > { %10042 = vmatpush3.bf16.msra.mxu1 %v11664_v12  ;;  %v10554_v12 = vld [vmem:[%s13027_s15 + $0x120] ss:$24 sps:$4 sm:$0xff]  }
 0xc97   : > { %4193 = vmatprep.subr.bf16.mxu1 %v10550_v17  ;;  %v10613_v17 = vld [vmem:[%s13027_s15 + $0x74] ss:$24 sps:$4 sm:$0xff]  }
 0xc99   : > { %10036 = vmatmul.mubr.msk.bf16.gmra.mxu1 %vm3035_vm6, %v10543_v18  ;;  %v10611_v18 = vld [vmem:[%s13027_s15 + $0x70] ss:$24 sps:$4 sm:$0xff]  }
 0xc9a   : > { %10043 = vmatprep.mubr.msk.bf16.mxu1 %vm3035_vm6, %v10544_v19  ;;  %v10616_v19 = vld [vmem:[%s13027_s15 + $0x44] ss:$24 sps:$4 sm:$0xff]  }
 0xca1   : > { %10044 = vmatmul.mubr.msk.bf16.vlgmr.msra.gmra.mxu1 %vm3035_vm6, %v10545_v2  ;;  %v10614_v2 = vld [vmem:[%s13027_s15 + $0x40] ss:$24 sps:$4 sm:$0xff]  }
 0xca2   : > { %10047 = vmatprep.mubr.msk.bf16.mxu1 %vm3035_vm6, %v10546_v20  ;;  %4194 = vmatpush1.bf16.msra.mxu1 %v10548_v21  ;;  %v10619_v21 = vld [vmem:[%s13027_s15 + $0x14] ss:$24 sps:$4 sm:$0xff]  }
 0xca3   : > { %4195 = vmatprep.subr.bf16.mxu1 %v10556_v22  ;;  %v10617_v22 = vld [vmem:[%s13027_s15 + $0x10] ss:$24 sps:$4 sm:$0xff]  }
 0xca6   : > { %4196 = vmatpush1.bf16.msra.mxu1 %v10554_v12 }
 0xca7   : > { %4197 = vmatprep.subr.bf16.mxu1 %v10562_v57 }
 0xca9   : > { %10048 = vmatmul.mubr.msk.bf16.gmra.mxu1 %vm3035_vm6, %v10547_v23 }
 0xcaa   : > { %4225 = vmatprep.mubr.bf16.mxu1 %v12979_v5  ;;  %4198 = vmatpush1.bf16.msra.mxu1 %v10560_v56 }
 0xcab   : > { %4199 = vmatprep.subr.bf16.mxu1 %v10568_v26 }
 0xcae   : > { %4200 = vmatpush1.bf16.msra.mxu1 %v10566_v28 }
 0xcaf   : > { %4201 = vmatprep.subr.bf16.mxu1 %v10574_v10 }
 0xcb2   : > { %4202 = vmatpush1.bf16.msra.mxu1 %v10572_v31 }
 0xcb3   : > { %4203 = vmatprep.subr.bf16.mxu1 %v10580_v32 }
 0xcb6   : > { %4204 = vmatpush1.bf16.msra.mxu1 %v10578_v35 }
 0xcb7   : > { %4205 = vmatprep.subr.bf16.mxu1 %v10586_v38 }
 0xcba   : > { %4206 = vmatpush1.bf16.msra.mxu1 %v10584_v40 }
 0xcbb   : > { %4207 = vmatprep.subr.bf16.mxu1 %v10592_v42 }
 0xcbe   : > { %4208 = vmatpush1.bf16.msra.mxu1 %v10590_v44 }
 0xcbf   : > { %4339 = vmatprep.subr.bf16.mxu1 %v10598_v50 }
 0xd51   : > { %v11749_v51 = vpop.f32.mrf.mxu1 }
 0xd53   : > { %v11751_v52 = vpop.f32.mrf.mxu1 }
 0xd55   : > { %v11753_v53 = vpop.f32.mrf.mxu1 }
 0xd57   : > { %v11755_v54 = vpop.f32.mrf.mxu1 }
 0xd59   : > { %v11757_v55 = vpop.f32.mrf.mxu1 }
 0xd5b   : > { %v11759_v58 = vpop.f32.mrf.mxu1 }
 0xd5d   : > { %v11761_v59 = vpop.f32.mrf.mxu1 }
 0xd5f   : > { %v11763_v61 = vpop.f32.mrf.mxu1 }
 0xd61   : > { %v10045_v62 = vpop.f32.mrf.mxu1 }
 0xd63   : > { %v3870_v63 = vpop.f32.mrf.mxu1 }
 0xd65   : > { %v10046_v0 = vpop.f32.mrf.mxu1 }
 0xd66   : > { %v3950_v46 = vpack.c.bf16 %v10046_v0, %v10045_v62  ;;  %v10630_v0 = vld [vmem:[%s13029_s0 + $0xac] ss:$12 sps:$4 sm:$0xff]  }
 0xd67   : > { %v3873_v3 = vpop.f32.mrf.mxu1 }
 0xd68   : > { %v3949_v6 = vpack.c.bf16 %v3873_v3, %v3870_v63 }
 0xd69   : > { %v10049_v7 = vpop.f32.mrf.mxu1 }
 0xd6a   : > { %4226 = vmatmul.mubr.bf16.vlgmr.msra.gmra.mxu1 %v3949_v6  ;;  %4299 = vmatmul.mubr.bf16.vlgmr.msra.gmra.mxu0 %v3949_v6 }
 0xd6b   : > { %4340 = vmatpush1.bf16.msra.mxu1 %v10596_v4  ;;  %4235 = vmatprep.mubr.bf16.mxu1 %v12979_v5  ;;  %v3886_v48 = vpop.f32.mrf.mxu1 }
 0xd6c   : > { %4341 = vmatprep.subr.bf16.mxu1 %v10601_v60  ;;  %4308 = vmatprep.mubr.bf16.mxu0 %v12979_v5 }
 0xd6d   : > { %v10050_v11 = vpop.f32.mrf.mxu1 }
 0xd6e   : > { %v3952_v20 = vpack.c.bf16 %v10050_v11, %v10049_v7  ;;  %v10628_v7 = vld [vmem:[%s13029_s0 + $0xa8] ss:$12 sps:$4 sm:$0xff]  }
 0xd6f   : > { %4342 = vmatpush1.bf16.msra.mxu1 %v10599_v8  ;;  %v3889_v15 = vpop.f32.mrf.mxu1  ;;  %v10633_v8 = vld [vmem:[%s13029_s0 + $0x94] ss:$12 sps:$4 sm:$0xff]   ;;  %v11810_v11 = vld [vmem:[%s13030_s1 + $0x8] sm:$0xff]  }
 0xd70   : > { %4343 = vmatprep.subr.bf16.mxu1 %v10604_v9  ;;  %v3951_v36 = vpack.c.bf16 %v3889_v15, %v3886_v48  ;;  %v10639_v15 = vld [vmem:[%s13029_s0 + $0x64] ss:$12 sps:$4 sm:$0xff]  }
 0xd72   : > { %4236 = vmatmul.mubr.bf16.gmra.mxu1 %v3950_v46  ;;  %4309 = vmatmul.mubr.bf16.gmra.mxu0 %v3950_v46 }
 0xd73   : > { %4344 = vmatpush1.bf16.msra.mxu1 %v10602_v47  ;;  %4245 = vmatprep.mubr.bf16.mxu1 %v12979_v5  ;;  %v10631_v47 = vld [vmem:[%s13029_s0 + $0x90] ss:$12 sps:$4 sm:$0xff]  }
 0xd74   : > { %4345 = vmatprep.subr.bf16.mxu1 %v10607_v49  ;;  %4318 = vmatprep.mubr.bf16.mxu0 %v12979_v5 }
 0xd77   : > { %4346 = vmatpush1.bf16.msra.mxu1 %v10605_v13 }
 0xd78   : > { %4347 = vmatprep.subr.bf16.mxu1 %v10610_v14  ;;  %v10634_v14 = vld [vmem:[%s13029_s0 + $0x78] ss:$12 sps:$4 sm:$0xff]  }
 0xd7a   : > { %4246 = vmatmul.mubr.bf16.gmra.mxu1 %v3951_v36  ;;  %4319 = vmatmul.mubr.bf16.gmra.mxu0 %v3951_v36 }
 0xd7b   : > { %4348 = vmatpush1.bf16.msra.mxu1 %v10608_v34  ;;  %4255 = vmatprep.mubr.bf16.mxu1 %v12979_v5 }
 0xd7c   : > { %4349 = vmatprep.subr.bf16.mxu1 %v10613_v17  ;;  %4328 = vmatprep.mubr.bf16.mxu0 %v12979_v5  ;;  %v10637_v17 = vld [vmem:[%s13029_s0 + $0x60] ss:$12 sps:$4 sm:$0xff]  }
 0xd7f   : > { %4350 = vmatpush1.bf16.msra.mxu1 %v10611_v18 }
 0xd80   : > { %4351 = vmatprep.subr.bf16.mxu1 %v10616_v19  ;;  %v11819_v19 = vld [vmem:[%s13030_s1 + $0x10] sm:$0xff]  }
 0xd82   : > { %4256 = vmatmul.mubr.bf16.gmra.mxu1 %v3952_v20  ;;  %4329 = vmatmul.mubr.bf16.gmra.mxu0 %v3952_v20 }
 0xd83   : > { %4352 = vmatpush1.bf16.msra.mxu1 %v10614_v2  ;;  %4371 = vmatprep.mubr.bf16.mxu1 %v12979_v5 }
 0xd84   : > { %4353 = vmatprep.subr.bf16.mxu1 %v10619_v21  ;;  %4493 = vmatprep.mubr.bf16.mxu0 %v12979_v5 }
 0xd87   : > { %4354 = vmatpush1.bf16.msra.mxu1 %v10617_v22 }
 0xd8a   : > { %4372 = vmatmul.mubr.bf16.vlgmr.msra.gmra.mxu1 %v3949_v6  ;;  %v11800_v6 = vld [vmem:[%s13030_s1] sm:$0xff]  }
 0xd8b   : > { %4381 = vmatprep.mubr.bf16.mxu1 %v12979_v5 }
 0xd92   : > { %4382 = vmatmul.mubr.bf16.gmra.mxu1 %v3950_v46  ;;  %v10636_v46 = vld [vmem:[%s13029_s0 + $0x7c] ss:$12 sps:$4 sm:$0xff]  }
 0xd93   : > { %4391 = vmatprep.mubr.bf16.mxu1 %v12979_v5 }
 0xd9a   : > { %4392 = vmatmul.mubr.bf16.gmra.mxu1 %v3951_v36 }
 0xd9b   : > { %4401 = vmatprep.mubr.bf16.mxu1 %v12979_v5 }
 0xda2   : > { %4402 = vmatmul.mubr.bf16.gmra.mxu1 %v3952_v20 }
 0xda3   : > { %4614 = vmatprep.mubr.bf16.mxu1 %v12979_v5 }
 0xe2a   : > { %v4227_v12 = vpop.f32.mrf.mxu1 }
 0xe2c   : > { %v4229_v23 = vpop.f32.mrf.mxu1 }
 0xe2e   : > { %v4231_v57 = vpop.f32.mrf.mxu1 }
 0xe2f   : > { %v4420_v3 = vpack.c.bf16 %v4231_v57, %v4227_v12  ;;  %v11825_v57 = vld [vmem:[%s13030_s1 + $0x18] sm:$0xff]   ;;  %s13036_s1 = sld [smem:[#allocation19_spill]] }
 0xe30   : > { %v4233_v24 = vpop.f32.mrf.mxu1 }
 0xe31   : > { %v4421_v62 = vpack.c.bf16 %v4233_v24, %v4229_v23 }
 0xe32   : > { %v4237_v56 = vpop.f32.mrf.mxu1 }
 0xe34   : > { %v4239_v25 = vpop.f32.mrf.mxu1 }
 0xe36   : > { %v4241_v26 = vpop.f32.mrf.mxu1 }
 0xe37   : > { %v4422_v45 = vpack.c.bf16 %v4241_v26, %v4237_v56  ;;  %v11833_v26 = vld [vmem:[%s13031_s2] sm:$0xff]  }
 0xe38   : > { %v4243_v27 = vpop.f32.mrf.mxu1 }
 0xe39   : > { %v4423_v43 = vpack.c.bf16 %v4243_v27, %v4239_v25  ;;  %v11839_v27 = vld [vmem:[%s13031_s2 + $0x8] sm:$0xff]  }
 0xe3a   : > { %v4247_v28 = vpop.f32.mrf.mxu1 }
 0xe3c   : > { %v4249_v29 = vpop.f32.mrf.mxu1 }
 0xe3e   : > { %v4251_v10 = vpop.f32.mrf.mxu1 }
 0xe3f   : > { %v4424_v41 = vpack.c.bf16 %v4251_v10, %v4247_v28  ;;  %v11845_v28 = vld [vmem:[%s13031_s2 + $0x10] sm:$0xff]   ;;  %v10642_v10 = vld [vmem:[%s13029_s0 + $0x4c] ss:$12 sps:$4 sm:$0xff]  }
 0xe40   : > { %v4253_v30 = vpop.f32.mrf.mxu1 }
 0xe41   : > { %v4425_v39 = vpack.c.bf16 %v4253_v30, %v4249_v29  ;;  %v11851_v29 = vld [vmem:[%s13031_s2 + $0x18] sm:$0xff]   ;;  %v10640_v30 = vld [vmem:[%s13029_s0 + $0x48] ss:$12 sps:$4 sm:$0xff]  }
 0xe42   : > { %v4257_v31 = vpop.f32.mrf.mxu1 }
 0xe44   : > { %v4259_v16 = vpop.f32.mrf.mxu1 }
 0xe46   : > { %v4261_v32 = vpop.f32.mrf.mxu1 }
 0xe47   : > { %v4426_v37 = vpack.c.bf16 %v4261_v32, %v4257_v31  ;;  %v10645_v31 = vld [vmem:[%s13029_s0 + $0x34] ss:$12 sps:$4 sm:$0xff]   ;;  %v10648_v32 = vld [vmem:[%s13029_s0 + $0x1c] ss:$12 sps:$4 sm:$0xff]  }
 0xe48   : > { %v4263_v33 = vpop.f32.mrf.mxu1 }
 0xe49   : > { %v4427_v35 = vpack.c.bf16 %v4263_v33, %v4259_v16  ;;  %v10643_v16 = vld [vmem:[%s13029_s0 + $0x30] ss:$12 sps:$4 sm:$0xff]   ;;  %v10646_v33 = vld [vmem:[%s13029_s0 + $0x18] ss:$12 sps:$4 sm:$0xff]  }
 0xe4a   : > { %v11792_v38 = vpop.f32.mrf.mxu1 }
 0xe4b   : > { %4469 = vmatprep.subr.bf16.mxu0 %v4427_v35  ;;  %v10651_v35 = vld [vmem:[%s13029_s0 + $0x4] ss:$12 sps:$4 sm:$0xff]  }
 0xe4c   : > { %v11794_v40 = vpop.f32.mrf.mxu1  ;;  %4470 = vmatpush1.bf16.msra.mxu0 %v4426_v37  ;;  %v10649_v37 = vld [vmem:[%s13029_s0] ss:$12 sps:$4 sm:$0xff]  }
 0xe4d   : > { %4471 = vmatprep.subr.bf16.mxu0 %v4425_v39  ;;  %v10655_v39 = vld [vmem:[%s13029_s0 + $0x170] ss:$12 sps:$4 sm:$0xff]  }
 0xe4e   : > { %v11796_v42 = vpop.f32.mrf.mxu1 }
 0xe4f   : > { %v4542_v25 = vpack.c.bf16 %v11796_v42, %v11792_v38  ;;  %v10654_v38 = vld [vmem:[%s13029_s0 + $0x16c] ss:$12 sps:$4 sm:$0xff]   ;;  %v10659_v42 = vld [vmem:[%s13029_s0 + $0x154] ss:$12 sps:$4 sm:$0xff]  }
 0xe50   : > { %v4379_v44 = vpop.f32.mrf.mxu1  ;;  %4472 = vmatpush1.bf16.msra.mxu0 %v4424_v41  ;;  %v10656_v41 = vld [vmem:[%s13029_s0 + $0xb0] ss:$12 sps:$4 sm:$0xff]  }
 0xe51   : > { %4473 = vmatprep.subr.bf16.mxu0 %v4423_v43  ;;  %v4543_v56 = vpack.c.bf16 %v4379_v44, %v11794_v40  ;;  %v10652_v40 = vld [vmem:[%s13029_s0 + $0x168] ss:$12 sps:$4 sm:$0xff]   ;;  %v10660_v43 = vld [vmem:[%s13029_s0 + $0x158] ss:$12 sps:$4 sm:$0xff]   ;;  %v10657_v44 = vld [vmem:[%s13029_s0 + $0x150] ss:$12 sps:$4 sm:$0xff]  }
 0xe52   : > { %v4383_v50 = vpop.f32.mrf.mxu1 }
 0xe54   : > { %v4385_v63 = vpop.f32.mrf.mxu1  ;;  %4474 = vmatpush1.bf16.msra.mxu0 %v4422_v45  ;;  %v10661_v45 = vld [vmem:[%s13029_s0 + $0x98] ss:$12 sps:$4 sm:$0xff]  }
 0xe55   : > { %4475 = vmatprep.subr.bf16.mxu0 %v4421_v62  ;;  %v10665_v62 = vld [vmem:[%s13029_s0 + $0x140] ss:$12 sps:$4 sm:$0xff]  }
 0xe56   : > { %v4387_v4 = vpop.f32.mrf.mxu1 }
 0xe57   : > { %v4544_v24 = vpack.c.bf16 %v4387_v4, %v4383_v50  ;;  %v10664_v50 = vld [vmem:[%s13029_s0 + $0x13c] ss:$12 sps:$4 sm:$0xff]  }
 0xe58   : > { %v4389_v60 = vpop.f32.mrf.mxu1  ;;  %4476 = vmatpush1.bf16.msra.mxu0 %v4420_v3  ;;  %v10669_v3 = vld [vmem:[%s13029_s0 + $0x124] ss:$12 sps:$4 sm:$0xff]   ;;  %v10670_v4 = vld [vmem:[%s13029_s0 + $0x128] ss:$12 sps:$4 sm:$0xff]  }
 0xe59   : > { %5075 = vmatprep.subr.bf16.mxu0 %v10630_v0  ;;  %v4545_v23 = vpack.c.bf16 %v4389_v60, %v4385_v63  ;;  %v10662_v63 = vld [vmem:[%s13029_s0 + $0x138] ss:$12 sps:$4 sm:$0xff]   ;;  %v10666_v0 = vld [vmem:[%s13029_s0 + $0x80] ss:$12 sps:$4 sm:$0xff]  }
 0xe5a   : > { %v4393_v9 = vpop.f32.mrf.mxu1  ;;  %v10667_v60 = vld [vmem:[%s13029_s0 + $0x120] ss:$12 sps:$4 sm:$0xff]  }
 0xe5b   : > { %9070 = vmatmul.mubr.msk.bf16.vlgmr.msra.gmra.mxu0 %vm4448_vm11, %v11800_v6 }
 0xe5c   : > { %v4395_v48 = vpop.f32.mrf.mxu1  ;;  %4503 = vmatprep.mubr.bf16.mxu0 %v12979_v5  ;;  %5076 = vmatpush1.bf16.msra.mxu0 %v10628_v7  ;;  %v10671_v7 = vld [vmem:[%s13029_s0 + $0x68] ss:$12 sps:$4 sm:$0xff]  }
 0xe5d   : > { %5077 = vmatprep.subr.bf16.mxu0 %v10633_v8  ;;  %v10674_v8 = vld [vmem:[%s13029_s0 + $0x10c] ss:$12 sps:$4 sm:$0xff]  }
 0xe5e   : > { %v4397_v49 = vpop.f32.mrf.mxu1 }
 0xe5f   : > { %v4546_v12 = vpack.c.bf16 %v4397_v49, %v4393_v9  ;;  %v10675_v9 = vld [vmem:[%s13029_s0 + $0x110] ss:$12 sps:$4 sm:$0xff]   ;;  %v10680_v49 = vld [vmem:[%s13029_s0 + $0xf8] ss:$12 sps:$4 sm:$0xff]  }
 0xe60   : > { %v4399_v13 = vpop.f32.mrf.mxu1  ;;  %5078 = vmatpush1.bf16.msra.mxu0 %v10631_v47  ;;  %v10676_v47 = vld [vmem:[%s13029_s0 + $0x50] ss:$12 sps:$4 sm:$0xff]  }
 0xe61   : > { %5079 = vmatprep.subr.bf16.mxu0 %v10636_v46  ;;  %v4547_v22 = vpack.c.bf16 %v4399_v13, %v4395_v48  ;;  %v10672_v48 = vld [vmem:[%s13029_s0 + $0x108] ss:$12 sps:$4 sm:$0xff]   ;;  %v10677_v13 = vld [vmem:[%s13029_s0 + $0xf0] ss:$12 sps:$4 sm:$0xff]  }
 0xe62   : > { %v4403_v34 = vpop.f32.mrf.mxu1  ;;  %v10679_v46 = vld [vmem:[%s13029_s0 + $0xf4] ss:$12 sps:$4 sm:$0xff]  }
 0xe63   : > { %9071 = vmatmul.mubr.msk.bf16.gmra.mxu0 %vm4448_vm11, %v11810_v11 }
 0xe64   : > { %v4405_v36 = vpop.f32.mrf.mxu1  ;;  %4513 = vmatprep.mubr.bf16.mxu0 %v12979_v5  ;;  %5080 = vmatpush1.bf16.msra.mxu0 %v10634_v14  ;;  %v10681_v14 = vld [vmem:[%s13029_s0 + $0x38] ss:$12 sps:$4 sm:$0xff]  }
 0xe65   : > { %5081 = vmatprep.subr.bf16.mxu0 %v10639_v15  ;;  %v10684_v15 = vld [vmem:[%s13029_s0 + $0xdc] ss:$12 sps:$4 sm:$0xff]  }
 0xe66   : > { %v4407_v18 = vpop.f32.mrf.mxu1 }
 0xe67   : > { %v4548_v21 = vpack.c.bf16 %v4407_v18, %v4403_v34  ;;  %v10685_v34 = vld [vmem:[%s13029_s0 + $0xe0] ss:$12 sps:$4 sm:$0xff]   ;;  %v10689_v18 = vld [vmem:[%s13029_s0 + $0xc4] ss:$12 sps:$4 sm:$0xff]  }
 0xe68   : > { %v4409_v2 = vpop.f32.mrf.mxu1  ;;  %5082 = vmatpush1.bf16.msra.mxu0 %v10637_v17  ;;  %v10686_v17 = vld [vmem:[%s13029_s0 + $0x20] ss:$12 sps:$4 sm:$0xff]  }
 0xe69   : > { %v4549_v20 = vpack.c.bf16 %v4409_v2, %v4405_v36  ;;  %5083 = vmatprep.subr.bf16.mxu0 %v10642_v10  ;;  %v10682_v36 = vld [vmem:[%s13029_s0 + $0xd8] ss:$12 sps:$4 sm:$0xff]   ;;  %v10690_v2 = vld [vmem:[%s13029_s0 + $0xc8] ss:$12 sps:$4 sm:$0xff]  }
 0xe6b   : > { %9072 = vmatmul.mubr.msk.bf16.gmra.mxu0 %vm4448_vm11, %v11819_v19  ;;  %4590 = vmatprep.subr.bf16.mxu1 %v4549_v20  ;;  %v10687_v20 = vld [vmem:[%s13029_s0 + $0xc0] ss:$12 sps:$4 sm:$0xff]  }
 0xe6c   : > { %4591 = vmatpush1.bf16.msra.mxu1 %v4548_v21  ;;  %4523 = vmatprep.mubr.bf16.mxu0 %v12979_v5  ;;  %v10691_v21 = vld [vmem:[%s13029_s0 + $0x8] ss:$12 sps:$4 sm:$0xff]   ;;  %s13032_s0 = sld [smem:[#allocation15_spill]] }
 0xe6d   : > { %4592 = vmatprep.subr.bf16.mxu1 %v4547_v22  ;;  %5084 = vmatpush1.bf16.msra.mxu0 %v10640_v30  ;;  %v4300_v22 = vpop.f32.mrf.mxu0 }
 0xe6e   : > { %5085 = vmatprep.subr.bf16.mxu0 %v10645_v31 }
 0xe70   : > { %4593 = vmatpush1.bf16.msra.mxu1 %v4546_v12  ;;  %v4302_v12 = vpop.f32.mrf.mxu0 }
 0xe71   : > { %4594 = vmatprep.subr.bf16.mxu1 %v4545_v23  ;;  %5086 = vmatpush1.bf16.msra.mxu0 %v10643_v16 }
 0xe72   : > { %5087 = vmatprep.subr.bf16.mxu0 %v10648_v32  ;;  %v4304_v23 = vpop.f32.mrf.mxu0 }
 0xe73   : > { %9073 = vmatmul.mubr.msk.bf16.gmra.mxu0 %vm4448_vm11, %v11825_v57 }
 0xe74   : > { %4595 = vmatpush1.bf16.msra.mxu1 %v4544_v24  ;;  %v4306_v24 = vpop.f32.mrf.mxu0 }
 0xe75   : > { %4596 = vmatprep.subr.bf16.mxu1 %v4543_v56  ;;  %5088 = vmatpush1.bf16.msra.mxu0 %v10646_v33 }
 0xe76   : > { %5089 = vmatprep.subr.bf16.mxu0 %v10651_v35  ;;  %v4310_v56 = vpop.f32.mrf.mxu0 }
 0xe78   : > { %4597 = vmatpush1.bf16.msra.mxu1 %v4542_v25  ;;  %v4312_v25 = vpop.f32.mrf.mxu0 }
 0xe79   : > { %5090 = vmatpush1.bf16.msra.mxu0 %v10649_v37  ;;  %9553 = vmatprep.subr.bf16.mxu1 %v10655_v39 }
 0xe7a   : > { %5091 = vmatprep.subr.bf16.mxu0 %v10654_v38  ;;  %v4314_v10 = vpop.f32.mrf.mxu0 }
 0xe7b   : > { %9078 = vmatmul.mubr.msk.bf16.vlgmr.msra.gmra.mxu1 %vm4448_vm11, %v11833_v26 }
 0xe7c   : > { %4624 = vmatprep.mubr.bf16.mxu1 %v12979_v5  ;;  %9554 = vmatpush3.bf16.msra.mxu1 %v10656_v41  ;;  %v4316_v30 = vpop.f32.mrf.mxu0 }
 0xe7d   : > { %5092 = vmatpush2.bf16.msra.mxu0 %v10652_v40  ;;  %9555 = vmatprep.subr.bf16.mxu1 %v10660_v43 }
 0xe7e   : > { %5093 = vmatprep.subr.bf16.mxu0 %v10659_v42  ;;  %v11895_v31 = vpop.f32.mrf.mxu0 }
 0xe80   : > { %9556 = vmatpush3.bf16.msra.mxu1 %v10661_v45  ;;  %v11897_v16 = vpop.f32.mrf.mxu0 }
 0xe81   : > { %5094 = vmatpush2.bf16.msra.mxu0 %v10657_v44  ;;  %9557 = vmatprep.subr.bf16.mxu1 %v10665_v62  ;;  %v4673_v62 = vlaneseq }
 0xe82   : > { %5095 = vmatprep.subr.bf16.mxu0 %v10664_v50  ;;  %v11899_v32 = vpop.f32.mrf.mxu0 }
 0xe83   : > { %9079 = vmatmul.mubr.msk.bf16.gmra.mxu1 %vm4448_vm11, %v11839_v27 }
 0xe84   : > { %4634 = vmatprep.mubr.bf16.mxu1 %v12979_v5  ;;  %9558 = vmatpush3.bf16.msra.mxu1 %v10666_v0  ;;  %v11901_v33 = vpop.f32.mrf.mxu0  ;;  %v11911_v0 = vshrl.u32 %v4673_v62, 7 }
 0xe85   : > { %5096 = vmatpush2.bf16.msra.mxu0 %v10662_v63  ;;  %9559 = vmatprep.subr.bf16.mxu1 %v10670_v4 }
 0xe86   : > { %5097 = vmatprep.subr.bf16.mxu0 %v10669_v3  ;;  %v11903_v35 = vpop.f32.mrf.mxu0  ;;  %13033 = vst [vmem:[#allocation26_spill] sm:$0xff] %v11911_v0  ;;  %v12978_v4 = vsub.s32 0, %v11911_v0 }
 0xe88   : > { %9560 = vmatpush3.bf16.msra.mxu1 %v10671_v7  ;;  %v11905_v37 = vpop.f32.mrf.mxu0  ;;  %v12977_v7 = vsub.s32 1, %v11911_v0 }
 0xe89   : > { %5098 = vmatpush2.bf16.msra.mxu0 %v10667_v60  ;;  %9561 = vmatprep.subr.bf16.mxu1 %v10675_v9  ;;  %v4671_v60 = vld [vmem:[%s13032_s0] sm:$0x3]  ;;  %s13034_s0 = sld [smem:[#allocation21_spill]] }
 0xe8a   : > { %5099 = vmatprep.subr.bf16.mxu0 %v10674_v8  ;;  %v11907_v38 = vpop.f32.mrf.mxu0 }
 0xe8b   : > { %9080 = vmatmul.mubr.msk.bf16.gmra.mxu1 %vm4448_vm11, %v11845_v28 }
 0xe8c   : > { %4644 = vmatprep.mubr.bf16.mxu1 %v12979_v5  ;;  %9562 = vmatpush3.bf16.msra.mxu1 %v10676_v47  ;;  %v11909_v39 = vpop.f32.mrf.mxu0 }
 0xe8d   : > { %5100 = vmatpush2.bf16.msra.mxu0 %v10672_v48  ;;  %9563 = vmatprep.subr.bf16.mxu1 %v10680_v49 }
 0xe8e   : > { %5101 = vmatprep.subr.bf16.mxu0 %v10679_v46  ;;  %v11918_v46 = vrot.slane %v4671_v60, %v12978_v4 }
 0xe90   : > { %9564 = vmatpush3.bf16.msra.mxu1 %v10681_v14 }
 0xe91   : > { %5102 = vmatpush2.bf16.msra.mxu0 %v10677_v13  ;;  %9565 = vmatprep.subr.bf16.mxu1 %v10685_v34  ;;  %v11922_v34 = vrot.slane %v4671_v60, %v12977_v7 }
 0xe92   : > { %5103 = vmatprep.subr.bf16.mxu0 %v10684_v15 }
 0xe93   : > { %9081 = vmatmul.mubr.msk.bf16.gmra.mxu1 %vm4448_vm11, %v11851_v29 }
 0xe94   : > { %9566 = vmatpush3.bf16.msra.mxu1 %v10686_v17 }
 0xe95   : > { %5104 = vmatpush2.bf16.msra.mxu0 %v10682_v36  ;;  %9567 = vmatprep.subr.bf16.mxu1 %v10690_v2 }
 0xe96   : > { %5105 = vmatprep.subr.bf16.mxu0 %v10689_v18 }
 0xe98   : > { %9568 = vmatpush3.bf16.msra.mxu1 %v10691_v21 }
 0xe99   : > { %5106 = vmatpush2.bf16.msra.mxu0 %v10687_v20 }
 0xf1b   : > { %v4495_v40 = vpop.f32.mrf.mxu0 }
 0xf1c   : > { %v4496_v9 = vadd.f32 %v4495_v40, %v4300_v22 }
 0xf1d   : > { %v4497_v41 = vpop.f32.mrf.mxu0 }
 0xf1e   : > { %v4498_v48 = vadd.f32 %v4497_v41, %v4302_v12 }
 0xf1f   : > { %v4499_v42 = vpop.f32.mrf.mxu0 }
 0xf20   : > { %v4500_v13 = vadd.f32 %v4499_v42, %v4304_v23 }
 0xf21   : > { %v4501_v43 = vpop.f32.mrf.mxu0 }
 0xf22   : > { %v4502_v18 = vadd.f32 %v4501_v43, %v4306_v24 }
 0xf23   : > { %v4505_v44 = vpop.f32.mrf.mxu0 }
 0xf24   : > { %v4506_v42 = vadd.f32 %v4505_v44, %v4310_v56 }
 0xf25   : > { %v4507_v45 = vpop.f32.mrf.mxu0 }
 0xf26   : > { %v4508_v23 = vadd.f32 %v4507_v45, %v4312_v25 }
 0xf27   : > { %v4509_v50 = vpop.f32.mrf.mxu0 }
 0xf28   : > { %v4510_v62 = vadd.f32 %v4509_v50, %v4314_v10 }
 0xf29   : > { %v4511_v63 = vpop.f32.mrf.mxu0 }
 0xf2b   : > { %v4515_v3 = vpop.f32.mrf.mxu0 }
 0xf2d   : > { %v4517_v47 = vpop.f32.mrf.mxu0 }
 0xf2f   : > { %v4519_v2 = vpop.f32.mrf.mxu0 }
 0xf3b   : > { %v4616_v8 = vpop.f32.mrf.mxu1 }
 0xf3c   : > { %v4655_v14 = vadd.f32 %v4616_v8, %v4496_v9  ;;  %v4521_v8 = vpop.f32.mrf.mxu0 }
 0xf3d   : > { %v4618_v49 = vpop.f32.mrf.mxu1 }
 0xf3e   : > { %v4656_v15 = vadd.f32 %v4618_v49, %v4498_v48  ;;  %v4683_v21 = vadd.f32 %v11918_v46, %v4655_v14  ;;  %v4525_v25 = vpop.f32.mrf.mxu0 }
 0xf3f   : > { %v4620_v36 = vpop.f32.mrf.mxu1 }
 0xf40   : > { %v4657_v17 = vadd.f32 %v4620_v36, %v4500_v13  ;;  %v4684_v22 = vadd.f32 %v11922_v34, %v4656_v15  ;;  %v4715_v49 = vmul.f32 0.2, %v4683_v21  ;;  %v4512_v36 = vadd.f32 %v4511_v63, %v4316_v30 }
 0xf41   : > { %v4622_v20 = vpop.f32.mrf.mxu1  ;;  %vm4699_vm15 = vcmp.ge.f32.partialorder %v4683_v21, 0.0  ;;  %v4518_v30 = vadd.f32 %v4517_v47, %v11897_v16 }
 0xf42   : > { %v4685_v12 = vadd.f32 %v11918_v46, %v4657_v17  ;;  %v4658_v40 = vadd.f32 %v4622_v20, %v4502_v18  ;;  %v4716_v24 = vmul.f32 0.2, %v4684_v22  ;;  %vm4700_vm13 = vcmp.ge.f32.partialorder %v4684_v22, 0.0 }
 0xf43   : > { %v4626_v41 = vpop.f32.mrf.mxu1 }
 0xf44   : > { %v4717_v9 = vmul.f32 0.2, %v4685_v12  ;;  %v4686_v60 = vadd.f32 %v11922_v34, %v4658_v40  ;;  %vm4701_vm12 = vcmp.ge.f32.partialorder %v4685_v12, 0.0  ;;  %v4659_v14 = vadd.f32 %v4626_v41, %v4506_v42 }
 0xf45   : > { %v4628_v48 = vpop.f32.mrf.mxu1  ;;  %v4732_v20 = vsel %vm4700_vm13, %v4684_v22, %v4716_v24  ;;  %v4731_v40 = vsel %vm4699_vm15, %v4683_v21, %v4715_v49  ;;  %v4516_v42 = vadd.f32 %v4515_v3, %v11895_v31  ;;  %v4522_v3 = vadd.f32 %v4521_v8, %v11901_v33 }
 0xf46   : > { %v4660_v43 = vadd.f32 %v4628_v48, %v4508_v23  ;;  %v4718_v13 = vmul.f32 0.2, %v4686_v60  ;;  %vm4702_vm14 = vcmp.ge.f32.partialorder %v4686_v60, 0.0  ;;  %v4733_v56 = vsel %vm4701_vm12, %v4685_v12, %v4717_v9  ;;  %v4527_v9 = vpop.f32.mrf.mxu0 }
 0xf47   : > { %v4630_v15 = vpop.f32.mrf.mxu1  ;;  %v4687_v23 = vadd.f32 %v11918_v46, %v4659_v14  ;;  %v11934_v63 = vpack.c.bf16 %v4733_v56, %v4731_v40  ;;  %v4528_v33 = vadd.f32 %v4527_v9, %v11905_v37 }
 0xf48   : > { %v4661_v17 = vadd.f32 %v4630_v15, %v4510_v62  ;;  %v4688_v10 = vadd.f32 %v11922_v34, %v4660_v43  ;;  %v4734_v45 = vsel %vm4702_vm14, %v4686_v60, %v4718_v13  ;;  %v4520_v62 = vadd.f32 %v4519_v2, %v11899_v32  ;;  %v4529_v49 = vpop.f32.mrf.mxu0 }
 0xf49   : > { %v4632_v44 = vpop.f32.mrf.mxu1  ;;  %v11931_v41 = vpack.c.bf16 %v4734_v45, %v4732_v20  ;;  %v4719_v47 = vmul.f32 0.2, %v4687_v23  ;;  %vm4703_vm5 = vcmp.ge.f32.partialorder %v4687_v23, 0.0 }
 0xf4a   : > { %v4689_v50 = vadd.f32 %v11918_v46, %v4661_v17  ;;  %v4662_v18 = vadd.f32 %v4632_v44, %v4512_v36  ;;  %v4720_v60 = vmul.f32 0.2, %v4688_v10  ;;  %vm4704_vm4 = vcmp.ge.f32.partialorder %v4688_v10, 0.0 }
 0xf4b   : > { %v4636_v48 = vpop.f32.mrf.mxu1  ;;  %5107 = vmatprep.mubr.bf16.mxu0 %v11931_v41  ;;  %5180 = vmatprep.mubr.bf16.mxu1 %v11931_v41  ;;  %v4735_v20 = vsel %vm4703_vm5, %v4687_v23, %v4719_v47 }
 0xf4c   : > { %v4690_v12 = vadd.f32 %v11922_v34, %v4662_v18  ;;  %v4721_v43 = vmul.f32 0.2, %v4689_v50  ;;  %vm4705_vm2 = vcmp.ge.f32.partialorder %v4689_v50, 0.0  ;;  %5108 = vmatmul.mubr.bf16.vlgmr.msra.gmra.mxu0 %v11934_v63  ;;  %5181 = vmatmul.mubr.bf16.vlgmr.msra.gmra.mxu1 %v11934_v63  ;;  %v4663_v31 = vadd.f32 %v4636_v48, %v4516_v42 }
 0xf4d   : > { %v4638_v21 = vpop.f32.mrf.mxu1  ;;  %v4736_v56 = vsel %vm4704_vm4, %v4688_v10, %v4720_v60  ;;  %v4526_v48 = vadd.f32 %v4525_v25, %v11903_v35 }
 0xf4e   : > { %v4722_v22 = vmul.f32 0.2, %v4690_v12  ;;  %v4664_v16 = vadd.f32 %v4638_v21, %v4518_v30  ;;  %vm4706_vm3 = vcmp.ge.f32.partialorder %v4690_v12, 0.0  ;;  %v4737_v15 = vsel %vm4705_vm2, %v4689_v50, %v4721_v43  ;;  %v4531_v30 = vpop.f32.mrf.mxu0 }
 0xf4f   : > { %v4640_v32 = vpop.f32.mrf.mxu1  ;;  %v4691_v44 = vadd.f32 %v11918_v46, %v4663_v31  ;;  %v11952_v40 = vpack.c.bf16 %v4737_v15, %v4735_v20  ;;  %v4530_v50 = vadd.f32 %v4529_v49, %v11907_v38  ;;  %v4532_v25 = vadd.f32 %v4531_v30, %v11909_v39 }
 0xf50   : > { %v4665_v2 = vadd.f32 %v4640_v32, %v4520_v62  ;;  %v4692_v24 = vadd.f32 %v11922_v34, %v4664_v16  ;;  %v4738_v14 = vsel %vm4706_vm3, %v4690_v12, %v4722_v22 }
 0xf51   : > { %v4642_v13 = vpop.f32.mrf.mxu1  ;;  %v11948_v18 = vpack.c.bf16 %v4738_v14, %v4736_v56  ;;  %v4723_v62 = vmul.f32 0.2, %v4691_v44  ;;  %vm4707_vm9 = vcmp.ge.f32.partialorder %v4691_v44, 0.0 }
 0xf52   : > { %v4693_v36 = vadd.f32 %v11918_v46, %v4665_v2  ;;  %v4666_v17 = vadd.f32 %v4642_v13, %v4522_v3  ;;  %v4724_v12 = vmul.f32 0.2, %v4692_v24  ;;  %vm4708_vm8 = vcmp.ge.f32.partialorder %v4692_v24, 0.0 }
 0xf53   : > { %v4646_v45 = vpop.f32.mrf.mxu1  ;;  %5117 = vmatprep.mubr.bf16.mxu0 %v11948_v18  ;;  %5188 = vmatprep.mubr.bf16.mxu1 %v11948_v18  ;;  %v4739_v2 = vsel %vm4707_vm9, %v4691_v44, %v4723_v62 }
 0xf54   : > { %v4694_v8 = vadd.f32 %v11922_v34, %v4666_v17  ;;  %v4725_v42 = vmul.f32 0.2, %v4693_v36  ;;  %vm4709_vm6 = vcmp.ge.f32.partialorder %v4693_v36, 0.0  ;;  %5118 = vmatmul.mubr.bf16.gmra.mxu0 %v11952_v40  ;;  %5189 = vmatmul.mubr.bf16.gmra.mxu1 %v11952_v40  ;;  %v4667_v35 = vadd.f32 %v4646_v45, %v4526_v48 }
 0xf55   : > { %v4648_v10 = vpop.f32.mrf.mxu1  ;;  %v4740_v31 = vsel %vm4708_vm8, %v4692_v24, %v4724_v12 }
 0xf56   : > { %v4726_v23 = vmul.f32 0.2, %v4694_v8  ;;  %v4668_v37 = vadd.f32 %v4648_v10, %v4528_v33  ;;  %vm4710_vm7 = vcmp.ge.f32.partialorder %v4694_v8, 0.0  ;;  %v4741_v22 = vsel %vm4709_vm6, %v4693_v36, %v4725_v42 }
 0xf57   : > { %v4650_v38 = vpop.f32.mrf.mxu1  ;;  %v4695_v32 = vadd.f32 %v11918_v46, %v4667_v35  ;;  %v11968_v13 = vpack.c.bf16 %v4741_v22, %v4739_v2 }
 0xf58   : > { %v4696_v9 = vadd.f32 %v11922_v34, %v4668_v37  ;;  %v4669_v60 = vadd.f32 %v4650_v38, %v4530_v50  ;;  %v4742_v21 = vsel %vm4710_vm7, %v4694_v8, %v4726_v23 }
 0xf59   : > { %v4652_v43 = vpop.f32.mrf.mxu1  ;;  %v11965_v3 = vpack.c.bf16 %v4742_v21, %v4740_v31  ;;  %vm4711_vm14 = vcmp.ge.f32.partialorder %v4695_v32, 0.0 }
 0xf5a   : > { %v4697_v16 = vadd.f32 %v11918_v46, %v4669_v60  ;;  %v4670_v47 = vadd.f32 %v4652_v43, %v4532_v25  ;;  %v4728_v49 = vmul.f32 0.2, %v4696_v9  ;;  %vm4712_vm10 = vcmp.ge.f32.partialorder %v4696_v9, 0.0 }
 0xf5b   : > { %5127 = vmatprep.mubr.bf16.mxu0 %v11965_v3  ;;  %5196 = vmatprep.mubr.bf16.mxu1 %v11965_v3  ;;  %v4727_v46 = vmul.f32 0.2, %v4695_v32 }
 0xf5c   : > { %v4698_v39 = vadd.f32 %v11922_v34, %v4670_v47  ;;  %v4729_v14 = vmul.f32 0.2, %v4697_v16  ;;  %vm4713_vm12 = vcmp.ge.f32.partialorder %v4697_v16, 0.0  ;;  %5128 = vmatmul.mubr.bf16.gmra.mxu0 %v11968_v13  ;;  %5197 = vmatmul.mubr.bf16.gmra.mxu1 %v11968_v13  ;;  %v4744_v24 = vsel %vm4712_vm10, %v4696_v9, %v4728_v49 }
 0xf5d   : > { %v4743_v56 = vsel %vm4711_vm14, %v4695_v32, %v4727_v46 }
 0xf5e   : > { %v4730_v15 = vmul.f32 0.2, %v4698_v39  ;;  %vm4714_vm13 = vcmp.ge.f32.partialorder %v4698_v39, 0.0  ;;  %v4745_v17 = vsel %vm4713_vm12, %v4697_v16, %v4729_v14 }
 0xf5f   : > { %v11978_v44 = vpack.c.bf16 %v4745_v17, %v4743_v56 }
 0xf60   : > { %v4746_v36 = vsel %vm4714_vm13, %v4698_v39, %v4730_v15 }
 0xf61   : > { %v11974_v34 = vpack.c.bf16 %v4746_v36, %v4744_v24 }
 0xf63   : > { %5137 = vmatprep.mubr.bf16.mxu0 %v11974_v34  ;;  %5204 = vmatprep.mubr.bf16.mxu1 %v11974_v34 }
 0xf64   : > { %5138 = vmatmul.mubr.bf16.gmra.mxu0 %v11978_v44  ;;  %5205 = vmatmul.mubr.bf16.gmra.mxu1 %v11978_v44 }
 0xf65   : > { %10059 = vmatprep.mubr.msk.bf16.mxu1 %vm4448_vm11, %v11800_v6  ;;  %10075 = vmatprep.mubr.msk.bf16.mxu0 %vm4448_vm11, %v11833_v26 }
0x100c   : > { %v5109_v45 = vpop.f32.mrf.mxu0  ;;  %v9569_v20 = vpop.f32.mrf.mxu1 }
0x100e   : > { %v11986_v33 = vpop.f32.mrf.mxu0  ;;  %v9570_v8 = vpop.f32.mrf.mxu1 }
0x1010   : > { %v5113_v48 = vpop.f32.mrf.mxu0  ;;  %v9572_v50 = vpop.f32.mrf.mxu1 }
0x1012   : > { %v11988_v30 = vpop.f32.mrf.mxu0  ;;  %v9573_v12 = vpop.f32.mrf.mxu1 }
0x1014   : > { %v5119_v42 = vpop.f32.mrf.mxu0  ;;  %v9575_v10 = vpop.f32.mrf.mxu1 }
0x1016   : > { %v11990_v23 = vpop.f32.mrf.mxu0  ;;  %v9576_v37 = vpop.f32.mrf.mxu1 }
0x1017   : > { %v9577_v0 = vadd.f32 %v9576_v37, %v9575_v10 }
0x1018   : > { %v5123_v62 = vpop.f32.mrf.mxu0  ;;  %v9578_v6 = vpop.f32.mrf.mxu1 }
0x1019   : > { %v5214_v4 = vpack.c.bf16 %v5123_v62, %v5119_v42  ;;  %v10692_v42 = vld [vmem:[%s13034_s0 + $0x38] sm:$0xff]  }
0x101a   : > { %v11992_v35 = vpop.f32.mrf.mxu0  ;;  %v9579_v26 = vpop.f32.mrf.mxu1 }
0x101b   : > { %v9580_v5 = vadd.f32 %v9579_v26, %v9578_v6 }
0x101c   : > { %v5129_v38 = vpop.f32.mrf.mxu0  ;;  %v9581_v25 = vpop.f32.mrf.mxu1 }
0x101e   : > { %v11994_v9 = vpop.f32.mrf.mxu0  ;;  %v9582_v60 = vpop.f32.mrf.mxu1 }
0x101f   : > { %v9583_v56 = vadd.f32 %v9582_v60, %v9581_v25  ;;  %v9571_v25 = vadd.f32 %v9570_v8, %v9569_v20 }
0x1020   : > { %v5133_v43 = vpop.f32.mrf.mxu0  ;;  %v9584_v21 = vpop.f32.mrf.mxu1 }
0x1021   : > { %v5215_v46 = vpack.c.bf16 %v5133_v43, %v5129_v38  ;;  %v5213_v38 = vpack.c.bf16 %v5113_v48, %v5109_v45  ;;  %v9574_v43 = vadd.f32 %v9573_v12, %v9572_v50 }
0x1022   : > { %v11996_v22 = vpop.f32.mrf.mxu0  ;;  %v9585_v16 = vpop.f32.mrf.mxu1 }
0x1023   : > { %v9586_v24 = vadd.f32 %v9585_v16, %v9584_v21  ;;  %v5283_v21 = vpack.c.bf16 %v9580_v5, %v9577_v0  ;;  %v5282_v62 = vpack.c.bf16 %v9574_v43, %v9571_v25  ;;  %v13035_v5 = vmov 0.0   ;;  %v10699_v0 = vld [vmem:[%s13034_s0] sm:$0xff]  }
0x1024   : > { %v5139_v47 = vpop.f32.mrf.mxu0  ;;  %v9587_v31 = vpop.f32.mrf.mxu1  ;;  %v9138_v16 = vld [vmem:[%s13036_s1] ss:$0 sm:$0xff]  ;;  %s13037_s1 = sld [smem:[#allocation23_spill]] }
0x1025   : > { %v5284_v1 = vpack.c.bf16 %v9586_v24, %v9583_v56 }
0x1026   : > { %v11998_v32 = vpop.f32.mrf.mxu0  ;;  %v9588_v2 = vpop.f32.mrf.mxu1 }
0x1027   : > { %v9589_v36 = vadd.f32 %v9588_v2, %v9587_v31 }
0x1028   : > { %v5143_v49 = vpop.f32.mrf.mxu0  ;;  %v9590_v39 = vpop.f32.mrf.mxu1 }
0x1029   : > { %v5216_v14 = vpack.c.bf16 %v5143_v49, %v5139_v47 }
0x102a   : > { %v9591_v15 = vpop.f32.mrf.mxu1 }
0x102b   : > { %v9592_v17 = vadd.f32 %v9591_v15, %v9590_v39  ;;  %10051 = vmatprep.subr.bf16.mxu1 %v5216_v14 }
0x102c   : > { %10052 = vmatpush3.bf16.msra.mxu1 %v5216_v14 }
0x102d   : > { %v5285_v7 = vpack.c.bf16 %v9592_v17, %v9589_v36  ;;  %10053 = vmatprep.subr.bf16.mxu1 %v5215_v46 }
0x102f   : > { %10067 = vmatprep.subr.bf16.mxu0 %v5285_v7 }
0x1030   : > { %10054 = vmatpush3.bf16.msra.mxu1 %v5215_v46  ;;  %10068 = vmatpush3.bf16.msra.mxu0 %v5285_v7  ;;  %v10693_v7 = vld [vmem:[%s13034_s0 + $0x30] sm:$0xff]  }
0x1031   : > { %10055 = vmatprep.subr.bf16.mxu1 %v5214_v4  ;;  %10069 = vmatprep.subr.bf16.mxu0 %v5284_v1 }
0x1034   : > { %10056 = vmatpush3.bf16.msra.mxu1 %v5214_v4  ;;  %10070 = vmatpush3.bf16.msra.mxu0 %v5284_v1  ;;  %v10694_v1 = vld [vmem:[%s13034_s0 + $0x28] sm:$0xff]  }
0x1035   : > { %10057 = vmatprep.subr.bf16.mxu1 %v5213_v38  ;;  %10071 = vmatprep.subr.bf16.mxu0 %v5283_v21 }
0x1038   : > { %10058 = vmatpush3.bf16.msra.mxu1 %v5213_v38  ;;  %10072 = vmatpush3.bf16.msra.mxu0 %v5283_v21 }
0x1039   : > { %10073 = vmatprep.subr.bf16.mxu0 %v5282_v62  ;;  %10083 = vmatprep.subr.bf16.mxu1 %v10692_v42 }
0x103b   : > { %10060 = vmatmul.mubr.msk.bf16.vlgmr.msra.gmra.mxu1 %vm4448_vm11, %v11810_v11  ;;  %v10695_v11 = vld [vmem:[%s13034_s0 + $0x20] sm:$0xff]  }
0x103c   : > { %10074 = vmatpush3.bf16.msra.mxu0 %v5282_v62  ;;  %10084 = vmatpush3.bf16.msra.mxu1 %v10692_v42 }
0x103d   : > { %10085 = vmatprep.subr.bf16.mxu1 %v10693_v7  ;;  %10063 = vmatprep.mubr.msk.bf16.mxu1 %vm4448_vm11, %v11819_v19  ;;  %v10696_v19 = vld [vmem:[%s13034_s0 + $0x18] sm:$0xff]  }
0x103e   : > { %10107 = vmatprep.subr.bf16.mxu0 %v13035_v5 }
0x103f   : > { %10076 = vmatmul.mubr.msk.bf16.vlgmr.msra.gmra.mxu0 %vm4448_vm11, %v11839_v27  ;;  %v10697_v27 = vld [vmem:[%s13034_s0 + $0x10] sm:$0xff]  }
0x1040   : > { %10086 = vmatpush3.bf16.msra.mxu1 %v10693_v7  ;;  %10079 = vmatprep.mubr.msk.bf16.mxu0 %vm4448_vm11, %v11845_v28  ;;  %v10698_v28 = vld [vmem:[%s13034_s0 + $0x8] sm:$0xff]   ;;  %s13038_s0 = sld [smem:[#allocation22_spill]] }
0x1041   : > { %10087 = vmatprep.subr.bf16.mxu1 %v10694_v1 }
0x1043   : > { %10064 = vmatmul.mubr.msk.bf16.gmra.mxu1 %vm4448_vm11, %v11825_v57 }
0x1044   : > { %10088 = vmatpush3.bf16.msra.mxu1 %v10694_v1 }
0x1045   : > { %10089 = vmatprep.subr.bf16.mxu1 %v10695_v11 }
0x1047   : > { %10080 = vmatmul.mubr.msk.bf16.gmra.mxu0 %vm4448_vm11, %v11851_v29  ;;  %v5145_v29 = vpop.f32.mrf.mxu0 }
0x1048   : > { %10090 = vmatpush3.bf16.msra.mxu1 %v10695_v11  ;;  %10115 = vmatprep.mubr.msk.bf16.mxu0 %vm11120_vm0, %v13035_v5 }
0x1049   : > { %10091 = vmatprep.subr.bf16.mxu1 %v10696_v19 }
0x104c   : > { %10092 = vmatpush3.bf16.msra.mxu1 %v10696_v19 }
0x104d   : > { %10093 = vmatprep.subr.bf16.mxu1 %v10697_v27 }
0x1050   : > { %10094 = vmatpush3.bf16.msra.mxu1 %v10697_v27 }
0x1051   : > { %10095 = vmatprep.subr.bf16.mxu1 %v10698_v28 }
0x1054   : > { %10096 = vmatpush3.bf16.msra.mxu1 %v10698_v28 }
0x1055   : > { %10097 = vmatprep.subr.bf16.mxu1 %v10699_v0 }
0x1058   : > { %10098 = vmatpush3.bf16.msra.mxu1 %v10699_v0 }
0x1059   : > { %5693 = vmatprep.subr.bf16.mxu1 %v11974_v34 }
0x10fb   : > { %v10061_v57 = vpop.f32.mrf.mxu1 }
0x10fc   : > { %v5260_v48 = vadd.f32 %v10061_v57, %v11990_v23 }
0x10fd   : > { %v5251_v4 = vpop.f32.mrf.mxu1 }
0x10fe   : > { %v5252_v8 = vadd.f32 %v5251_v4, %v11986_v33  ;;  %v10719_v4 = vld [vmem:[%s13037_s1 + $0xe4] ss:$36 sps:$4 sm:$0xff]  }
0x10ff   : > { %v10062_v45 = vpop.f32.mrf.mxu1  ;;  %v10077_v20 = vpop.f32.mrf.mxu0 }
0x1100   : > { %v5263_v10 = vadd.f32 %v10062_v45, %v11992_v35  ;;  %v5353_v6 = vadd.f32 %v10077_v20, %v5260_v48  ;;  %v10702_v45 = vld [vmem:[%s13038_s0 + $0x10] sm:$0xff]   ;;  %v10717_v20 = vld [vmem:[%s13037_s1 + $0xe0] ss:$36 sps:$4 sm:$0xff]   ;;  %v10720_v48 = vld [vmem:[%s13037_s1 + $0x98] ss:$36 sps:$4 sm:$0xff]  }
0x1101   : > { %v5254_v50 = vpop.f32.mrf.mxu1  ;;  %v5320_v12 = vpop.f32.mrf.mxu0 }
0x1102   : > { %v5351_v37 = vadd.f32 %v5320_v12, %v5252_v8  ;;  %v5255_v34 = vadd.f32 %v5254_v50, %v11988_v30  ;;  %v5368_v33 = vadd.f32 %v9138_v16, %v5353_v6  ;;  %v10722_v8 = vld [vmem:[%s13037_s1 + $0x9c] ss:$36 sps:$4 sm:$0xff]   ;;  %v10725_v50 = vld [vmem:[%s13037_s1 + $0x54] ss:$36 sps:$4 sm:$0xff]   ;;  %v10726_v6 = vld [vmem:[%s13037_s1 + $0x8] ss:$36 sps:$4 sm:$0xff]  }
0x1103   : > { %v10065_v26 = vpop.f32.mrf.mxu1  ;;  %v10078_v60 = vpop.f32.mrf.mxu0  ;;  %v10703_v12 = vld [vmem:[%s13038_s0 + $0x18] sm:$0xff]  }
0x1104   : > { %v5354_v47 = vadd.f32 %v10078_v60, %v5263_v10  ;;  %v5366_v49 = vadd.f32 %v9138_v16, %v5351_v37  ;;  %v5276_v24 = vadd.f32 %v10065_v26, %v11998_v32  ;;  %v5376_v21 = vadd.f32 %v11749_v51, %v5368_v33  ;;  %v10723_v10 = vld [vmem:[%s13037_s1 + $0x50] ss:$36 sps:$4 sm:$0xff]   ;;  %v10731_v26 = vld [vmem:[%s13037_s1 + $0x444] ss:$36 sps:$4 sm:$0xff]   ;;  %v10704_v60 = vld [vmem:[%s13038_s0 + $0x20] ss:$0 sps:$4 sm:$0xff]  }
0x1105   : > { %v5267_v31 = vpop.f32.mrf.mxu1  ;;  %v5323_v2 = vpop.f32.mrf.mxu0  ;;  %v10728_v37 = vld [vmem:[%s13037_s1 + $0xc] ss:$36 sps:$4 sm:$0xff]   ;;  %v10743_v33 = vld [vmem:[%s13037_s1 + $0x324] ss:$36 sps:$4 sm:$0xff]  }
0x1106   : > { %v5369_v39 = vadd.f32 %v9138_v16, %v5354_v47  ;;  %v5352_v14 = vadd.f32 %v5323_v2, %v5255_v34  ;;  %v5268_v36 = vadd.f32 %v5267_v31, %v11994_v9  ;;  %v5374_v30 = vadd.f32 %v5366_v49, %v11751_v52  ;;  %v10734_v34 = vld [vmem:[%s13037_s1 + $0x3fc] ss:$36 sps:$4 sm:$0xff]   ;;  %v10735_v31 = vld [vmem:[%s13037_s1 + $0x3b0] ss:$36 sps:$4 sm:$0xff]  }
0x1107   : > { %v10066_v15 = vpop.f32.mrf.mxu1  ;;  %v10081_v23 = vpop.f32.mrf.mxu0  ;;  %v10732_v47 = vld [vmem:[%s13037_s1 + $0x3f8] ss:$36 sps:$4 sm:$0xff]   ;;  %v10740_v49 = vld [vmem:[%s13037_s1 + $0x36c] ss:$36 sps:$4 sm:$0xff]  }
0x1108   : > { %v5367_v46 = vadd.f32 %v9138_v16, %v5352_v14  ;;  %v5377_v35 = vadd.f32 %v11753_v53, %v5369_v39  ;;  %v5279_v43 = vadd.f32 %v10066_v15, %v5145_v29  ;;  %v5357_v25 = vadd.f32 %v10081_v23, %v5276_v24  ;;  %v10737_v2 = vld [vmem:[%s13037_s1 + $0x3b4] ss:$36 sps:$4 sm:$0xff]   ;;  %v10738_v39 = vld [vmem:[%s13037_s1 + $0x368] ss:$36 sps:$4 sm:$0xff]   ;;  %v10741_v14 = vld [vmem:[%s13037_s1 + $0x320] ss:$36 sps:$4 sm:$0xff]  }
0x1109   : > { %v5270_v17 = vpop.f32.mrf.mxu1  ;;  %v5336_v56 = vpop.f32.mrf.mxu0  ;;  %v10746_v15 = vld [vmem:[%s13037_s1 + $0x2dc] ss:$36 sps:$4 sm:$0xff]   ;;  %v10749_v24 = vld [vmem:[%s13037_s1 + $0x294] ss:$36 sps:$4 sm:$0xff]  }
0x110a   : > { %v5375_v38 = vadd.f32 %v5367_v46, %v11755_v54  ;;  %v5355_v42 = vadd.f32 %v5336_v56, %v5268_v36  ;;  %v5271_v7 = vadd.f32 %v5270_v17, %v11996_v22  ;;  %v5408_v11 = vpack.c.bf16 %v5377_v35, %v5376_v21  ;;  %v10744_v23 = vld [vmem:[%s13037_s1 + $0x2d8] ss:$36 sps:$4 sm:$0xff]   ;;  %v10747_v46 = vld [vmem:[%s13037_s1 + $0x290] ss:$36 sps:$4 sm:$0xff]   ;;  %v10750_v36 = vld [vmem:[%s13037_s1 + $0x248] ss:$36 sps:$4 sm:$0xff]  }
0x110b   : > { %v10082_v62 = vpop.f32.mrf.mxu0  ;;  %v5372_v28 = vadd.f32 %v9138_v16, %v5357_v25  ;;  %v10752_v35 = vld [vmem:[%s13037_s1 + $0x24c] ss:$36 sps:$4 sm:$0xff]   ;;  %v10755_v17 = vld [vmem:[%s13037_s1 + $0x214] ss:$36 sps:$4 sm:$0xff]  }
0x110c   : > { %v5358_v1 = vadd.f32 %v10082_v62, %v5279_v43  ;;  %v5407_v32 = vpack.c.bf16 %v5375_v38, %v5374_v30  ;;  %v5370_v19 = vadd.f32 %v9138_v16, %v5355_v42 }
0x110d   : > { %v5339_v53 = vpop.f32.mrf.mxu0  ;;  %v5380_v0 = vadd.f32 %v11757_v55, %v5372_v28  ;;  %v10700_v55 = vld [vmem:[%s13038_s0] sm:$0xff]  }
0x110e   : > { %v5373_v9 = vadd.f32 %v9138_v16, %v5358_v1  ;;  %v5356_v27 = vadd.f32 %v5339_v53, %v5271_v7  ;;  %10099 = vmatprep.mubr.bf16.mxu1 %v5407_v32  ;;  %v5378_v54 = vadd.f32 %v5370_v19, %v11759_v58  ;;  %v10707_v58 = vld [vmem:[%s13037_s1 + $0x204] ss:$36 sps:$4 sm:$0xff]  }
0x110f   : > { %10100 = vmatmul.mubr.bf16.vlgmr.msra.gmra.mxu1 %v5408_v11 }
0x1110   : > { %v5371_v52 = vadd.f32 %v9138_v16, %v5356_v27  ;;  %5694 = vmatpush1.bf16.msra.mxu1 %v11978_v44  ;;  %v5381_v51 = vadd.f32 %v11761_v59, %v5373_v9  ;;  %v13039_v59 = vmov 0   ;;  %v10714_v44 = vld [vmem:[%s13037_s1 + $0x128] ss:$36 sps:$4 sm:$0xff]   ;;  %v10729_v16 = vld [vmem:[%s13037_s1 + $0x440] ss:$36 sps:$4 sm:$0xff]  }
0x1111   : > { %5695 = vmatprep.subr.bf16.mxu1 %v11965_v3  ;;  %v10701_v3 = vld [vmem:[%s13038_s0 + $0x8] sm:$0xff]   ;;  %s13040_s0 = sld [smem:[#allocation20_spill]] }
0x1112   : > { %v5379_v22 = vadd.f32 %v5371_v52, %v11763_v61  ;;  %v5410_v29 = vpack.c.bf16 %v5381_v51, %v5380_v0  ;;  %v10705_v61 = vld [vmem:[%s13037_s1 + $0x200] ss:$36 sps:$4 sm:$0xff]   ;;  %v10753_v52 = vld [vmem:[%s13037_s1 + $0x210] ss:$36 sps:$4 sm:$0xff]  }
0x1114   : > { %5696 = vmatpush1.bf16.msra.mxu1 %v11968_v13  ;;  %v5409_v57 = vpack.c.bf16 %v5379_v22, %v5378_v54  ;;  %v10711_v13 = vld [vmem:[%s13037_s1 + $0x170] ss:$36 sps:$4 sm:$0xff]   ;;  %v10762_v22 = vld [vmem:[%s13037_s1 + $0x1fc] ss:$36 sps:$4 sm:$0xff]  }
0x1115   : > { %5697 = vmatprep.subr.bf16.mxu1 %v11948_v18  ;;  %v10710_v18 = vld [vmem:[%s13037_s1 + $0x1bc] ss:$36 sps:$4 sm:$0xff]   ;;  %v10758_v54 = vld [vmem:[%s13037_s1 + $0x1cc] ss:$36 sps:$4 sm:$0xff]  }
0x1116   : > { %10103 = vmatprep.mubr.bf16.mxu1 %v5409_v57 }
0x1117   : > { %10104 = vmatmul.mubr.bf16.gmra.mxu1 %v5410_v29  ;;  %v10759_v29 = vld [vmem:[%s13040_s0] sm:$0xff]  }
0x1118   : > { %5698 = vmatpush1.bf16.msra.mxu1 %v11952_v40  ;;  %5717 = vmatprep.mubr.bf16.mxu1 %v13039_v59  ;;  %v10708_v40 = vld [vmem:[%s13037_s1 + $0x1b8] ss:$36 sps:$4 sm:$0xff]  }
0x1119   : > { %5699 = vmatprep.subr.bf16.mxu1 %v11931_v41  ;;  %v10713_v41 = vld [vmem:[%s13037_s1 + $0x174] ss:$36 sps:$4 sm:$0xff]  }
0x111c   : > { %5700 = vmatpush1.bf16.msra.mxu1 %v11934_v63  ;;  %v10716_v63 = vld [vmem:[%s13037_s1 + $0x12c] ss:$36 sps:$4 sm:$0xff]  }
0x111d   : > { %6753 = vmatprep.subr.bf16.mxu1 %v10707_v58  ;;  %v10756_v58 = vld [vmem:[%s13037_s1 + $0x1c8] ss:$36 sps:$4 sm:$0xff]  }
0x111f   : > { %9162 = vmatmul.mubr.msk.bf16.vlgmr.msra.gmra.mxu1 %vm4448_vm11, %v10700_v55  ;;  %v10760_v55 = vld [vmem:[%s13037_s1 + $0x1f8] ss:$36 sps:$4 sm:$0xff]  }
0x1120   : > { %5727 = vmatprep.mubr.bf16.mxu1 %v13039_v59  ;;  %6754 = vmatpush1.bf16.msra.mxu1 %v10705_v61 }
0x1121   : > { %6755 = vmatprep.subr.bf16.mxu1 %v10710_v18  ;;  %v10765_v18 = vld [vmem:[%s13037_s1 + $0x184] ss:$36 sps:$4 sm:$0xff]  }
0x1124   : > { %6756 = vmatpush1.bf16.msra.mxu1 %v10708_v40  ;;  %v10768_v40 = vld [vmem:[%s13037_s1 + $0x1b4] ss:$36 sps:$4 sm:$0xff]  }
0x1125   : > { %6757 = vmatprep.subr.bf16.mxu1 %v10713_v41 }
0x1127   : > { %9163 = vmatmul.mubr.msk.bf16.gmra.mxu1 %vm4448_vm11, %v10701_v3 }
0x1128   : > { %5737 = vmatprep.mubr.bf16.mxu1 %v13039_v59  ;;  %6758 = vmatpush1.bf16.msra.mxu1 %v10711_v13 }
0x1129   : > { %6759 = vmatprep.subr.bf16.mxu1 %v10716_v63  ;;  %v10763_v63 = vld [vmem:[%s13037_s1 + $0x180] ss:$36 sps:$4 sm:$0xff]  }
0x112c   : > { %6760 = vmatpush1.bf16.msra.mxu1 %v10714_v44  ;;  %v10766_v44 = vld [vmem:[%s13037_s1 + $0x1b0] ss:$36 sps:$4 sm:$0xff]  }
0x112d   : > { %6761 = vmatprep.subr.bf16.mxu1 %v10719_v4 }
0x112f   : > { %9164 = vmatmul.mubr.msk.bf16.gmra.mxu1 %vm4448_vm11, %v10702_v45  ;;  %v10771_v45 = vld [vmem:[%s13037_s1 + $0x13c] ss:$36 sps:$4 sm:$0xff]  }
0x1130   : > { %5747 = vmatprep.mubr.bf16.mxu1 %v13039_v59  ;;  %6762 = vmatpush1.bf16.msra.mxu1 %v10717_v20  ;;  %v10774_v20 = vld [vmem:[%s13037_s1 + $0x16c] ss:$36 sps:$4 sm:$0xff]  }
0x1131   : > { %6763 = vmatprep.subr.bf16.mxu1 %v10722_v8 }
0x1134   : > { %6764 = vmatpush1.bf16.msra.mxu1 %v10720_v48  ;;  %v10799_v48 = vld [vmem:[%s13040_s0 + $0x8] sm:$0xff]  }
0x1135   : > { %6765 = vmatprep.subr.bf16.mxu1 %v10725_v50  ;;  %v10769_v50 = vld [vmem:[%s13037_s1 + $0x138] ss:$36 sps:$4 sm:$0xff]  }
0x1137   : > { %9165 = vmatmul.mubr.msk.bf16.gmra.mxu1 %vm4448_vm11, %v10703_v12  ;;  %v10772_v12 = vld [vmem:[%s13037_s1 + $0x168] ss:$36 sps:$4 sm:$0xff]  }
0x1138   : > { %5757 = vmatprep.mubr.bf16.mxu1 %v13039_v59  ;;  %6766 = vmatpush1.bf16.msra.mxu1 %v10723_v10 }
0x1139   : > { %6767 = vmatprep.subr.bf16.mxu1 %v10728_v37  ;;  %v10777_v37 = vld [vmem:[%s13037_s1 + $0xf4] ss:$36 sps:$4 sm:$0xff]  }
0x113c   : > { %6768 = vmatpush1.bf16.msra.mxu1 %v10726_v6  ;;  %v10780_v6 = vld [vmem:[%s13037_s1 + $0x124] ss:$36 sps:$4 sm:$0xff]  }
0x113d   : > { %6769 = vmatprep.subr.bf16.mxu1 %v10731_v26 }
0x113f   : > { %9166 = vmatmul.mubr.msk.bf16.gmra.mxu1 %vm4448_vm11, %v10704_v60 }
0x1140   : > { %6770 = vmatpush2.bf16.msra.mxu1 %v10729_v16 }
0x1141   : > { %6771 = vmatprep.subr.bf16.mxu1 %v10734_v34  ;;  %v10775_v34 = vld [vmem:[%s13037_s1 + $0xf0] ss:$36 sps:$4 sm:$0xff]  }
0x1144   : > { %6772 = vmatpush2.bf16.msra.mxu1 %v10732_v47  ;;  %v10778_v47 = vld [vmem:[%s13037_s1 + $0x120] ss:$36 sps:$4 sm:$0xff]  }
0x1145   : > { %6773 = vmatprep.subr.bf16.mxu1 %v10737_v2  ;;  %v10783_v2 = vld [vmem:[%s13037_s1 + $0xac] ss:$36 sps:$4 sm:$0xff]  }
0x1148   : > { %6774 = vmatpush2.bf16.msra.mxu1 %v10735_v31 }
0x1149   : > { %6775 = vmatprep.subr.bf16.mxu1 %v10740_v49  ;;  %v10786_v49 = vld [vmem:[%s13037_s1 + $0xdc] ss:$36 sps:$4 sm:$0xff]  }
0x114c   : > { %6776 = vmatpush2.bf16.msra.mxu1 %v10738_v39 }
0x114d   : > { %6777 = vmatprep.subr.bf16.mxu1 %v10743_v33  ;;  %v10781_v33 = vld [vmem:[%s13037_s1 + $0xa8] ss:$36 sps:$4 sm:$0xff]  }
0x1150   : > { %6778 = vmatpush2.bf16.msra.mxu1 %v10741_v14  ;;  %v10812_v14 = vld [vmem:[%s13040_s0 + $0x10] sm:$0xff]  }
0x1151   : > { %6779 = vmatprep.subr.bf16.mxu1 %v10746_v15  ;;  %v10784_v15 = vld [vmem:[%s13037_s1 + $0xd8] ss:$36 sps:$4 sm:$0xff]  }
0x1154   : > { %6780 = vmatpush2.bf16.msra.mxu1 %v10744_v23 }
0x1155   : > { %6781 = vmatprep.subr.bf16.mxu1 %v10749_v24  ;;  %v10792_v24 = vld [vmem:[%s13037_s1 + $0x94] ss:$36 sps:$4 sm:$0xff]  }
0x1158   : > { %6782 = vmatpush2.bf16.msra.mxu1 %v10747_v46  ;;  %v10789_v46 = vld [vmem:[%s13037_s1 + $0x64] ss:$36 sps:$4 sm:$0xff]  }
0x1159   : > { %6783 = vmatprep.subr.bf16.mxu1 %v10752_v35 }
0x115c   : > { %6784 = vmatpush2.bf16.msra.mxu1 %v10750_v36 }
0x115d   : > { %6915 = vmatprep.subr.bf16.mxu1 %v10755_v17 }
0x11cf   : > { %v10101_v56 = vpop.f32.mrf.mxu1 }
0x11d1   : > { %v5493_v30 = vpop.f32.mrf.mxu1 }
0x11d3   : > { %v10102_v38 = vpop.f32.mrf.mxu1 }
0x11d4   : > { %v5525_v19 = vpack.c.bf16 %v10102_v38, %v10101_v56  ;;  %v10787_v56 = vld [vmem:[%s13037_s1 + $0x60] ss:$36 sps:$4 sm:$0xff]  }
0x11d5   : > { %v5496_v43 = vpop.f32.mrf.mxu1 }
0x11d6   : > { %v5524_v0 = vpack.c.bf16 %v5496_v43, %v5493_v30  ;;  %v10790_v30 = vld [vmem:[%s13037_s1 + $0x90] ss:$36 sps:$4 sm:$0xff]   ;;  %v10795_v43 = vld [vmem:[%s13037_s1 + $0x1c] ss:$36 sps:$4 sm:$0xff]  }
0x11d7   : > { %v10105_v21 = vpop.f32.mrf.mxu1 }
0x11d9   : > { %v5509_v25 = vpop.f32.mrf.mxu1 }
0x11db   : > { %v10106_v42 = vpop.f32.mrf.mxu1 }
0x11dc   : > { %v5527_v62 = vpack.c.bf16 %v10106_v42, %v10105_v21  ;;  %v10798_v21 = vld [vmem:[%s13037_s1 + $0x4c] ss:$36 sps:$4 sm:$0xff]   ;;  %v10825_v42 = vld [vmem:[%s13040_s0 + $0x18] sm:$0xff]  }
0x11dd   : > { %v5512_v7 = vpop.f32.mrf.mxu1 }
0x11de   : > { %10108 = vmatpush3.bf16.msra.mxu0 %v5527_v62  ;;  %v5526_v32 = vpack.c.bf16 %v5512_v7, %v5509_v25  ;;  %v10793_v62 = vld [vmem:[%s13037_s1 + $0x18] ss:$36 sps:$4 sm:$0xff]  }
0x11df   : > { %v5719_v1 = vpop.f32.mrf.mxu1  ;;  %10109 = vmatprep.subr.bf16.mxu0 %v13035_v5 }
0x11e1   : > { %v5721_v11 = vpop.f32.mrf.mxu1 }
0x11e2   : > { %10110 = vmatpush3.bf16.msra.mxu0 %v5526_v32  ;;  %v10802_v32 = vld [vmem:[%s13037_s1 + $0x454] ss:$36 sps:$4 sm:$0xff]  }
0x11e3   : > { %v5723_v53 = vpop.f32.mrf.mxu1  ;;  %10111 = vmatprep.subr.bf16.mxu0 %v13035_v5 }
0x11e4   : > { %v12097_v9 = vpack.c.bf16 %v5723_v53, %v5719_v1  ;;  %v10796_v1 = vld [vmem:[%s13037_s1 + $0x48] ss:$36 sps:$4 sm:$0xff]  }
0x11e5   : > { %v5725_v27 = vpop.f32.mrf.mxu1 }
0x11e6   : > { %v12099_v28 = vpack.c.bf16 %v5725_v27, %v5721_v11  ;;  %10112 = vmatpush3.bf16.msra.mxu0 %v5525_v19  ;;  %v10805_v11 = vld [vmem:[%s13037_s1 + $0x4] ss:$36 sps:$4 sm:$0xff]  }
0x11e7   : > { %v5729_v51 = vpop.f32.mrf.mxu1  ;;  %10113 = vmatprep.subr.bf16.mxu0 %v13035_v5 }
0x11e8   : > { %6785 = vmatprep.mubr.bf16.mxu1 %v12099_v28 }
0x11e9   : > { %v5731_v57 = vpop.f32.mrf.mxu1  ;;  %6786 = vmatmul.mubr.bf16.vlgmr.msra.gmra.mxu1 %v12097_v9 }
0x11ea   : > { %6916 = vmatpush1.bf16.msra.mxu1 %v10753_v52  ;;  %10114 = vmatpush3.bf16.msra.mxu0 %v5524_v0  ;;  %v10800_v52 = vld [vmem:[%s13037_s1 + $0x450] ss:$36 sps:$4 sm:$0xff]   ;;  %v10838_v0 = vld [vmem:[%s13040_s0 + $0x20] ss:$0 sps:$4 sm:$0xff]   ;;  %s13050_s0 = sld [smem:[#allocation25_spill]] }
0x11eb   : > { %v5733_v61 = vpop.f32.mrf.mxu1  ;;  %6917 = vmatprep.subr.bf16.mxu1 %v10758_v54  ;;  %6672 = vmatprep.subr.bf16.mxu0 %v10762_v22  ;;  %v10808_v54 = vld [vmem:[%s13037_s1 + $0x40c] ss:$36 sps:$4 sm:$0xff]   ;;  %v10811_v22 = vld [vmem:[%s13037_s1 + $0x43c] ss:$36 sps:$4 sm:$0xff]  }
0x11ec   : > { %v12112_v41 = vpack.c.bf16 %v5733_v61, %v5729_v51  ;;  %v10803_v51 = vld [vmem:[%s13037_s1] ss:$36 sps:$4 sm:$0xff]  }
0x11ed   : > { %10116 = vmatmul.mubr.msk.bf16.vlgmr.msra.gmra.mxu0 %vm4448_vm11, %v10759_v29  ;;  %v5735_v3 = vpop.f32.mrf.mxu1  ;;  %v10809_v29 = vld [vmem:[%s13037_s1 + $0x438] ss:$36 sps:$4 sm:$0xff]   ;;  %v10813_v61 = vld [vmem:[%s13037_s1 + $0x3c0] ss:$36 sps:$4 sm:$0xff]  }
0x11ee   : > { %v12115_v13 = vpack.c.bf16 %v5735_v3, %v5731_v57  ;;  %6918 = vmatpush1.bf16.msra.mxu1 %v10756_v58  ;;  %6673 = vmatpush1.bf16.msra.mxu0 %v10760_v55  ;;  %v10806_v57 = vld [vmem:[%s13037_s1 + $0x408] ss:$36 sps:$4 sm:$0xff]   ;;  %v10818_v55 = vld [vmem:[%s13037_s1 + $0x3f4] ss:$36 sps:$4 sm:$0xff]  }
0x11ef   : > { %v5739_v4 = vpop.f32.mrf.mxu1  ;;  %6919 = vmatprep.subr.bf16.mxu1 %v10765_v18  ;;  %6674 = vmatprep.subr.bf16.mxu0 %v10768_v40  ;;  %v10815_v58 = vld [vmem:[%s13037_s1 + $0x3c4] ss:$36 sps:$4 sm:$0xff]   ;;  %v10816_v18 = vld [vmem:[%s13037_s1 + $0x3f0] ss:$36 sps:$4 sm:$0xff]   ;;  %v10821_v40 = vld [vmem:[%s13037_s1 + $0x37c] ss:$36 sps:$4 sm:$0xff]  }
0x11f0   : > { %6795 = vmatprep.mubr.bf16.mxu1 %v12115_v13  ;;  %10119 = vmatprep.mubr.msk.bf16.mxu0 %vm11120_vm0, %v13035_v5  ;;  %v10824_v3 = vld [vmem:[%s13037_s1 + $0x3ac] ss:$36 sps:$4 sm:$0xff]  }
0x11f1   : > { %v5741_v8 = vpop.f32.mrf.mxu1  ;;  %6796 = vmatmul.mubr.bf16.gmra.mxu1 %v12112_v41 }
0x11f2   : > { %6920 = vmatpush1.bf16.msra.mxu1 %v10763_v63  ;;  %6675 = vmatpush1.bf16.msra.mxu0 %v10766_v44  ;;  %v10819_v63 = vld [vmem:[%s13037_s1 + $0x378] ss:$36 sps:$4 sm:$0xff]   ;;  %v10822_v44 = vld [vmem:[%s13037_s1 + $0x3a8] ss:$36 sps:$4 sm:$0xff]  }
0x11f3   : > { %v5743_v10 = vpop.f32.mrf.mxu1  ;;  %6921 = vmatprep.subr.bf16.mxu1 %v10771_v45  ;;  %6676 = vmatprep.subr.bf16.mxu0 %v10774_v20  ;;  %v10831_v45 = vld [vmem:[%s13037_s1 + $0x364] ss:$36 sps:$4 sm:$0xff]   ;;  %v10826_v20 = vld [vmem:[%s13037_s1 + $0x330] ss:$36 sps:$4 sm:$0xff]  }
0x11f4   : > { %v12130_v26 = vpack.c.bf16 %v5743_v10, %v5739_v4  ;;  %v10828_v4 = vld [vmem:[%s13037_s1 + $0x334] ss:$36 sps:$4 sm:$0xff]  }
0x11f5   : > { %v5745_v60 = vpop.f32.mrf.mxu1  ;;  %10120 = vmatmul.mubr.msk.bf16.gmra.mxu0 %vm4448_vm11, %v10799_v48  ;;  %v10834_v48 = vld [vmem:[%s13037_s1 + $0x2ec] ss:$36 sps:$4 sm:$0xff]   ;;  %v10835_v10 = vld [vmem:[%s13037_s1 + $0x318] ss:$36 sps:$4 sm:$0xff]  }
0x11f6   : > { %v12133_v16 = vpack.c.bf16 %v5745_v60, %v5741_v8  ;;  %6922 = vmatpush1.bf16.msra.mxu1 %v10769_v50  ;;  %6677 = vmatpush1.bf16.msra.mxu0 %v10772_v12  ;;  %v10829_v8 = vld [vmem:[%s13037_s1 + $0x360] ss:$36 sps:$4 sm:$0xff]   ;;  %v10832_v12 = vld [vmem:[%s13037_s1 + $0x2e8] ss:$36 sps:$4 sm:$0xff]  }
0x11f7   : > { %v5749_v31 = vpop.f32.mrf.mxu1  ;;  %6923 = vmatprep.subr.bf16.mxu1 %v10777_v37  ;;  %6678 = vmatprep.subr.bf16.mxu0 %v10780_v6  ;;  %v10837_v50 = vld [vmem:[%s13037_s1 + $0x31c] ss:$36 sps:$4 sm:$0xff]   ;;  %v10841_v37 = vld [vmem:[%s13037_s1 + $0x2a4] ss:$36 sps:$4 sm:$0xff]   ;;  %v10844_v6 = vld [vmem:[%s13037_s1 + $0x2d4] ss:$36 sps:$4 sm:$0xff]  }
0x11f8   : > { %6805 = vmatprep.mubr.bf16.mxu1 %v12133_v16  ;;  %10123 = vmatprep.mubr.msk.bf16.mxu0 %vm11120_vm0, %v13035_v5  ;;  %v10839_v60 = vld [vmem:[%s13037_s1 + $0x2a0] ss:$36 sps:$4 sm:$0xff]  }
0x11f9   : > { %v5751_v39 = vpop.f32.mrf.mxu1  ;;  %6806 = vmatmul.mubr.bf16.gmra.mxu1 %v12130_v26 }
0x11fa   : > { %6924 = vmatpush1.bf16.msra.mxu1 %v10775_v34  ;;  %6679 = vmatpush1.bf16.msra.mxu0 %v10778_v47  ;;  %v10842_v34 = vld [vmem:[%s13037_s1 + $0x2d0] ss:$36 sps:$4 sm:$0xff]   ;;  %v10847_v47 = vld [vmem:[%s13037_s1 + $0x25c] ss:$36 sps:$4 sm:$0xff]  }
0x11fb   : > { %v5753_v23 = vpop.f32.mrf.mxu1  ;;  %6925 = vmatprep.subr.bf16.mxu1 %v10783_v2  ;;  %6680 = vmatprep.subr.bf16.mxu0 %v10786_v49  ;;  %v10845_v2 = vld [vmem:[%s13037_s1 + $0x258] ss:$36 sps:$4 sm:$0xff]   ;;  %v10848_v49 = vld [vmem:[%s13037_s1 + $0x288] ss:$36 sps:$4 sm:$0xff]  }
0x11fc   : > { %v12148_v35 = vpack.c.bf16 %v5753_v23, %v5749_v31  ;;  %v10850_v31 = vld [vmem:[%s13037_s1 + $0x28c] ss:$36 sps:$4 sm:$0xff]   ;;  %v10859_v23 = vld [vmem:[%s13037_s1 + $0x1c4] ss:$36 sps:$4 sm:$0xff]  }
0x11fd   : > { %v5755_v36 = vpop.f32.mrf.mxu1  ;;  %10124 = vmatmul.mubr.msk.bf16.gmra.mxu0 %vm4448_vm11, %v10812_v14  ;;  %v10851_v14 = vld [vmem:[%s13037_s1 + $0x240] ss:$36 sps:$4 sm:$0xff]  }
0x11fe   : > { %v12151_v17 = vpack.c.bf16 %v5755_v36, %v5751_v39  ;;  %6926 = vmatpush1.bf16.msra.mxu1 %v10781_v33  ;;  %6681 = vmatpush1.bf16.msra.mxu0 %v10784_v15  ;;  %v10853_v39 = vld [vmem:[%s13037_s1 + $0x244] ss:$36 sps:$4 sm:$0xff]   ;;  %v10856_v33 = vld [vmem:[%s13037_s1 + $0x20c] ss:$36 sps:$4 sm:$0xff]   ;;  %v10860_v36 = vld [vmem:[%s13037_s1 + $0x178] ss:$36 sps:$4 sm:$0xff]  }
0x11ff   : > { %6927 = vmatprep.subr.bf16.mxu1 %v10789_v46  ;;  %6682 = vmatprep.subr.bf16.mxu0 %v10792_v24  ;;  %v5759_v38 = vpop.f32.mrf.mxu1  ;;  %v10854_v15 = vld [vmem:[%s13037_s1 + $0x208] ss:$36 sps:$4 sm:$0xff]   ;;  %v10857_v46 = vld [vmem:[%s13037_s1 + $0x1c0] ss:$36 sps:$4 sm:$0xff]  }
0x1200   : > { %6815 = vmatprep.mubr.bf16.mxu1 %v12151_v17  ;;  %10127 = vmatprep.mubr.msk.bf16.mxu0 %vm11120_vm0, %v13035_v5  ;;  %v12169_v19 = vpack.c.bf16 %v5759_v38, %v5759_v38  ;;  %v10862_v24 = vld [vmem:[%s13037_s1 + $0x17c] ss:$36 sps:$4 sm:$0xff]   ;;  %v10868_v38 = vld [vmem:[%s13037_s1 + $0xec] ss:$36 sps:$4 sm:$0xff]  }
0x1201   : > { %6816 = vmatmul.mubr.bf16.gmra.mxu1 %v12148_v35  ;;  %v5761_v25 = vpop.f32.mrf.mxu1 }
0x1202   : > { %6928 = vmatpush1.bf16.msra.mxu1 %v10787_v56  ;;  %6683 = vmatpush1.bf16.msra.mxu0 %v10790_v30  ;;  %v12163_v7 = vpack.c.bf16 %v5761_v25, %v5761_v25  ;;  %v10865_v56 = vld [vmem:[%s13037_s1 + $0x134] ss:$36 sps:$4 sm:$0xff]   ;;  %v10869_v25 = vld [vmem:[%s13037_s1 + $0xa0] ss:$36 sps:$4 sm:$0xff]  }
0x1203   : > { %6929 = vmatprep.subr.bf16.mxu1 %v10795_v43  ;;  %6684 = vmatprep.subr.bf16.mxu0 %v10798_v21  ;;  %v5763_v53 = vpop.f32.mrf.mxu1  ;;  %v10863_v30 = vld [vmem:[%s13037_s1 + $0x130] ss:$36 sps:$4 sm:$0xff]   ;;  %v10866_v43 = vld [vmem:[%s13037_s1 + $0xe8] ss:$36 sps:$4 sm:$0xff]  }
0x1204   : > { %6825 = vmatprep.mubr.bf16.mxu1 %v12163_v7  ;;  %v10871_v21 = vld [vmem:[%s13037_s1 + $0xa4] ss:$36 sps:$4 sm:$0xff]  }
0x1205   : > { %10128 = vmatmul.mubr.msk.bf16.gmra.mxu0 %vm4448_vm11, %v10825_v42  ;;  %v5764_v27 = vpop.f32.mrf.mxu1  ;;  %v10874_v42 = vld [vmem:[%s13037_s1 + $0x5c] ss:$36 sps:$4 sm:$0xff]   ;;  %v10878_v53 = vld [vmem:[%s13037_s1 + $0x448] ss:$36 sps:$4 sm:$0xff]  }
0x1206   : > { %6930 = vmatpush1.bf16.msra.mxu1 %v10793_v62  ;;  %6685 = vmatpush1.bf16.msra.mxu0 %v10796_v1  ;;  %v10872_v62 = vld [vmem:[%s13037_s1 + $0x58] ss:$36 sps:$4 sm:$0xff]   ;;  %v10883_v27 = vld [vmem:[%s13037_s1 + $0x404] ss:$36 sps:$4 sm:$0xff]  }
0x1207   : > { %6931 = vmatprep.subr.bf16.mxu1 %v10802_v32  ;;  %6686 = vmatprep.subr.bf16.mxu0 %v10805_v11  ;;  %v10877_v1 = vld [vmem:[%s13037_s1 + $0x14] ss:$36 sps:$4 sm:$0xff]   ;;  %v10880_v11 = vld [vmem:[%s13037_s1 + $0x44c] ss:$36 sps:$4 sm:$0xff]  }
0x1208   : > { %10131 = vmatprep.mubr.msk.bf16.mxu0 %vm11120_vm0, %v13035_v5  ;;  %v10875_v32 = vld [vmem:[%s13037_s1 + $0x10] ss:$36 sps:$4 sm:$0xff]  }
0x1209   : > { %6826 = vmatmul.mubr.bf16.gmra.mxu1 %v12169_v19 }
0x120a   : > { %6932 = vmatpush2.bf16.msra.mxu1 %v10800_v52  ;;  %6687 = vmatpush1.bf16.msra.mxu0 %v10803_v51  ;;  %v10881_v52 = vld [vmem:[%s13037_s1 + $0x400] ss:$36 sps:$4 sm:$0xff]  }
0x120b   : > { %6933 = vmatprep.subr.bf16.mxu1 %v10808_v54  ;;  %6688 = vmatprep.subr.bf16.mxu0 %v10811_v22  ;;  %v10886_v51 = vld [vmem:[%s13037_s1 + $0x3bc] ss:$36 sps:$4 sm:$0xff]   ;;  %v10889_v22 = vld [vmem:[%s13037_s1 + $0x374] ss:$36 sps:$4 sm:$0xff]  }
0x120c   : > { %6947 = vmatprep.mubr.bf16.mxu1 %v12099_v28  ;;  %v10884_v54 = vld [vmem:[%s13037_s1 + $0x3b8] ss:$36 sps:$4 sm:$0xff]  }
0x120d   : > { %10132 = vmatmul.mubr.msk.bf16.gmra.mxu0 %vm4448_vm11, %v10838_v0  ;;  %v10887_v0 = vld [vmem:[%s13037_s1 + $0x370] ss:$36 sps:$4 sm:$0xff]   ;;  %vm7115_vm11 = vcmask 588800  }
0x120e   : > { %6934 = vmatpush2.bf16.msra.mxu1 %v10806_v57  ;;  %6689 = vmatpush2.bf16.msra.mxu0 %v10809_v29  ;;  %v10892_v57 = vld [vmem:[%s13037_s1 + $0x32c] ss:$36 sps:$4 sm:$0xff]  }
0x120f   : > { %6935 = vmatprep.subr.bf16.mxu1 %v10815_v58  ;;  %6690 = vmatprep.subr.bf16.mxu0 %v10818_v55  ;;  %v10890_v29 = vld [vmem:[%s13037_s1 + $0x328] ss:$36 sps:$4 sm:$0xff]   ;;  %v10893_v55 = vld [vmem:[%s13037_s1 + $0x2e0] ss:$36 sps:$4 sm:$0xff]  }
0x1210   : > { %6704 = vmatprep.mubr.bf16.mxu0 %v12099_v28  ;;  %v10895_v58 = vld [vmem:[%s13037_s1 + $0x2e4] ss:$36 sps:$4 sm:$0xff]  }
0x1212   : > { %6936 = vmatpush2.bf16.msra.mxu1 %v10813_v61  ;;  %6691 = vmatpush2.bf16.msra.mxu0 %v10816_v18  ;;  %v10898_v61 = vld [vmem:[%s13037_s1 + $0x29c] ss:$36 sps:$4 sm:$0xff]  }
0x1213   : > { %6937 = vmatprep.subr.bf16.mxu1 %v10821_v40  ;;  %6692 = vmatprep.subr.bf16.mxu0 %v10824_v3  ;;  %v10896_v18 = vld [vmem:[%s13037_s1 + $0x298] ss:$36 sps:$4 sm:$0xff]   ;;  %v10899_v3 = vld [vmem:[%s13037_s1 + $0x250] ss:$36 sps:$4 sm:$0xff]  }
0x1214   : > { %v10901_v40 = vld [vmem:[%s13037_s1 + $0x254] ss:$36 sps:$4 sm:$0xff]  }
0x1216   : > { %6938 = vmatpush2.bf16.msra.mxu1 %v10819_v63  ;;  %6693 = vmatpush2.bf16.msra.mxu0 %v10822_v44  ;;  %v10902_v63 = vld [vmem:[%s13037_s1 + $0x458] ss:$36 sps:$4 sm:$0xff]  }
0x1217   : > { %6939 = vmatprep.subr.bf16.mxu1 %v10828_v4  ;;  %6694 = vmatprep.subr.bf16.mxu0 %v10831_v45  ;;  %v10903_v44 = vld [vmem:[%s13037_s1 + $0x218] ss:$36 sps:$4 sm:$0xff]   ;;  %v10904_v4 = vld [vmem:[%s13037_s1 + $0x410] ss:$36 sps:$4 sm:$0xff]  }
0x1218   : > { %v10905_v45 = vld [vmem:[%s13037_s1 + $0x1d0] ss:$36 sps:$4 sm:$0xff]  }
0x121a   : > { %6940 = vmatpush2.bf16.msra.mxu1 %v10826_v20  ;;  %6695 = vmatpush2.bf16.msra.mxu0 %v10829_v8  ;;  %v10906_v20 = vld [vmem:[%s13037_s1 + $0x3c8] ss:$36 sps:$4 sm:$0xff]  }
0x121b   : > { %6941 = vmatprep.subr.bf16.mxu1 %v10834_v48  ;;  %6696 = vmatprep.subr.bf16.mxu0 %v10837_v50  ;;  %v10907_v8 = vld [vmem:[%s13037_s1 + $0x188] ss:$36 sps:$4 sm:$0xff]   ;;  %v10908_v48 = vld [vmem:[%s13037_s1 + $0x380] ss:$36 sps:$4 sm:$0xff]  }
0x121c   : > { %v10909_v50 = vld [vmem:[%s13037_s1 + $0x140] ss:$36 sps:$4 sm:$0xff]  }
0x121e   : > { %6942 = vmatpush2.bf16.msra.mxu1 %v10832_v12  ;;  %6697 = vmatpush2.bf16.msra.mxu0 %v10835_v10  ;;  %v10910_v12 = vld [vmem:[%s13037_s1 + $0x338] ss:$36 sps:$4 sm:$0xff]  }
0x121f   : > { %6943 = vmatprep.subr.bf16.mxu1 %v10841_v37  ;;  %6698 = vmatprep.subr.bf16.mxu0 %v10844_v6  ;;  %v10911_v10 = vld [vmem:[%s13037_s1 + $0xf8] ss:$36 sps:$4 sm:$0xff]   ;;  %v10912_v37 = vld [vmem:[%s13037_s1 + $0x2f0] ss:$36 sps:$4 sm:$0xff]  }
0x1220   : > { %v10913_v6 = vld [vmem:[%s13037_s1 + $0xb0] ss:$36 sps:$4 sm:$0xff]  }
0x1222   : > { %6944 = vmatpush2.bf16.msra.mxu1 %v10839_v60  ;;  %6699 = vmatpush2.bf16.msra.mxu0 %v10842_v34  ;;  %v10914_v60 = vld [vmem:[%s13037_s1 + $0x2a8] ss:$36 sps:$4 sm:$0xff]  }
0x1223   : > { %6945 = vmatprep.subr.bf16.mxu1 %v10847_v47  ;;  %6700 = vmatprep.subr.bf16.mxu0 %v10850_v31  ;;  %v10915_v34 = vld [vmem:[%s13037_s1 + $0x68] ss:$36 sps:$4 sm:$0xff]   ;;  %v10916_v47 = vld [vmem:[%s13037_s1 + $0x260] ss:$36 sps:$4 sm:$0xff]  }
0x1224   : > { %v10917_v31 = vld [vmem:[%s13037_s1 + $0x20] ss:$36 sps:$4 sm:$0xff]   ;;  %s13061_s1 = sld [smem:[#allocation24_spill]] }
0x1226   : > { %6946 = vmatpush2.bf16.msra.mxu1 %v10845_v2  ;;  %6701 = vmatpush2.bf16.msra.mxu0 %v10848_v49 }
0x1227   : > { %6702 = vmatprep.subr.bf16.mxu0 %v10853_v39 }
0x1229   : > { %6948 = vmatmul.mubr.bf16.vlgmr.msra.gmra.mxu1 %v12097_v9 }
0x122a   : > { %6703 = vmatpush2.bf16.msra.mxu0 %v10851_v14  ;;  %6957 = vmatprep.mubr.bf16.mxu1 %v12115_v13 }
0x122b   : > { %6834 = vmatprep.subr.bf16.mxu0 %v10856_v33 }
0x122d   : > { %6705 = vmatmul.mubr.bf16.vlgmr.msra.gmra.mxu0 %v12097_v9 }
0x122e   : > { %6835 = vmatpush1.bf16.msra.mxu0 %v10854_v15  ;;  %6714 = vmatprep.mubr.bf16.mxu0 %v12115_v13 }
0x122f   : > { %6836 = vmatprep.subr.bf16.mxu0 %v10859_v23 }
0x1231   : > { %6958 = vmatmul.mubr.bf16.gmra.mxu1 %v12112_v41 }
0x1232   : > { %6837 = vmatpush1.bf16.msra.mxu0 %v10857_v46  ;;  %6967 = vmatprep.mubr.bf16.mxu1 %v12133_v16 }
0x1233   : > { %6838 = vmatprep.subr.bf16.mxu0 %v10862_v24 }
0x1235   : > { %6715 = vmatmul.mubr.bf16.gmra.mxu0 %v12112_v41 }
0x1236   : > { %6839 = vmatpush1.bf16.msra.mxu0 %v10860_v36  ;;  %6724 = vmatprep.mubr.bf16.mxu0 %v12133_v16 }
0x1237   : > { %6840 = vmatprep.subr.bf16.mxu0 %v10865_v56 }
0x1239   : > { %6968 = vmatmul.mubr.bf16.gmra.mxu1 %v12130_v26 }
0x123a   : > { %6841 = vmatpush1.bf16.msra.mxu0 %v10863_v30  ;;  %6977 = vmatprep.mubr.bf16.mxu1 %v12151_v17 }
0x123b   : > { %6842 = vmatprep.subr.bf16.mxu0 %v10868_v38 }
0x123d   : > { %6725 = vmatmul.mubr.bf16.gmra.mxu0 %v12130_v26 }
0x123e   : > { %6843 = vmatpush1.bf16.msra.mxu0 %v10866_v43  ;;  %6734 = vmatprep.mubr.bf16.mxu0 %v12151_v17 }
0x123f   : > { %6844 = vmatprep.subr.bf16.mxu0 %v10871_v21 }
0x1241   : > { %6978 = vmatmul.mubr.bf16.gmra.mxu1 %v12148_v35 }
0x1242   : > { %6845 = vmatpush1.bf16.msra.mxu0 %v10869_v25  ;;  %6987 = vmatprep.mubr.bf16.mxu1 %v12163_v7 }
0x1243   : > { %6846 = vmatprep.subr.bf16.mxu0 %v10874_v42 }
0x1245   : > { %6735 = vmatmul.mubr.bf16.gmra.mxu0 %v12148_v35 }
0x1246   : > { %6847 = vmatpush1.bf16.msra.mxu0 %v10872_v62  ;;  %6744 = vmatprep.mubr.bf16.mxu0 %v12163_v7 }
0x1247   : > { %6848 = vmatprep.subr.bf16.mxu0 %v10877_v1 }
0x1249   : > { %6988 = vmatmul.mubr.bf16.gmra.mxu1 %v12169_v19 }
0x124a   : > { %6849 = vmatpush1.bf16.msra.mxu0 %v10875_v32  ;;  %7172 = vmatprep.mubr.bf16.mxu1 %v13039_v59 }
0x124b   : > { %6850 = vmatprep.subr.bf16.mxu0 %v10880_v11 }
0x124d   : > { %6745 = vmatmul.mubr.bf16.gmra.mxu0 %v12169_v19 }
0x124e   : > { %6851 = vmatpush2.bf16.msra.mxu0 %v10878_v53  ;;  %6866 = vmatprep.mubr.bf16.mxu0 %v12099_v28 }
0x124f   : > { %6852 = vmatprep.subr.bf16.mxu0 %v10883_v27 }
0x1252   : > { %6853 = vmatpush2.bf16.msra.mxu0 %v10881_v52 }
0x1253   : > { %6854 = vmatprep.subr.bf16.mxu0 %v10886_v51 }
0x1256   : > { %6855 = vmatpush2.bf16.msra.mxu0 %v10884_v54 }
0x1257   : > { %6856 = vmatprep.subr.bf16.mxu0 %v10889_v22 }
0x125a   : > { %6857 = vmatpush2.bf16.msra.mxu0 %v10887_v0 }
0x125b   : > { %6858 = vmatprep.subr.bf16.mxu0 %v10892_v57 }
0x125e   : > { %6859 = vmatpush2.bf16.msra.mxu0 %v10890_v29 }
0x125f   : > { %6860 = vmatprep.subr.bf16.mxu0 %v10895_v58 }
0x1262   : > { %6861 = vmatpush2.bf16.msra.mxu0 %v10893_v55 }
0x1263   : > { %6862 = vmatprep.subr.bf16.mxu0 %v10898_v61 }
0x1266   : > { %6863 = vmatpush2.bf16.msra.mxu0 %v10896_v18 }
0x1267   : > { %6864 = vmatprep.subr.bf16.mxu0 %v10901_v40 }
0x126a   : > { %6865 = vmatpush2.bf16.msra.mxu0 %v10899_v3 }
0x126b   : > { %9630 = vmatprep.subr.bf16.mxu0 %v10902_v63  ;;  %v12343_v63 = vld [vmem:[%s13050_s0] sm:$0xff]  }
0x126d   : > { %6867 = vmatmul.mubr.bf16.vlgmr.msra.gmra.mxu0 %v12097_v9 }
0x126e   : > { %6876 = vmatprep.mubr.bf16.mxu0 %v12115_v13  ;;  %9631 = vmatpush3.bf16.msra.mxu0 %v10903_v44  ;;  %v12351_v44 = vld [vmem:[%s13050_s0 + $0x8] sm:$0xff]  }
0x126f   : > { %9632 = vmatprep.subr.bf16.mxu0 %v10904_v4 }
0x1272   : > { %9633 = vmatpush3.bf16.msra.mxu0 %v10905_v45 }
0x1273   : > { %9634 = vmatprep.subr.bf16.mxu0 %v10906_v20  ;;  %v12362_v20 = vld [vmem:[%s13050_s0 + $0x10] sm:$0xff]  }
0x1275   : > { %6877 = vmatmul.mubr.bf16.gmra.mxu0 %v12112_v41 }
0x1276   : > { %6886 = vmatprep.mubr.bf16.mxu0 %v12133_v16  ;;  %9635 = vmatpush3.bf16.msra.mxu0 %v10907_v8 }
0x1277   : > { %9636 = vmatprep.subr.bf16.mxu0 %v10908_v48 }
0x127a   : > { %9637 = vmatpush3.bf16.msra.mxu0 %v10909_v50 }
0x127b   : > { %9638 = vmatprep.subr.bf16.mxu0 %v10910_v12 }
0x127d   : > { %6887 = vmatmul.mubr.bf16.gmra.mxu0 %v12130_v26 }
0x127e   : > { %6896 = vmatprep.mubr.bf16.mxu0 %v12151_v17  ;;  %9639 = vmatpush3.bf16.msra.mxu0 %v10911_v10 }
0x127f   : > { %9640 = vmatprep.subr.bf16.mxu0 %v10912_v37 }
0x1282   : > { %9641 = vmatpush3.bf16.msra.mxu0 %v10913_v6 }
0x1283   : > { %9642 = vmatprep.subr.bf16.mxu0 %v10914_v60 }
0x1285   : > { %6897 = vmatmul.mubr.bf16.gmra.mxu0 %v12148_v35 }
0x1286   : > { %6906 = vmatprep.mubr.bf16.mxu0 %v12163_v7  ;;  %9643 = vmatpush3.bf16.msra.mxu0 %v10915_v34 }
0x1287   : > { %9644 = vmatprep.subr.bf16.mxu0 %v10916_v47  ;;  %v12385_v47 = vld [vmem:[%s13050_s0 + $0x18] sm:$0xff]  }
0x128a   : > { %9645 = vmatpush3.bf16.msra.mxu0 %v10917_v31 }
0x128b   : > { %10135 = vmatprep.subr.bf16.mxu0 %v13035_v5 }
0x128d   : > { %6907 = vmatmul.mubr.bf16.gmra.mxu0 %v12169_v19 }
0x128e   : > { %7028 = vmatprep.mubr.bf16.mxu0 %v12099_v28 }
0x1295   : > { %7029 = vmatmul.mubr.bf16.vlgmr.msra.gmra.mxu0 %v12097_v9 }
0x1296   : > { %7036 = vmatprep.mubr.bf16.mxu0 %v12115_v13 }
0x129d   : > { %7037 = vmatmul.mubr.bf16.gmra.mxu0 %v12112_v41 }
0x129e   : > { %7044 = vmatprep.mubr.bf16.mxu0 %v12133_v16 }
0x12a5   : > { %7045 = vmatmul.mubr.bf16.gmra.mxu0 %v12130_v26 }
0x12a6   : > { %7052 = vmatprep.mubr.bf16.mxu0 %v12151_v17 }
0x12a9   : > { %v6787_v2 = vpop.f32.mrf.mxu1 }
0x12ab   : > { %v12296_v49 = vpop.f32.mrf.mxu1 }
0x12ad   : > { %v12298_v39 = vpop.f32.mrf.mxu0  ;;  %v6791_v14 = vpop.f32.mrf.mxu1  ;;  %7053 = vmatmul.mubr.bf16.gmra.mxu0 %v12148_v35 }
0x12ae   : > { %13041 = vst [vmem:[#allocation27_spill] sm:$0xff] %v12298_v39  ;;  %7060 = vmatprep.mubr.bf16.mxu0 %v12163_v7  ;;  %v7079_v3 = vpack.c.bf16 %v6791_v14, %v6787_v2 }
0x12af   : > { %v10117_v9 = vpop.f32.mrf.mxu0  ;;  %v12302_v28 = vpop.f32.mrf.mxu1 }
0x12b1   : > { %v12304_v41 = vpop.f32.mrf.mxu0  ;;  %v6797_v13 = vpop.f32.mrf.mxu1 }
0x12b2   : > { %13042 = vst [vmem:[#allocation28_spill] sm:$0xff] %v12304_v41 }
0x12b3   : > { %v10118_v16 = vpop.f32.mrf.mxu0  ;;  %v12306_v26 = vpop.f32.mrf.mxu1 }
0x12b5   : > { %v6801_v17 = vpop.f32.mrf.mxu1  ;;  %7061 = vmatmul.mubr.bf16.gmra.mxu0 %v12169_v19  ;;  %v12309_v33 = vpop.f32.mrf.mxu0 }
0x12b6   : > { %13043 = vst [vmem:[#allocation29_spill] sm:$0xff] %v12309_v33  ;;  %10145 = vmatprep.mubr.msk.bf16.mxu0 %vm11120_vm0, %v13035_v5  ;;  %v7082_v40 = vpack.c.bf16 %v6801_v17, %v6797_v13 }
0x12b7   : > { %v12313_v35 = vpop.f32.mrf.mxu1  ;;  %v10121_v7 = vpop.f32.mrf.mxu0 }
0x12b9   : > { %v6807_v15 = vpop.f32.mrf.mxu1  ;;  %v12315_v23 = vpop.f32.mrf.mxu0 }
0x12ba   : > { %13044 = vst [vmem:[#allocation30_spill] sm:$0xff] %v12315_v23 }
0x12bb   : > { %v12317_v46 = vpop.f32.mrf.mxu1  ;;  %v10122_v24 = vpop.f32.mrf.mxu0 }
0x12bd   : > { %v6811_v36 = vpop.f32.mrf.mxu1  ;;  %v12319_v56 = vpop.f32.mrf.mxu0 }
0x12be   : > { %13045 = vst [vmem:[#allocation31_spill] sm:$0xff] %v12319_v56  ;;  %v7085_v55 = vpack.c.bf16 %v6811_v36, %v6807_v15  ;;  %v12398_v15 = vld [vmem:[%s13050_s0 + $0x20] ss:$0 sps:$4 sm:$0xff]  }
0x12bf   : > { %v12321_v30 = vpop.f32.mrf.mxu1  ;;  %v10125_v19 = vpop.f32.mrf.mxu0 }
0x12c1   : > { %v6817_v38 = vpop.f32.mrf.mxu1  ;;  %v12323_v43 = vpop.f32.mrf.mxu0 }
0x12c2   : > { %13046 = vst [vmem:[#allocation32_spill] sm:$0xff] %v12323_v43 }
0x12c3   : > { %v12325_v21 = vpop.f32.mrf.mxu1  ;;  %v10126_v25 = vpop.f32.mrf.mxu0 }
0x12c5   : > { %v6821_v42 = vpop.f32.mrf.mxu1  ;;  %v12327_v62 = vpop.f32.mrf.mxu0 }
0x12c6   : > { %13047 = vst [vmem:[#allocation33_spill] sm:$0xff] %v12327_v62  ;;  %v7088_v22 = vpack.c.bf16 %v6821_v42, %v6817_v38 }
0x12c7   : > { %v12329_v1 = vpop.f32.mrf.mxu1  ;;  %v10129_v32 = vpop.f32.mrf.mxu0 }
0x12c9   : > { %v6827_v11 = vpop.f32.mrf.mxu1  ;;  %v12331_v53 = vpop.f32.mrf.mxu0 }
0x12ca   : > { %13048 = vst [vmem:[#allocation34_spill] sm:$0xff] %v12331_v53  ;;  %v7091_v27 = vpack.c.bf16 %v6827_v11, %v6827_v11 }
0x12cb   : > { %v10130_v52 = vpop.f32.mrf.mxu0  ;;  %v12333_v51 = vpop.f32.mrf.mxu1 }
0x12cc   : > { %v7138_v54 = vsel %vm1486_vm1, %v7091_v27, 0 }
0x12cd   : > { %10136 = vmatpush3.bf16.msra.mxu0 %v7138_v54  ;;  %v12336_v0 = vpop.f32.mrf.mxu0  ;;  %v6831_v57 = vpop.f32.mrf.mxu1 }
0x12ce   : > { %13049 = vst [vmem:[#allocation35_spill] sm:$0xff] %v12336_v0  ;;  %10137 = vmatprep.subr.bf16.mxu0 %v13035_v5 }
0x12cf   : > { %v10133_v29 = vpop.f32.mrf.mxu0  ;;  %v6832_v58 = vpop.f32.mrf.mxu1 }
0x12d1   : > { %10138 = vmatpush3.bf16.msra.mxu0 %v7088_v22  ;;  %v5635_v61 = vpop.f32.mrf.mxu0 }
0x12d2   : > { %10139 = vmatprep.subr.bf16.mxu0 %v13035_v5 }
0x12d3   : > { %v10134_v18 = vpop.f32.mrf.mxu0 }
0x12d5   : > { %10140 = vmatpush3.bf16.msra.mxu0 %v7085_v55 }
0x12d6   : > { %10141 = vmatprep.subr.bf16.mxu0 %v13035_v5 }
0x12d9   : > { %10142 = vmatpush3.bf16.msra.mxu0 %v7082_v40 }
0x12da   : > { %10143 = vmatprep.subr.bf16.mxu0 %v13035_v5 }
0x12dd   : > { %10144 = vmatpush3.bf16.msra.mxu0 %v7079_v3 }
0x12de   : > { %10165 = vmatprep.subr.bf16.mxu0 %v13035_v5 }
0x12e0   : > { %10146 = vmatmul.mubr.msk.bf16.vlgmr.msra.gmra.mxu0 %vm7115_vm11, %v12343_v63 }
0x12e1   : > { %10149 = vmatprep.mubr.msk.bf16.mxu0 %vm11120_vm0, %v13035_v5 }
0x12e8   : > { %10150 = vmatmul.mubr.msk.bf16.gmra.mxu0 %vm7115_vm11, %v12351_v44 }
0x12e9   : > { %v12355_v4 = vpop.f32.mrf.mxu1  ;;  %10153 = vmatprep.mubr.msk.bf16.mxu0 %vm11120_vm0, %v13035_v5 }
0x12eb   : > { %v12359_v45 = vpop.f32.mrf.mxu1 }
0x12ed   : > { %v12364_v8 = vpop.f32.mrf.mxu1  ;;  %v12366_v48 = vpop.f32.mrf.mxu0 }
0x12ef   : > { %v12370_v12 = vpop.f32.mrf.mxu1  ;;  %v12372_v10 = vpop.f32.mrf.mxu0 }
0x12f0   : > { %10154 = vmatmul.mubr.msk.bf16.gmra.mxu0 %vm7115_vm11, %v12362_v20 }
0x12f1   : > { %v12376_v37 = vpop.f32.mrf.mxu0  ;;  %10157 = vmatprep.mubr.msk.bf16.mxu0 %vm11120_vm0, %v13035_v5  ;;  %v12380_v6 = vpop.f32.mrf.mxu1 }
0x12f3   : > { %v6712_v60 = vpop.f32.mrf.mxu0  ;;  %v12382_v34 = vpop.f32.mrf.mxu1 }
0x12f5   : > { %v6716_v31 = vpop.f32.mrf.mxu0  ;;  %v12387_v2 = vpop.f32.mrf.mxu1 }
0x12f7   : > { %v6718_v14 = vpop.f32.mrf.mxu0  ;;  %v12389_v9 = vpop.f32.mrf.mxu1 }
0x12f8   : > { %10158 = vmatmul.mubr.msk.bf16.gmra.mxu0 %vm7115_vm11, %v12385_v47 }
0x12f9   : > { %v6720_v13 = vpop.f32.mrf.mxu0  ;;  %10161 = vmatprep.mubr.msk.bf16.mxu0 %vm11120_vm0, %v13035_v5  ;;  %v12395_v16 = vpop.f32.mrf.mxu1 }
0x12fb   : > { %v6722_v17 = vpop.f32.mrf.mxu0  ;;  %v6971_v7 = vpop.f32.mrf.mxu1 }
0x12fc   : > { %v7081_v39 = vpack.c.bf16 %v6722_v17, %v6718_v14  ;;  %v10933_v17 = vld [vmem:[%s11325_s6 + $0x94] ss:$12 sps:$4 sm:$0xff]  }
0x12fd   : > { %v6726_v24 = vpop.f32.mrf.mxu0  ;;  %v6973_v36 = vpop.f32.mrf.mxu1 }
0x12ff   : > { %v6728_v19 = vpop.f32.mrf.mxu0  ;;  %v6975_v38 = vpop.f32.mrf.mxu1 }
0x1300   : > { %10162 = vmatmul.mubr.msk.bf16.gmra.mxu0 %vm7115_vm11, %v12398_v15 }
0x1301   : > { %v6730_v25 = vpop.f32.mrf.mxu0  ;;  %v6979_v42 = vpop.f32.mrf.mxu1  ;;  %10175 = vmatprep.mubr.msk.bf16.mxu0 %vm11120_vm0, %v13035_v5 }
0x1302   : > { %v7083_v41 = vpack.c.bf16 %v6730_v25, %v6726_v24  ;;  %v10931_v24 = vld [vmem:[%s11325_s6 + $0x90] ss:$12 sps:$4 sm:$0xff]  }
0x1303   : > { %v6732_v32 = vpop.f32.mrf.mxu0  ;;  %v6981_v11 = vpop.f32.mrf.mxu1 }
0x1304   : > { %v7084_v33 = vpack.c.bf16 %v6732_v32, %v6728_v19  ;;  %v12483_v19 = vld [vmem:[%s11320_s12 + $0x8] sm:$0xff]  }
0x1305   : > { %v6736_v27 = vpop.f32.mrf.mxu0  ;;  %v6983_v52 = vpop.f32.mrf.mxu1 }
0x1307   : > { %v6738_v54 = vpop.f32.mrf.mxu0  ;;  %v6985_v22 = vpop.f32.mrf.mxu1 }
0x1309   : > { %v6740_v57 = vpop.f32.mrf.mxu0  ;;  %v6989_v29 = vpop.f32.mrf.mxu1 }
0x130a   : > { %v7086_v56 = vpack.c.bf16 %v6740_v57, %v6736_v27 }
0x130b   : > { %v6742_v58 = vpop.f32.mrf.mxu0  ;;  %v6991_v55 = vpop.f32.mrf.mxu1 }
0x130c   : > { %v7087_v0 = vpack.c.bf16 %v6742_v58, %v6738_v54  ;;  %v7314_v54 = vpack.c.bf16 %v6989_v29, %v6989_v29  ;;  %v7315_v58 = vpack.c.bf16 %v6991_v55, %v6991_v55  ;;  %v12507_v29 = vld [vmem:[%s11320_s12 + $0x18] sm:$0xff]  }
0x130d   : > { %v6746_v61 = vpop.f32.mrf.mxu0  ;;  %v6993_v18 = vpop.f32.mrf.mxu1 }
0x130e   : > { %v7089_v40 = vpack.c.bf16 %v6746_v61, %v6746_v61  ;;  %v7080_v61 = vpack.c.bf16 %v6720_v13, %v6716_v31 }
0x130f   : > { %v6748_v3 = vpop.f32.mrf.mxu0  ;;  %v6994_v50 = vpop.f32.mrf.mxu1 }
0x1310   : > { %v7132_v53 = vsel %vm1486_vm1, %v7089_v40, 0  ;;  %v7090_v62 = vpack.c.bf16 %v6748_v3, %v6748_v3  ;;  %v7078_v50 = vpack.c.bf16 %v6712_v60, %v12372_v10  ;;  %v7303_v10 = vpack.c.bf16 %v12370_v12, %v12359_v45  ;;  %v10936_v40 = vld [vmem:[%s11325_s6 + $0x7c] ss:$12 sps:$4 sm:$0xff]  }
0x1311   : > { %v6750_v43 = vpop.f32.mrf.mxu0 }
0x1312   : > { %9316 = vmatprep.subr.msk.bf16.mxu1 %vm1486_vm1, %v7090_v62  ;;  %v7077_v43 = vpack.c.bf16 %v12376_v37, %v12366_v48 }
0x1313   : > { %7147 = vmatpush1.bf16.msra.mxu1 %v7132_v53  ;;  %v6751_v23 = vpop.f32.mrf.mxu0  ;;  %v7306_v53 = vpack.c.bf16 %v12389_v9, %v12382_v34  ;;  %v12468_v9 = vld [vmem:[%s11320_s12] sm:$0xff]  }
0x1314   : > { %7148 = vmatprep.subr.bf16.mxu1 %v7087_v0  ;;  %v7356_v23 = vsel %vm1486_vm1, %v7314_v54, 0  ;;  %v12515_v54 = vld [vmem:[%s11320_s12 + $0x20] ss:$0 sps:$4 sm:$0xff]  }
0x1317   : > { %7149 = vmatpush1.bf16.msra.mxu1 %v7086_v56  ;;  %v7308_v56 = vpack.c.bf16 %v6973_v36, %v12395_v16  ;;  %v10928_v16 = vld [vmem:[%s11325_s6 + $0xa8] ss:$12 sps:$4 sm:$0xff]  }
0x1318   : > { %7150 = vmatprep.subr.bf16.mxu1 %v7084_v33  ;;  %v7312_v33 = vpack.c.bf16 %v6985_v22, %v6981_v11  ;;  %v12495_v11 = vld [vmem:[%s11320_s12 + $0x10] sm:$0xff]  }
0x131b   : > { %7151 = vmatpush1.bf16.msra.mxu1 %v7083_v41  ;;  %v7309_v41 = vpack.c.bf16 %v6975_v38, %v6971_v7 }
0x131c   : > { %7152 = vmatprep.subr.bf16.mxu1 %v7081_v39  ;;  %v7311_v39 = vpack.c.bf16 %v6983_v52, %v6979_v42 }
0x131f   : > { %7153 = vmatpush1.bf16.msra.mxu1 %v7080_v61  ;;  %v10934_v61 = vld [vmem:[%s11325_s6 + $0x78] ss:$12 sps:$4 sm:$0xff]  }
0x1320   : > { %7154 = vmatprep.subr.bf16.mxu1 %v7078_v50 }
0x1323   : > { %7155 = vmatpush1.bf16.msra.mxu1 %v7077_v43 }
0x1324   : > { %9332 = vmatprep.subr.msk.bf16.mxu1 %vm1486_vm1, %v7315_v58  ;;  %v10939_v58 = vld [vmem:[%s11325_s6 + $0x64] ss:$12 sps:$4 sm:$0xff]  }
0x1326   : > { %9317 = vmatmul.mubr.msk.bf16.vlgmr.msra.gmra.mxu1 %vm7115_vm11, %v12343_v63  ;;  %v7305_v63 = vpack.c.bf16 %v12387_v2, %v12380_v6  ;;  %v13051_v6 = vpack.c.bf16 %v12364_v8, %v12355_v4  ;;  %v10930_v8 = vld [vmem:[%s11325_s6 + $0xac] ss:$12 sps:$4 sm:$0xff]  }
0x1327   : > { %7371 = vmatpush1.bf16.msra.mxu1 %v7356_v23  ;;  %7182 = vmatprep.mubr.bf16.mxu1 %v13039_v59  ;;  %v10937_v23 = vld [vmem:[%s11325_s6 + $0x60] ss:$12 sps:$4 sm:$0xff]  }
0x1328   : > { %7372 = vmatprep.subr.bf16.mxu1 %v7312_v33 }
0x132b   : > { %7373 = vmatpush1.bf16.msra.mxu1 %v7311_v39  ;;  %v10942_v39 = vld [vmem:[%s11325_s6 + $0x4c] ss:$12 sps:$4 sm:$0xff]  }
0x132c   : > { %7374 = vmatprep.subr.bf16.mxu1 %v7309_v41 }
0x132d   : > { %v12415_v62 = vpop.f32.mrf.mxu0 }
0x132e   : > { %9318 = vmatmul.mubr.msk.bf16.gmra.mxu1 %vm7115_vm11, %v12351_v44 }
0x132f   : > { %v12421_v0 = vpop.f32.mrf.mxu0  ;;  %7375 = vmatpush1.bf16.msra.mxu1 %v7308_v56  ;;  %7192 = vmatprep.mubr.bf16.mxu1 %v13039_v59  ;;  %v10940_v56 = vld [vmem:[%s11325_s6 + $0x48] ss:$12 sps:$4 sm:$0xff]  }
0x1330   : > { %7376 = vmatprep.subr.bf16.mxu1 %v7306_v53 }
0x1331   : > { %v12426_v48 = vpop.f32.mrf.mxu0 }
0x1333   : > { %v12430_v37 = vpop.f32.mrf.mxu0  ;;  %7377 = vmatpush1.bf16.msra.mxu1 %v7305_v63  ;;  %v10945_v63 = vld [vmem:[%s11325_s6 + $0x34] ss:$12 sps:$4 sm:$0xff]  }
0x1334   : > { %7378 = vmatprep.subr.bf16.mxu1 %v7303_v10 }
0x1335   : > { %v12432_v44 = vpop.f32.mrf.mxu0 }
0x1336   : > { %9319 = vmatmul.mubr.msk.bf16.gmra.mxu1 %vm7115_vm11, %v12362_v20 }
0x1337   : > { %v12436_v60 = vpop.f32.mrf.mxu0  ;;  %7379 = vmatpush1.bf16.msra.mxu1 %v13051_v6  ;;  %7202 = vmatprep.mubr.bf16.mxu1 %v13039_v59  ;;  %v10943_v6 = vld [vmem:[%s11325_s6 + $0x30] ss:$12 sps:$4 sm:$0xff]  }
0x1338   : > { %8164 = vmatprep.subr.bf16.mxu1 %v10930_v8 }
0x1339   : > { %v12442_v45 = vpop.f32.mrf.mxu0 }
0x133b   : > { %v12444_v12 = vpop.f32.mrf.mxu0 }
0x133d   : > { %v12446_v34 = vpop.f32.mrf.mxu0 }
0x133e   : > { %9320 = vmatmul.mubr.msk.bf16.gmra.mxu1 %vm7115_vm11, %v12385_v47 }
0x133f   : > { %v12450_v20 = vpop.f32.mrf.mxu0  ;;  %7212 = vmatprep.mubr.bf16.mxu1 %v13039_v59 }
0x1341   : > { %v12453_v4 = vpop.f32.mrf.mxu0 }
0x1343   : > { %v12456_v31 = vpop.f32.mrf.mxu0 }
0x1344   : > { %13052 = vst [vmem:[#allocation36_spill] sm:$0xff] %v12456_v31 }
0x1345   : > { %v12458_v2 = vpop.f32.mrf.mxu0 }
0x1346   : > { %9321 = vmatmul.mubr.msk.bf16.gmra.mxu1 %vm7115_vm11, %v12398_v15 }
0x1347   : > { %v12462_v14 = vpop.f32.mrf.mxu0  ;;  %7396 = vmatprep.mubr.bf16.mxu1 %v13039_v59 }
0x1348   : > { %13053 = vst [vmem:[#allocation37_spill] sm:$0xff] %v12462_v14 }
0x1349   : > { %v12465_v47 = vpop.f32.mrf.mxu0 }
0x134b   : > { %v12470_v13 = vpop.f32.mrf.mxu0 }
0x134c   : > { %13054 = vst [vmem:[#allocation38_spill] sm:$0xff] %v12470_v13 }
0x134d   : > { %v12474_v7 = vpop.f32.mrf.mxu0 }
0x134e   : > { %9333 = vmatmul.mubr.msk.bf16.vlgmr.msra.gmra.mxu1 %vm7115_vm11, %v12468_v9 }
0x134f   : > { %v12478_v15 = vpop.f32.mrf.mxu0  ;;  %7406 = vmatprep.mubr.bf16.mxu1 %v13039_v59  ;;  %8165 = vmatpush1.bf16.msra.mxu1 %v10928_v16  ;;  %v10948_v16 = vld [vmem:[%s11325_s6 + $0x1c] ss:$12 sps:$4 sm:$0xff]  }
0x1350   : > { %13055 = vst [vmem:[#allocation39_spill] sm:$0xff] %v12478_v15  ;;  %8166 = vmatprep.subr.bf16.mxu1 %v10933_v17 }
0x1351   : > { %v6912_v36 = vpop.f32.mrf.mxu0 }
0x1353   : > { %v6913_v38 = vpop.f32.mrf.mxu0  ;;  %8167 = vmatpush1.bf16.msra.mxu1 %v10931_v24  ;;  %v10946_v24 = vld [vmem:[%s11325_s6 + $0x18] ss:$12 sps:$4 sm:$0xff]  }
0x1354   : > { %8168 = vmatprep.subr.bf16.mxu1 %v10936_v40 }
0x1355   : > { %v12485_v25 = vpop.f32.mrf.mxu0 }
0x1356   : > { %9334 = vmatmul.mubr.msk.bf16.gmra.mxu1 %vm7115_vm11, %v12483_v19 }
0x1357   : > { %v12489_v42 = vpop.f32.mrf.mxu0  ;;  %7416 = vmatprep.mubr.bf16.mxu1 %v13039_v59  ;;  %8169 = vmatpush1.bf16.msra.mxu1 %v10934_v61  ;;  %v10951_v61 = vld [vmem:[%s11325_s6 + $0x4] ss:$12 sps:$4 sm:$0xff]  }
0x1358   : > { %8170 = vmatprep.subr.bf16.mxu1 %v10939_v58 }
0x1359   : > { %v12492_v32 = vpop.f32.mrf.mxu0 }
0x135b   : > { %v12497_v27 = vpop.f32.mrf.mxu0  ;;  %8171 = vmatpush1.bf16.msra.mxu1 %v10937_v23 }
0x135c   : > { %8172 = vmatprep.subr.bf16.mxu1 %v10942_v39  ;;  %v10949_v39 = vld [vmem:[%s11325_s6] ss:$12 sps:$4 sm:$0xff]  }
0x135d   : > { %v12499_v52 = vpop.f32.mrf.mxu0 }
0x135e   : > { %9335 = vmatmul.mubr.msk.bf16.gmra.mxu1 %vm7115_vm11, %v12495_v11 }
0x135f   : > { %v12503_v22 = vpop.f32.mrf.mxu0  ;;  %7426 = vmatprep.mubr.bf16.mxu1 %v13039_v59  ;;  %8173 = vmatpush1.bf16.msra.mxu1 %v10940_v56 }
0x1360   : > { %8174 = vmatprep.subr.bf16.mxu1 %v10945_v63 }
0x1361   : > { %v9655_v57 = vpop.f32.mrf.mxu0 }
0x1363   : > { %v9656_v55 = vpop.f32.mrf.mxu0  ;;  %8175 = vmatpush1.bf16.msra.mxu1 %v10943_v6  ;;  %v10954_v6 = vld [vmem:[%s11325_s6 + $0x16c] ss:$12 sps:$4 sm:$0xff]  }
0x1364   : > { %8176 = vmatprep.subr.bf16.mxu1 %v10948_v16 }
0x1365   : > { %v9658_v18 = vpop.f32.mrf.mxu0 }
0x1366   : > { %9336 = vmatmul.mubr.msk.bf16.gmra.mxu1 %vm7115_vm11, %v12507_v29 }
0x1367   : > { %v9659_v3 = vpop.f32.mrf.mxu0  ;;  %7436 = vmatprep.mubr.bf16.mxu1 %v13039_v59  ;;  %8177 = vmatpush1.bf16.msra.mxu1 %v10946_v24 }
0x1368   : > { %8178 = vmatprep.subr.bf16.mxu1 %v10951_v61  ;;  %v9660_v24 = vadd.f32 %v9659_v3, %v9658_v18  ;;  %v10960_v18 = vld [vmem:[%s11325_s6 + $0x13c] ss:$12 sps:$4 sm:$0xff]   ;;  %v9651_v3 = vadd.f32 %v12497_v27, %v12492_v32  ;;  %v10966_v32 = vld [vmem:[%s11325_s6 + $0x10c] ss:$12 sps:$4 sm:$0xff]  }
0x1369   : > { %v9661_v50 = vpop.f32.mrf.mxu0  ;;  %v10964_v27 = vld [vmem:[%s11325_s6 + $0x108] ss:$12 sps:$4 sm:$0xff]   ;;  %v10973_v61 = vld [vmem:[%s11325_s6 + $0xc0] ss:$12 sps:$4 sm:$0xff]  }
0x136b   : > { %v9662_v43 = vpop.f32.mrf.mxu0  ;;  %8179 = vmatpush1.bf16.msra.mxu1 %v10949_v39 }
0x136c   : > { %8180 = vmatprep.subr.bf16.mxu1 %v10954_v6 }
0x136d   : > { %v9664_v33 = vpop.f32.mrf.mxu0 }
0x136e   : > { %9337 = vmatmul.mubr.msk.bf16.gmra.mxu1 %vm7115_vm11, %v12515_v54 }
0x136f   : > { %v9665_v41 = vpop.f32.mrf.mxu0 }
0x1370   : > { %v9666_v63 = vadd.f32 %v9665_v41, %v9664_v33  ;;  %v10955_v41 = vld [vmem:[%s11325_s6 + $0x150] ss:$12 sps:$4 sm:$0xff]  }
0x1371   : > { %v9667_v53 = vpop.f32.mrf.mxu0 }
0x1373   : > { %v9668_v10 = vpop.f32.mrf.mxu0 }
0x1374   : > { %v9669_v58 = vadd.f32 %v9668_v10, %v9667_v53  ;;  %v10957_v53 = vld [vmem:[%s11325_s6 + $0x154] ss:$12 sps:$4 sm:$0xff]   ;;  %v9657_v10 = vadd.f32 %v9656_v55, %v9655_v57  ;;  %v10958_v57 = vld [vmem:[%s11325_s6 + $0x138] ss:$12 sps:$4 sm:$0xff]   ;;  %v9648_v55 = vadd.f32 %v12489_v42, %v12485_v25  ;;  %v10967_v42 = vld [vmem:[%s11325_s6 + $0xf0] ss:$12 sps:$4 sm:$0xff]  }
0x1375   : > { %v9670_v8 = vpop.f32.mrf.mxu0  ;;  %v10969_v25 = vld [vmem:[%s11325_s6 + $0xf4] ss:$12 sps:$4 sm:$0xff]  }
0x1376   : > { %v7313_v16 = vpack.c.bf16 %v9669_v58, %v9666_v63 }
0x1377   : > { %v9671_v17 = vpop.f32.mrf.mxu0 }
0x1378   : > { %v9672_v36 = vadd.f32 %v9671_v17, %v9670_v8  ;;  %v9663_v8 = vadd.f32 %v9662_v43, %v9661_v50  ;;  %v10952_v17 = vld [vmem:[%s11325_s6 + $0x168] ss:$12 sps:$4 sm:$0xff]   ;;  %v9654_v50 = vadd.f32 %v12503_v22, %v12499_v52  ;;  %v10961_v52 = vld [vmem:[%s11325_s6 + $0x120] ss:$12 sps:$4 sm:$0xff]   ;;  %v10963_v22 = vld [vmem:[%s11325_s6 + $0x124] ss:$12 sps:$4 sm:$0xff]  }
0x1379   : > { %v9673_v38 = vpop.f32.mrf.mxu0  ;;  %8181 = vmatpush2.bf16.msra.mxu1 %v10952_v17 }
0x137a   : > { %v7316_v40 = vpack.c.bf16 %v9672_v36, %v9672_v36  ;;  %v7310_v33 = vpack.c.bf16 %v9663_v8, %v9660_v24  ;;  %8182 = vmatprep.subr.bf16.mxu1 %v10957_v53  ;;  %v7307_v43 = vpack.c.bf16 %v9657_v10, %v9654_v50  ;;  %v7304_v36 = vpack.c.bf16 %v9651_v3, %v9648_v55  ;;  %v10972_v38 = vld [vmem:[%s11325_s6 + $0xdc] ss:$12 sps:$4 sm:$0xff]   ;;  %v10982_v3 = vld [vmem:[%s11325_s6 + $0x214] ss:$12 sps:$4 sm:$0xff]  }
0x137b   : > { %v9674_v23 = vpop.f32.mrf.mxu0  ;;  %v10976_v10 = vld [vmem:[%s11325_s6 + $0x228] ss:$12 sps:$4 sm:$0xff]  }
0x137c   : > { %v7362_v56 = vsel %vm1486_vm1, %v7316_v40, 0  ;;  %v10970_v40 = vld [vmem:[%s11325_s6 + $0xd8] ss:$12 sps:$4 sm:$0xff]  }
0x137d   : > { %10166 = vmatpush3.bf16.msra.mxu0 %v7362_v56  ;;  %8183 = vmatpush2.bf16.msra.mxu1 %v10955_v41 }
0x137e   : > { %10167 = vmatprep.subr.bf16.mxu0 %v13035_v5  ;;  %8184 = vmatprep.subr.bf16.mxu1 %v10960_v18  ;;  %v10980_v18 = vld [vmem:[%s11325_s6 + $0x210] ss:$12 sps:$4 sm:$0xff]  }
0x1381   : > { %10168 = vmatpush3.bf16.msra.mxu0 %v7313_v16  ;;  %8185 = vmatpush2.bf16.msra.mxu1 %v10958_v57  ;;  %v10986_v57 = vld [vmem:[%s11325_s6 + $0x1fc] ss:$12 sps:$4 sm:$0xff]  }
0x1382   : > { %10169 = vmatprep.subr.bf16.mxu0 %v13035_v5  ;;  %8186 = vmatprep.subr.bf16.mxu1 %v10963_v22  ;;  %v10990_v22 = vld [vmem:[%s11325_s6 + $0x1e4] ss:$12 sps:$4 sm:$0xff]  }
0x1385   : > { %10170 = vmatpush3.bf16.msra.mxu0 %v7310_v33  ;;  %8187 = vmatpush2.bf16.msra.mxu1 %v10961_v52  ;;  %v10978_v33 = vld [vmem:[%s11325_s6 + $0x22c] ss:$12 sps:$4 sm:$0xff]  }
0x1386   : > { %10171 = vmatprep.subr.bf16.mxu0 %v13035_v5  ;;  %8188 = vmatprep.subr.bf16.mxu1 %v10966_v32  ;;  %v10984_v52 = vld [vmem:[%s11325_s6 + $0x1f8] ss:$12 sps:$4 sm:$0xff]   ;;  %v10988_v32 = vld [vmem:[%s11325_s6 + $0x1e0] ss:$12 sps:$4 sm:$0xff]  }
0x1389   : > { %10172 = vmatpush3.bf16.msra.mxu0 %v7307_v43  ;;  %8189 = vmatpush2.bf16.msra.mxu1 %v10964_v27  ;;  %v10994_v27 = vld [vmem:[%s11325_s6 + $0x1cc] ss:$12 sps:$4 sm:$0xff]  }
0x138a   : > { %10173 = vmatprep.subr.bf16.mxu0 %v13035_v5  ;;  %8190 = vmatprep.subr.bf16.mxu1 %v10969_v25  ;;  %v10992_v25 = vld [vmem:[%s11325_s6 + $0x1c8] ss:$12 sps:$4 sm:$0xff]  }
0x138d   : > { %10174 = vmatpush3.bf16.msra.mxu0 %v7304_v36  ;;  %8191 = vmatpush2.bf16.msra.mxu1 %v10967_v42  ;;  %v10998_v42 = vld [vmem:[%s11325_s6 + $0x1b4] ss:$12 sps:$4 sm:$0xff]  }
0x138e   : > { %8192 = vmatprep.subr.bf16.mxu1 %v10972_v38  ;;  %8245 = vmatprep.subr.bf16.mxu0 %v10978_v33  ;;  %v10996_v38 = vld [vmem:[%s11325_s6 + $0x1b0] ss:$12 sps:$4 sm:$0xff]  }
0x1390   : > { %10176 = vmatmul.mubr.msk.bf16.vlgmr.msra.gmra.mxu0 %vm7115_vm11, %v12468_v9  ;;  %v10975_v9 = vld [vmem:[%s11325_s6 + $0xc4] ss:$12 sps:$4 sm:$0xff]  }
0x1391   : > { %10179 = vmatprep.mubr.msk.bf16.mxu0 %vm11120_vm0, %v13035_v5  ;;  %8193 = vmatpush2.bf16.msra.mxu1 %v10970_v40  ;;  %v11002_v40 = vld [vmem:[%s11325_s6 + $0x19c] ss:$12 sps:$4 sm:$0xff]  }
0x1392   : > { %8194 = vmatprep.subr.bf16.mxu1 %v10975_v9  ;;  %8246 = vmatpush1.bf16.msra.mxu0 %v10976_v10  ;;  %v11000_v9 = vld [vmem:[%s11325_s6 + $0x198] ss:$12 sps:$4 sm:$0xff]  }
0x1393   : > { %8247 = vmatprep.subr.bf16.mxu0 %v10982_v3 }
0x1395   : > { %8195 = vmatpush2.bf16.msra.mxu1 %v10973_v61  ;;  %v11006_v61 = vld [vmem:[%s11325_s6 + $0x184] ss:$12 sps:$4 sm:$0xff]  }
0x1396   : > { %10195 = vmatprep.subr.bf16.mxu1 %v13035_v5  ;;  %8248 = vmatpush1.bf16.msra.mxu0 %v10980_v18 }
0x1397   : > { %8249 = vmatprep.subr.bf16.mxu0 %v10986_v57 }
0x1398   : > { %10180 = vmatmul.mubr.msk.bf16.gmra.mxu0 %vm7115_vm11, %v12483_v19 }
0x1399   : > { %10183 = vmatprep.mubr.msk.bf16.mxu0 %vm11120_vm0, %v13035_v5 }
0x139a   : > { %8250 = vmatpush1.bf16.msra.mxu0 %v10984_v52 }
0x139b   : > { %8251 = vmatprep.subr.bf16.mxu0 %v10990_v22 }
0x139e   : > { %8252 = vmatpush1.bf16.msra.mxu0 %v10988_v32 }
0x139f   : > { %8253 = vmatprep.subr.bf16.mxu0 %v10994_v27 }
0x13a0   : > { %v12565_v58 = vpop.f32.mrf.mxu0  ;;  %10184 = vmatmul.mubr.msk.bf16.gmra.mxu0 %vm7115_vm11, %v12495_v11 }
0x13a1   : > { %10187 = vmatprep.mubr.msk.bf16.mxu0 %vm11120_vm0, %v13035_v5 }
0x13a2   : > { %v10147_v19 = vpop.f32.mrf.mxu0  ;;  %8254 = vmatpush1.bf16.msra.mxu0 %v10992_v25 }
0x13a3   : > { %8255 = vmatprep.subr.bf16.mxu0 %v10998_v42  ;;  %v11004_v19 = vld [vmem:[%s11325_s6 + $0x180] ss:$12 sps:$4 sm:$0xff]  }
0x13a4   : > { %v12571_v23 = vpop.f32.mrf.mxu0 }
0x13a6   : > { %v10148_v39 = vpop.f32.mrf.mxu0  ;;  %8256 = vmatpush1.bf16.msra.mxu0 %v10996_v38  ;;  %v12626_v38 = vld [vmem:[%s13061_s1] sm:$0x7]  ;;  %s10291_s1 = smul.u32 72, %s13085_s10 }
0x13a7   : > { %8257 = vmatprep.subr.bf16.mxu0 %v11002_v40 }
0x13a8   : > { %v12573_v56 = vpop.f32.mrf.mxu0  ;;  %10188 = vmatmul.mubr.msk.bf16.gmra.mxu0 %vm7115_vm11, %v12507_v29 }
0x13a9   : > { %10191 = vmatprep.mubr.msk.bf16.mxu0 %vm11120_vm0, %v13035_v5 }
0x13aa   : > { %v10151_v63 = vpop.f32.mrf.mxu0  ;;  %8258 = vmatpush1.bf16.msra.mxu0 %v11000_v9 }
0x13ab   : > { %8259 = vmatprep.subr.bf16.mxu0 %v11006_v61  ;;  %v11008_v63 = vld [vmem:[%s11325_s6 + $0x170] ss:$12 sps:$4 sm:$0xff]  }
0x13ac   : > { %v12579_v6 = vpop.f32.mrf.mxu0 }
0x13ae   : > { %v10152_v11 = vpop.f32.mrf.mxu0  ;;  %8260 = vmatpush1.bf16.msra.mxu0 %v11004_v19  ;;  %v13062_v19 = vld [vmem:[#allocation26_spill] sm:$0xff] }
0x13af   : > { %9696 = vmatprep.subr.bf16.mxu0 %v11008_v63  ;;  %v13063_v63 = vsub.s32 0, %v13062_v19 }
0x13b0   : > { %v12581_v8 = vpop.f32.mrf.mxu0  ;;  %10192 = vmatmul.mubr.msk.bf16.gmra.mxu0 %vm7115_vm11, %v12515_v54 }
0x13b1   : > { %13056 = vst [vmem:[#allocation40_spill] sm:$0xff] %v12581_v8  ;;  %8277 = vmatprep.mubr.bf16.mxu0 %v13039_v59 }
0x13b2   : > { %v10155_v16 = vpop.f32.mrf.mxu0 }
0x13b4   : > { %v12586_v17 = vpop.f32.mrf.mxu0 }
0x13b5   : > { %13057 = vst [vmem:[#allocation41_spill] sm:$0xff] %v12586_v17 }
0x13b6   : > { %v10156_v29 = vpop.f32.mrf.mxu0 }
0x13b8   : > { %v12588_v24 = vpop.f32.mrf.mxu0 }
0x13b9   : > { %13058 = vst [vmem:[#allocation42_spill] sm:$0xff] %v12588_v24 }
0x13ba   : > { %v10159_v53 = vpop.f32.mrf.mxu0 }
0x13bc   : > { %v12592_v41 = vpop.f32.mrf.mxu0 }
0x13bd   : > { %13059 = vst [vmem:[#allocation43_spill] sm:$0xff] %v12592_v41  ;;  %v13064_v41 = vsub.s32 1, %v13062_v19 }
0x13be   : > { %v10160_v54 = vpop.f32.mrf.mxu0 }
0x13bf   : > { %v12638_v13 = vrot.slane %v12626_v38, %v13064_v41 }
0x13c0   : > { %v12594_v50 = vpop.f32.mrf.mxu0 }
0x13c1   : > { %13060 = vst [vmem:[#allocation44_spill] sm:$0xff] %v12594_v50  ;;  %v12633_v50 = vrot.slane %v12626_v38, %v13063_v63 }
0x13c2   : > { %v10163_v43 = vpop.f32.mrf.mxu0 }
0x13c4   : > { %v7290_v55 = vpop.f32.mrf.mxu0 }
0x13c6   : > { %v10164_v36 = vpop.f32.mrf.mxu0 }
0x13e6   : > { %v7174_v39 = vpop.f32.mrf.mxu1 }
0x13e7   : > { %v7175_v9 = vadd.f32 %v7174_v39, %v12296_v49 }
0x13e8   : > { %v7176_v11 = vpop.f32.mrf.mxu1 }
0x13e9   : > { %v7177_v61 = vadd.f32 %v7176_v11, %v12415_v62 }
0x13ea   : > { %v7178_v16 = vpop.f32.mrf.mxu1 }
0x13ec   : > { %v7180_v29 = vpop.f32.mrf.mxu1 }
0x13ed   : > { %v7181_v49 = vadd.f32 %v7180_v29, %v12426_v48 }
0x13ee   : > { %v7184_v53 = vpop.f32.mrf.mxu1 }
0x13ef   : > { %v7185_v8 = vadd.f32 %v7184_v53, %v12306_v26 }
0x13f0   : > { %v7186_v10 = vpop.f32.mrf.mxu1 }
0x13f1   : > { %v7187_v41 = vadd.f32 %v7186_v10, %v12432_v44 }
0x13f2   : > { %v7188_v33 = vpop.f32.mrf.mxu1 }
0x13f4   : > { %v7190_v54 = vpop.f32.mrf.mxu1 }
0x13f5   : > { %v7191_v26 = vadd.f32 %v7190_v54, %v12442_v45 }
0x13f6   : > { %v7194_v18 = vpop.f32.mrf.mxu1 }
0x13f8   : > { %v7196_v3 = vpop.f32.mrf.mxu1 }
0x13f9   : > { %v7197_v45 = vadd.f32 %v7196_v3, %v12446_v34 }
0x13fa   : > { %v7198_v43 = vpop.f32.mrf.mxu1 }
0x13fc   : > { %v12611_v57 = vpop.f32.mrf.mxu1 }
0x13fd   : > { %v7201_v3 = vadd.f32 %v12611_v57, %v12453_v4 }
0x13fe   : > { %v12613_v55 = vpop.f32.mrf.mxu1 }
0x1400   : > { %v12615_v52 = vpop.f32.mrf.mxu1 }
0x1401   : > { %v7207_v4 = vadd.f32 %v12615_v52, %v12458_v2 }
0x1402   : > { %v12617_v22 = vpop.f32.mrf.mxu1 }
0x1404   : > { %v12619_v36 = vpop.f32.mrf.mxu1 }
0x1406   : > { %v12621_v32 = vpop.f32.mrf.mxu1 }
0x1408   : > { %v12623_v27 = vpop.f32.mrf.mxu1 }
0x140a   : > { %v7218_v25 = vpop.f32.mrf.mxu1 }
0x140b   : > { %v7179_v25 = vadd.f32 %v7178_v16, %v12302_v28  ;;  %v7189_v28 = vadd.f32 %v7188_v33, %v12313_v35 }
0x140c   : > { %v7219_v42 = vpop.f32.mrf.mxu1 }
0x140e   : > { %v7398_v40 = vpop.f32.mrf.mxu1 }
0x140f   : > { %v7517_v42 = vadd.f32 %v7398_v40, %v7175_v9 }
0x1410   : > { %v7400_v15 = vpop.f32.mrf.mxu1 }
0x1411   : > { %v7518_v24 = vadd.f32 %v7400_v15, %v7177_v61  ;;  %v7561_v39 = vadd.f32 %v12633_v50, %v7517_v42 }
0x1412   : > { %v7402_v14 = vpop.f32.mrf.mxu1 }
0x1413   : > { %v7520_v17 = vadd.f32 %v7402_v14, %v7179_v25  ;;  %v7562_v11 = vadd.f32 %v12638_v13, %v7518_v24  ;;  %v7615_v48 = vmul.f32 0.2, %v7561_v39  ;;  %vm7588_vm4 = vcmp.ge.f32.partialorder %v7561_v39, 0.0 }
0x1414   : > { %v7404_v62 = vpop.f32.mrf.mxu1 }
0x1415   : > { %v7564_v63 = vadd.f32 %v12633_v50, %v7520_v17  ;;  %v7521_v31 = vadd.f32 %v7404_v62, %v7181_v49  ;;  %v7616_v29 = vmul.f32 0.2, %v7562_v11  ;;  %vm7589_vm2 = vcmp.ge.f32.partialorder %v7562_v11, 0.0 }
0x1416   : > { %v7408_v59 = vpop.f32.mrf.mxu1  ;;  %v7642_v25 = vsel %vm7588_vm4, %v7561_v39, %v7615_v48  ;;  %v10983_v48 = vld [vmem:[%s11325_s6 + $0x218] ss:$12 sps:$4 sm:$0xff]  }
0x1417   : > { %v7618_v15 = vmul.f32 0.2, %v7564_v63  ;;  %v7565_v14 = vadd.f32 %v12638_v13, %v7521_v31  ;;  %vm7591_vm15 = vcmp.ge.f32.partialorder %v7564_v63, 0.0  ;;  %v7523_v17 = vadd.f32 %v7408_v59, %v7185_v8  ;;  %v10979_v8 = vld [vmem:[%s11325_s6 + $0x230] ss:$12 sps:$4 sm:$0xff]  }
0x1418   : > { %v7410_v16 = vpop.f32.mrf.mxu1  ;;  %v7643_v61 = vsel %vm7589_vm2, %v7562_v11, %v7616_v29 }
0x1419   : > { %v7524_v40 = vadd.f32 %v7410_v16, %v7187_v41  ;;  %vm7592_vm3 = vcmp.ge.f32.partialorder %v7565_v14, 0.0  ;;  %v7619_v24 = vmul.f32 0.2, %v7565_v14  ;;  %v7645_v53 = vsel %vm7591_vm15, %v7564_v63, %v7618_v15 }
0x141a   : > { %v7412_v9 = vpop.f32.mrf.mxu1  ;;  %v7567_v42 = vadd.f32 %v12633_v50, %v7523_v17  ;;  %v7195_v41 = vadd.f32 %v7194_v18, %v12317_v46  ;;  %v12658_v54 = vpack.c.bf16 %v7645_v53, %v7642_v25  ;;  %v7199_v63 = vadd.f32 %v7198_v43, %v12321_v30 }
0x141b   : > { %v7526_v44 = vadd.f32 %v7412_v9, %v7189_v28  ;;  %v7646_v10 = vsel %vm7592_vm3, %v7565_v14, %v7619_v24  ;;  %v7568_v31 = vadd.f32 %v12638_v13, %v7524_v40 }
0x141c   : > { %v7414_v35 = vpop.f32.mrf.mxu1  ;;  %v12653_v59 = vpack.c.bf16 %v7646_v10, %v7643_v61  ;;  %v7621_v46 = vmul.f32 0.2, %v7567_v42  ;;  %vm7594_vm8 = vcmp.ge.f32.partialorder %v7567_v42, 0.0  ;;  %v10987_v61 = vld [vmem:[%s11325_s6 + $0x200] ss:$12 sps:$4 sm:$0xff]  }
0x141d   : > { %v7570_v33 = vadd.f32 %v12633_v50, %v7526_v44  ;;  %v7527_v49 = vadd.f32 %v7414_v35, %v7191_v26  ;;  %v7622_v15 = vmul.f32 0.2, %v7568_v31  ;;  %vm7595_vm6 = vcmp.ge.f32.partialorder %v7568_v31, 0.0 }
0x141e   : > { %v7418_v62 = vpop.f32.mrf.mxu1  ;;  %8196 = vmatprep.mubr.bf16.mxu1 %v12653_v59  ;;  %v7648_v26 = vsel %vm7594_vm8, %v7567_v42, %v7621_v46 }
0x141f   : > { %v7624_v28 = vmul.f32 0.2, %v7570_v33  ;;  %v7571_v11 = vadd.f32 %v12638_v13, %v7527_v49  ;;  %vm7597_vm5 = vcmp.ge.f32.partialorder %v7570_v33, 0.0  ;;  %v7529_v14 = vadd.f32 %v7418_v62, %v7195_v41  ;;  %8197 = vmatmul.mubr.bf16.vlgmr.msra.gmra.mxu1 %v12658_v54 }
0x1420   : > { %v7420_v39 = vpop.f32.mrf.mxu1  ;;  %10196 = vmatpush3.bf16.msra.mxu1 %v10979_v8  ;;  %v7649_v44 = vsel %vm7595_vm6, %v7568_v31, %v7622_v15  ;;  %v7209_v31 = vadd.f32 %v12617_v22, %v12329_v1  ;;  %v10991_v1 = vld [vmem:[%s11325_s6 + $0x1e8] ss:$12 sps:$4 sm:$0xff]   ;;  %v7211_v41 = vadd.f32 %v12619_v36, %v12465_v47  ;;  %v10995_v47 = vld [vmem:[%s11325_s6 + $0x1d0] ss:$12 sps:$4 sm:$0xff]   ;;  %v7217_v36 = vadd.f32 %v12623_v27, %v12474_v7 }
0x1421   : > { %v7530_v16 = vadd.f32 %v7420_v39, %v7197_v45  ;;  %vm7598_vm7 = vcmp.ge.f32.partialorder %v7571_v11, 0.0  ;;  %v7625_v34 = vmul.f32 0.2, %v7571_v11  ;;  %10197 = vmatprep.subr.bf16.mxu1 %v13035_v5  ;;  %v7651_v43 = vsel %vm7597_vm5, %v7570_v33, %v7624_v28 }
0x1422   : > { %v7422_v18 = vpop.f32.mrf.mxu1  ;;  %v7573_v24 = vadd.f32 %v12633_v50, %v7529_v14  ;;  %v12676_v57 = vpack.c.bf16 %v7651_v43, %v7648_v26  ;;  %v7205_v33 = vadd.f32 %v12613_v55, %v12325_v21  ;;  %v7215_v39 = vadd.f32 %v12621_v32, %v12333_v51 }
0x1423   : > { %v7532_v30 = vadd.f32 %v7422_v18, %v7199_v63  ;;  %v7652_v40 = vsel %vm7598_vm7, %v7571_v11, %v7625_v34  ;;  %v7574_v17 = vadd.f32 %v12638_v13, %v7530_v16 }
0x1424   : > { %v7424_v29 = vpop.f32.mrf.mxu1  ;;  %v12671_v10 = vpack.c.bf16 %v7652_v40, %v7649_v44  ;;  %10198 = vmatpush3.bf16.msra.mxu1 %v10983_v48  ;;  %v7627_v62 = vmul.f32 0.2, %v7573_v24  ;;  %vm7600_vm13 = vcmp.ge.f32.partialorder %v7573_v24, 0.0 }
0x1425   : > { %v7576_v9 = vadd.f32 %v12633_v50, %v7532_v30  ;;  %v7533_v53 = vadd.f32 %v7424_v29, %v7201_v3  ;;  %10199 = vmatprep.subr.bf16.mxu1 %v13035_v5  ;;  %v7628_v8 = vmul.f32 0.2, %v7574_v17  ;;  %vm7601_vm10 = vcmp.ge.f32.partialorder %v7574_v17, 0.0 }
0x1426   : > { %v7428_v35 = vpop.f32.mrf.mxu1  ;;  %8206 = vmatprep.mubr.bf16.mxu1 %v12671_v10  ;;  %v7654_v16 = vsel %vm7600_vm13, %v7573_v24, %v7627_v62  ;;  %v10999_v24 = vld [vmem:[%s11325_s6 + $0x1b8] ss:$12 sps:$4 sm:$0xff]   ;;  %v11007_v62 = vld [vmem:[%s11325_s6 + $0x188] ss:$12 sps:$4 sm:$0xff]  }
0x1427   : > { %v7630_v25 = vmul.f32 0.2, %v7576_v9  ;;  %v7577_v42 = vadd.f32 %v12638_v13, %v7533_v53  ;;  %vm7603_vm9 = vcmp.ge.f32.partialorder %v7576_v9, 0.0  ;;  %8207 = vmatmul.mubr.bf16.gmra.mxu1 %v12676_v57  ;;  %v7535_v21 = vadd.f32 %v7428_v35, %v7205_v33 }
0x1428   : > { %v7430_v49 = vpop.f32.mrf.mxu1  ;;  %10200 = vmatpush3.bf16.msra.mxu1 %v10987_v61  ;;  %v7655_v14 = vsel %vm7601_vm10, %v7574_v17, %v7628_v8 }
0x1429   : > { %v7536_v2 = vadd.f32 %v7430_v49, %v7207_v4  ;;  %vm7604_vm12 = vcmp.ge.f32.partialorder %v7577_v42, 0.0  ;;  %v7631_v52 = vmul.f32 0.2, %v7577_v42  ;;  %10201 = vmatprep.subr.bf16.mxu1 %v13035_v5  ;;  %v7657_v45 = vsel %vm7603_vm9, %v7576_v9, %v7630_v25  ;;  %v11003_v25 = vld [vmem:[%s11325_s6 + $0x1a0] ss:$12 sps:$4 sm:$0xff]  }
0x142a   : > { %v7432_v55 = vpop.f32.mrf.mxu1  ;;  %v7579_v48 = vadd.f32 %v12633_v50, %v7535_v21  ;;  %v12701_v30 = vpack.c.bf16 %v7657_v45, %v7654_v16  ;;  %v7256_v21 = vadd.f32 %v12565_v58, %v12421_v0  ;;  %v7259_v45 = vadd.f32 %v12571_v23, %v12430_v37 }
0x142b   : > { %v7538_v22 = vadd.f32 %v7432_v55, %v7209_v31  ;;  %v7580_v63 = vadd.f32 %v12638_v13, %v7536_v2  ;;  %v7658_v11 = vsel %vm7604_vm12, %v7577_v42, %v7631_v52  ;;  %v7556_v52 = vsub.s32 2, %v13062_v19 }
0x142c   : > { %v7434_v28 = vpop.f32.mrf.mxu1  ;;  %v12696_v18 = vpack.c.bf16 %v7658_v11, %v7655_v14  ;;  %10202 = vmatpush3.bf16.msra.mxu1 %v10991_v1  ;;  %v7633_v17 = vmul.f32 0.2, %v7579_v48  ;;  %vm7606_vm3 = vcmp.ge.f32.partialorder %v7579_v48, 0.0  ;;  %v7264_v19 = vadd.f32 %v12573_v56, %v12436_v60  ;;  %v11009_v56 = vld [vmem:[%s11325_s6 + $0xb0] ss:$12 sps:$4 sm:$0xff]  }
0x142d   : > { %v7582_v15 = vadd.f32 %v12633_v50, %v7538_v22  ;;  %v7539_v46 = vadd.f32 %v7434_v28, %v7211_v41  ;;  %10203 = vmatprep.subr.bf16.mxu1 %v13035_v5  ;;  %v7634_v51 = vmul.f32 0.2, %v7580_v63  ;;  %vm7607_vm14 = vcmp.ge.f32.partialorder %v7580_v63, 0.0 }
0x142e   : > { %v7438_v34 = vpop.f32.mrf.mxu1  ;;  %8216 = vmatprep.mubr.bf16.mxu1 %v12696_v18  ;;  %v7660_v31 = vsel %vm7606_vm3, %v7579_v48, %v7633_v17  ;;  %v12734_v55 = vrot.slane %v12626_v38, %v7556_v52  ;;  %v7267_v37 = vadd.f32 %v12579_v6, %v12444_v12  ;;  %v13066_v6 = vmov 0  }
0x142f   : > { %v7636_v32 = vmul.f32 0.2, %v7582_v15  ;;  %v7583_v3 = vadd.f32 %v12638_v13, %v7539_v46  ;;  %v7541_v43 = vadd.f32 %v7438_v34, %v7215_v39  ;;  %vm7609_vm15 = vcmp.ge.f32.partialorder %v7582_v15, 0.0  ;;  %8217 = vmatmul.mubr.bf16.gmra.mxu1 %v12701_v30 }
0x1430   : > { %v7440_v29 = vpop.f32.mrf.mxu1  ;;  %10204 = vmatpush3.bf16.msra.mxu1 %v10995_v47  ;;  %v7661_v53 = vsel %vm7607_vm14, %v7580_v63, %v7634_v51 }
0x1431   : > { %v7542_v40 = vadd.f32 %v7440_v29, %v7217_v36  ;;  %vm7610_vm2 = vcmp.ge.f32.partialorder %v7583_v3, 0.0  ;;  %v7637_v7 = vmul.f32 0.2, %v7583_v3  ;;  %10205 = vmatprep.subr.bf16.mxu1 %v13035_v5  ;;  %v7663_v44 = vsel %vm7609_vm15, %v7582_v15, %v7636_v32  ;;  %v11010_v36 = vld [vmem:[%s11325_s6 + $0x158] ss:$12 sps:$4 sm:$0xff]   ;;  %v13065_v32 = vld [vmem:[#allocation40_spill] sm:$0xff] }
0x1432   : > { %v7442_v27 = vpop.f32.mrf.mxu1  ;;  %v7585_v26 = vadd.f32 %v12633_v50, %v7541_v43  ;;  %v12715_v42 = vpack.c.bf16 %v7663_v44, %v7660_v31  ;;  %v11013_v31 = vld [vmem:[%s11325_s6 + $0x80] ss:$12 sps:$4 sm:$0xff]  }
0x1433   : > { %v7586_v9 = vadd.f32 %v12638_v13, %v7542_v40  ;;  %v7664_v35 = vsel %vm7610_vm2, %v7583_v3, %v7637_v7  ;;  %v7272_v3 = vadd.f32 %v13065_v32, %v12450_v20  ;;  %v11011_v40 = vld [vmem:[%s11325_s6 + $0x98] ss:$12 sps:$4 sm:$0xff]   ;;  %v11012_v7 = vld [vmem:[%s11325_s6 + $0x140] ss:$12 sps:$4 sm:$0xff]   ;;  %v13067_v27 = vld [vmem:[#allocation36_spill] sm:$0xff] }
0x1434   : > { %v7443_v61 = vpop.f32.mrf.mxu1  ;;  %v12711_v33 = vpack.c.bf16 %v7664_v35, %v7661_v53  ;;  %10206 = vmatpush3.bf16.msra.mxu1 %v10999_v24  ;;  %v7639_v49 = vmul.f32 0.2, %v7585_v26  ;;  %vm7612_vm5 = vcmp.ge.f32.partialorder %v7585_v26, 0.0  ;;  %v11019_v32 = vld [vmem:[%s11325_s6 + $0x38] ss:$12 sps:$4 sm:$0xff]  }
0x1435   : > { %v7640_v4 = vmul.f32 0.2, %v7586_v9  ;;  %vm7613_vm4 = vcmp.ge.f32.partialorder %v7586_v9, 0.0  ;;  %10207 = vmatprep.subr.bf16.mxu1 %v13035_v5 }
0x1436   : > { %8226 = vmatprep.mubr.bf16.mxu1 %v12711_v33  ;;  %v7666_v8 = vsel %vm7612_vm5, %v7585_v26, %v7639_v49 }
0x1437   : > { %v7667_v13 = vsel %vm7613_vm4, %v7586_v9, %v7640_v4  ;;  %8227 = vmatmul.mubr.bf16.gmra.mxu1 %v12715_v42  ;;  %v12724_v2 = vpack.c.bf16 %v7666_v8, %v7666_v8  ;;  %v13068_v9 = vld [vmem:[#allocation41_spill] sm:$0xff]  ;;  %v13070_v8 = vld [vmem:[#allocation42_spill] sm:$0xff] }
0x1438   : > { %v12718_v50 = vpack.c.bf16 %v7667_v13, %v7667_v13  ;;  %10208 = vmatpush3.bf16.msra.mxu1 %v11003_v25  ;;  %v7275_v44 = vadd.f32 %v13068_v9, %v13067_v27  ;;  %v11014_v13 = vld [vmem:[%s11325_s6 + $0x128] ss:$12 sps:$4 sm:$0xff]   ;;  %v11021_v27 = vld [vmem:[%s11325_s6 + $0x20] ss:$12 sps:$4 sm:$0xff]  }
0x1439   : > { %10209 = vmatprep.subr.bf16.mxu1 %v13035_v5 }
0x143a   : > { %8236 = vmatprep.mubr.bf16.mxu1 %v12718_v50 }
0x143c   : > { %10210 = vmatpush3.bf16.msra.mxu1 %v11007_v62  ;;  %v13069_v62 = vld [vmem:[#allocation37_spill] sm:$0xff] }
0x143d   : > { %10261 = vmatprep.subr.bf16.mxu1 %v13035_v5  ;;  %v7280_v52 = vadd.f32 %v13070_v8, %v13069_v62 }
0x143f   : > { %8237 = vmatmul.mubr.bf16.gmra.mxu1 %v12724_v2 }
0x1440   : > { %10211 = vmatprep.mubr.msk.bf16.mxu1 %vm11120_vm0, %v13035_v5 }
0x1450   : > { %v7479_v1 = vpop.f32.mrf.mxu0 }
0x1451   : > { %v7519_v22 = vadd.f32 %v7479_v1, %v7256_v21 }
0x1452   : > { %v10177_v41 = vpop.f32.mrf.mxu0 }
0x1453   : > { %v7563_v63 = vadd.f32 %v12734_v55, %v7519_v22  ;;  %v11015_v41 = vld [vmem:[%s11325_s6 + $0x68] ss:$12 sps:$4 sm:$0xff]  }
0x1454   : > { %v7482_v28 = vpop.f32.mrf.mxu0 }
0x1455   : > { %v7522_v11 = vadd.f32 %v7482_v28, %v7259_v45  ;;  %v7617_v15 = vmul.f32 0.2, %v7563_v63  ;;  %vm7590_vm6 = vcmp.ge.f32.partialorder %v7563_v63, 0.0  ;;  %v11016_v28 = vld [vmem:[%s11325_s6 + $0x110] ss:$12 sps:$4 sm:$0xff]  }
0x1456   : > { %v10178_v39 = vpop.f32.mrf.mxu0 }
0x1457   : > { %v7566_v0 = vadd.f32 %v12734_v55, %v7522_v11  ;;  %v7644_v23 = vsel %vm7590_vm6, %v7563_v63, %v7617_v15  ;;  %v13071_v39 = vld [vmem:[#allocation38_spill] sm:$0xff] }
0x1458   : > { %v7487_v58 = vpop.f32.mrf.mxu0 }
0x1459   : > { %vm7593_vm7 = vcmp.ge.f32.partialorder %v7566_v0, 0.0  ;;  %v7620_v38 = vmul.f32 0.2, %v7566_v0  ;;  %v7525_v14 = vadd.f32 %v7487_v58, %v7264_v19  ;;  %v13072_v19 = vld [vmem:[#allocation43_spill] sm:$0xff] }
0x145a   : > { %v10181_v16 = vpop.f32.mrf.mxu0  ;;  %v7283_v15 = vadd.f32 %v13072_v19, %v13071_v39 }
0x145b   : > { %v7647_v48 = vsel %vm7593_vm7, %v7566_v0, %v7620_v38  ;;  %v7569_v46 = vadd.f32 %v12734_v55, %v7525_v14 }
0x145c   : > { %v7767_v34 = vpack.c.bf16 %v7647_v48, %v7644_v23  ;;  %v7490_v60 = vpop.f32.mrf.mxu0  ;;  %v11018_v48 = vld [vmem:[%s11325_s6 + $0xf8] ss:$12 sps:$4 sm:$0xff]  }
0x145d   : > { %v7528_v47 = vadd.f32 %v7490_v60, %v7267_v37  ;;  %v7623_v43 = vmul.f32 0.2, %v7569_v46  ;;  %vm7596_vm8 = vcmp.ge.f32.partialorder %v7569_v46, 0.0  ;;  %v11017_v37 = vld [vmem:[%s11325_s6 + $0x50] ss:$12 sps:$4 sm:$0xff]  }
0x145e   : > { %v10182_v51 = vpop.f32.mrf.mxu0  ;;  %8278 = vmatmul.mubr.bf16.vlgmr.msra.gmra.mxu0 %v7767_v34  ;;  %10212 = vmatmul.mubr.bf16.vlgmr.msra.gmra.mxu1 %v7767_v34  ;;  %v13073_v34 = vld [vmem:[#allocation39_spill] sm:$0xff]  ;;  %v13074_v60 = vld [vmem:[#allocation44_spill] sm:$0xff] }
0x145f   : > { %v7572_v12 = vadd.f32 %v12734_v55, %v7528_v47  ;;  %8287 = vmatprep.mubr.bf16.mxu0 %v13066_v6  ;;  %10215 = vmatprep.mubr.msk.bf16.mxu1 %vm11120_vm0, %v13035_v5  ;;  %v7650_v26 = vsel %vm7596_vm8, %v7569_v46, %v7623_v43 }
0x1460   : > { %v7495_v29 = vpop.f32.mrf.mxu0  ;;  %9697 = vmatpush3.bf16.msra.mxu0 %v11009_v56  ;;  %v7288_v56 = vadd.f32 %v13074_v60, %v13073_v34 }
0x1461   : > { %vm7599_vm9 = vcmp.ge.f32.partialorder %v7572_v12, 0.0  ;;  %v7626_v24 = vmul.f32 0.2, %v7572_v12  ;;  %v7531_v17 = vadd.f32 %v7495_v29, %v7272_v3  ;;  %9698 = vmatprep.subr.bf16.mxu0 %v11010_v36 }
0x1462   : > { %v10185_v20 = vpop.f32.mrf.mxu0 }
0x1463   : > { %v7653_v53 = vsel %vm7599_vm9, %v7572_v12, %v7626_v24  ;;  %v7575_v35 = vadd.f32 %v12734_v55, %v7531_v17  ;;  %v11020_v12 = vld [vmem:[%s11325_s6 + $0xe0] ss:$12 sps:$4 sm:$0xff]  }
0x1464   : > { %v7498_v61 = vpop.f32.mrf.mxu0  ;;  %v7770_v4 = vpack.c.bf16 %v7653_v53, %v7650_v26  ;;  %9699 = vmatpush3.bf16.msra.mxu0 %v11011_v40  ;;  %v11023_v53 = vld [vmem:[%s11325_s6 + $0x8] ss:$12 sps:$4 sm:$0xff]  }
0x1465   : > { %v7534_v25 = vadd.f32 %v7498_v61, %v7275_v44  ;;  %9700 = vmatprep.subr.bf16.mxu0 %v11012_v7  ;;  %v7629_v21 = vmul.f32 0.2, %v7575_v35  ;;  %vm7602_vm10 = vcmp.ge.f32.partialorder %v7575_v35, 0.0  ;;  %v11022_v44 = vld [vmem:[%s11325_s6 + $0xc8] ss:$12 sps:$4 sm:$0xff]  }
0x1466   : > { %v10186_v49 = vpop.f32.mrf.mxu0  ;;  %8288 = vmatmul.mubr.bf16.gmra.mxu0 %v7770_v4  ;;  %10216 = vmatmul.mubr.bf16.gmra.mxu1 %v7770_v4 }
0x1467   : > { %v7578_v1 = vadd.f32 %v12734_v55, %v7534_v25  ;;  %8297 = vmatprep.mubr.bf16.mxu0 %v13066_v6  ;;  %10219 = vmatprep.mubr.msk.bf16.mxu1 %vm11120_vm0, %v13035_v5  ;;  %v7656_v0 = vsel %vm7602_vm10, %v7575_v35, %v7629_v21 }
0x1468   : > { %v7503_v22 = vpop.f32.mrf.mxu0  ;;  %9701 = vmatpush3.bf16.msra.mxu0 %v11013_v31 }
0x1469   : > { %vm7605_vm12 = vcmp.ge.f32.partialorder %v7578_v1, 0.0  ;;  %v7632_v45 = vmul.f32 0.2, %v7578_v1  ;;  %v7537_v63 = vadd.f32 %v7503_v22, %v7280_v52  ;;  %9702 = vmatprep.subr.bf16.mxu0 %v11014_v13 }
0x146a   : > { %v10189_v11 = vpop.f32.mrf.mxu0 }
0x146b   : > { %v7659_v58 = vsel %vm7605_vm12, %v7578_v1, %v7632_v45  ;;  %v7581_v38 = vadd.f32 %v12734_v55, %v7537_v63 }
0x146c   : > { %v7506_v14 = vpop.f32.mrf.mxu0  ;;  %v7773_v16 = vpack.c.bf16 %v7659_v58, %v7656_v0  ;;  %9703 = vmatpush3.bf16.msra.mxu0 %v11015_v41 }
0x146d   : > { %v7540_v23 = vadd.f32 %v7506_v14, %v7283_v15  ;;  %9704 = vmatprep.subr.bf16.mxu0 %v11016_v28  ;;  %v7635_v47 = vmul.f32 0.2, %v7581_v38  ;;  %vm7608_vm13 = vcmp.ge.f32.partialorder %v7581_v38, 0.0 }
0x146e   : > { %v10190_v46 = vpop.f32.mrf.mxu0  ;;  %8298 = vmatmul.mubr.bf16.gmra.mxu0 %v7773_v16  ;;  %10220 = vmatmul.mubr.bf16.gmra.mxu1 %v7773_v16 }
0x146f   : > { %v7584_v36 = vadd.f32 %v12734_v55, %v7540_v23  ;;  %8307 = vmatprep.mubr.bf16.mxu0 %v13066_v6  ;;  %10223 = vmatprep.mubr.msk.bf16.mxu1 %vm11120_vm0, %v13035_v5  ;;  %v7662_v40 = vsel %vm7608_vm13, %v7581_v38, %v7635_v47 }
0x1470   : > { %v7511_v51 = vpop.f32.mrf.mxu0  ;;  %9705 = vmatpush3.bf16.msra.mxu0 %v11017_v37 }
0x1471   : > { %vm7611_vm14 = vcmp.ge.f32.partialorder %v7584_v36, 0.0  ;;  %v7638_v3 = vmul.f32 0.2, %v7584_v36  ;;  %v7543_v43 = vadd.f32 %v7511_v51, %v7288_v56  ;;  %9706 = vmatprep.subr.bf16.mxu0 %v11018_v48 }
0x1472   : > { %v10193_v29 = vpop.f32.mrf.mxu0 }
0x1473   : > { %v7665_v24 = vsel %vm7611_vm14, %v7584_v36, %v7638_v3  ;;  %v7587_v17 = vadd.f32 %v12734_v55, %v7543_v43 }
0x1474   : > { %v7514_v7 = vpop.f32.mrf.mxu0  ;;  %v7776_v20 = vpack.c.bf16 %v7665_v24, %v7662_v40  ;;  %9707 = vmatpush3.bf16.msra.mxu0 %v11019_v32 }
0x1475   : > { %v7641_v9 = vmul.f32 0.2, %v7587_v17  ;;  %9708 = vmatprep.subr.bf16.mxu0 %v11020_v12  ;;  %vm7614_vm15 = vcmp.ge.f32.partialorder %v7587_v17, 0.0 }
0x1476   : > { %v10194_v26 = vpop.f32.mrf.mxu0  ;;  %8308 = vmatmul.mubr.bf16.gmra.mxu0 %v7776_v20  ;;  %10224 = vmatmul.mubr.bf16.gmra.mxu1 %v7776_v20 }
0x1477   : > { %8317 = vmatprep.mubr.bf16.mxu0 %v13066_v6  ;;  %10227 = vmatprep.mubr.msk.bf16.mxu1 %vm11120_vm0, %v13035_v5  ;;  %v7668_v35 = vsel %vm7614_vm15, %v7587_v17, %v7641_v9 }
0x1478   : > { %9709 = vmatpush3.bf16.msra.mxu0 %v11021_v27  ;;  %v7779_v55 = vpack.c.bf16 %v7668_v35, %v7668_v35 }
0x1479   : > { %9710 = vmatprep.subr.bf16.mxu0 %v11022_v44 }
0x147c   : > { %9711 = vmatpush3.bf16.msra.mxu0 %v11023_v53 }
0x147d   : > { %10231 = vmatprep.subr.bf16.mxu0 %v13035_v5 }
0x147e   : > { %8318 = vmatmul.mubr.bf16.gmra.mxu0 %v7779_v55  ;;  %10228 = vmatmul.mubr.bf16.gmra.mxu1 %v7779_v55 }
0x147f   : > { %8358 = vmatprep.mubr.bf16.mxu0 %v12653_v59  ;;  %10271 = vmatprep.mubr.msk.bf16.mxu1 %vm11120_vm0, %v13035_v5 }
0x1486   : > { %8359 = vmatmul.mubr.bf16.vlgmr.msra.gmra.mxu0 %v12658_v54 }
0x1487   : > { %8366 = vmatprep.mubr.bf16.mxu0 %v12671_v10 }
0x148e   : > { %8367 = vmatmul.mubr.bf16.gmra.mxu0 %v12676_v57 }
0x148f   : > { %8374 = vmatprep.mubr.bf16.mxu0 %v12696_v18 }
0x1496   : > { %8375 = vmatmul.mubr.bf16.gmra.mxu0 %v12701_v30 }
0x1497   : > { %8382 = vmatprep.mubr.bf16.mxu0 %v12711_v33 }
0x149e   : > { %8383 = vmatmul.mubr.bf16.gmra.mxu0 %v12715_v42 }
0x149f   : > { %8390 = vmatprep.mubr.bf16.mxu0 %v12718_v50 }
0x14a6   : > { %8391 = vmatmul.mubr.bf16.gmra.mxu0 %v12724_v2 }
0x14a7   : > { %10241 = vmatprep.mubr.msk.bf16.mxu0 %vm11120_vm0, %v13035_v5 }
0x14df   : > { %v8198_v59 = vpop.f32.mrf.mxu1 }
0x14e1   : > { %v8200_v54 = vpop.f32.mrf.mxu1 }
0x14e3   : > { %v8202_v10 = vpop.f32.mrf.mxu1 }
0x14e5   : > { %v8204_v6 = vpop.f32.mrf.mxu1 }
0x14e7   : > { %v8208_v57 = vpop.f32.mrf.mxu1 }
0x14e9   : > { %v8210_v61 = vpop.f32.mrf.mxu1 }
0x14eb   : > { %v8212_v18 = vpop.f32.mrf.mxu1 }
0x14ed   : > { %v8214_v4 = vpop.f32.mrf.mxu1 }
0x14ef   : > { %v8218_v30 = vpop.f32.mrf.mxu1 }
0x14f1   : > { %v8220_v31 = vpop.f32.mrf.mxu1 }
0x14f3   : > { %v8222_v33 = vpop.f32.mrf.mxu1 }
0x14f5   : > { %v8224_v25 = vpop.f32.mrf.mxu1 }
0x14f7   : > { %v8228_v42 = vpop.f32.mrf.mxu1 }
0x14f9   : > { %v8230_v13 = vpop.f32.mrf.mxu1 }
0x14fb   : > { %v8232_v50 = vpop.f32.mrf.mxu1 }
0x14fd   : > { %v8234_v49 = vpop.f32.mrf.mxu1 }
0x14ff   : > { %v8238_v2 = vpop.f32.mrf.mxu1 }
0x1501   : > { %v8240_v62 = vpop.f32.mrf.mxu1 }
0x1503   : > { %v8242_v8 = vpop.f32.mrf.mxu1 }
0x1505   : > { %v8243_v52 = vpop.f32.mrf.mxu1 }
0x151e   : > { %v8279_v21 = vpop.f32.mrf.mxu0  ;;  %v12803_v1 = vpop.f32.mrf.mxu1 }
0x151f   : > { %v12809_v11 = vadd.f32 %v8279_v21, %v8198_v59 }
0x1520   : > { %v8281_v22 = vpop.f32.mrf.mxu0  ;;  %v10213_v41 = vpop.f32.mrf.mxu1 }
0x1521   : > { %v12805_v45 = vadd.f32 %v8281_v22, %v8200_v54 }
0x1522   : > { %v8283_v63 = vpop.f32.mrf.mxu0  ;;  %v12807_v28 = vpop.f32.mrf.mxu1 }
0x1523   : > { %v12811_v39 = vadd.f32 %v8283_v63, %v8202_v10 }
0x1524   : > { %v8285_v19 = vpop.f32.mrf.mxu0  ;;  %v10214_v15 = vpop.f32.mrf.mxu1 }
0x1525   : > { %v8470_v0 = vpack.c.bf16 %v12811_v39, %v12809_v11  ;;  %v12815_v58 = vadd.f32 %v8285_v19, %v8204_v6 }
0x1526   : > { %v8289_v38 = vpop.f32.mrf.mxu0  ;;  %v12817_v14 = vpop.f32.mrf.mxu1 }
0x1527   : > { %v8290_v34 = vadd.f32 %v8289_v38, %v8208_v57 }
0x1528   : > { %v8291_v16 = vpop.f32.mrf.mxu0  ;;  %v10217_v37 = vpop.f32.mrf.mxu1 }
0x1529   : > { %v12819_v23 = vadd.f32 %v8291_v16, %v8210_v61 }
0x152a   : > { %v8293_v48 = vpop.f32.mrf.mxu0  ;;  %v12821_v46 = vpop.f32.mrf.mxu1 }
0x152b   : > { %v8294_v60 = vadd.f32 %v8293_v48, %v8212_v18 }
0x152c   : > { %v8295_v56 = vpop.f32.mrf.mxu0  ;;  %v10218_v47 = vpop.f32.mrf.mxu1 }
0x152d   : > { %v8471_v36 = vpack.c.bf16 %v8294_v60, %v8290_v34  ;;  %v12823_v51 = vadd.f32 %v8295_v56, %v8214_v4 }
0x152e   : > { %v8299_v32 = vpop.f32.mrf.mxu0  ;;  %v12825_v3 = vpop.f32.mrf.mxu1 }
0x152f   : > { %v8300_v17 = vadd.f32 %v8299_v32, %v8218_v30 }
0x1530   : > { %v8301_v43 = vpop.f32.mrf.mxu0  ;;  %v10221_v12 = vpop.f32.mrf.mxu1 }
0x1531   : > { %v12827_v29 = vadd.f32 %v8301_v43, %v8220_v31 }
0x1532   : > { %v8303_v40 = vpop.f32.mrf.mxu0  ;;  %v12829_v24 = vpop.f32.mrf.mxu1 }
0x1533   : > { %v8304_v7 = vadd.f32 %v8303_v40, %v8222_v33 }
0x1534   : > { %v8305_v20 = vpop.f32.mrf.mxu0  ;;  %v10222_v27 = vpop.f32.mrf.mxu1 }
0x1535   : > { %v8472_v9 = vpack.c.bf16 %v8304_v7, %v8300_v17  ;;  %v12831_v44 = vadd.f32 %v8305_v20, %v8224_v25 }
0x1536   : > { %v8309_v26 = vpop.f32.mrf.mxu0  ;;  %v12833_v53 = vpop.f32.mrf.mxu1 }
0x1537   : > { %v8310_v6 = vadd.f32 %v8309_v26, %v8228_v42 }
0x1538   : > { %v8311_v35 = vpop.f32.mrf.mxu0  ;;  %v10225_v55 = vpop.f32.mrf.mxu1 }
0x1539   : > { %v12835_v59 = vadd.f32 %v8311_v35, %v8230_v13 }
0x153a   : > { %v8313_v54 = vpop.f32.mrf.mxu0  ;;  %v12837_v10 = vpop.f32.mrf.mxu1 }
0x153b   : > { %v8314_v57 = vadd.f32 %v8313_v54, %v8232_v50 }
0x153c   : > { %v8315_v61 = vpop.f32.mrf.mxu0  ;;  %v10226_v18 = vpop.f32.mrf.mxu1 }
0x153d   : > { %v8473_v4 = vpack.c.bf16 %v8314_v57, %v8310_v6  ;;  %v12839_v30 = vadd.f32 %v8315_v61, %v8234_v49  ;;  %v11062_v6 = vld [vmem:[%s13050_s0 + $0x10] sm:$0xff]  }
0x153e   : > { %v8319_v31 = vpop.f32.mrf.mxu0  ;;  %v12841_v33 = vpop.f32.mrf.mxu1 }
0x153f   : > { %v8320_v25 = vadd.f32 %v8319_v31, %v8238_v2 }
0x1540   : > { %v8321_v8 = vpop.f32.mrf.mxu0  ;;  %v10229_v52 = vpop.f32.mrf.mxu1 }
0x1541   : > { %v8474_v21 = vpack.c.bf16 %v8320_v25, %v8320_v25  ;;  %v12843_v22 = vadd.f32 %v8321_v8, %v8240_v62  ;;  %v11063_v52 = vld [vmem:[%s13050_s0 + $0x18] sm:$0xff]  }
0x1542   : > { %v8323_v13 = vpop.f32.mrf.mxu0  ;;  %v8467_v41 = vpop.f32.mrf.mxu1 }
0x1543   : > { %v8476_v63 = vsel %vm1486_vm1, %v8474_v21, 0  ;;  %v11066_v41 = vld [vmem:[%s11320_s12 + $0x8] sm:$0xff]  }
0x1544   : > { %v8324_v42 = vpop.f32.mrf.mxu0  ;;  %v10230_v50 = vpop.f32.mrf.mxu1  ;;  %10232 = vmatpush3.bf16.msra.mxu0 %v8476_v63  ;;  %v11067_v63 = vld [vmem:[%s11320_s12 + $0x10] sm:$0xff]  }
0x1545   : > { %10233 = vmatprep.subr.bf16.mxu0 %v13035_v5  ;;  %v11068_v42 = vld [vmem:[%s11320_s12 + $0x18] sm:$0xff]   ;;  %v11069_v50 = vld [vmem:[%s11320_s12 + $0x20] ss:$0 sps:$4 sm:$0xff]  }
0x1546   : > { %v9712_v49 = vpop.f32.mrf.mxu0 }
0x1548   : > { %v9713_v19 = vpop.f32.mrf.mxu0  ;;  %10234 = vmatpush3.bf16.msra.mxu0 %v8473_v4 }
0x1549   : > { %10235 = vmatprep.subr.bf16.mxu0 %v13035_v5  ;;  %v9714_v15 = vadd.f32 %v9713_v19, %v9712_v49 }
0x154a   : > { %v9715_v2 = vpop.f32.mrf.mxu0 }
0x154b   : > { %v8433_v37 = vadd.f32 %v9714_v15, %v12803_v1 }
0x154c   : > { %v9716_v38 = vpop.f32.mrf.mxu0  ;;  %10236 = vmatpush3.bf16.msra.mxu0 %v8472_v9  ;;  %v11061_v9 = vld [vmem:[%s13050_s0 + $0x8] sm:$0xff]  }
0x154d   : > { %v9717_v62 = vadd.f32 %v9716_v38, %v9715_v2  ;;  %10237 = vmatprep.subr.bf16.mxu0 %v13035_v5 }
0x154e   : > { %v9718_v16 = vpop.f32.mrf.mxu0 }
0x154f   : > { %v8436_v48 = vadd.f32 %v9717_v62, %v12807_v28  ;;  %v11060_v28 = vld [vmem:[%s13050_s0] sm:$0xff]  }
0x1550   : > { %v9719_v34 = vpop.f32.mrf.mxu0  ;;  %10238 = vmatpush3.bf16.msra.mxu0 %v8471_v36 }
0x1551   : > { %v8550_v60 = vpack.c.bf16 %v8436_v48, %v8433_v37  ;;  %10239 = vmatprep.subr.bf16.mxu0 %v13035_v5  ;;  %v9720_v47 = vadd.f32 %v9719_v34, %v9718_v16 }
0x1552   : > { %v9721_v56 = vpop.f32.mrf.mxu0 }
0x1553   : > { %v8441_v40 = vadd.f32 %v9720_v47, %v12817_v14 }
0x1554   : > { %v9722_v32 = vpop.f32.mrf.mxu0  ;;  %10240 = vmatpush3.bf16.msra.mxu0 %v8470_v0 }
0x1555   : > { %v9723_v43 = vadd.f32 %v9722_v32, %v9721_v56 }
0x1556   : > { %v9724_v12 = vpop.f32.mrf.mxu0 }
0x1557   : > { %v8444_v1 = vadd.f32 %v9723_v43, %v12821_v46  ;;  %10242 = vmatmul.mubr.msk.bf16.vlgmr.msra.gmra.mxu0 %vm7115_vm11, %v11060_v28 }
0x1558   : > { %v9725_v36 = vpop.f32.mrf.mxu0  ;;  %10245 = vmatprep.mubr.msk.bf16.mxu0 %vm11120_vm0, %v13035_v5 }
0x1559   : > { %v8551_v17 = vpack.c.bf16 %v8444_v1, %v8441_v40  ;;  %v9726_v20 = vadd.f32 %v9725_v36, %v9724_v12 }
0x155a   : > { %v9727_v7 = vpop.f32.mrf.mxu0 }
0x155b   : > { %v8449_v27 = vadd.f32 %v9726_v20, %v12825_v3 }
0x155c   : > { %v9728_v11 = vpop.f32.mrf.mxu0 }
0x155d   : > { %v9729_v39 = vadd.f32 %v9728_v11, %v9727_v7  ;;  %v12909_v7 = vld [vmem:[%s11330_s27] ss:$0 sm:$0xff] }
0x155e   : > { %v9730_v0 = vpop.f32.mrf.mxu0 }
0x155f   : > { %v8452_v14 = vadd.f32 %v9729_v39, %v12829_v24  ;;  %10246 = vmatmul.mubr.msk.bf16.gmra.mxu0 %vm7115_vm11, %v11061_v9 }
0x1560   : > { %v9731_v46 = vpop.f32.mrf.mxu0  ;;  %10249 = vmatprep.mubr.msk.bf16.mxu0 %vm11120_vm0, %v13035_v5 }
0x1561   : > { %v8552_v26 = vpack.c.bf16 %v8452_v14, %v8449_v27  ;;  %v9732_v4 = vadd.f32 %v9731_v46, %v9730_v0  ;;  %v13075_v14 = vld [vmem:[#allocation27_spill] sm:$0xff] }
0x1562   : > { %v9733_v35 = vpop.f32.mrf.mxu0 }
0x1563   : > { %v8457_v13 = vadd.f32 %v9732_v4, %v12833_v53  ;;  %v11065_v53 = vld [vmem:[%s11320_s12] sm:$0xff]  }
0x1564   : > { %v9734_v55 = vpop.f32.mrf.mxu0 }
0x1565   : > { %v9735_v24 = vadd.f32 %v9734_v55, %v9733_v35 }
0x1566   : > { %v9736_v54 = vpop.f32.mrf.mxu0 }
0x1567   : > { %10250 = vmatmul.mubr.msk.bf16.gmra.mxu0 %vm7115_vm11, %v11062_v6  ;;  %v8460_v8 = vadd.f32 %v9735_v24, %v12837_v10  ;;  %v11064_v10 = vld [vmem:[%s13050_s0 + $0x20] ss:$0 sps:$4 sm:$0xff]   ;;  %s12941_s0 = scalar_lea.vmem %s11335_s4, %s10291_s1 }
0x1568   : > { %v9737_v57 = vpop.f32.mrf.mxu0  ;;  %10253 = vmatprep.mubr.msk.bf16.mxu0 %vm11120_vm0, %v13035_v5 }
0x1569   : > { %v9738_v3 = vadd.f32 %v9737_v57, %v9736_v54  ;;  %v13076_v57 = vld [vmem:[#allocation28_spill] sm:$0xff] }
0x156a   : > { %v9739_v61 = vpop.f32.mrf.mxu0 }
0x156b   : > { %v8465_v18 = vadd.f32 %v9738_v3, %v12841_v33  ;;  %v8553_v33 = vpack.c.bf16 %v8460_v8, %v8457_v13  ;;  %v13077_v8 = vld [vmem:[#allocation29_spill] sm:$0xff] }
0x156c   : > { %v9740_v31 = vpop.f32.mrf.mxu0 }
0x156d   : > { %v8554_v25 = vpack.c.bf16 %v8465_v18, %v8465_v18 }
0x156f   : > { %10254 = vmatmul.mubr.msk.bf16.gmra.mxu0 %vm7115_vm11, %v11063_v52  ;;  %v8556_v21 = vsel %vm1486_vm1, %v8554_v25, 0 }
0x1570   : > { %10262 = vmatpush3.bf16.msra.mxu1 %v8556_v21  ;;  %10257 = vmatprep.mubr.msk.bf16.mxu0 %vm11120_vm0, %v13035_v5 }
0x1571   : > { %10263 = vmatprep.subr.bf16.mxu1 %v13035_v5 }
0x1574   : > { %10264 = vmatpush3.bf16.msra.mxu1 %v8553_v33 }
0x1575   : > { %10265 = vmatprep.subr.bf16.mxu1 %v13035_v5 }
0x1577   : > { %10258 = vmatmul.mubr.msk.bf16.gmra.mxu0 %vm7115_vm11, %v11064_v10 }
0x1578   : > { %10266 = vmatpush3.bf16.msra.mxu1 %v8552_v26 }
0x1579   : > { %10267 = vmatprep.subr.bf16.mxu1 %v13035_v5 }
0x157c   : > { %10268 = vmatpush3.bf16.msra.mxu1 %v8551_v17 }
0x157d   : > { %10269 = vmatprep.subr.bf16.mxu1 %v13035_v5 }
0x1580   : > { %10270 = vmatpush3.bf16.msra.mxu1 %v8550_v60 }
0x1583   : > { %10272 = vmatmul.mubr.msk.bf16.vlgmr.msra.gmra.mxu1 %vm7115_vm11, %v11065_v53 }
0x1584   : > { %10275 = vmatprep.mubr.msk.bf16.mxu1 %vm11120_vm0, %v13035_v5 }
0x158b   : > { %10276 = vmatmul.mubr.msk.bf16.gmra.mxu1 %vm7115_vm11, %v11066_v41 }
0x158c   : > { %10279 = vmatprep.mubr.msk.bf16.mxu1 %vm11120_vm0, %v13035_v5 }
0x1593   : > { %10280 = vmatmul.mubr.msk.bf16.gmra.mxu1 %vm7115_vm11, %v11067_v63  ;;  %v13078_v63 = vld [vmem:[#allocation30_spill] sm:$0xff] }
0x1594   : > { %10283 = vmatprep.mubr.msk.bf16.mxu1 %vm11120_vm0, %v13035_v5 }
0x159b   : > { %10284 = vmatmul.mubr.msk.bf16.gmra.mxu1 %vm7115_vm11, %v11068_v42 }
0x159c   : > { %10287 = vmatprep.mubr.msk.bf16.mxu1 %vm11120_vm0, %v13035_v5 }
0x15a3   : > { %10288 = vmatmul.mubr.msk.bf16.gmra.mxu1 %vm7115_vm11, %v11069_v50 }
0x1617   : > { %v8512_v49 = vpop.f32.mrf.mxu0 }
0x1618   : > { %v8513_v36 = vadd.f32 %v8512_v49, %v12805_v45 }
0x1619   : > { %v10243_v19 = vpop.f32.mrf.mxu0 }
0x161b   : > { %v8515_v2 = vpop.f32.mrf.mxu0 }
0x161c   : > { %v8516_v39 = vadd.f32 %v8515_v2, %v12815_v58 }
0x161d   : > { %v10244_v15 = vpop.f32.mrf.mxu0 }
0x161f   : > { %v8520_v38 = vpop.f32.mrf.mxu0 }
0x1620   : > { %v8521_v35 = vadd.f32 %v8520_v38, %v12819_v23 }
0x1621   : > { %v10247_v62 = vpop.f32.mrf.mxu0 }
0x1622   : > { %v13079_v62 = vld [vmem:[#allocation31_spill] sm:$0xff] }
0x1623   : > { %v8523_v16 = vpop.f32.mrf.mxu0 }
0x1624   : > { %v8524_v58 = vadd.f32 %v8523_v16, %v12823_v51 }
0x1625   : > { %v10248_v37 = vpop.f32.mrf.mxu0 }
0x1627   : > { %v8528_v48 = vpop.f32.mrf.mxu0 }
0x1628   : > { %v8529_v13 = vadd.f32 %v8528_v48, %v12827_v29 }
0x1629   : > { %v10251_v34 = vpop.f32.mrf.mxu0 }
0x162b   : > { %v8531_v60 = vpop.f32.mrf.mxu0 }
0x162c   : > { %v8532_v49 = vadd.f32 %v8531_v60, %v12831_v44  ;;  %v13080_v60 = vld [vmem:[#allocation32_spill] sm:$0xff] }
0x162d   : > { %v10252_v56 = vpop.f32.mrf.mxu0 }
0x162f   : > { %v8536_v47 = vpop.f32.mrf.mxu0 }
0x1630   : > { %v8537_v48 = vadd.f32 %v8536_v47, %v12835_v59 }
0x1631   : > { %v10255_v32 = vpop.f32.mrf.mxu0 }
0x1633   : > { %v12903_v43 = vpop.f32.mrf.mxu0 }
0x1635   : > { %v10256_v5 = vpop.f32.mrf.mxu0 }
0x1637   : > { %v12905_v12 = vpop.f32.mrf.mxu0 }
0x1639   : > { %v10259_v40 = vpop.f32.mrf.mxu0 }
0x163b   : > { %v8547_v1 = vpop.f32.mrf.mxu0 }
0x163d   : > { %v10260_v28 = vpop.f32.mrf.mxu0 }
0x1643   : > { %v8592_v17 = vpop.f32.mrf.mxu1 }
0x1644   : > { %v8630_v20 = vadd.f32 %v8592_v17, %v8513_v36  ;;  %v8540_v17 = vadd.f32 %v12903_v43, %v12839_v30 }
0x1645   : > { %v10273_v11 = vpop.f32.mrf.mxu1 }
0x1646   : > { %v8646_v0 = vadd.f32 %v12909_v7, %v8630_v20 }
0x1647   : > { %v8595_v27 = vpop.f32.mrf.mxu1 }
0x1648   : > { %v8655_v9 = vadd.f32 %v8646_v0, %v13075_v14  ;;  %v8631_v46 = vadd.f32 %v8595_v27, %v8516_v39  ;;  %v13081_v27 = vld [vmem:[#allocation33_spill] sm:$0xff] }
0x1649   : > { %v10274_v26 = vpop.f32.mrf.mxu1 }
0x164a   : > { %v8664_v55 = vsub.f32 0.0, %v8655_v9  ;;  %v8647_v54 = vadd.f32 %v12909_v7, %v8631_v46  ;;  %v8545_v26 = vadd.f32 %v12905_v12, %v12843_v22 }
0x164b   : > { %v8600_v45 = vpop.f32.mrf.mxu1 }
0x164c   : > { %v8673_v6 = vmul.f32 1.442695, %v8664_v55  ;;  %v8656_v3 = vadd.f32 %v8647_v54, %v13076_v57  ;;  %v8632_v24 = vadd.f32 %v8600_v45, %v8521_v35 }
0x164d   : > { %v10277_v61 = vpop.f32.mrf.mxu1 }
0x164e   : > { %11024 = vpow2.f32 %v8673_v6  ;;  %v8665_v18 = vsub.f32 0.0, %v8656_v3  ;;  %v8648_v4 = vadd.f32 %v12909_v7, %v8632_v24  ;;  %v13082_v6 = vld [vmem:[#allocation34_spill] sm:$0xff] }
0x164f   : > { %v8603_v31 = vpop.f32.mrf.mxu1 }
0x1650   : > { %v8675_v25 = vmul.f32 1.442695, %v8665_v18  ;;  %v8657_v52 = vadd.f32 %v8648_v4, %v13077_v8  ;;  %v8633_v23 = vadd.f32 %v8603_v31, %v8524_v58  ;;  %v13083_v31 = vld [vmem:[#allocation35_spill] sm:$0xff] }
0x1651   : > { %v10278_v21 = vpop.f32.mrf.mxu1 }
0x1652   : > { %11026 = vpow2.f32 %v8675_v25  ;;  %v8666_v33 = vsub.f32 0.0, %v8657_v52  ;;  %v8649_v10 = vadd.f32 %v12909_v7, %v8633_v23 }
0x1653   : > { %v8608_v53 = vpop.f32.mrf.mxu1 }
0x1654   : > { %v8677_v41 = vmul.f32 1.442695, %v8666_v33  ;;  %v8658_v51 = vadd.f32 %v8649_v10, %v13078_v63  ;;  %v8634_v42 = vadd.f32 %v8608_v53, %v8529_v13 }
0x1655   : > { %v10281_v50 = vpop.f32.mrf.mxu1 }
0x1656   : > { %11028 = vpow2.f32 %v8677_v41  ;;  %v8667_v19 = vsub.f32 0.0, %v8658_v51  ;;  %v8650_v2 = vadd.f32 %v12909_v7, %v8634_v42 }
0x1657   : > { %v8611_v15 = vpop.f32.mrf.mxu1 }
0x1658   : > { %v8679_v38 = vmul.f32 1.442695, %v8667_v19  ;;  %v8659_v29 = vadd.f32 %v8650_v2, %v13079_v62  ;;  %v8635_v16 = vadd.f32 %v8611_v15, %v8532_v49 }
0x1659   : > { %v10282_v37 = vpop.f32.mrf.mxu1 }
0x165a   : > { %11030 = vpow2.f32 %v8679_v38  ;;  %v8668_v34 = vsub.f32 0.0, %v8659_v29  ;;  %v8651_v56 = vadd.f32 %v12909_v7, %v8635_v16 }
0x165b   : > { %v11025_v32 = vpop.eup %11024  ;;  %v8616_v5 = vpop.f32.mrf.mxu1 }
0x165c   : > { %v8691_v40 = vadd.f32 1.0, %v11025_v32  ;;  %v8681_v44 = vmul.f32 1.442695, %v8668_v34  ;;  %v8660_v1 = vadd.f32 %v8651_v56, %v13080_v60  ;;  %v8636_v28 = vadd.f32 %v8616_v5, %v8537_v48 }
0x165d   : > { %v10285_v36 = vpop.f32.mrf.mxu1 }
0x165e   : > { %11032 = vrcp.f32 %v8691_v40  ;;  %v8669_v20 = vsub.f32 0.0, %v8660_v1  ;;  %v8652_v11 = vadd.f32 %v12909_v7, %v8636_v28 }
0x165f   : > { %v11027_v59 = vpop.eup %11026  ;;  %11034 = vpow2.f32 %v8681_v44  ;;  %v8619_v47 = vpop.f32.mrf.mxu1 }
0x1660   : > { %v8692_v39 = vadd.f32 1.0, %v11027_v59  ;;  %v8683_v0 = vmul.f32 1.442695, %v8669_v20  ;;  %v8661_v14 = vadd.f32 %v8652_v11, %v13081_v27  ;;  %v8637_v9 = vadd.f32 %v8619_v47, %v8540_v17 }
0x1661   : > { %v10286_v46 = vpop.f32.mrf.mxu1 }
0x1662   : > { %11036 = vrcp.f32 %v8692_v39  ;;  %v8670_v35 = vsub.f32 0.0, %v8661_v14  ;;  %v8653_v30 = vadd.f32 %v12909_v7, %v8637_v9 }
0x1663   : > { %v11029_v43 = vpop.eup %11028  ;;  %11038 = vpow2.f32 %v8683_v0  ;;  %v8624_v55 = vpop.f32.mrf.mxu1 }
0x1664   : > { %v8693_v54 = vadd.f32 1.0, %v11029_v43  ;;  %v8685_v45 = vmul.f32 1.442695, %v8670_v35  ;;  %v8662_v57 = vadd.f32 %v8653_v30, %v13082_v6  ;;  %v8638_v3 = vadd.f32 %v8624_v55, %v8545_v26 }
0x1665   : > { %v10289_v24 = vpop.f32.mrf.mxu1 }
0x1666   : > { %11040 = vrcp.f32 %v8693_v54  ;;  %v8671_v61 = vsub.f32 0.0, %v8662_v57  ;;  %v8654_v58 = vadd.f32 %v12909_v7, %v8638_v3 }
0x1667   : > { %v11031_v22 = vpop.eup %11030  ;;  %11042 = vpow2.f32 %v8685_v45  ;;  %v8627_v12 = vpop.f32.mrf.mxu1 }
0x1668   : > { %v8694_v18 = vadd.f32 1.0, %v11031_v22  ;;  %v8687_v4 = vmul.f32 1.442695, %v8671_v61  ;;  %v8663_v25 = vadd.f32 %v8654_v58, %v13083_v31 }
0x1669   : > { %v10290_v8 = vpop.f32.mrf.mxu1 }
0x166a   : > { %11044 = vrcp.f32 %v8694_v18  ;;  %v8672_v52 = vsub.f32 0.0, %v8663_v25 }
0x166b   : > { %v11033_v23 = vpop.eup %11032  ;;  %11046 = vpow2.f32 %v8687_v4 }
0x166c   : > { %v11035_v21 = vpop.eup %11034  ;;  %8709 = vst [vmem:[%s12941_s0] sm:$0xff] %v11033_v23  ;;  %v8689_v7 = vmul.f32 1.442695, %v8672_v52 }
0x166d   : > { %v8695_v13 = vadd.f32 1.0, %v11035_v21 }
0x166e   : > { %11048 = vpow2.f32 %v8689_v7 }
0x166f   : > { %v11037_v33 = vpop.eup %11036  ;;  %11050 = vrcp.f32 %v8695_v13 }
0x1670   : > { %v11039_v10 = vpop.eup %11038  ;;  %8710 = vst [vmem:[%s12941_s0 + $0x8] sm:$0xff] %v11037_v33 }
0x1671   : > { %v8696_v53 = vadd.f32 1.0, %v11039_v10 }
0x1673   : > { %v11041_v41 = vpop.eup %11040  ;;  %11052 = vrcp.f32 %v8696_v53 }
0x1674   : > { %v11043_v63 = vpop.eup %11042  ;;  %8711 = vst [vmem:[%s12941_s0 + $0x10] sm:$0xff] %v11041_v41 }
0x1675   : > { %v8697_v51 = vadd.f32 1.0, %v11043_v63 }
0x1677   : > { %v11045_v42 = vpop.eup %11044  ;;  %11054 = vrcp.f32 %v8697_v51 }
0x1678   : > { %v11047_v50 = vpop.eup %11046  ;;  %8712 = vst [vmem:[%s12941_s0 + $0x18] sm:$0xff] %v11045_v42 }
0x1679   : > { %v8698_v49 = vadd.f32 1.0, %v11047_v50 }
0x167b   : > { %v11049_v19 = vpop.eup %11048  ;;  %11056 = vrcp.f32 %v8698_v49 }
0x167c   : > { %v11051_v2 = vpop.eup %11050  ;;  %v8699_v15 = vadd.f32 1.0, %v11049_v19 }
0x167d   : > { %8713 = vst [vmem:[%s12941_s0 + $0x20] sm:$0xff] %v11051_v2 }
0x167e   : > { %11058 = vrcp.f32 %v8699_v15 }
0x1680   : > { %v11053_v38 = vpop.eup %11052 }
0x1681   : > { %8714 = vst [vmem:[%s12941_s0 + $0x28] sm:$0xff] %v11053_v38 }
0x1684   : > { %v11055_v62 = vpop.eup %11054 }
0x1685   : > { %8715 = vst [vmem:[%s12941_s0 + $0x30] sm:$0xff] %v11055_v62 }
0x1688   : > { %v11057_v29 = vpop.eup %11056 }
0x1689   : > { %8716 = vst [vmem:[%s12941_s0 + $0x38] sm:$0xff] %v11057_v29 }
0x168b   : > { %v11059_v16 = vpop.eup %11058 }
0x168c   : > { %8717 = vst [vmem:[%s12941_s0 + $0x40] sm:$0xff] %v11059_v16 }
0x168d PF: > { %s93_s7 = sadd.s32 1, %s11076_s7  }
0x168e   : > { %p90_p4 = scmp.ge.s32.totalorder %s93_s7, 4  }
0x1690   :  { %92 = sbr.rel (!%p90_p4) target bundleno = 73 (0x49), region = 255 }

</bundles_post_ra>
